<compile_context>
chip_gen: v7x
topology: tpu7x:2x2x1
jax: 0.10.0
libtpu: 0.0.40
codegen_flags: <defaults>
</compile_context>

<pallas_src>
import math

import jax
import jax.numpy as jnp
from jax.experimental import pallas as pl
from jax.experimental.pallas import tpu as pltpu


# ----------------------------------------------------------------------------
# Tiling / compiler-parameter helpers
# ----------------------------------------------------------------------------
_GEMM_TM_CAP = 512       # row tile (M) for the GEMM kernels
_AFFINE_TM_CAP = 1024    # row tile for the mem-bound affine+ReLU kernel
_TK_CAP = 512            # contraction (K) tile
_PALLAS_MIN_M = 256      # below this many GEMM rows a layer runs as plain XLA


def _tpu_vmem_budget():
    """Generation-aware VMEM budget: ~40 MiB on v7x (64 MiB/TC), ~96 MiB on v5e/v6e."""
    cap = 128 * 1024 * 1024
    try:
        cap = getattr(pltpu.get_tpu_info(), "vmem_capacity_bytes", cap)
    except Exception:
        pass
    return 40 * 1024 * 1024 if cap <= 64 * 1024 * 1024 else 96 * 1024 * 1024


_VMEM_LIMIT = _tpu_vmem_budget()


def _cparams(*semantics):
    return pltpu.CompilerParams(
        dimension_semantics=semantics,
        vmem_limit_bytes=_VMEM_LIMIT,
    )


def _round_up(x, m):
    return ((x + m - 1) // m) * m


def _tile_and_pad(m, cap, step):
    """Pick a tile that is a multiple of `step` and <= cap.

    Prefers the largest divisor of m (no padding).  If none exists, returns a
    cap-sized tile and the padded extent -- never a giant full-dim block."""
    cap = max(step, (cap // step) * step)
    best = None
    d = step
    while d <= min(m, cap):
        if m % d == 0:
            best = d
        d += step
    if best is not None:
        return best, m
    tile = min(cap, _round_up(m, step))
    return tile, _round_up(m, tile)


# ----------------------------------------------------------------------------
# Pallas kernels
# ----------------------------------------------------------------------------
def _gemm_bias_stats_kernel(a_ref, b_ref, bias_ref, y_ref, sum_ref, sq_ref, acc_ref):
    """K-tiled acc = A @ B (bf16 operands, f32 accumulator).

    Finalize: y = bf16(acc + bias) plus per-row-tile partial sums of acc and
    acc^2 (bias-free -> no catastrophic cancellation; zero-padded rows/cols
    contribute exactly nothing to the statistics)."""
    k = pl.program_id(2)

    @pl.when(k == 0)
    def _():
        acc_ref[...] = jnp.zeros_like(acc_ref)

    acc_ref[...] += jnp.dot(a_ref[...], b_ref[...],
                            preferred_element_type=jnp.float32)

    @pl.when(k == pl.num_programs(2) - 1)
    def _():
        acc = acc_ref[...]
        y_ref[...] = (acc + bias_ref[...]).astype(y_ref.dtype)
        sum_ref[...] = jnp.sum(acc, axis=0, keepdims=True)[None]      # (1, 1, C)
        sq_ref[...] = jnp.sum(acc * acc, axis=0, keepdims=True)[None]  # (1, 1, C)


def _affine_relu_kernel(y_ref, scale_ref, shift_ref, o_ref):
    """out = bf16(relu(f32(y) * scale + shift)); f32 VPU math, cast at the store."""
    o_ref[...] = jnp.maximum(
        y_ref[...].astype(jnp.float32) * scale_ref[...] + shift_ref[...], 0.0
    ).astype(o_ref.dtype)


def _gemm_bias_tanh_kernel(a_ref, b_ref, bias_ref, o_ref, acc_ref):
    """K-tiled final-layer GEMM: out = tanh(A @ B + bias), f32 output."""
    k = pl.program_id(2)

    @pl.when(k == 0)
    def _():
        acc_ref[...] = jnp.zeros_like(acc_ref)

    acc_ref[...] += jnp.dot(a_ref[...], b_ref[...],
                            preferred_element_type=jnp.float32)

    @pl.when(k == pl.num_programs(2) - 1)
    def _():
        o_ref[...] = jnp.tanh(acc_ref[...] + bias_ref[...])


# ----------------------------------------------------------------------------
# pallas_call wrappers
# ----------------------------------------------------------------------------
def _convT_gemm_stats(A, Bp, bias, tm, tk):
    _, Mp, Kp = A.shape
    C = Bp.shape[-1]
    n_m, n_k = Mp // tm, Kp // tk
    return pl.pallas_call(
        _gemm_bias_stats_kernel,
        out_shape=(
            jax.ShapeDtypeStruct((4, Mp, C), jnp.bfloat16),
            jax.ShapeDtypeStruct((4, n_m, 1, C), jnp.float32),
            jax.ShapeDtypeStruct((4, n_m, 1, C), jnp.float32),
        ),
        grid=(4, n_m, n_k),
        in_specs=[
            pl.BlockSpec((None, tm, tk), lambda p, i, k: (p, i, k)),
            pl.BlockSpec((None, tk, C), lambda p, i, k: (p, k, 0)),
            pl.BlockSpec((1, C), lambda p, i, k: (0, 0)),
        ],
        out_specs=(
            pl.BlockSpec((None, tm, C), lambda p, i, k: (p, i, 0)),
            pl.BlockSpec((None, 1, 1, C), lambda p, i, k: (p, i, 0, 0)),
            pl.BlockSpec((None, 1, 1, C), lambda p, i, k: (p, i, 0, 0)),
        ),
        scratch_shapes=[pltpu.VMEM((tm, C), jnp.float32)],
        compiler_params=_cparams("parallel", "parallel", "arbitrary"),
    )(A, Bp, bias)


def _affine_relu_call(yv, scale, shift, tm):
    M, C = yv.shape
    return pl.pallas_call(
        _affine_relu_kernel,
        out_shape=jax.ShapeDtypeStruct((M, C), jnp.bfloat16),
        grid=(M // tm,),
        in_specs=[
            pl.BlockSpec((tm, C), lambda i: (i, 0)),
            pl.BlockSpec((1, C), lambda i: (0, 0)),
            pl.BlockSpec((1, C), lambda i: (0, 0)),
        ],
        out_specs=pl.BlockSpec((tm, C), lambda i: (i, 0)),
        compiler_params=_cparams("parallel"),
    )(yv, scale, shift)


def _affine_relu(y2d, scale, shift):
    """Fused BN-affine + ReLU: bf16 in/out, f32 math, lane-dense when C < 128."""
    M, C = y2d.shape
    if C < 128 and 128 % C == 0 and (M * C) % 128 == 0:
        rep = 128 // C
        yv = y2d.reshape((M * C) // 128, 128)            # row-major reinterpretation
        sv = jnp.tile(scale, (1, rep))
        tv = jnp.tile(shift, (1, rep))
    else:
        yv, sv, tv = y2d, scale, shift
    Mv, Cv = yv.shape
    cap = max(8, min(_AFFINE_TM_CAP, (1 << 20) // max(Cv, 1)))
    tm, Mpad = _tile_and_pad(Mv, cap, 8)
    if Mpad != Mv:
        yv = jnp.pad(yv, ((0, Mpad - Mv), (0, 0)))
    out = _affine_relu_call(yv, sv, tv, tm)
    if Mpad != Mv:
        out = out[:Mv]
    return out.reshape(M, C)


def _final_gemm_tanh(A, Bp, bias, tm, tk):
    _, Mp, Kp = A.shape
    C = Bp.shape[-1]
    n_m, n_k = Mp // tm, Kp // tk
    return pl.pallas_call(
        _gemm_bias_tanh_kernel,
        out_shape=jax.ShapeDtypeStruct((4, Mp, C), jnp.float32),
        grid=(4, n_m, n_k),
        in_specs=[
            pl.BlockSpec((None, tm, tk), lambda p, i, k: (p, i, k)),
            pl.BlockSpec((None, tk, C), lambda p, i, k: (p, k, 0)),
            pl.BlockSpec((1, C), lambda p, i, k: (0, 0)),
        ],
        out_specs=pl.BlockSpec((None, tm, C), lambda p, i, k: (p, i, 0)),
        scratch_shapes=[pltpu.VMEM((tm, C), jnp.float32)],
        compiler_params=_cparams("parallel", "parallel", "arbitrary"),
    )(A, Bp, bias)


# ----------------------------------------------------------------------------
# Plain-JAX glue: sub-pixel decomposition of the stride-2 ConvTranspose
# ----------------------------------------------------------------------------
def _taps(parity, pad):
    """For output rows with oh%2==parity: the 2 contributing (kh, base_ih) taps.
    oh = 2*r + parity uses input row ih = base + r for each tap."""
    a = (parity + pad) % 2
    return [(kh, (parity + pad - kh) // 2) for kh in (a, a + 2)]


def _parity_patches(x, pad, OHp, OWp):
    """x: (N, H, W, Cin) NHWC (bf16) -> 4 patch slabs (N, OHp, OWp, 4, Cin),
    parity order (ph, pw) = (0,0),(0,1),(1,0),(1,1).  Tap-major K layout so the
    slab is built from 4 contiguous shifted-window copies (no interleave)."""
    xp = jnp.pad(x, ((0, 0), (1, 1), (1, 1), (0, 0)))
    blocks = []
    for ph in (0, 1):
        th = _taps(ph, pad)
        for pw in (0, 1):
            tw = _taps(pw, pad)
            slabs = [xp[:, bh + 1:bh + 1 + OHp, bw + 1:bw + 1 + OWp, :]
                     for (_, bh) in th for (_, bw) in tw]
            blocks.append(jnp.stack(slabs, axis=3))      # (N, OHp, OWp, 4, Cin)
    return blocks


def _out_dims(H, W, pad):
    OH = (H - 1) * 2 - 2 * pad + 4
    OW = (W - 1) * 2 - 2 * pad + 4
    return OH, OW, OH // 2, OW // 2


def _build_slab(x, pad, OHp, OWp, Mp, Kc):
    patches = _parity_patches(x, pad, OHp, OWp)
    return jnp.stack([blk.reshape(Mp, Kc) for blk in patches], axis=0)  # (4, Mp, Kc)


def _pad_gemm_operands(A, Bp, Mp, Kc, Mpad, Kpad):
    if Mpad != Mp or Kpad != Kc:
        A = jnp.pad(A, ((0, 0), (0, Mpad - Mp), (0, Kpad - Kc)))
    if Kpad != Kc:
        Bp = jnp.pad(Bp, ((0, 0), (0, Kpad - Kc), (0, 0)))
    return A, Bp


def _gen_block_hidden_pallas(x, p, pad):
    N, H, W, Cin = x.shape
    Cout = p["Bp"].shape[-1]
    OH, OW, OHp, OWp = _out_dims(H, W, pad)
    Mp, Kc = N * OHp * OWp, 4 * Cin

    A = _build_slab(x, pad, OHp, OWp, Mp, Kc)            # bf16 slab, tap-major K
    tm, Mpad = _tile_and_pad(Mp, _GEMM_TM_CAP, 16)       # 16-aligned for bf16 A
    tk, Kpad = _tile_and_pad(Kc, _TK_CAP, 128)
    A, Bp = _pad_gemm_operands(A, p["Bp"], Mp, Kc, Mpad, Kpad)

    y, s1, s2 = _convT_gemm_stats(A, Bp, p["b"], tm, tk)

    # Training-mode BatchNorm stats from bias-free f32 partial sums.  Padded
    # rows/cols contributed exactly 0, so divide by the true element count.
    Mtot = 4 * Mp                                        # = N * OH * OW
    mu = s1.sum(axis=(0, 1, 2)) / Mtot
    var = jnp.maximum(s2.sum(axis=(0, 1, 2)) / Mtot - mu * mu, 0.0)
    mean = mu + p["b"].reshape(-1)
    inv_std = jax.lax.rsqrt(var + 1e-5)
    scale = (p["gamma"] * inv_std).reshape(1, Cout)
    shift = (p["beta"] - mean * p["gamma"] * inv_std).reshape(1, Cout)

    y = y if Mpad == Mp else y[:, :Mp, :]
    out = _affine_relu(y.reshape(Mtot, Cout), scale, shift)

    # (ph, pw, N, OHp, OWp, C) -> NHWC with oh = 2*ohp + ph, ow = 2*owp + pw.
    out = out.reshape(2, 2, N, OHp, OWp, Cout)
    out = out.transpose(2, 3, 0, 4, 1, 5).reshape(N, OH, OW, Cout)
    return out


def _gen_block_hidden_xla(x, p, pad):
    """Tiny-layer path: a Pallas grid cannot amortize launch/step overhead here."""
    N, H, W, Cin = x.shape
    Cout = p["Bp"].shape[-1]
    OH, OW, OHp, OWp = _out_dims(H, W, pad)
    Mp, Kc = N * OHp * OWp, 4 * Cin

    A = _build_slab(x, pad, OHp, OWp, Mp, Kc)
    acc = jnp.einsum("pmk,pkc->pmc", A, p["Bp"],
                     preferred_element_type=jnp.float32)
    mu = acc.mean(axis=(0, 1))
    var = acc.var(axis=(0, 1))
    mean = mu + p["b"].reshape(-1)
    inv_std = jax.lax.rsqrt(var + 1e-5)
    scale = p["gamma"] * inv_std
    shift = p["beta"] - mean * scale
    out = jnp.maximum((acc + p["b"]) * scale + shift, 0.0).astype(jnp.bfloat16)

    out = out.reshape(2, 2, N, OHp, OWp, Cout)
    out = out.transpose(2, 3, 0, 4, 1, 5).reshape(N, OH, OW, Cout)
    return out


def _gen_block_final(x, p, pad):
    N, H, W, Cin = x.shape
    Cout = p["Bp"].shape[-1]
    OH, OW, OHp, OWp = _out_dims(H, W, pad)
    Mp, Kc = N * OHp * OWp, 4 * Cin

    A = _build_slab(x, pad, OHp, OWp, Mp, Kc)            # no big transpose anymore
    tm, Mpad = _tile_and_pad(Mp, _GEMM_TM_CAP, 16)
    tk, Kpad = _tile_and_pad(Kc, _TK_CAP, 128)
    A, Bp = _pad_gemm_operands(A, p["Bp"], Mp, Kc, Mpad, Kpad)

    o = _final_gemm_tanh(A, Bp, p["b"], tm, tk)          # (4, Mpad, Cout) f32
    o = o if Mpad == Mp else o[:, :Mp, :]

    # (ph, pw, N, OHp, OWp, C) -> NCHW, matching the PyTorch module output.
    o = o.reshape(2, 2, N, OHp, OWp, Cout)
    o = o.transpose(2, 5, 3, 0, 4, 1).reshape(N, Cout, OH, OW)
    return o


def make_forward(cfgs):
    def fwd(noise, params):
        n, z = noise.shape
        x = noise.reshape(n, 1, 1, z).astype(jnp.bfloat16)   # unsqueeze_noise (NHWC, bf16)
        for p, cfg in zip(params, cfgs):
            H, W = x.shape[1], x.shape[2]
            _, _, OHp, OWp = _out_dims(H, W, cfg["pad"])
            mp = n * OHp * OWp
            if cfg["final"]:
                x = _gen_block_final(x, p, cfg["pad"])
            elif mp >= _PALLAS_MIN_M:
                x = _gen_block_hidden_pallas(x, p, cfg["pad"])
            else:
                x = _gen_block_hidden_xla(x, p, cfg["pad"])
        return x                                          # (N, img_channels, 100, 100) f32
    return jax.jit(fwd)


# ----------------------------------------------------------------------------
# Deterministic parameter construction (shapes match Generator.__init__),
# with packed per-parity, tap-major sub-kernel weights precomputed at init.
# ----------------------------------------------------------------------------
def init_generator(key, z_dim, img_channels, hidden):
    chans = [z_dim, hidden * 4, hidden * 8, hidden * 16, hidden * 32,
             hidden * 16, hidden * 4, img_channels]
    params, cfgs = [], []
    for li in range(7):
        cin, cout = chans[li], chans[li + 1]
        final = li == 6
        pad = 15 if final else 1
        key, wkey, bkey = jax.random.split(key, 3)
        bound = 1.0 / math.sqrt(cin * 16)
        W = jax.random.uniform(wkey, (cin, cout, 4, 4), jnp.float32, -bound, bound)
        b = jax.random.uniform(bkey, (cout,), jnp.float32, -bound, bound)

        # Per-parity 2x2 sub-kernels, tap-major rows (row = tap*Cin + ci) to
        # match the tap-major patch slab layout.
        mats = []
        for ph in (0, 1):
            th = _taps(ph, pad)
            for pw in (0, 1):
                tw = _taps(pw, pad)
                taps = [W[:, :, kh, kw] for (kh, _) in th for (kw, _) in tw]
                mats.append(jnp.concatenate(taps, axis=0))       # (4*Cin, Cout)
        Bp = jnp.stack(mats, axis=0).astype(jnp.bfloat16)        # (4, 4*Cin, Cout)

        p = {"Bp": Bp, "b": b.reshape(1, cout)}
        if not final:
            p["gamma"] = jnp.ones((cout,), jnp.float32)
            p["beta"] = jnp.zeros((cout,), jnp.float32)
        params.append(p)
        cfgs.append({"pad": pad, "final": final})
    return params, cfgs


if __name__ == "__main__":
    N, Z_DIM, HIDDEN, IMG_C = 2, 16, 8, 3   # small but structurally faithful config

    key = jax.random.PRNGKey(0)
    kparams, knoise = jax.random.split(key)
    params, cfgs = init_generator(kparams, Z_DIM, IMG_C, HIDDEN)
    noise = jax.random.normal(knoise, (N, Z_DIM), jnp.float32)

    fwd = make_forward(cfgs)
    out = jax.block_until_ready(fwd(noise, params))

    # 7 stride-2 blocks: 1 -> 2 -> 4 -> 8 -> 16 -> 32 -> 64 -> 100 (final pad=15)
    assert out.shape == (N, IMG_C, 100, 100), out.shape
    assert bool(jnp.all(jnp.isfinite(out)))
    assert bool(jnp.all(jnp.abs(out) <= 1.0))   # tanh output range
    print("KERNEL_OK")
</pallas_src>

<mosaic_0001>
module attributes {stable_mosaic.version = 11 : i64} {
  func.func @_gemm_bias_stats_kernel(%arg0: i32, %arg1: i32, %arg2: i32, %arg3: memref<1x512x512xbf16, #tpu.memory_space<vmem>>, %arg4: memref<1x512x128xbf16, #tpu.memory_space<vmem>>, %arg5: memref<1x128xf32, #tpu.memory_space<vmem>>, %arg6: memref<1x512x128xbf16, #tpu.memory_space<vmem>>, %arg7: memref<1x1x1x128xf32, #tpu.memory_space<vmem>>, %arg8: memref<1x1x1x128xf32, #tpu.memory_space<vmem>>, %arg9: memref<512x128xf32, #tpu.memory_space<vmem>>) attributes {dimension_semantics = [#tpu.dimension_semantics<parallel>, #tpu.dimension_semantics<parallel>, #tpu.dimension_semantics<arbitrary>], iteration_bounds = array<i64: 4, 1, 2>, scalar_prefetch = 0 : i64, scratch_operands = 1 : i64, tpu.core_type = #tpu.core_type<tc>, window_params = [{transform_indices = @transform_0, window_bounds = array<i64: 1, 512, 512>}, {transform_indices = @transform_1, window_bounds = array<i64: 1, 512, 128>}, {pipeline_mode = #tpu.pipeline_mode<synchronous>, transform_indices = @transform_2, window_bounds = array<i64: 1, 128>}, {transform_indices = @transform_3, window_bounds = array<i64: 1, 512, 128>}, {transform_indices = @transform_4, window_bounds = array<i64: 1, 1, 1, 128>}, {transform_indices = @transform_5, window_bounds = array<i64: 1, 1, 1, 128>}]} {
    %c0_i32 = arith.constant 0 : i32
    %0 = arith.cmpi eq, %arg2, %c0_i32 : i32
    %1 = arith.extui %0 : i1 to i32
    %c0_i32_0 = arith.constant 0 : i32
    %2 = arith.cmpi ne, %1, %c0_i32_0 : i32
    scf.if %2 {
      %cst_11 = arith.constant 0.000000e+00 : f32
      %14 = vector.broadcast %cst_11 : f32 to vector<512x128xf32>
      %c0_12 = arith.constant 0 : index
      %c0_13 = arith.constant 0 : index
      %15 = vector.load %arg9[%c0_12, %c0_13] : memref<512x128xf32, #tpu.memory_space<vmem>>, vector<512x128xf32>
      tpu.vector_store %arg9[%c0_12, %c0_13], %14 {strides = array<i32>} : memref<512x128xf32, #tpu.memory_space<vmem>>, vector<512x128xf32>,
    } else {
    }
    %c0 = arith.constant 0 : index
    %c0_1 = arith.constant 0 : index
    %3 = vector.load %arg9[%c0, %c0_1] : memref<512x128xf32, #tpu.memory_space<vmem>>, vector<512x128xf32>
    %c0_2 = arith.constant 0 : index
    %c0_3 = arith.constant 0 : index
    %c0_4 = arith.constant 0 : index
    %4 = vector.load %arg3[%c0_2, %c0_3, %c0_4] : memref<1x512x512xbf16, #tpu.memory_space<vmem>>, vector<1x512x512xbf16>
    %5 = vector.shape_cast %4 : vector<1x512x512xbf16> to vector<512x512xbf16>
    %c0_5 = arith.constant 0 : index
    %c0_6 = arith.constant 0 : index
    %c0_7 = arith.constant 0 : index
    %6 = vector.load %arg4[%c0_5, %c0_6, %c0_7] : memref<1x512x128xbf16, #tpu.memory_space<vmem>>, vector<1x512x128xbf16>
    %7 = vector.shape_cast %6 : vector<1x512x128xbf16> to vector<512x128xbf16>
    %cst = arith.constant dense<0.000000e+00> : vector<512x128xf32>
    %8 = tpu.matmul %5, %7, %cst {dimension_numbers = #tpu.dot_dimension_numbers<[1], [0], [0], [1], [0, 0, 1, 1], [], []>} : vector<512x512xbf16>, vector<512x128xbf16>, vector<512x128xf32> -> vector<512x128xf32>
    %9 = arith.addf %3, %8 : vector<512x128xf32>
    %c0_8 = arith.constant 0 : index
    %c0_9 = arith.constant 0 : index
    %10 = vector.load %arg9[%c0_8, %c0_9] : memref<512x128xf32, #tpu.memory_space<vmem>>, vector<512x128xf32>
    tpu.vector_store %arg9[%c0_8, %c0_9], %9 {strides = array<i32>} : memref<512x128xf32, #tpu.memory_space<vmem>>, vector<512x128xf32>,
    %c1_i32 = arith.constant 1 : i32
    %11 = arith.cmpi eq, %arg2, %c1_i32 : i32
    %12 = arith.extui %11 : i1 to i32
    %c0_i32_10 = arith.constant 0 : i32
    %13 = arith.cmpi ne, %12, %c0_i32_10 : i32
    scf.if %13 {
      %c0_11 = arith.constant 0 : index
      %c0_12 = arith.constant 0 : index
      %14 = vector.load %arg9[%c0_11, %c0_12] : memref<512x128xf32, #tpu.memory_space<vmem>>, vector<512x128xf32>
      %c0_13 = arith.constant 0 : index
      %c0_14 = arith.constant 0 : index
      %15 = vector.load %arg5[%c0_13, %c0_14] : memref<1x128xf32, #tpu.memory_space<vmem>>, vector<1x128xf32>
      %16 = vector.broadcast %15 : vector<1x128xf32> to vector<512x128xf32>
      %17 = arith.addf %14, %16 : vector<512x128xf32>
      %18 = arith.truncf %17 : vector<512x128xf32> to vector<512x128xbf16>
      %c0_15 = arith.constant 0 : index
      %c0_16 = arith.constant 0 : index
      %c0_17 = arith.constant 0 : index
      %19 = vector.load %arg6[%c0_15, %c0_16, %c0_17] : memref<1x512x128xbf16, #tpu.memory_space<vmem>>, vector<1x512x128xbf16>
      %20 = vector.shape_cast %19 : vector<1x512x128xbf16> to vector<512x128xbf16>
      %21 = vector.shape_cast %18 : vector<512x128xbf16> to vector<1x512x128xbf16>
      tpu.vector_store %arg6[%c0_15, %c0_16, %c0_17], %21 {strides = array<i32>} : memref<1x512x128xbf16, #tpu.memory_space<vmem>>, vector<1x512x128xbf16>,
      %cst_18 = arith.constant dense<0.000000e+00> : vector<128xf32>
      %22 = vector.multi_reduction <add>, %14, %cst_18 [0] : vector<512x128xf32> to vector<128xf32>
      %23 = vector.shape_cast %22 : vector<128xf32> to vector<1x128xf32>
      %24 = vector.shape_cast %23 : vector<1x128xf32> to vector<1x1x128xf32>
      %c0_19 = arith.constant 0 : index
      %c0_20 = arith.constant 0 : index
      %c0_21 = arith.constant 0 : index
      %c0_22 = arith.constant 0 : index
      %25 = vector.load %arg7[%c0_19, %c0_20, %c0_21, %c0_22] : memref<1x1x1x128xf32, #tpu.memory_space<vmem>>, vector<1x1x1x128xf32>
      %26 = vector.shape_cast %25 : vector<1x1x1x128xf32> to vector<1x1x128xf32>
      %27 = vector.shape_cast %24 : vector<1x1x128xf32> to vector<1x1x1x128xf32>
      tpu.vector_store %arg7[%c0_19, %c0_20, %c0_21, %c0_22], %27 {strides = array<i32>} : memref<1x1x1x128xf32, #tpu.memory_space<vmem>>, vector<1x1x1x128xf32>,
      %28 = arith.mulf %14, %14 : vector<512x128xf32>
      %cst_23 = arith.constant dense<0.000000e+00> : vector<128xf32>
      %29 = vector.multi_reduction <add>, %28, %cst_23 [0] : vector<512x128xf32> to vector<128xf32>
      %30 = vector.shape_cast %29 : vector<128xf32> to vector<1x128xf32>
      %31 = vector.shape_cast %30 : vector<1x128xf32> to vector<1x1x128xf32>
      %c0_24 = arith.constant 0 : index
      %c0_25 = arith.constant 0 : index
      %c0_26 = arith.constant 0 : index
      %c0_27 = arith.constant 0 : index
      %32 = vector.load %arg8[%c0_24, %c0_25, %c0_26, %c0_27] : memref<1x1x1x128xf32, #tpu.memory_space<vmem>>, vector<1x1x1x128xf32>
      %33 = vector.shape_cast %32 : vector<1x1x1x128xf32> to vector<1x1x128xf32>
      %34 = vector.shape_cast %31 : vector<1x1x128xf32> to vector<1x1x1x128xf32>
      tpu.vector_store %arg8[%c0_24, %c0_25, %c0_26, %c0_27], %34 {strides = array<i32>} : memref<1x1x1x128xf32, #tpu.memory_space<vmem>>, vector<1x1x1x128xf32>,
    } else {
    }
    return
  }
  func.func @transform_0(%arg0: i32, %arg1: i32, %arg2: i32) -> (i32, i32, i32) {
    %c0_i32 = arith.constant 0 : i32
    return %arg0, %arg1, %arg2 : i32, i32, i32
  }
  func.func @transform_1(%arg0: i32, %arg1: i32, %arg2: i32) -> (i32, i32, i32) {
    %c0_i32 = arith.constant 0 : i32
    %c0_i32_0 = arith.constant 0 : i32
    return %arg0, %arg2, %c0_i32 : i32, i32, i32
  }
  func.func @transform_2(%arg0: i32, %arg1: i32, %arg2: i32) -> (i32, i32) {
    %c0_i32 = arith.constant 0 : i32
    %c0_i32_0 = arith.constant 0 : i32
    %c0_i32_1 = arith.constant 0 : i32
    return %c0_i32, %c0_i32_0 : i32, i32
  }
  func.func @transform_3(%arg0: i32, %arg1: i32, %arg2: i32) -> (i32, i32, i32) {
    %c0_i32 = arith.constant 0 : i32
    %c0_i32_0 = arith.constant 0 : i32
    return %arg0, %arg1, %c0_i32 : i32, i32, i32
  }
  func.func @transform_4(%arg0: i32, %arg1: i32, %arg2: i32) -> (i32, i32, i32, i32) {
    %c0_i32 = arith.constant 0 : i32
    %c0_i32_0 = arith.constant 0 : i32
    %c0_i32_1 = arith.constant 0 : i32
    return %arg0, %arg1, %c0_i32, %c0_i32_0 : i32, i32, i32, i32
  }
  func.func @transform_5(%arg0: i32, %arg1: i32, %arg2: i32) -> (i32, i32, i32, i32) {
    %c0_i32 = arith.constant 0 : i32
    %c0_i32_0 = arith.constant 0 : i32
    %c0_i32_1 = arith.constant 0 : i32
    return %arg0, %arg1, %c0_i32, %c0_i32_0 : i32, i32, i32, i32
  }
}

module attributes {stable_mosaic.version = 11 : i64} {
  func.func @_affine_relu_kernel(%arg0: i32, %arg1: memref<1024x128xbf16, #tpu.memory_space<vmem>>, %arg2: memref<1x128xf32, #tpu.memory_space<vmem>>, %arg3: memref<1x128xf32, #tpu.memory_space<vmem>>, %arg4: memref<1024x128xbf16, #tpu.memory_space<vmem>>) attributes {dimension_semantics = [#tpu.dimension_semantics<parallel>], iteration_bounds = array<i64: 2>, scalar_prefetch = 0 : i64, scratch_operands = 0 : i64, tpu.core_type = #tpu.core_type<tc>, window_params = [{transform_indices = @transform_0, window_bounds = array<i64: 1024, 128>}, {pipeline_mode = #tpu.pipeline_mode<synchronous>, transform_indices = @transform_1, window_bounds = array<i64: 1, 128>}, {pipeline_mode = #tpu.pipeline_mode<synchronous>, transform_indices = @transform_2, window_bounds = array<i64: 1, 128>}, {transform_indices = @transform_3, window_bounds = array<i64: 1024, 128>}]} {
    %c0 = arith.constant 0 : index
    %c0_0 = arith.constant 0 : index
    %0 = vector.load %arg1[%c0, %c0_0] : memref<1024x128xbf16, #tpu.memory_space<vmem>>, vector<1024x128xbf16>
    %1 = arith.extf %0 : vector<1024x128xbf16> to vector<1024x128xf32>
    %c0_1 = arith.constant 0 : index
    %c0_2 = arith.constant 0 : index
    %2 = vector.load %arg2[%c0_1, %c0_2] : memref<1x128xf32, #tpu.memory_space<vmem>>, vector<1x128xf32>
    %3 = vector.broadcast %2 : vector<1x128xf32> to vector<1024x128xf32>
    %4 = arith.mulf %1, %3 : vector<1024x128xf32>
    %c0_3 = arith.constant 0 : index
    %c0_4 = arith.constant 0 : index
    %5 = vector.load %arg3[%c0_3, %c0_4] : memref<1x128xf32, #tpu.memory_space<vmem>>, vector<1x128xf32>
    %6 = vector.broadcast %5 : vector<1x128xf32> to vector<1024x128xf32>
    %7 = arith.addf %4, %6 : vector<1024x128xf32>
    %cst = arith.constant 0.000000e+00 : f32
    %8 = vector.broadcast %cst : f32 to vector<1024x128xf32>
    %9 = arith.maximumf %7, %8 : vector<1024x128xf32>
    %10 = arith.truncf %9 : vector<1024x128xf32> to vector<1024x128xbf16>
    %c0_5 = arith.constant 0 : index
    %c0_6 = arith.constant 0 : index
    %11 = vector.load %arg4[%c0_5, %c0_6] : memref<1024x128xbf16, #tpu.memory_space<vmem>>, vector<1024x128xbf16>
    tpu.vector_store %arg4[%c0_5, %c0_6], %10 {strides = array<i32>} : memref<1024x128xbf16, #tpu.memory_space<vmem>>, vector<1024x128xbf16>,
    return
  }
  func.func @transform_0(%arg0: i32) -> (i32, i32) {
    %c0_i32 = arith.constant 0 : i32
    %c0_i32_0 = arith.constant 0 : i32
    return %arg0, %c0_i32 : i32, i32
  }
  func.func @transform_1(%arg0: i32) -> (i32, i32) {
    %c0_i32 = arith.constant 0 : i32
    %c0_i32_0 = arith.constant 0 : i32
    %c0_i32_1 = arith.constant 0 : i32
    return %c0_i32, %c0_i32_0 : i32, i32
  }
  func.func @transform_2(%arg0: i32) -> (i32, i32) {
    %c0_i32 = arith.constant 0 : i32
    %c0_i32_0 = arith.constant 0 : i32
    %c0_i32_1 = arith.constant 0 : i32
    return %c0_i32, %c0_i32_0 : i32, i32
  }
  func.func @transform_3(%arg0: i32) -> (i32, i32) {
    %c0_i32 = arith.constant 0 : i32
    %c0_i32_0 = arith.constant 0 : i32
    return %arg0, %c0_i32 : i32, i32
  }
}

module attributes {stable_mosaic.version = 11 : i64} {
  func.func @_gemm_bias_stats_kernel(%arg0: i32, %arg1: i32, %arg2: i32, %arg3: memref<1x512x512xbf16, #tpu.memory_space<vmem>>, %arg4: memref<1x512x32xbf16, #tpu.memory_space<vmem>>, %arg5: memref<1x32xf32, #tpu.memory_space<vmem>>, %arg6: memref<1x512x32xbf16, #tpu.memory_space<vmem>>, %arg7: memref<1x1x1x32xf32, #tpu.memory_space<vmem>>, %arg8: memref<1x1x1x32xf32, #tpu.memory_space<vmem>>, %arg9: memref<512x32xf32, #tpu.memory_space<vmem>>) attributes {dimension_semantics = [#tpu.dimension_semantics<parallel>, #tpu.dimension_semantics<parallel>, #tpu.dimension_semantics<arbitrary>], iteration_bounds = array<i64: 4, 4, 1>, scalar_prefetch = 0 : i64, scratch_operands = 1 : i64, tpu.core_type = #tpu.core_type<tc>, window_params = [{transform_indices = @transform_0, window_bounds = array<i64: 1, 512, 512>}, {transform_indices = @transform_1, window_bounds = array<i64: 1, 512, 32>}, {pipeline_mode = #tpu.pipeline_mode<synchronous>, transform_indices = @transform_2, window_bounds = array<i64: 1, 32>}, {transform_indices = @transform_3, window_bounds = array<i64: 1, 512, 32>}, {transform_indices = @transform_4, window_bounds = array<i64: 1, 1, 1, 32>}, {transform_indices = @transform_5, window_bounds = array<i64: 1, 1, 1, 32>}]} {
    %c0_i32 = arith.constant 0 : i32
    %0 = arith.cmpi eq, %arg2, %c0_i32 : i32
    %1 = arith.extui %0 : i1 to i32
    %c0_i32_0 = arith.constant 0 : i32
    %2 = arith.cmpi ne, %1, %c0_i32_0 : i32
    scf.if %2 {
      %cst_12 = arith.constant 0.000000e+00 : f32
      %14 = vector.broadcast %cst_12 : f32 to vector<512x32xf32>
      %c0_13 = arith.constant 0 : index
      %c0_14 = arith.constant 0 : index
      %15 = vector.load %arg9[%c0_13, %c0_14] : memref<512x32xf32, #tpu.memory_space<vmem>>, vector<512x32xf32>
      tpu.vector_store %arg9[%c0_13, %c0_14], %14 {strides = array<i32>} : memref<512x32xf32, #tpu.memory_space<vmem>>, vector<512x32xf32>,
    } else {
    }
    %c0 = arith.constant 0 : index
    %c0_1 = arith.constant 0 : index
    %3 = vector.load %arg9[%c0, %c0_1] : memref<512x32xf32, #tpu.memory_space<vmem>>, vector<512x32xf32>
    %c0_2 = arith.constant 0 : index
    %c0_3 = arith.constant 0 : index
    %c0_4 = arith.constant 0 : index
    %4 = vector.load %arg3[%c0_2, %c0_3, %c0_4] : memref<1x512x512xbf16, #tpu.memory_space<vmem>>, vector<1x512x512xbf16>
    %5 = vector.shape_cast %4 : vector<1x512x512xbf16> to vector<512x512xbf16>
    %c0_5 = arith.constant 0 : index
    %c0_6 = arith.constant 0 : index
    %c0_7 = arith.constant 0 : index
    %6 = vector.load %arg4[%c0_5, %c0_6, %c0_7] : memref<1x512x32xbf16, #tpu.memory_space<vmem>>, vector<1x512x32xbf16>
    %7 = vector.shape_cast %6 : vector<1x512x32xbf16> to vector<512x32xbf16>
    %cst = arith.constant dense<0.000000e+00> : vector<512x32xf32>
    %8 = tpu.matmul %5, %7, %cst {dimension_numbers = #tpu.dot_dimension_numbers<[1], [0], [0], [1], [0, 0, 1, 1], [], []>} : vector<512x512xbf16>, vector<512x32xbf16>, vector<512x32xf32> -> vector<512x32xf32>
    %9 = arith.addf %3, %8 : vector<512x32xf32>
    %c0_8 = arith.constant 0 : index
    %c0_9 = arith.constant 0 : index
    %10 = vector.load %arg9[%c0_8, %c0_9] : memref<512x32xf32, #tpu.memory_space<vmem>>, vector<512x32xf32>
    tpu.vector_store %arg9[%c0_8, %c0_9], %9 {strides = array<i32>} : memref<512x32xf32, #tpu.memory_space<vmem>>, vector<512x32xf32>,
    %c0_i32_10 = arith.constant 0 : i32
    %11 = arith.cmpi eq, %arg2, %c0_i32_10 : i32
    %12 = arith.extui %11 : i1 to i32
    %c0_i32_11 = arith.constant 0 : i32
    %13 = arith.cmpi ne, %12, %c0_i32_11 : i32
    scf.if %13 {
      %c0_12 = arith.constant 0 : index
      %c0_13 = arith.constant 0 : index
      %14 = vector.load %arg9[%c0_12, %c0_13] : memref<512x32xf32, #tpu.memory_space<vmem>>, vector<512x32xf32>
      %c0_14 = arith.constant 0 : index
      %c0_15 = arith.constant 0 : index
      %15 = vector.load %arg5[%c0_14, %c0_15] : memref<1x32xf32, #tpu.memory_space<vmem>>, vector<1x32xf32>
      %16 = vector.broadcast %15 : vector<1x32xf32> to vector<512x32xf32>
      %17 = arith.addf %14, %16 : vector<512x32xf32>
      %18 = arith.truncf %17 : vector<512x32xf32> to vector<512x32xbf16>
      %c0_16 = arith.constant 0 : index
      %c0_17 = arith.constant 0 : index
      %c0_18 = arith.constant 0 : index
      %19 = vector.load %arg6[%c0_16, %c0_17, %c0_18] : memref<1x512x32xbf16, #tpu.memory_space<vmem>>, vector<1x512x32xbf16>
      %20 = vector.shape_cast %19 : vector<1x512x32xbf16> to vector<512x32xbf16>
      %21 = vector.shape_cast %18 : vector<512x32xbf16> to vector<1x512x32xbf16>
      tpu.vector_store %arg6[%c0_16, %c0_17, %c0_18], %21 {strides = array<i32>} : memref<1x512x32xbf16, #tpu.memory_space<vmem>>, vector<1x512x32xbf16>,
      %cst_19 = arith.constant dense<0.000000e+00> : vector<32xf32>
      %22 = vector.multi_reduction <add>, %14, %cst_19 [0] : vector<512x32xf32> to vector<32xf32>
      %23 = vector.shape_cast %22 : vector<32xf32> to vector<1x32xf32>
      %24 = vector.shape_cast %23 : vector<1x32xf32> to vector<1x1x32xf32>
      %c0_20 = arith.constant 0 : index
      %c0_21 = arith.constant 0 : index
      %c0_22 = arith.constant 0 : index
      %c0_23 = arith.constant 0 : index
      %25 = vector.load %arg7[%c0_20, %c0_21, %c0_22, %c0_23] : memref<1x1x1x32xf32, #tpu.memory_space<vmem>>, vector<1x1x1x32xf32>
      %26 = vector.shape_cast %25 : vector<1x1x1x32xf32> to vector<1x1x32xf32>
      %27 = vector.shape_cast %24 : vector<1x1x32xf32> to vector<1x1x1x32xf32>
      tpu.vector_store %arg7[%c0_20, %c0_21, %c0_22, %c0_23], %27 {strides = array<i32>} : memref<1x1x1x32xf32, #tpu.memory_space<vmem>>, vector<1x1x1x32xf32>,
      %28 = arith.mulf %14, %14 : vector<512x32xf32>
      %cst_24 = arith.constant dense<0.000000e+00> : vector<32xf32>
      %29 = vector.multi_reduction <add>, %28, %cst_24 [0] : vector<512x32xf32> to vector<32xf32>
      %30 = vector.shape_cast %29 : vector<32xf32> to vector<1x32xf32>
      %31 = vector.shape_cast %30 : vector<1x32xf32> to vector<1x1x32xf32>
      %c0_25 = arith.constant 0 : index
      %c0_26 = arith.constant 0 : index
      %c0_27 = arith.constant 0 : index
      %c0_28 = arith.constant 0 : index
      %32 = vector.load %arg8[%c0_25, %c0_26, %c0_27, %c0_28] : memref<1x1x1x32xf32, #tpu.memory_space<vmem>>, vector<1x1x1x32xf32>
      %33 = vector.shape_cast %32 : vector<1x1x1x32xf32> to vector<1x1x32xf32>
      %34 = vector.shape_cast %31 : vector<1x1x32xf32> to vector<1x1x1x32xf32>
      tpu.vector_store %arg8[%c0_25, %c0_26, %c0_27, %c0_28], %34 {strides = array<i32>} : memref<1x1x1x32xf32, #tpu.memory_space<vmem>>, vector<1x1x1x32xf32>,
    } else {
    }
    return
  }
  func.func @transform_0(%arg0: i32, %arg1: i32, %arg2: i32) -> (i32, i32, i32) {
    %c0_i32 = arith.constant 0 : i32
    return %arg0, %arg1, %arg2 : i32, i32, i32
  }
  func.func @transform_1(%arg0: i32, %arg1: i32, %arg2: i32) -> (i32, i32, i32) {
    %c0_i32 = arith.constant 0 : i32
    %c0_i32_0 = arith.constant 0 : i32
    return %arg0, %arg2, %c0_i32 : i32, i32, i32
  }
  func.func @transform_2(%arg0: i32, %arg1: i32, %arg2: i32) -> (i32, i32) {
    %c0_i32 = arith.constant 0 : i32
    %c0_i32_0 = arith.constant 0 : i32
    %c0_i32_1 = arith.constant 0 : i32
    return %c0_i32, %c0_i32_0 : i32, i32
  }
  func.func @transform_3(%arg0: i32, %arg1: i32, %arg2: i32) -> (i32, i32, i32) {
    %c0_i32 = arith.constant 0 : i32
    %c0_i32_0 = arith.constant 0 : i32
    return %arg0, %arg1, %c0_i32 : i32, i32, i32
  }
  func.func @transform_4(%arg0: i32, %arg1: i32, %arg2: i32) -> (i32, i32, i32, i32) {
    %c0_i32 = arith.constant 0 : i32
    %c0_i32_0 = arith.constant 0 : i32
    %c0_i32_1 = arith.constant 0 : i32
    return %arg0, %arg1, %c0_i32, %c0_i32_0 : i32, i32, i32, i32
  }
  func.func @transform_5(%arg0: i32, %arg1: i32, %arg2: i32) -> (i32, i32, i32, i32) {
    %c0_i32 = arith.constant 0 : i32
    %c0_i32_0 = arith.constant 0 : i32
    %c0_i32_1 = arith.constant 0 : i32
    return %arg0, %arg1, %c0_i32, %c0_i32_0 : i32, i32, i32, i32
  }
}

module attributes {stable_mosaic.version = 11 : i64} {
  func.func @_gemm_bias_tanh_kernel(%arg0: i32, %arg1: i32, %arg2: i32, %arg3: memref<1x512x128xbf16, #tpu.memory_space<vmem>>, %arg4: memref<1x128x3xbf16, #tpu.memory_space<vmem>>, %arg5: memref<1x3xf32, #tpu.memory_space<vmem>>, %arg6: memref<1x512x3xf32, #tpu.memory_space<vmem>>, %arg7: memref<512x3xf32, #tpu.memory_space<vmem>>) attributes {dimension_semantics = [#tpu.dimension_semantics<parallel>, #tpu.dimension_semantics<parallel>, #tpu.dimension_semantics<arbitrary>], iteration_bounds = array<i64: 4, 10, 1>, scalar_prefetch = 0 : i64, scratch_operands = 1 : i64, tpu.core_type = #tpu.core_type<tc>, window_params = [{transform_indices = @transform_0, window_bounds = array<i64: 1, 512, 128>}, {transform_indices = @transform_1, window_bounds = array<i64: 1, 128, 3>}, {pipeline_mode = #tpu.pipeline_mode<synchronous>, transform_indices = @transform_2, window_bounds = array<i64: 1, 3>}, {transform_indices = @transform_3, window_bounds = array<i64: 1, 512, 3>}]} {
    %c0_i32 = arith.constant 0 : i32
    %0 = arith.cmpi eq, %arg2, %c0_i32 : i32
    %1 = arith.extui %0 : i1 to i32
    %c0_i32_0 = arith.constant 0 : i32
    %2 = arith.cmpi ne, %1, %c0_i32_0 : i32
    scf.if %2 {
      %cst_12 = arith.constant 0.000000e+00 : f32
      %14 = vector.broadcast %cst_12 : f32 to vector<512x3xf32>
      %c0_13 = arith.constant 0 : index
      %c0_14 = arith.constant 0 : index
      %15 = vector.load %arg7[%c0_13, %c0_14] : memref<512x3xf32, #tpu.memory_space<vmem>>, vector<512x3xf32>
      tpu.vector_store %arg7[%c0_13, %c0_14], %14 {strides = array<i32>} : memref<512x3xf32, #tpu.memory_space<vmem>>, vector<512x3xf32>,
    } else {
    }
    %c0 = arith.constant 0 : index
    %c0_1 = arith.constant 0 : index
    %3 = vector.load %arg7[%c0, %c0_1] : memref<512x3xf32, #tpu.memory_space<vmem>>, vector<512x3xf32>
    %c0_2 = arith.constant 0 : index
    %c0_3 = arith.constant 0 : index
    %c0_4 = arith.constant 0 : index
    %4 = vector.load %arg3[%c0_2, %c0_3, %c0_4] : memref<1x512x128xbf16, #tpu.memory_space<vmem>>, vector<1x512x128xbf16>
    %5 = vector.shape_cast %4 : vector<1x512x128xbf16> to vector<512x128xbf16>
    %c0_5 = arith.constant 0 : index
    %c0_6 = arith.constant 0 : index
    %c0_7 = arith.constant 0 : index
    %6 = vector.load %arg4[%c0_5, %c0_6, %c0_7] : memref<1x128x3xbf16, #tpu.memory_space<vmem>>, vector<1x128x3xbf16>
    %7 = vector.shape_cast %6 : vector<1x128x3xbf16> to vector<128x3xbf16>
    %cst = arith.constant dense<0.000000e+00> : vector<512x3xf32>
    %8 = tpu.matmul %5, %7, %cst {dimension_numbers = #tpu.dot_dimension_numbers<[1], [0], [0], [1], [0, 0, 1, 1], [], []>} : vector<512x128xbf16>, vector<128x3xbf16>, vector<512x3xf32> -> vector<512x3xf32>
    %9 = arith.addf %3, %8 : vector<512x3xf32>
    %c0_8 = arith.constant 0 : index
    %c0_9 = arith.constant 0 : index
    %10 = vector.load %arg7[%c0_8, %c0_9] : memref<512x3xf32, #tpu.memory_space<vmem>>, vector<512x3xf32>
    tpu.vector_store %arg7[%c0_8, %c0_9], %9 {strides = array<i32>} : memref<512x3xf32, #tpu.memory_space<vmem>>, vector<512x3xf32>,
    %c0_i32_10 = arith.constant 0 : i32
    %11 = arith.cmpi eq, %arg2, %c0_i32_10 : i32
    %12 = arith.extui %11 : i1 to i32
    %c0_i32_11 = arith.constant 0 : i32
    %13 = arith.cmpi ne, %12, %c0_i32_11 : i32
    scf.if %13 {
      %c0_12 = arith.constant 0 : index
      %c0_13 = arith.constant 0 : index
      %14 = vector.load %arg7[%c0_12, %c0_13] : memref<512x3xf32, #tpu.memory_space<vmem>>, vector<512x3xf32>
      %c0_14 = arith.constant 0 : index
      %c0_15 = arith.constant 0 : index
      %15 = vector.load %arg5[%c0_14, %c0_15] : memref<1x3xf32, #tpu.memory_space<vmem>>, vector<1x3xf32>
      %16 = vector.broadcast %15 : vector<1x3xf32> to vector<512x3xf32>
      %17 = arith.addf %14, %16 : vector<512x3xf32>
      %18 = math.tanh %17 : vector<512x3xf32>
      %c0_16 = arith.constant 0 : index
      %c0_17 = arith.constant 0 : index
      %c0_18 = arith.constant 0 : index
      %19 = vector.load %arg6[%c0_16, %c0_17, %c0_18] : memref<1x512x3xf32, #tpu.memory_space<vmem>>, vector<1x512x3xf32>
      %20 = vector.shape_cast %19 : vector<1x512x3xf32> to vector<512x3xf32>
      %21 = vector.shape_cast %18 : vector<512x3xf32> to vector<1x512x3xf32>
      tpu.vector_store %arg6[%c0_16, %c0_17, %c0_18], %21 {strides = array<i32>} : memref<1x512x3xf32, #tpu.memory_space<vmem>>, vector<1x512x3xf32>,
    } else {
    }
    return
  }
  func.func @transform_0(%arg0: i32, %arg1: i32, %arg2: i32) -> (i32, i32, i32) {
    %c0_i32 = arith.constant 0 : i32
    return %arg0, %arg1, %arg2 : i32, i32, i32
  }
  func.func @transform_1(%arg0: i32, %arg1: i32, %arg2: i32) -> (i32, i32, i32) {
    %c0_i32 = arith.constant 0 : i32
    %c0_i32_0 = arith.constant 0 : i32
    return %arg0, %arg2, %c0_i32 : i32, i32, i32
  }
  func.func @transform_2(%arg0: i32, %arg1: i32, %arg2: i32) -> (i32, i32) {
    %c0_i32 = arith.constant 0 : i32
    %c0_i32_0 = arith.constant 0 : i32
    %c0_i32_1 = arith.constant 0 : i32
    return %c0_i32, %c0_i32_0 : i32, i32
  }
  func.func @transform_3(%arg0: i32, %arg1: i32, %arg2: i32) -> (i32, i32, i32) {
    %c0_i32 = arith.constant 0 : i32
    %c0_i32_0 = arith.constant 0 : i32
    return %arg0, %arg1, %c0_i32 : i32, i32, i32
  }
}

</mosaic_0001>

<bundles_post_ra>
// kernel: fwd.5
= control target key start
LH: loop header
LB: loop body
LE: loop exit
PB: predicated region body
PF: predicated region fallthrough
CT: control target
= control target key end

     0   :  { %s5372_s0 = inlined_call_operand.hbm [shape: bf16[4,512,1024], index: 0, kind: input, shape index: {}]   ;;  %s5373_s1 = inlined_call_operand.hbm [shape: bf16[4,1024,128], index: 1, kind: input, shape index: {}]   ;;  %s5374_s2 = inlined_call_operand.hbm [shape: f32[1,128], index: 2, kind: input, shape index: {}]   ;;  %s5375_s3 = inlined_call_operand.hbm [shape: bf16[4,512,128], index: 3, kind: output, shape index: {0}]   ;;  %s5376_s4 = inlined_call_operand.hbm [shape: f32[4,1,1,128], index: 4, kind: output, shape index: {1}]   ;;  %s5377_s5 = inlined_call_operand.hbm [shape: f32[4,1,1,128], index: 5, kind: output, shape index: {2}]  }
   0x1   :  { %5393 = sst [smem:[#allocation26_spill]] %s5372_s0 }
   0x2   :  { %5394 = sst [smem:[#allocation27_spill]] %s5374_s2 }
   0x3   :  { %5395 = sst [smem:[#allocation28_spill]] %s5375_s3 }
   0x4   :  { %5396 = sst [smem:[#allocation29_spill]] %s5376_s4 }
   0x5   :  { %5397 = sst [smem:[#allocation30_spill]] %s5377_s5 }
   0x6   :  { %11 = vsyncpa [#allocation4], 0 }
   0x7   :  { %13 = vsyncpa [#allocation4 + $0x1], 0 }
   0x8   :  { %14 = vsyncpa [#allocation7], 0 }
   0x9   :  { %16 = vsyncpa [#allocation7 + $0x1], 0 }
   0xa   :  { %17 = vsyncpa [#allocation5], 0 }
   0xb   :  { %19 = vsyncpa [#allocation5 + $0x1], 0 }
   0xc   :  { %20 = vsyncpa [#allocation11], 0 }
   0xd   :  { %22 = vsyncpa [#allocation11 + $0x1], 0  ;;  %s4310_s18 = smov 0   ;;  %s4312_s19 = smov 0  }
   0xe   :  { %s4314_s20 = smov 0   ;;  %s4316_s21 = smov 0  }
   0xf   :  { %s4318_s22 = smov 0   ;;  %s4320_s23 = smov 0  }
  0x10   :  { %s4322_s24 = smov 0   ;;  %s4324_s25 = smov 0  }
  0x11   :  { %s4326_s26 = smov 0   ;;  %s4328_s27 = smov 0  }
  0x12   :  { %s4330_s28 = smov 0  }
  0x13 LB: > { %5398 = sst [smem:[#allocation18_spill]] %s4223_s18  ;;  %s4364_s29 = sadd.s32 4294967295, %s4263_s28   ;;  %s4263_s28 = sphi %s4330_s28, %s28_s28   ;;  %s4259_s27 = sphi %s4328_s27, %s5444_s27   ;;  %s4255_s26 = sphi %s4326_s26, %s5443_s26   ;;  %s4251_s25 = sphi %s4324_s25, %s5442_s25   ;;  %s4247_s24 = sphi %s4322_s24, %s5441_s24   ;;  %s4243_s23 = sphi %s4320_s23, %s5440_s23   ;;  %s4239_s22 = sphi %s4318_s22, %s5439_s22   ;;  %s4235_s21 = sphi %s4316_s21, %s5438_s21   ;;  %s4231_s20 = sphi %s4314_s20, %s5431_s20   ;;  %s4227_s19 = sphi %s4312_s19, %s5437_s19   ;;  %s4223_s18 = sphi %s4310_s18, %s5436_s18  }
  0x14   : > { %5399 = sst [smem:[#allocation19_spill]] %s4231_s20  ;;  %s5378_s30 = sadd.s32 4294967294, %s4263_s28  }
  0x15   : > { %5400 = sst [smem:[#allocation20_spill]] %s4243_s23  ;;  %s40_s6 = sadd.s32 1, %s4255_s26 }
  0x16   : > { %s47_s7 = sadd.s32 1, %s4259_s27  ;;  %p41_p0 = scmp.ge.s32.totalorder %s40_s6, 2 }
  0x17   : > { %s58_s8 = sadd.s32 1, %s4243_s23  ;;  %p65_p1 = scmp.ne.s32.totalorder %s4243_s23, %s4239_s22 }
  0x18   : > { %p66_p2 = scmp.eq.s32.totalorder %s4263_s28, 0  ;;  %s5446_s6 = smov (%p41_p0, %s40_s6), 0 }
  0x19   : > { %5401 = sst [smem:[#allocation21_spill]] %s5446_s6  ;;  %s5448_s7 = smov (!%p41_p0, %s47_s7), %s4259_s27 }
  0x1a   : > { %s54_s9 = ssub.s32 %s4255_s26, %s5446_s6  ;;  %p4378_p3 = por %p66_p2, %p65_p1 }
  0x1b   : > { %p49_p4 = scmp.ge.s32.totalorder %s5448_s7, 4  ;;  %p71_p5 = scmp.ne.s32.totalorder %s4239_s22, %s4235_s21 }
  0x1c   : > { %p5384_p6 = scmp.eq.s32.totalorder %s4364_s29, 0  ;;  %s135_s11 = sadd.s32 1, %s4231_s20 }
  0x1d   : > { %s5450_s7 = smov (%p49_p4, %s5448_s7), 0  ;;  %p145_p8 = scmp.ne.s32.totalorder %s4231_s20, %s4227_s19 }
  0x1e   : > { %5403 = sst [smem:[#allocation22_spill]] %s5450_s7  ;;  %p4389_p7 = por %p5384_p6, %p71_p5 }
  0x1f   : > { %s51_s13 = ssub.s32 %s4259_s27, %s5450_s7  ;;  %p146_p9 = scmp.eq.s32.totalorder %s4364_s29, 7 }
  0x20   : > { %s5404_s12 = scalar_select %p4389_p7, 1, 0 }
  0x21   : > { %s55_s14 = sor.u32 %s54_s9, %s51_s13  ;;  %p133_p10 = scmp.eq.s32.totalorder %s51_s13, 0 }
  0x22   : > { %p56_p11 = scmp.eq.s32.totalorder %s55_s14, 0  ;;  %p4398_p12 = por %p146_p9, %p145_p8 }
  0x23   : > { %s4403_s16 = scalar_select %p133_p10, %s4231_s20, %s135_s11  }
  0x24   : > { %s5405_s15 = scalar_select %p4398_p12, 1, 0 }
  0x25   : > { %5406 = sst [smem:[#allocation23_spill]] %s4403_s16  ;;  %p151_p13 = scmp.ne.s32.totalorder %s4227_s19, %s4223_s18 }
  0x26   : > { %s4406_s17 = scalar_select %p56_p11, %s4243_s23, %s58_s8  }
  0x27   : > { %p152_p0 = scmp.eq.s32.totalorder %s5378_s30, 7  ;;  %p3118_p1 = scmp.ge.s32.totalorder %s4263_s28, 1 }
  0x28   : > { %5407 = sst [smem:[#allocation24_spill]] %s4406_s17  ;;  %p215_p2 = scmp.lt.s32.totalorder %s4263_s28, 9 }
  0x29   : > { %p4414_p4 = por %p152_p0, %p151_p13  ;;  %s4265_s13 = smov [#allocation8]  }
  0x2a   : > { %p4418_p5 = pnand %p3118_p1, %p215_p2  ;;  %s228_s14 = sshll.u32 %s4265_s13, 4  ;;  %s229_s14 = int_to_ptr.vmem [resolvable:$true] %s228_s14 }
  0x2b   : > { %s5408_s21 = scalar_select %p4414_p4, 1, 0 }
  0x2c   : > { %s5410_s9 = scalar_select %p4418_p5, 1, 0 }
  0x2d   : > { %5409 = sst [smem:[#allocation25_spill]] %s5408_s21  ;;  %p3638_p8 = pneg %p4418_p5 }
  0x2e   : > { %p3660_p9 = scmp.lt.s32.totalorder %s4263_s28, 8  ;;  %s4426_s8 = sand.u32 1, %s4243_s23  }
  0x2f   : > { %p4430_p10 = pnand %p3638_p8, %p5384_p6  ;;  %s3121_s7 = sshll.u32 %s4426_s8, 10 }
  0x30   : > { %p4436_p11 = pnand %p3660_p9, %p4378_p3  ;;  %s5413_s2 = sld [smem:[#allocation27_spill]] }
  0x31   : > { %p3987_p0 = pneg %p4430_p10 }
  0x32   : > { %s5412_s30 = scalar_select %p4436_p11, 1, 0 }
  0x36   : > { %s3985_s17 = scalar_lea.hbm %s5413_s2, 16 }
  0x37   : > { %p3986_p13 = scmp.ne.s32.totalorder %s5413_s2, %s3985_s17  ;;  %p3992_p3 = scmp.lt.u32.totalorder %s3985_s17, %s5413_s2 }
  0x39   : > { %p3988_p1 = pnand %p3987_p0, %p3986_p13 }
  0x3b   : > { %p3989_p2 = pneg %p3988_p1 }
  0x3d   : > { %p3994_p8 = pnand %p3992_p3, %p3989_p2 }
  0x3f   : > { %3997 = shalt.err (!%p3994_p8)
}
  0x40   : > { %s3998_s21 = scalar_lea.vmem %s229_s14, 16  ;;  %s4005_s6 = scalar_lea.vmem %s229_s14, 32 }
  0x41   : > { %p3999_p9 = scmp.ne.s32.totalorder %s229_s14, %s3998_s21  ;;  %p4006_p12 = scmp.lt.s32.totalorder %s229_s14, %s229_s14 }
  0x42   : > { %p4007_p7 = scmp.lt.s32.totalorder %s4005_s6, %s3998_s21 }
  0x43   : > { %p4001_p6 = pnand %p3999_p9, %p3987_p0 }
  0x44   : > { %p4008_p5 = por %p4007_p7, %p4006_p12 }
  0x45   : > { %p4002_p4 = pneg %p4001_p6 }
  0x47   : > { %p4009_p11 = pnand %p4008_p5, %p4002_p4 }
  0x49   : > { %4012 = shalt.err (!%p4009_p11)
}
  0x4a   : > { %3641 = dma.hbm_to_vmem [thread:$0]  (!%p4430_p10), %s5413_s2, 16, %s229_s14, [#allocation7]  }
  0x4b   : > { %s3122_s20 = sshll.u32 %s4255_s26, 2  ;;  %s3123_s17 = sshll.u32 %s4259_s27, 9 }
  0x4c   : > { %s243_s13 = scalar_lea.vmem [#allocation3], %s3121_s7  ;;  %s252_s21 = sadd.s32 %s3123_s17, %s3122_s20 }
  0x4d   : > { %s255_s10 = sshll.u32 %s243_s13, 4  ;;  %s3124_s6 = sshll.u32 %s252_s21, 6  ;;  %s4459_s10 = int_to_ptr.vmem [resolvable:$true] %s255_s10 }
  0x4e   : > { %s5414_s0 = sld [smem:[#allocation26_spill]]  ;;  %s240_s16 = scalar_lea.sflag [#allocation4], %s4426_s8 }
  0x4f   : > { %p5415_p7 = scmp.ne.s32.totalorder %s5412_s30, 0 }
  0x51   : > { %p4015_p12 = pneg %p5415_p7 }
  0x54   : > { %s4464_s5 = scalar_lea.hbm %s5414_s0, %s3124_s6  ;;  %s4018_s18 = scalar_lea.hbm %s5414_s0, 131072 }
  0x55   : > { %s4013_s14 = scalar_lea.hbm %s4464_s5, 16384  ;;  %p4019_p10 = scmp.lt.u32.totalorder %s4464_s5, %s5414_s0 }
  0x56   : > { %p4014_p6 = scmp.ne.s32.totalorder %s4464_s5, %s4013_s14  ;;  %p4020_p11 = scmp.lt.u32.totalorder %s4018_s18, %s4013_s14 }
  0x57   : > { %p4022_p0 = scmp.lt.u32.totalorder %s4013_s14, %s4464_s5 }
  0x58   : > { %p4016_p4 = pnand %p4015_p12, %p4014_p6  ;;  %p4021_p13 = por %p4020_p11, %p4019_p10 }
  0x5a   : > { %p4017_p5 = pneg %p4016_p4  ;;  %p4023_p1 = por %p4022_p0, %p4021_p13 }
  0x5c   : > { %p4024_p2 = pnand %p4023_p1, %p4017_p5 }
  0x5e   : > { %4027 = shalt.err (!%p4024_p2)
}
  0x5f   : > { %s4028_s21 = scalar_lea.vmem %s4459_s10, 16384  ;;  %s4266_s6 = smov [#allocation3]  }
  0x60   : > { %p4029_p3 = scmp.ne.s32.totalorder %s4459_s10, %s4028_s21  ;;  %s4033_s11 = sshll.u32 %s4266_s6, 4  ;;  %s4034_s11 = int_to_ptr.vmem [resolvable:$false] %s4033_s11 }
  0x61   : > { %s4035_s7 = scalar_lea.vmem %s4034_s11, 32768  ;;  %p4036_p6 = scmp.lt.s32.totalorder %s4459_s10, %s4034_s11 }
  0x62   : > { %p4031_p8 = pnand %p4029_p3, %p4015_p12  ;;  %p4037_p4 = scmp.lt.s32.totalorder %s4035_s7, %s4028_s21 }
  0x64   : > { %p4032_p9 = pneg %p4031_p8  ;;  %p4038_p10 = por %p4037_p4, %p4036_p6 }
  0x66   : > { %p4039_p11 = pnand %p4038_p10, %p4032_p9 }
  0x68   : > { %4042 = shalt.err (!%p4039_p11)
}
  0x69   : > { %s4267_s14 = smov 512   ;;  %s4268_s20 = smov 256  }
  0x6a   : > { %s4269_s18 = smov 16   ;;  %s3125_s17 = sshll.u32 %s4426_s8, 8 }
  0x6b   : > { %3645 = dma.hbm_to_vmem [thread:$0]  (!%p5415_p7), %s4464_s5, 16384, %s4459_s10, %s240_s16, %s4267_s14, %s4268_s20, %s4269_s18  }
  0x6c   : > { %s3126_s13 = sshll.u32 %s4255_s26, 6  ;;  %s3127_s21 = sshll.u32 %s4259_s27, 7 }
  0x6d   : > { %s269_s6 = scalar_lea.vmem [#allocation6], %s3125_s17  ;;  %s275_s7 = sadd.s32 %s3127_s21, %s3126_s13 }
  0x6e   : > { %s278_s11 = sshll.u32 %s269_s6, 4  ;;  %s3128_s23 = sshll.u32 %s275_s7, 6  ;;  %s4498_s11 = int_to_ptr.vmem [resolvable:$true] %s278_s11 }
  0x6f   : > { %s4503_s3 = scalar_lea.hbm %s5373_s1, %s3128_s23  ;;  %s5416_s4 = sand.u32 1, %s4263_s28  }
  0x70   : > { %s4507_s5 = scalar_lea.sflag [#allocation7], %s5416_s4  ;;  %s4043_s8 = scalar_lea.hbm %s4503_s3, 4096 }
  0x71   : > { %p4044_p5 = scmp.ne.s32.totalorder %s4503_s3, %s4043_s8  ;;  %s4048_s14 = scalar_lea.hbm %s5373_s1, 32768 }
  0x72   : > { %p4049_p1 = scmp.lt.u32.totalorder %s4503_s3, %s5373_s1  ;;  %p4050_p2 = scmp.lt.u32.totalorder %s4048_s14, %s4043_s8 }
  0x73   : > { %p4046_p13 = pnand %p4044_p5, %p4015_p12  ;;  %p4052_p8 = scmp.lt.u32.totalorder %s4043_s8, %s4503_s3 }
  0x74   : > { %p4051_p3 = por %p4050_p2, %p4049_p1 }
  0x75   : > { %p4047_p0 = pneg %p4046_p13 }
  0x76   : > { %p4053_p9 = por %p4052_p8, %p4051_p3 }
  0x78   : > { %p4054_p6 = pnand %p4053_p9, %p4047_p0 }
  0x7a   : > { %4057 = shalt.err (!%p4054_p6)
}
  0x7b   : > { %s4058_s4 = scalar_lea.vmem %s4498_s11, 4096  ;;  %s4270_s23 = smov [#allocation6]  }
  0x7c   : > { %p4059_p4 = scmp.ne.s32.totalorder %s4498_s11, %s4058_s4  ;;  %s4063_s20 = sshll.u32 %s4270_s23, 4  ;;  %s4064_s20 = int_to_ptr.vmem [resolvable:$false] %s4063_s20 }
  0x7d   : > { %s4065_s18 = scalar_lea.vmem %s4064_s20, 8192  ;;  %p4066_p5 = scmp.lt.s32.totalorder %s4498_s11, %s4064_s20 }
  0x7e   : > { %p4061_p10 = pnand %p4059_p4, %p4015_p12  ;;  %p4067_p13 = scmp.lt.s32.totalorder %s4065_s18, %s4058_s4 }
  0x80   : > { %p4062_p11 = pneg %p4061_p10  ;;  %p4068_p1 = por %p4067_p13, %p4066_p5 }
  0x82   : > { %p4069_p2 = pnand %p4068_p1, %p4062_p11 }
  0x84   : > { %4072 = shalt.err (!%p4069_p2)
}
  0x85   : > { %s4271_s17 = smov 64   ;;  %s4272_s13 = smov 4  }
  0x86   : > { %3648 = dma.hbm_to_vmem [thread:$0]  (!%p5415_p7), %s4503_s3, 4096, %s4498_s11, %s4507_s5, %s4271_s17, %s4271_s17, %s4272_s13  }
  0x87   : > { %p5417_p12 = scmp.ne.s32.totalorder %s5410_s9, 0 }
  0x88   : > { %s292_s21 = sand.u32 (!%p5417_p12), 1, %s4239_s22   ;;  %p5418_p0 = scmp.ne.s32.totalorder (!%p5417_p12), %s5404_s12, 0 }
  0x89   : > { %290 = sbr.rel (%p5417_p12) target bundleno = 921 (0x399), region = 32  ;;  %s3130_s6 = sshll.u32 (!%p5417_p12), %s292_s21, 10 }
  0x8a   : > { %s293_s7 = scalar_lea.sflag (!%p5417_p12), [#allocation4], %s292_s21  ;;  %s4536_s8 = scalar_lea.vmem (!%p5417_p12), [#allocation3], %s3130_s6 }
  0x90   : > { %4202 = dma.done.wait (%p5418_p0), %s293_s7, 16384  }
  0x91   : > { %4204 = vsyncadd (%p5418_p0), %s293_s7, 4294950912  ;;  %s301_s30 = sand.u32 1, %s4364_s29   ;;  %s3131_s3 = sshll.u32 %s292_s21, 8 }
  0x92   : > { %s302_s9 = scalar_lea.sflag [#allocation7], %s301_s30  ;;  %s4545_s11 = scalar_lea.vmem [#allocation6], %s3131_s3 }
  0x93   : > { %4206 = dma.done.wait (%p5418_p0), %s302_s9, 4096  }
  0x94   : > { %4208 = vsyncadd (%p5418_p0), %s302_s9, 4294963200  ;;  %p5419_p7 = scmp.eq.s32.totalorder %s4364_s29, 0 }
  0x96   : > { %4210 = dma.done.wait (%p5419_p7), [#allocation7], 16   ;;  %p5420_p3 = pmov %p5419_p7 }
  0x97   : > { %s4556_s5 = sand.u32 1, %s4227_s19   ;;  %p3134_p8 = scmp.ne.s32.totalorder %s4247_s24, 0 }
  0x98   : > { %4212 = vsyncadd (%p5420_p3), [#allocation7], 4294967280  ;;  %s3133_s10 = sshll.u32 %s4556_s5, 8  ;;  %s342_s14 = scalar_lea.vmem [#allocation10], %s4556_s5  ;;  %v4273_v0 = vmov (!%p3134_p8), 0.0  }
  0x99   : > { %s4559_s16 = scalar_lea.vmem [#allocation9], %s3133_s10  ;;  %s348_s0 = scalar_lea.vmem [#allocation12], %s4556_s5  ;;  %358 = vst [vmem:[#allocation2] sm:$0xff] (!%p3134_p8), %v4273_v0  ;;  %359 = vst [vmem:[#allocation2 + $0x8] sm:$0xff] (!%p3134_p8), %v4273_v0 }
  0x9a   : > { %357 = sbr.rel (%p3134_p8) target bundleno = 185 (0xb9), region = 48  ;;  %360 = vst [vmem:[#allocation2 + $0x10] sm:$0xff] (!%p3134_p8), %v4273_v0  ;;  %361 = vst [vmem:[#allocation2 + $0x18] sm:$0xff] (!%p3134_p8), %v4273_v0 }
  0x9b   : > { %362 = vst [vmem:[#allocation2 + $0x20] sm:$0xff] (!%p3134_p8), %v4273_v0  ;;  %363 = vst [vmem:[#allocation2 + $0x28] sm:$0xff] (!%p3134_p8), %v4273_v0 }
  0x9c   : > { %364 = vst [vmem:[#allocation2 + $0x30] sm:$0xff] (!%p3134_p8), %v4273_v0  ;;  %365 = vst [vmem:[#allocation2 + $0x38] sm:$0xff] (!%p3134_p8), %v4273_v0 }
  0x9d   : > { %366 = vst [vmem:[#allocation2 + $0x40] sm:$0xff] (!%p3134_p8), %v4273_v0  ;;  %367 = vst [vmem:[#allocation2 + $0x48] sm:$0xff] (!%p3134_p8), %v4273_v0 }
  0x9e   : > { %368 = vst [vmem:[#allocation2 + $0x50] sm:$0xff] (!%p3134_p8), %v4273_v0  ;;  %369 = vst [vmem:[#allocation2 + $0x58] sm:$0xff] (!%p3134_p8), %v4273_v0 }
  0x9f   : > { %370 = vst [vmem:[#allocation2 + $0x60] sm:$0xff] (!%p3134_p8), %v4273_v0  ;;  %371 = vst [vmem:[#allocation2 + $0x68] sm:$0xff] (!%p3134_p8), %v4273_v0 }
  0xa0   : > { %372 = vst [vmem:[#allocation2 + $0x70] sm:$0xff] (!%p3134_p8), %v4273_v0  ;;  %373 = vst [vmem:[#allocation2 + $0x78] sm:$0xff] (!%p3134_p8), %v4273_v0 }
  0xa1   : > { %374 = vst [vmem:[#allocation2 + $0x80] sm:$0xff] %v4273_v0  ;;  %375 = vst [vmem:[#allocation2 + $0x88] sm:$0xff] %v4273_v0 }
  0xa2   : > { %376 = vst [vmem:[#allocation2 + $0x90] sm:$0xff] %v4273_v0  ;;  %377 = vst [vmem:[#allocation2 + $0x98] sm:$0xff] %v4273_v0 }
  0xa3   : > { %378 = vst [vmem:[#allocation2 + $0xa0] sm:$0xff] %v4273_v0  ;;  %379 = vst [vmem:[#allocation2 + $0xa8] sm:$0xff] %v4273_v0 }
  0xa4   : > { %380 = vst [vmem:[#allocation2 + $0xb0] sm:$0xff] %v4273_v0  ;;  %381 = vst [vmem:[#allocation2 + $0xb8] sm:$0xff] %v4273_v0 }
  0xa5   : > { %382 = vst [vmem:[#allocation2 + $0xc0] sm:$0xff] %v4273_v0  ;;  %383 = vst [vmem:[#allocation2 + $0xc8] sm:$0xff] %v4273_v0 }
  0xa6   : > { %384 = vst [vmem:[#allocation2 + $0xd0] sm:$0xff] %v4273_v0  ;;  %385 = vst [vmem:[#allocation2 + $0xd8] sm:$0xff] %v4273_v0 }
  0xa7   : > { %386 = vst [vmem:[#allocation2 + $0xe0] sm:$0xff] %v4273_v0  ;;  %387 = vst [vmem:[#allocation2 + $0xe8] sm:$0xff] %v4273_v0 }
  0xa8   : > { %388 = vst [vmem:[#allocation2 + $0xf0] sm:$0xff] %v4273_v0  ;;  %389 = vst [vmem:[#allocation2 + $0xf8] sm:$0xff] %v4273_v0 }
  0xa9   : > { %390 = vst [vmem:[#allocation2 + $0x100] sm:$0xff] %v4273_v0  ;;  %391 = vst [vmem:[#allocation2 + $0x108] sm:$0xff] %v4273_v0 }
  0xaa   : > { %392 = vst [vmem:[#allocation2 + $0x110] sm:$0xff] %v4273_v0  ;;  %393 = vst [vmem:[#allocation2 + $0x118] sm:$0xff] %v4273_v0 }
  0xab   : > { %394 = vst [vmem:[#allocation2 + $0x120] sm:$0xff] %v4273_v0  ;;  %395 = vst [vmem:[#allocation2 + $0x128] sm:$0xff] %v4273_v0 }
  0xac   : > { %396 = vst [vmem:[#allocation2 + $0x130] sm:$0xff] %v4273_v0  ;;  %397 = vst [vmem:[#allocation2 + $0x138] sm:$0xff] %v4273_v0 }
  0xad   : > { %398 = vst [vmem:[#allocation2 + $0x140] sm:$0xff] %v4273_v0  ;;  %399 = vst [vmem:[#allocation2 + $0x148] sm:$0xff] %v4273_v0 }
  0xae   : > { %400 = vst [vmem:[#allocation2 + $0x150] sm:$0xff] %v4273_v0  ;;  %401 = vst [vmem:[#allocation2 + $0x158] sm:$0xff] %v4273_v0 }
  0xaf   : > { %402 = vst [vmem:[#allocation2 + $0x160] sm:$0xff] %v4273_v0  ;;  %403 = vst [vmem:[#allocation2 + $0x168] sm:$0xff] %v4273_v0 }
  0xb0   : > { %404 = vst [vmem:[#allocation2 + $0x170] sm:$0xff] %v4273_v0  ;;  %405 = vst [vmem:[#allocation2 + $0x178] sm:$0xff] %v4273_v0 }
  0xb1   : > { %406 = vst [vmem:[#allocation2 + $0x180] sm:$0xff] %v4273_v0  ;;  %407 = vst [vmem:[#allocation2 + $0x188] sm:$0xff] %v4273_v0 }
  0xb2   : > { %408 = vst [vmem:[#allocation2 + $0x190] sm:$0xff] %v4273_v0  ;;  %409 = vst [vmem:[#allocation2 + $0x198] sm:$0xff] %v4273_v0 }
  0xb3   : > { %410 = vst [vmem:[#allocation2 + $0x1a0] sm:$0xff] %v4273_v0  ;;  %411 = vst [vmem:[#allocation2 + $0x1a8] sm:$0xff] %v4273_v0 }
  0xb4   : > { %412 = vst [vmem:[#allocation2 + $0x1b0] sm:$0xff] %v4273_v0  ;;  %413 = vst [vmem:[#allocation2 + $0x1b8] sm:$0xff] %v4273_v0 }
  0xb5   : > { %414 = vst [vmem:[#allocation2 + $0x1c0] sm:$0xff] %v4273_v0  ;;  %415 = vst [vmem:[#allocation2 + $0x1c8] sm:$0xff] %v4273_v0 }
  0xb6   : > { %416 = vst [vmem:[#allocation2 + $0x1d0] sm:$0xff] %v4273_v0  ;;  %417 = vst [vmem:[#allocation2 + $0x1d8] sm:$0xff] %v4273_v0 }
  0xb7   : > { %418 = vst [vmem:[#allocation2 + $0x1e0] sm:$0xff] %v4273_v0  ;;  %419 = vst [vmem:[#allocation2 + $0x1e8] sm:$0xff] %v4273_v0 }
  0xb8   : > { %420 = vst [vmem:[#allocation2 + $0x1f0] sm:$0xff] %v4273_v0  ;;  %421 = vst [vmem:[#allocation2 + $0x1f8] sm:$0xff] %v4273_v0 }
  0xb9 PF: > { %v3761_v1 = vld [vmem:[%s4545_s11] sm:$0xff]   ;;  %v4274_v2 = vmov 0   ;;  %v3763_v4 = vld [vmem:[%s4545_s11 + $0x8] sm:$0xff]   ;;  %v3765_v6 = vld [vmem:[%s4545_s11 + $0x10] sm:$0xff]   ;;  %p3295_p9 = scmp.ne.s32.totalorder %s4247_s24, 1 }
  0xba   : > { %1510 = vmatprep.subr.bf16.mxu0 %v4274_v2  ;;  %1799 = vmatprep.subr.bf16.mxu1 %v4274_v2  ;;  %v3762_v3 = vld [vmem:[%s4545_s11 + $0x80] sm:$0xff]   ;;  %v3764_v5 = vld [vmem:[%s4545_s11 + $0x88] sm:$0xff]   ;;  %v3766_v7 = vld [vmem:[%s4545_s11 + $0x90] sm:$0xff]  }
  0xbb   : > { %1511 = vmatpush1.bf16.msra.mxu0 %v3761_v1  ;;  %1800 = vmatpush1.bf16.msra.mxu1 %v3762_v3  ;;  %v3767_v8 = vld [vmem:[%s4545_s11 + $0x18] sm:$0xff]   ;;  %v3769_v10 = vld [vmem:[%s4545_s11 + $0x20] sm:$0xff]   ;;  %v3771_v12 = vld [vmem:[%s4545_s11 + $0x28] sm:$0xff]  }
  0xbc   : > { %1512 = vmatprep.subr.bf16.mxu0 %v4274_v2  ;;  %1801 = vmatprep.subr.bf16.mxu1 %v4274_v2  ;;  %v3768_v9 = vld [vmem:[%s4545_s11 + $0x98] sm:$0xff]   ;;  %v3770_v11 = vld [vmem:[%s4545_s11 + $0xa0] sm:$0xff]   ;;  %v3772_v13 = vld [vmem:[%s4545_s11 + $0xa8] sm:$0xff]  }
  0xbd   : > { %v3773_v14 = vld [vmem:[%s4545_s11 + $0x30] sm:$0xff]   ;;  %v3775_v16 = vld [vmem:[%s4545_s11 + $0x38] sm:$0xff]   ;;  %v3777_v18 = vld [vmem:[%s4545_s11 + $0x40] sm:$0xff]  }
  0xbe   : > { %v3774_v15 = vld [vmem:[%s4545_s11 + $0xb0] sm:$0xff]   ;;  %v3776_v17 = vld [vmem:[%s4545_s11 + $0xb8] sm:$0xff]   ;;  %v3778_v19 = vld [vmem:[%s4545_s11 + $0xc0] sm:$0xff]  }
  0xbf   : > { %1513 = vmatpush1.bf16.msra.mxu0 %v3763_v4  ;;  %1802 = vmatpush1.bf16.msra.mxu1 %v3764_v5  ;;  %v3795_v20 = vld [vmem:[%s4536_s8 + $0x4] ss:$16 sps:$4 sm:$0xff]   ;;  %v3779_v21 = vld [vmem:[%s4545_s11 + $0x48] sm:$0xff]   ;;  %v3783_v26 = vld [vmem:[%s4545_s11 + $0x58] sm:$0xff]  }
  0xc0   : > { %1514 = vmatprep.subr.bf16.mxu0 %v4274_v2  ;;  %1803 = vmatprep.subr.bf16.mxu1 %v4274_v2  ;;  %v3798_v22 = vld [vmem:[%s4536_s8 + $0xc] ss:$16 sps:$4 sm:$0xff]   ;;  %v3781_v24 = vld [vmem:[%s4545_s11 + $0x50] sm:$0xff]   ;;  %v3785_v28 = vld [vmem:[%s4545_s11 + $0x60] sm:$0xff]  }
  0xc1   : > { %v3780_v23 = vld [vmem:[%s4545_s11 + $0xc8] sm:$0xff]   ;;  %1542 = vmatprep.mubr.bf16.mxu0 %v3795_v20  ;;  %1831 = vmatprep.mubr.bf16.mxu1 %v3798_v22  ;;  %v3782_v25 = vld [vmem:[%s4545_s11 + $0xd0] sm:$0xff]   ;;  %v3784_v27 = vld [vmem:[%s4545_s11 + $0xd8] sm:$0xff]  }
  0xc2   : > { %v3786_v29 = vld [vmem:[%s4545_s11 + $0xe0] sm:$0xff]   ;;  %v3787_v30 = vld [vmem:[%s4545_s11 + $0x68] sm:$0xff]   ;;  %v3789_v32 = vld [vmem:[%s4545_s11 + $0x70] sm:$0xff]  }
  0xc3   : > { %1515 = vmatpush1.bf16.msra.mxu0 %v3765_v6  ;;  %1804 = vmatpush1.bf16.msra.mxu1 %v3766_v7  ;;  %v3788_v31 = vld [vmem:[%s4545_s11 + $0xe8] sm:$0xff]   ;;  %v3790_v33 = vld [vmem:[%s4545_s11 + $0xf0] sm:$0xff]   ;;  %v3791_v34 = vld [vmem:[%s4545_s11 + $0x78] sm:$0xff]  }
  0xc4   : > { %1516 = vmatprep.subr.bf16.mxu0 %v4274_v2  ;;  %1805 = vmatprep.subr.bf16.mxu1 %v4274_v2  ;;  %v3792_v35 = vld [vmem:[%s4545_s11 + $0xf8] sm:$0xff]   ;;  %v3793_v36 = vld [vmem:[%s4536_s8] ss:$16 sps:$4 sm:$0xff]   ;;  %v3799_v38 = vld [vmem:[%s4536_s8 + $0x24] ss:$16 sps:$4 sm:$0xff]  }
  0xc5   : > { %v3796_v37 = vld [vmem:[%s4536_s8 + $0x8] ss:$16 sps:$4 sm:$0xff]   ;;  %v3801_v39 = vld [vmem:[%s4536_s8 + $0x2c] ss:$16 sps:$4 sm:$0xff]   ;;  %v3803_v40 = vld [vmem:[%s4536_s8 + $0x20] ss:$16 sps:$4 sm:$0xff]  }
  0xc6   : > { %v3804_v41 = vld [vmem:[%s4536_s8 + $0x28] ss:$16 sps:$4 sm:$0xff]   ;;  %v3805_v42 = vld [vmem:[%s4536_s8 + $0x44] ss:$16 sps:$4 sm:$0xff]   ;;  %v3807_v43 = vld [vmem:[%s4536_s8 + $0x4c] ss:$16 sps:$4 sm:$0xff]  }
  0xc7   : > { %1517 = vmatpush1.bf16.msra.mxu0 %v3767_v8  ;;  %1806 = vmatpush1.bf16.msra.mxu1 %v3768_v9  ;;  %v3809_v44 = vld [vmem:[%s4536_s8 + $0x40] ss:$16 sps:$4 sm:$0xff]   ;;  %v3810_v45 = vld [vmem:[%s4536_s8 + $0x48] ss:$16 sps:$4 sm:$0xff]   ;;  %v3811_v46 = vld [vmem:[%s4536_s8 + $0x64] ss:$16 sps:$4 sm:$0xff]  }
  0xc8   : > { %1518 = vmatprep.subr.bf16.mxu0 %v4274_v2  ;;  %1807 = vmatprep.subr.bf16.mxu1 %v4274_v2  ;;  %v3813_v47 = vld [vmem:[%s4536_s8 + $0x6c] ss:$16 sps:$4 sm:$0xff]   ;;  %v3815_v48 = vld [vmem:[%s4536_s8 + $0x60] ss:$16 sps:$4 sm:$0xff]   ;;  %v3816_v49 = vld [vmem:[%s4536_s8 + $0x68] ss:$16 sps:$4 sm:$0xff]  }
  0xc9   : > { %v3817_v50 = vld [vmem:[%s4536_s8 + $0x84] ss:$16 sps:$4 sm:$0xff]   ;;  %v3819_v51 = vld [vmem:[%s4536_s8 + $0x8c] ss:$16 sps:$4 sm:$0xff]   ;;  %v3821_v52 = vld [vmem:[%s4536_s8 + $0x80] ss:$16 sps:$4 sm:$0xff]  }
  0xca   : > { %v3822_v53 = vld [vmem:[%s4536_s8 + $0x88] ss:$16 sps:$4 sm:$0xff]   ;;  %v3823_v54 = vld [vmem:[%s4536_s8 + $0xa4] ss:$16 sps:$4 sm:$0xff]   ;;  %v3825_v55 = vld [vmem:[%s4536_s8 + $0xac] ss:$16 sps:$4 sm:$0xff]  }
  0xcb   : > { %1519 = vmatpush1.bf16.msra.mxu0 %v3769_v10  ;;  %1808 = vmatpush1.bf16.msra.mxu1 %v3770_v11  ;;  %v3827_v56 = vld [vmem:[%s4536_s8 + $0xa0] ss:$16 sps:$4 sm:$0xff]   ;;  %v3828_v57 = vld [vmem:[%s4536_s8 + $0xa8] ss:$16 sps:$4 sm:$0xff]   ;;  %v3829_v58 = vld [vmem:[%s4536_s8 + $0xc4] ss:$16 sps:$4 sm:$0xff]  }
  0xcc   : > { %1520 = vmatprep.subr.bf16.mxu0 %v4274_v2  ;;  %1809 = vmatprep.subr.bf16.mxu1 %v4274_v2  ;;  %v3831_v59 = vld [vmem:[%s4536_s8 + $0xcc] ss:$16 sps:$4 sm:$0xff]   ;;  %v3833_v60 = vld [vmem:[%s4536_s8 + $0xc0] ss:$16 sps:$4 sm:$0xff]   ;;  %v3834_v61 = vld [vmem:[%s4536_s8 + $0xc8] ss:$16 sps:$4 sm:$0xff]  }
  0xcd   : > { %v3835_v62 = vld [vmem:[%s4536_s8 + $0xe4] ss:$16 sps:$4 sm:$0xff]   ;;  %v3837_v63 = vld [vmem:[%s4536_s8 + $0xec] ss:$16 sps:$4 sm:$0xff]   ;;  %v3839_v0 = vld [vmem:[%s4536_s8 + $0xe0] ss:$16 sps:$4 sm:$0xff]  }
  0xce   : > { %v3840_v1 = vld [vmem:[%s4536_s8 + $0xe8] ss:$16 sps:$4 sm:$0xff]   ;;  %v3843_v3 = vld [vmem:[%s4536_s8 + $0x10c] ss:$16 sps:$4 sm:$0xff]   ;;  %v3845_v4 = vld [vmem:[%s4536_s8 + $0x100] ss:$16 sps:$4 sm:$0xff]  }
  0xcf   : > { %1521 = vmatpush1.bf16.msra.mxu0 %v3771_v12  ;;  %1810 = vmatpush1.bf16.msra.mxu1 %v3772_v13  ;;  %v3846_v5 = vld [vmem:[%s4536_s8 + $0x108] ss:$16 sps:$4 sm:$0xff]   ;;  %v3847_v6 = vld [vmem:[%s4536_s8 + $0x124] ss:$16 sps:$4 sm:$0xff]   ;;  %v3849_v7 = vld [vmem:[%s4536_s8 + $0x12c] ss:$16 sps:$4 sm:$0xff]  }
  0xd0   : > { %1522 = vmatprep.subr.bf16.mxu0 %v4274_v2  ;;  %1811 = vmatprep.subr.bf16.mxu1 %v4274_v2  ;;  %v3851_v8 = vld [vmem:[%s4536_s8 + $0x120] ss:$16 sps:$4 sm:$0xff]   ;;  %v3852_v9 = vld [vmem:[%s4536_s8 + $0x128] ss:$16 sps:$4 sm:$0xff]   ;;  %v3853_v10 = vld [vmem:[%s4536_s8 + $0x144] ss:$16 sps:$4 sm:$0xff]  }
  0xd1   : > { %v3855_v11 = vld [vmem:[%s4536_s8 + $0x14c] ss:$16 sps:$4 sm:$0xff]   ;;  %v3857_v12 = vld [vmem:[%s4536_s8 + $0x140] ss:$16 sps:$4 sm:$0xff]   ;;  %v3858_v13 = vld [vmem:[%s4536_s8 + $0x148] ss:$16 sps:$4 sm:$0xff]  }
  0xd2   : > { %v3869_v20 = vld [vmem:[%s4536_s8 + $0x180] ss:$16 sps:$4 sm:$0xff]   ;;  %v3871_v22 = vld [vmem:[%s4536_s8 + $0x1a4] ss:$16 sps:$4 sm:$0xff]  }
  0xd3   : > { %1523 = vmatpush1.bf16.msra.mxu0 %v3773_v14  ;;  %1812 = vmatpush1.bf16.msra.mxu1 %v3774_v15  ;;  %v3859_v14 = vld [vmem:[%s4536_s8 + $0x164] ss:$16 sps:$4 sm:$0xff]   ;;  %v3861_v15 = vld [vmem:[%s4536_s8 + $0x16c] ss:$16 sps:$4 sm:$0xff]  }
  0xd4   : > { %1524 = vmatprep.subr.bf16.mxu0 %v4274_v2  ;;  %1813 = vmatprep.subr.bf16.mxu1 %v4274_v2 }
  0xd7   : > { %1525 = vmatpush1.bf16.msra.mxu0 %v3775_v16  ;;  %1814 = vmatpush1.bf16.msra.mxu1 %v3776_v17  ;;  %v3863_v16 = vld [vmem:[%s4536_s8 + $0x160] ss:$16 sps:$4 sm:$0xff]   ;;  %v3864_v17 = vld [vmem:[%s4536_s8 + $0x168] ss:$16 sps:$4 sm:$0xff]  }
  0xd8   : > { %1526 = vmatprep.subr.bf16.mxu0 %v4274_v2  ;;  %1815 = vmatprep.subr.bf16.mxu1 %v4274_v2 }
  0xdb   : > { %1527 = vmatpush1.bf16.msra.mxu0 %v3777_v18  ;;  %1816 = vmatpush1.bf16.msra.mxu1 %v3778_v19  ;;  %v3865_v18 = vld [vmem:[%s4536_s8 + $0x184] ss:$16 sps:$4 sm:$0xff]   ;;  %v3867_v19 = vld [vmem:[%s4536_s8 + $0x18c] ss:$16 sps:$4 sm:$0xff]  }
  0xdc   : > { %1528 = vmatprep.subr.bf16.mxu0 %v4274_v2  ;;  %1817 = vmatprep.subr.bf16.mxu1 %v4274_v2 }
  0xdf   : > { %1529 = vmatpush1.bf16.msra.mxu0 %v3779_v21  ;;  %1818 = vmatpush1.bf16.msra.mxu1 %v3780_v23  ;;  %v3870_v21 = vld [vmem:[%s4536_s8 + $0x188] ss:$16 sps:$4 sm:$0xff]   ;;  %v3873_v23 = vld [vmem:[%s4536_s8 + $0x1ac] ss:$16 sps:$4 sm:$0xff]  }
  0xe0   : > { %1530 = vmatprep.subr.bf16.mxu0 %v4274_v2  ;;  %1819 = vmatprep.subr.bf16.mxu1 %v4274_v2 }
  0xe3   : > { %1531 = vmatpush1.bf16.msra.mxu0 %v3781_v24  ;;  %1820 = vmatpush1.bf16.msra.mxu1 %v3782_v25  ;;  %v3875_v24 = vld [vmem:[%s4536_s8 + $0x1a0] ss:$16 sps:$4 sm:$0xff]   ;;  %v3876_v25 = vld [vmem:[%s4536_s8 + $0x1a8] ss:$16 sps:$4 sm:$0xff]  }
  0xe4   : > { %1532 = vmatprep.subr.bf16.mxu0 %v4274_v2  ;;  %1821 = vmatprep.subr.bf16.mxu1 %v4274_v2 }
  0xe7   : > { %1533 = vmatpush1.bf16.msra.mxu0 %v3783_v26  ;;  %1822 = vmatpush1.bf16.msra.mxu1 %v3784_v27  ;;  %v3877_v26 = vld [vmem:[%s4536_s8 + $0x1c4] ss:$16 sps:$4 sm:$0xff]   ;;  %v3879_v27 = vld [vmem:[%s4536_s8 + $0x1cc] ss:$16 sps:$4 sm:$0xff]  }
  0xe8   : > { %1534 = vmatprep.subr.bf16.mxu0 %v4274_v2  ;;  %1823 = vmatprep.subr.bf16.mxu1 %v4274_v2 }
  0xeb   : > { %1535 = vmatpush1.bf16.msra.mxu0 %v3785_v28  ;;  %1824 = vmatpush1.bf16.msra.mxu1 %v3786_v29  ;;  %v3881_v28 = vld [vmem:[%s4536_s8 + $0x1c0] ss:$16 sps:$4 sm:$0xff]   ;;  %v3882_v29 = vld [vmem:[%s4536_s8 + $0x1c8] ss:$16 sps:$4 sm:$0xff]  }
  0xec   : > { %1536 = vmatprep.subr.bf16.mxu0 %v4274_v2  ;;  %1825 = vmatprep.subr.bf16.mxu1 %v4274_v2 }
  0xef   : > { %1537 = vmatpush1.bf16.msra.mxu0 %v3787_v30  ;;  %1826 = vmatpush1.bf16.msra.mxu1 %v3788_v31  ;;  %v3883_v30 = vld [vmem:[%s4536_s8 + $0x1e4] ss:$16 sps:$4 sm:$0xff]   ;;  %v3885_v31 = vld [vmem:[%s4536_s8 + $0x1ec] ss:$16 sps:$4 sm:$0xff]  }
  0xf0   : > { %1538 = vmatprep.subr.bf16.mxu0 %v4274_v2  ;;  %1827 = vmatprep.subr.bf16.mxu1 %v4274_v2 }
  0xf3   : > { %1539 = vmatpush1.bf16.msra.mxu0 %v3789_v32  ;;  %1828 = vmatpush1.bf16.msra.mxu1 %v3790_v33  ;;  %v3887_v32 = vld [vmem:[%s4536_s8 + $0x1e0] ss:$16 sps:$4 sm:$0xff]   ;;  %v3888_v33 = vld [vmem:[%s4536_s8 + $0x1e8] ss:$16 sps:$4 sm:$0xff]  }
  0xf4   : > { %1540 = vmatprep.subr.bf16.mxu0 %v4274_v2  ;;  %1829 = vmatprep.subr.bf16.mxu1 %v4274_v2  ;;  %v3841_v2 = vld [vmem:[%s4536_s8 + $0x104] ss:$16 sps:$4 sm:$0xff]  }
  0xf7   : > { %1541 = vmatpush1.bf16.msra.mxu0 %v3791_v34  ;;  %1830 = vmatpush1.bf16.msra.mxu1 %v3792_v35  ;;  %v3889_v34 = vld [vmem:[%s4536_s8 + $0x204] ss:$16 sps:$4 sm:$0xff]   ;;  %v3891_v35 = vld [vmem:[%s4536_s8 + $0x20c] ss:$16 sps:$4 sm:$0xff]  }
  0xfa   : > { %1543 = vmatmul.mubr.bf16.vlgmr.msra.gmra.mrb[0].mxu0 %v3793_v36  ;;  %1832 = vmatmul.mubr.bf16.vlgmr.msra.gmra.mrb[0].mxu1 %v3796_v37  ;;  %v3893_v36 = vld [vmem:[%s4536_s8 + $0x200] ss:$16 sps:$4 sm:$0xff]   ;;  %v3894_v37 = vld [vmem:[%s4536_s8 + $0x208] ss:$16 sps:$4 sm:$0xff]  }
  0xfb   : > { %1550 = vmatprep.mubr.bf16.mxu0 %v3799_v38  ;;  %1839 = vmatprep.mubr.bf16.mxu1 %v3801_v39  ;;  %v3895_v38 = vld [vmem:[%s4536_s8 + $0x224] ss:$16 sps:$4 sm:$0xff]   ;;  %v3897_v39 = vld [vmem:[%s4536_s8 + $0x22c] ss:$16 sps:$4 sm:$0xff]  }
 0x102   : > { %1551 = vmatmul.mubr.bf16.gmra.mrb[4].mxu0 %v3803_v40  ;;  %1840 = vmatmul.mubr.bf16.gmra.mrb[4].mxu1 %v3804_v41  ;;  %v3899_v40 = vld [vmem:[%s4536_s8 + $0x220] ss:$16 sps:$4 sm:$0xff]   ;;  %v3900_v41 = vld [vmem:[%s4536_s8 + $0x228] ss:$16 sps:$4 sm:$0xff]  }
 0x103   : > { %1558 = vmatprep.mubr.bf16.mxu0 %v3805_v42  ;;  %1847 = vmatprep.mubr.bf16.mxu1 %v3807_v43  ;;  %v3901_v42 = vld [vmem:[%s4536_s8 + $0x244] ss:$16 sps:$4 sm:$0xff]   ;;  %v3903_v43 = vld [vmem:[%s4536_s8 + $0x24c] ss:$16 sps:$4 sm:$0xff]  }
 0x10a   : > { %1559 = vmatmul.mubr.bf16.gmra.mrb[8].mxu0 %v3809_v44  ;;  %1848 = vmatmul.mubr.bf16.gmra.mrb[8].mxu1 %v3810_v45  ;;  %v3905_v44 = vld [vmem:[%s4536_s8 + $0x240] ss:$16 sps:$4 sm:$0xff]   ;;  %v3906_v45 = vld [vmem:[%s4536_s8 + $0x248] ss:$16 sps:$4 sm:$0xff]  }
 0x10b   : > { %1566 = vmatprep.mubr.bf16.mxu0 %v3811_v46  ;;  %1855 = vmatprep.mubr.bf16.mxu1 %v3813_v47  ;;  %v3907_v46 = vld [vmem:[%s4536_s8 + $0x264] ss:$16 sps:$4 sm:$0xff]   ;;  %v3909_v47 = vld [vmem:[%s4536_s8 + $0x26c] ss:$16 sps:$4 sm:$0xff]  }
 0x112   : > { %1567 = vmatmul.mubr.bf16.gmra.mrb[12].mxu0 %v3815_v48  ;;  %1856 = vmatmul.mubr.bf16.gmra.mrb[12].mxu1 %v3816_v49  ;;  %v3911_v48 = vld [vmem:[%s4536_s8 + $0x260] ss:$16 sps:$4 sm:$0xff]   ;;  %v3912_v49 = vld [vmem:[%s4536_s8 + $0x268] ss:$16 sps:$4 sm:$0xff]  }
 0x113   : > { %1574 = vmatprep.mubr.bf16.mxu0 %v3817_v50  ;;  %1863 = vmatprep.mubr.bf16.mxu1 %v3819_v51  ;;  %v3913_v50 = vld [vmem:[%s4536_s8 + $0x284] ss:$16 sps:$4 sm:$0xff]   ;;  %v3915_v51 = vld [vmem:[%s4536_s8 + $0x28c] ss:$16 sps:$4 sm:$0xff]  }
 0x11a   : > { %1575 = vmatmul.mubr.bf16.gmra.mrb[16].mxu0 %v3821_v52  ;;  %1864 = vmatmul.mubr.bf16.gmra.mrb[16].mxu1 %v3822_v53  ;;  %v3917_v52 = vld [vmem:[%s4536_s8 + $0x280] ss:$16 sps:$4 sm:$0xff]   ;;  %v3918_v53 = vld [vmem:[%s4536_s8 + $0x288] ss:$16 sps:$4 sm:$0xff]  }
 0x11b   : > { %1582 = vmatprep.mubr.bf16.mxu0 %v3823_v54  ;;  %1871 = vmatprep.mubr.bf16.mxu1 %v3825_v55  ;;  %v3919_v54 = vld [vmem:[%s4536_s8 + $0x2a4] ss:$16 sps:$4 sm:$0xff]   ;;  %v3921_v55 = vld [vmem:[%s4536_s8 + $0x2ac] ss:$16 sps:$4 sm:$0xff]  }
 0x122   : > { %1583 = vmatmul.mubr.bf16.gmra.mrb[20].mxu0 %v3827_v56  ;;  %1872 = vmatmul.mubr.bf16.gmra.mrb[20].mxu1 %v3828_v57  ;;  %v3923_v56 = vld [vmem:[%s4536_s8 + $0x2a0] ss:$16 sps:$4 sm:$0xff]   ;;  %v3924_v57 = vld [vmem:[%s4536_s8 + $0x2a8] ss:$16 sps:$4 sm:$0xff]  }
 0x123   : > { %1590 = vmatprep.mubr.bf16.mxu0 %v3829_v58  ;;  %1879 = vmatprep.mubr.bf16.mxu1 %v3831_v59  ;;  %v3925_v58 = vld [vmem:[%s4536_s8 + $0x2c4] ss:$16 sps:$4 sm:$0xff]   ;;  %v3927_v59 = vld [vmem:[%s4536_s8 + $0x2cc] ss:$16 sps:$4 sm:$0xff]  }
 0x12a   : > { %1591 = vmatmul.mubr.bf16.gmra.mrb[24].mxu0 %v3833_v60  ;;  %1880 = vmatmul.mubr.bf16.gmra.mrb[24].mxu1 %v3834_v61  ;;  %v3929_v60 = vld [vmem:[%s4536_s8 + $0x2c0] ss:$16 sps:$4 sm:$0xff]   ;;  %v3930_v61 = vld [vmem:[%s4536_s8 + $0x2c8] ss:$16 sps:$4 sm:$0xff]  }
 0x12b   : > { %1598 = vmatprep.mubr.bf16.mxu0 %v3835_v62  ;;  %1887 = vmatprep.mubr.bf16.mxu1 %v3837_v63  ;;  %v3931_v62 = vld [vmem:[%s4536_s8 + $0x2e4] ss:$16 sps:$4 sm:$0xff]   ;;  %v3933_v63 = vld [vmem:[%s4536_s8 + $0x2ec] ss:$16 sps:$4 sm:$0xff]  }
 0x132   : > { %1599 = vmatmul.mubr.bf16.gmra.mrb[28].mxu0 %v3839_v0  ;;  %1888 = vmatmul.mubr.bf16.gmra.mrb[28].mxu1 %v3840_v1  ;;  %v3935_v0 = vld [vmem:[%s4536_s8 + $0x2e0] ss:$16 sps:$4 sm:$0xff]   ;;  %v3936_v1 = vld [vmem:[%s4536_s8 + $0x2e8] ss:$16 sps:$4 sm:$0xff]  }
 0x133   : > { %1606 = vmatprep.mubr.bf16.mxu0 %v3841_v2  ;;  %1895 = vmatprep.mubr.bf16.mxu1 %v3843_v3  ;;  %v3937_v2 = vld [vmem:[%s4536_s8 + $0x304] ss:$16 sps:$4 sm:$0xff]   ;;  %v3939_v3 = vld [vmem:[%s4536_s8 + $0x30c] ss:$16 sps:$4 sm:$0xff]  }
 0x13a   : > { %1607 = vmatmul.mubr.bf16.gmra.mrb[32].mxu0 %v3845_v4  ;;  %1896 = vmatmul.mubr.bf16.gmra.mrb[32].mxu1 %v3846_v5  ;;  %v3941_v4 = vld [vmem:[%s4536_s8 + $0x300] ss:$16 sps:$4 sm:$0xff]   ;;  %v3942_v5 = vld [vmem:[%s4536_s8 + $0x308] ss:$16 sps:$4 sm:$0xff]  }
 0x13b   : > { %1614 = vmatprep.mubr.bf16.mxu0 %v3847_v6  ;;  %1903 = vmatprep.mubr.bf16.mxu1 %v3849_v7  ;;  %v3943_v6 = vld [vmem:[%s4536_s8 + $0x324] ss:$16 sps:$4 sm:$0xff]   ;;  %v3945_v7 = vld [vmem:[%s4536_s8 + $0x32c] ss:$16 sps:$4 sm:$0xff]  }
 0x142   : > { %1615 = vmatmul.mubr.bf16.gmra.mrb[36].mxu0 %v3851_v8  ;;  %1904 = vmatmul.mubr.bf16.gmra.mrb[36].mxu1 %v3852_v9  ;;  %v3947_v8 = vld [vmem:[%s4536_s8 + $0x320] ss:$16 sps:$4 sm:$0xff]   ;;  %v3948_v9 = vld [vmem:[%s4536_s8 + $0x328] ss:$16 sps:$4 sm:$0xff]  }
 0x143   : > { %1622 = vmatprep.mubr.bf16.mxu0 %v3853_v10  ;;  %1911 = vmatprep.mubr.bf16.mxu1 %v3855_v11  ;;  %v3949_v10 = vld [vmem:[%s4536_s8 + $0x344] ss:$16 sps:$4 sm:$0xff]   ;;  %v3951_v11 = vld [vmem:[%s4536_s8 + $0x34c] ss:$16 sps:$4 sm:$0xff]  }
 0x14a   : > { %1623 = vmatmul.mubr.bf16.gmra.mrb[40].mxu0 %v3857_v12  ;;  %1912 = vmatmul.mubr.bf16.gmra.mrb[40].mxu1 %v3858_v13  ;;  %v3953_v12 = vld [vmem:[%s4536_s8 + $0x340] ss:$16 sps:$4 sm:$0xff]   ;;  %v3954_v13 = vld [vmem:[%s4536_s8 + $0x348] ss:$16 sps:$4 sm:$0xff]  }
 0x14b   : > { %1630 = vmatprep.mubr.bf16.mxu0 %v3859_v14  ;;  %1919 = vmatprep.mubr.bf16.mxu1 %v3861_v15  ;;  %v3955_v14 = vld [vmem:[%s4536_s8 + $0x364] ss:$16 sps:$4 sm:$0xff]   ;;  %v3957_v15 = vld [vmem:[%s4536_s8 + $0x36c] ss:$16 sps:$4 sm:$0xff]  }
 0x152   : > { %1631 = vmatmul.mubr.bf16.gmra.mrb[44].mxu0 %v3863_v16  ;;  %1920 = vmatmul.mubr.bf16.gmra.mrb[44].mxu1 %v3864_v17  ;;  %v422_v17 = vld [vmem:[#allocation2] sm:$0xff] }
 0x153   : > { %1638 = vmatprep.mubr.bf16.mxu0 %v3865_v18  ;;  %1927 = vmatprep.mubr.bf16.mxu1 %v3867_v19 }
 0x15a   : > { %1639 = vmatmul.mubr.bf16.gmra.mrb[48].mxu0 %v3869_v20  ;;  %1928 = vmatmul.mubr.bf16.gmra.mrb[48].mxu1 %v3870_v21  ;;  %v3959_v20 = vld [vmem:[%s4536_s8 + $0x360] ss:$16 sps:$4 sm:$0xff]  }
 0x15b   : > { %1646 = vmatprep.mubr.bf16.mxu0 %v3871_v22  ;;  %1935 = vmatprep.mubr.bf16.mxu1 %v3873_v23 }
 0x162   : > { %1647 = vmatmul.mubr.bf16.gmra.mrb[52].mxu0 %v3875_v24  ;;  %1936 = vmatmul.mubr.bf16.gmra.mrb[52].mxu1 %v3876_v25  ;;  %v3960_v24 = vld [vmem:[%s4536_s8 + $0x368] ss:$16 sps:$4 sm:$0xff]   ;;  %v3961_v25 = vld [vmem:[%s4536_s8 + $0x384] ss:$16 sps:$4 sm:$0xff]  }
 0x163   : > { %1654 = vmatprep.mubr.bf16.mxu0 %v3877_v26  ;;  %1943 = vmatprep.mubr.bf16.mxu1 %v3879_v27  ;;  %v423_v26 = vld [vmem:[#allocation2 + $0x8] sm:$0xff] }
 0x16a   : > { %1655 = vmatmul.mubr.bf16.gmra.mrb[56].mxu0 %v3881_v28  ;;  %1944 = vmatmul.mubr.bf16.gmra.mrb[56].mxu1 %v3882_v29  ;;  %v3963_v29 = vld [vmem:[%s4536_s8 + $0x38c] ss:$16 sps:$4 sm:$0xff]  }
 0x16b   : > { %1662 = vmatprep.mubr.bf16.mxu0 %v3883_v30  ;;  %1951 = vmatprep.mubr.bf16.mxu1 %v3885_v31 }
 0x172   : > { %1663 = vmatmul.mubr.bf16.gmra.mrb[60].mxu0 %v3887_v32  ;;  %1952 = vmatmul.mubr.bf16.gmra.mrb[60].mxu1 %v3888_v33 }
 0x173   : > { %1670 = vmatprep.mubr.bf16.mxu0 %v3889_v34  ;;  %1959 = vmatprep.mubr.bf16.mxu1 %v3891_v35  ;;  %v424_v35 = vld [vmem:[#allocation2 + $0x10] sm:$0xff] }
 0x17a   : > { %1671 = vmatmul.mubr.bf16.gmra.mrb[64].mxu0 %v3893_v36  ;;  %1960 = vmatmul.mubr.bf16.gmra.mrb[64].mxu1 %v3894_v37 }
 0x17b   : > { %1678 = vmatprep.mubr.bf16.mxu0 %v3895_v38  ;;  %1967 = vmatprep.mubr.bf16.mxu1 %v3897_v39  ;;  %v3965_v38 = vld [vmem:[%s4536_s8 + $0x380] ss:$16 sps:$4 sm:$0xff]  }
 0x182   : > { %1679 = vmatmul.mubr.bf16.gmra.mrb[68].mxu0 %v3899_v40  ;;  %1968 = vmatmul.mubr.bf16.gmra.mrb[68].mxu1 %v3900_v41 }
 0x183   : > { %1686 = vmatprep.mubr.bf16.mxu0 %v3901_v42  ;;  %1975 = vmatprep.mubr.bf16.mxu1 %v3903_v43  ;;  %v3966_v42 = vld [vmem:[%s4536_s8 + $0x388] ss:$16 sps:$4 sm:$0xff]   ;;  %v3967_v43 = vld [vmem:[%s4536_s8 + $0x3a4] ss:$16 sps:$4 sm:$0xff]  }
 0x18a   : > { %1687 = vmatmul.mubr.bf16.gmra.mrb[72].mxu0 %v3905_v44  ;;  %1976 = vmatmul.mubr.bf16.gmra.mrb[72].mxu1 %v3906_v45  ;;  %v425_v44 = vld [vmem:[#allocation2 + $0x18] sm:$0xff] }
 0x18b   : > { %1694 = vmatprep.mubr.bf16.mxu0 %v3907_v46  ;;  %1983 = vmatprep.mubr.bf16.mxu1 %v3909_v47  ;;  %v3969_v47 = vld [vmem:[%s4536_s8 + $0x3ac] ss:$16 sps:$4 sm:$0xff]  }
 0x192   : > { %1695 = vmatmul.mubr.bf16.gmra.mrb[76].mxu0 %v3911_v48  ;;  %1984 = vmatmul.mubr.bf16.gmra.mrb[76].mxu1 %v3912_v49 }
 0x193   : > { %1702 = vmatprep.mubr.bf16.mxu0 %v3913_v50  ;;  %1991 = vmatprep.mubr.bf16.mxu1 %v3915_v51 }
 0x19a   : > { %1703 = vmatmul.mubr.bf16.gmra.mrb[80].mxu0 %v3917_v52  ;;  %1992 = vmatmul.mubr.bf16.gmra.mrb[80].mxu1 %v3918_v53  ;;  %v426_v53 = vld [vmem:[#allocation2 + $0x20] sm:$0xff] }
 0x19b   : > { %1710 = vmatprep.mubr.bf16.mxu0 %v3919_v54  ;;  %1999 = vmatprep.mubr.bf16.mxu1 %v3921_v55 }
 0x1a2   : > { %1711 = vmatmul.mubr.bf16.gmra.mrb[84].mxu0 %v3923_v56  ;;  %2000 = vmatmul.mubr.bf16.gmra.mrb[84].mxu1 %v3924_v57  ;;  %v3971_v56 = vld [vmem:[%s4536_s8 + $0x3a0] ss:$16 sps:$4 sm:$0xff]  }
 0x1a3   : > { %1718 = vmatprep.mubr.bf16.mxu0 %v3925_v58  ;;  %2007 = vmatprep.mubr.bf16.mxu1 %v3927_v59 }
 0x1aa   : > { %1719 = vmatmul.mubr.bf16.gmra.mrb[88].mxu0 %v3929_v60  ;;  %2008 = vmatmul.mubr.bf16.gmra.mrb[88].mxu1 %v3930_v61  ;;  %v3972_v60 = vld [vmem:[%s4536_s8 + $0x3a8] ss:$16 sps:$4 sm:$0xff]   ;;  %v3973_v61 = vld [vmem:[%s4536_s8 + $0x3c4] ss:$16 sps:$4 sm:$0xff]  }
 0x1ab   : > { %1726 = vmatprep.mubr.bf16.mxu0 %v3931_v62  ;;  %2015 = vmatprep.mubr.bf16.mxu1 %v3933_v63  ;;  %v427_v62 = vld [vmem:[#allocation2 + $0x28] sm:$0xff] }
 0x1b2   : > { %1727 = vmatmul.mubr.bf16.gmra.mrb[92].mxu0 %v3935_v0  ;;  %2016 = vmatmul.mubr.bf16.gmra.mrb[92].mxu1 %v3936_v1  ;;  %v3975_v1 = vld [vmem:[%s4536_s8 + $0x3cc] ss:$16 sps:$4 sm:$0xff]  }
 0x1b3   : > { %1734 = vmatprep.mubr.bf16.mxu0 %v3937_v2  ;;  %2023 = vmatprep.mubr.bf16.mxu1 %v3939_v3 }
 0x1ba   : > { %1735 = vmatmul.mubr.bf16.gmra.mrb[96].mxu0 %v3941_v4  ;;  %2024 = vmatmul.mubr.bf16.gmra.mrb[96].mxu1 %v3942_v5 }
 0x1bb   : > { %1742 = vmatprep.mubr.bf16.mxu0 %v3943_v6  ;;  %2031 = vmatprep.mubr.bf16.mxu1 %v3945_v7  ;;  %v428_v7 = vld [vmem:[#allocation2 + $0x30] sm:$0xff] }
 0x1c2   : > { %1743 = vmatmul.mubr.bf16.gmra.mrb[100].mxu0 %v3947_v8  ;;  %2032 = vmatmul.mubr.bf16.gmra.mrb[100].mxu1 %v3948_v9 }
 0x1c3   : > { %1750 = vmatprep.mubr.bf16.mxu0 %v3949_v10  ;;  %2039 = vmatprep.mubr.bf16.mxu1 %v3951_v11  ;;  %v3977_v10 = vld [vmem:[%s4536_s8 + $0x3c0] ss:$16 sps:$4 sm:$0xff]  }
 0x1ca   : > { %1751 = vmatmul.mubr.bf16.gmra.mrb[104].mxu0 %v3953_v12  ;;  %2040 = vmatmul.mubr.bf16.gmra.mrb[104].mxu1 %v3954_v13 }
 0x1cb   : > { %1758 = vmatprep.mubr.bf16.mxu0 %v3955_v14  ;;  %2047 = vmatprep.mubr.bf16.mxu1 %v3957_v15  ;;  %v3978_v14 = vld [vmem:[%s4536_s8 + $0x3c8] ss:$16 sps:$4 sm:$0xff]   ;;  %v3979_v15 = vld [vmem:[%s4536_s8 + $0x3e4] ss:$16 sps:$4 sm:$0xff]  }
 0x1cd   : > { %v1544_v16 = vpop.f32.mrb[0].mxu0  ;;  %v1833_v18 = vpop.f32.mrb[0].mxu1 }
 0x1ce   : > { %v1546_v19 = vpop.f32.mrb[1].mxu0  ;;  %v1834_v21 = vadd.f32 %v1833_v18, %v1544_v16  ;;  %v1835_v22 = vpop.f32.mrb[1].mxu1  ;;  %v429_v16 = vld [vmem:[#allocation2 + $0x38] sm:$0xff] }
 0x1cf   : > { %v1547_v23 = vpop.f32.mrb[2].mxu0  ;;  %v1836_v27 = vpop.f32.mrb[2].mxu1  ;;  %v3981_v19 = vld [vmem:[%s4536_s8 + $0x3ec] ss:$16 sps:$4 sm:$0xff]  }
 0x1d0   : > { %v1549_v28 = vpop.f32.mrb[3].mxu0  ;;  %v2088_v30 = vadd.f32 %v1834_v21, %v422_v17  ;;  %v1837_v31 = vadd.f32 %v1836_v27, %v1547_v23  ;;  %v1838_v32 = vpop.f32.mrb[3].mxu1 }
 0x1d1   : > { %v3983_v28 = vld [vmem:[%s4536_s8 + $0x3e0] ss:$16 sps:$4 sm:$0xff]   ;;  %v3984_v32 = vld [vmem:[%s4536_s8 + $0x3e8] ss:$16 sps:$4 sm:$0xff]  }
 0x1d2   : > { %1759 = vmatmul.mubr.bf16.gmra.mrb[108].mxu0 %v3959_v20  ;;  %2152 = vst [vmem:[#allocation2] sm:$0xff] %v2088_v30  ;;  %v2089_v33 = vadd.f32 %v1837_v31, %v423_v26  ;;  %2048 = vmatmul.mubr.bf16.gmra.mrb[108].mxu1 %v3960_v24 }
 0x1d3   : > { %1766 = vmatprep.mubr.bf16.mxu0 %v3961_v25  ;;  %2055 = vmatprep.mubr.bf16.mxu1 %v3963_v29  ;;  %v430_v25 = vld [vmem:[#allocation2 + $0x40] sm:$0xff] }
 0x1d4   : > { %2153 = vst [vmem:[#allocation2 + $0x8] sm:$0xff] %v2089_v33  ;;  %v431_v33 = vld [vmem:[#allocation2 + $0x48] sm:$0xff] }
 0x1d5   : > { %v1552_v34 = vpop.f32.mrb[4].mxu0  ;;  %v1841_v36 = vpop.f32.mrb[4].mxu1 }
 0x1d6   : > { %v1554_v37 = vpop.f32.mrb[5].mxu0  ;;  %v1842_v39 = vadd.f32 %v1841_v36, %v1552_v34  ;;  %v1843_v40 = vpop.f32.mrb[5].mxu1 }
 0x1d7   : > { %v1555_v41 = vpop.f32.mrb[6].mxu0  ;;  %v1844_v45 = vpop.f32.mrb[6].mxu1 }
 0x1d8   : > { %v1557_v46 = vpop.f32.mrb[7].mxu0  ;;  %v2090_v48 = vadd.f32 %v1842_v39, %v424_v35  ;;  %v1845_v49 = vadd.f32 %v1844_v45, %v1555_v41  ;;  %v1846_v50 = vpop.f32.mrb[7].mxu1  ;;  %v432_v41 = vld [vmem:[#allocation2 + $0x50] sm:$0xff] }
 0x1da   : > { %1767 = vmatmul.mubr.bf16.gmra.mrb[112].mxu0 %v3965_v38  ;;  %2154 = vst [vmem:[#allocation2 + $0x10] sm:$0xff] %v2090_v48  ;;  %v2091_v51 = vadd.f32 %v1845_v49, %v425_v44  ;;  %2056 = vmatmul.mubr.bf16.gmra.mrb[112].mxu1 %v3966_v42 }
 0x1db   : > { %1774 = vmatprep.mubr.bf16.mxu0 %v3967_v43  ;;  %2063 = vmatprep.mubr.bf16.mxu1 %v3969_v47  ;;  %v433_v47 = vld [vmem:[#allocation2 + $0x58] sm:$0xff] }
 0x1dc   : > { %2155 = vst [vmem:[#allocation2 + $0x18] sm:$0xff] %v2091_v51 }
 0x1dd   : > { %v1560_v52 = vpop.f32.mrb[8].mxu0  ;;  %v1849_v54 = vpop.f32.mrb[8].mxu1 }
 0x1de   : > { %v1562_v55 = vpop.f32.mrb[9].mxu0  ;;  %v1850_v57 = vadd.f32 %v1849_v54, %v1560_v52  ;;  %v1851_v58 = vpop.f32.mrb[9].mxu1 }
 0x1df   : > { %v1563_v59 = vpop.f32.mrb[10].mxu0  ;;  %v1852_v63 = vpop.f32.mrb[10].mxu1  ;;  %v434_v55 = vld [vmem:[#allocation2 + $0x60] sm:$0xff] }
 0x1e0   : > { %v1565_v0 = vpop.f32.mrb[11].mxu0  ;;  %v2092_v2 = vadd.f32 %v1850_v57, %v426_v53  ;;  %v1853_v3 = vadd.f32 %v1852_v63, %v1563_v59  ;;  %v1854_v4 = vpop.f32.mrb[11].mxu1 }
 0x1e2   : > { %1775 = vmatmul.mubr.bf16.gmra.mrb[116].mxu0 %v3971_v56  ;;  %2156 = vst [vmem:[#allocation2 + $0x20] sm:$0xff] %v2092_v2  ;;  %v2093_v5 = vadd.f32 %v1853_v3, %v427_v62  ;;  %2064 = vmatmul.mubr.bf16.gmra.mrb[116].mxu1 %v3972_v60 }
 0x1e3   : > { %1782 = vmatprep.mubr.bf16.mxu0 %v3973_v61  ;;  %2071 = vmatprep.mubr.bf16.mxu1 %v3975_v1  ;;  %v435_v61 = vld [vmem:[#allocation2 + $0x68] sm:$0xff] }
 0x1e4   : > { %2157 = vst [vmem:[#allocation2 + $0x28] sm:$0xff] %v2093_v5  ;;  %v436_v5 = vld [vmem:[#allocation2 + $0x70] sm:$0xff] }
 0x1e5   : > { %v1568_v6 = vpop.f32.mrb[12].mxu0  ;;  %v1857_v8 = vpop.f32.mrb[12].mxu1 }
 0x1e6   : > { %v1570_v9 = vpop.f32.mrb[13].mxu0  ;;  %v1858_v11 = vadd.f32 %v1857_v8, %v1568_v6  ;;  %v1859_v12 = vpop.f32.mrb[13].mxu1 }
 0x1e7   : > { %v1571_v13 = vpop.f32.mrb[14].mxu0  ;;  %v1860_v17 = vpop.f32.mrb[14].mxu1 }
 0x1e8   : > { %v1573_v18 = vpop.f32.mrb[15].mxu0  ;;  %v2094_v20 = vadd.f32 %v1858_v11, %v428_v7  ;;  %v1861_v21 = vadd.f32 %v1860_v17, %v1571_v13  ;;  %v1862_v22 = vpop.f32.mrb[15].mxu1  ;;  %v437_v11 = vld [vmem:[#allocation2 + $0x78] sm:$0xff] }
 0x1ea   : > { %1783 = vmatmul.mubr.bf16.gmra.mrb[120].mxu0 %v3977_v10  ;;  %2158 = vst [vmem:[#allocation2 + $0x30] sm:$0xff] %v2094_v20  ;;  %v2095_v23 = vadd.f32 %v1861_v21, %v429_v16  ;;  %2072 = vmatmul.mubr.bf16.gmra.mrb[120].mxu1 %v3978_v14 }
 0x1eb   : > { %1790 = vmatprep.mubr.bf16.mxu0 %v3979_v15  ;;  %2079 = vmatprep.mubr.bf16.mxu1 %v3981_v19  ;;  %v438_v19 = vld [vmem:[#allocation2 + $0x80] sm:$0xff] }
 0x1ec   : > { %2159 = vst [vmem:[#allocation2 + $0x38] sm:$0xff] %v2095_v23 }
 0x1ed   : > { %v1576_v24 = vpop.f32.mrb[16].mxu0  ;;  %v1865_v26 = vpop.f32.mrb[16].mxu1 }
 0x1ee   : > { %v1578_v27 = vpop.f32.mrb[17].mxu0  ;;  %v1866_v29 = vadd.f32 %v1865_v26, %v1576_v24  ;;  %v1867_v30 = vpop.f32.mrb[17].mxu1 }
 0x1ef   : > { %v1579_v31 = vpop.f32.mrb[18].mxu0  ;;  %v1868_v34 = vpop.f32.mrb[18].mxu1 }
 0x1f0   : > { %v1581_v35 = vpop.f32.mrb[19].mxu0  ;;  %v2096_v36 = vadd.f32 %v1866_v29, %v430_v25  ;;  %v1869_v37 = vadd.f32 %v1868_v34, %v1579_v31  ;;  %v1870_v38 = vpop.f32.mrb[19].mxu1  ;;  %v439_v25 = vld [vmem:[#allocation2 + $0x88] sm:$0xff] }
 0x1f2   : > { %1791 = vmatmul.mubr.bf16.gmra.mrb[124].mxu0 %v3983_v28  ;;  %2160 = vst [vmem:[#allocation2 + $0x40] sm:$0xff] %v2096_v36  ;;  %v2097_v39 = vadd.f32 %v1869_v37, %v431_v33  ;;  %2080 = vmatmul.mubr.bf16.gmra.mrb[124].mxu1 %v3984_v32  ;;  %v440_v33 = vld [vmem:[#allocation2 + $0x90] sm:$0xff] }
 0x1f4   : > { %2161 = vst [vmem:[#allocation2 + $0x48] sm:$0xff] %v2097_v39  ;;  %v441_v39 = vld [vmem:[#allocation2 + $0x98] sm:$0xff] }
 0x1f5   : > { %v1584_v40 = vpop.f32.mrb[20].mxu0  ;;  %v1873_v42 = vpop.f32.mrb[20].mxu1 }
 0x1f6   : > { %v1586_v43 = vpop.f32.mrb[21].mxu0  ;;  %v1874_v44 = vadd.f32 %v1873_v42, %v1584_v40  ;;  %v1875_v45 = vpop.f32.mrb[21].mxu1 }
 0x1f7   : > { %v1587_v46 = vpop.f32.mrb[22].mxu0  ;;  %v1876_v48 = vpop.f32.mrb[22].mxu1 }
 0x1f8   : > { %v1589_v49 = vpop.f32.mrb[23].mxu0  ;;  %v2098_v50 = vadd.f32 %v1874_v44, %v432_v41  ;;  %v1877_v51 = vadd.f32 %v1876_v48, %v1587_v46  ;;  %v1878_v52 = vpop.f32.mrb[23].mxu1 }
 0x1fa   : > { %2162 = vst [vmem:[#allocation2 + $0x50] sm:$0xff] %v2098_v50  ;;  %v2099_v53 = vadd.f32 %v1877_v51, %v433_v47  ;;  %v442_v47 = vld [vmem:[#allocation2 + $0xa0] sm:$0xff] }
 0x1fc   : > { %2163 = vst [vmem:[#allocation2 + $0x58] sm:$0xff] %v2099_v53  ;;  %v443_v53 = vld [vmem:[#allocation2 + $0xa8] sm:$0xff] }
 0x1fd   : > { %v1592_v54 = vpop.f32.mrb[24].mxu0  ;;  %v1881_v56 = vpop.f32.mrb[24].mxu1 }
 0x1fe   : > { %v1594_v57 = vpop.f32.mrb[25].mxu0  ;;  %v1882_v58 = vadd.f32 %v1881_v56, %v1592_v54  ;;  %v1883_v59 = vpop.f32.mrb[25].mxu1 }
 0x1ff   : > { %v1595_v60 = vpop.f32.mrb[26].mxu0  ;;  %v1884_v62 = vpop.f32.mrb[26].mxu1 }
 0x200   : > { %v1597_v63 = vpop.f32.mrb[27].mxu0  ;;  %v2100_v0 = vadd.f32 %v1882_v58, %v434_v55  ;;  %v1885_v1 = vadd.f32 %v1884_v62, %v1595_v60  ;;  %v1886_v2 = vpop.f32.mrb[27].mxu1 }
 0x202   : > { %2164 = vst [vmem:[#allocation2 + $0x60] sm:$0xff] %v2100_v0  ;;  %v2101_v3 = vadd.f32 %v1885_v1, %v435_v61  ;;  %v444_v61 = vld [vmem:[#allocation2 + $0xb0] sm:$0xff] }
 0x204   : > { %2165 = vst [vmem:[#allocation2 + $0x68] sm:$0xff] %v2101_v3  ;;  %v445_v3 = vld [vmem:[#allocation2 + $0xb8] sm:$0xff] }
 0x205   : > { %v1600_v4 = vpop.f32.mrb[28].mxu0  ;;  %v1889_v6 = vpop.f32.mrb[28].mxu1 }
 0x206   : > { %v1602_v7 = vpop.f32.mrb[29].mxu0  ;;  %v1890_v8 = vadd.f32 %v1889_v6, %v1600_v4  ;;  %v1891_v9 = vpop.f32.mrb[29].mxu1 }
 0x207   : > { %v1603_v10 = vpop.f32.mrb[30].mxu0  ;;  %v1892_v12 = vpop.f32.mrb[30].mxu1 }
 0x208   : > { %v1605_v13 = vpop.f32.mrb[31].mxu0  ;;  %v2102_v14 = vadd.f32 %v1890_v8, %v436_v5  ;;  %v1893_v15 = vadd.f32 %v1892_v12, %v1603_v10  ;;  %v1894_v16 = vpop.f32.mrb[31].mxu1 }
 0x20a   : > { %2166 = vst [vmem:[#allocation2 + $0x70] sm:$0xff] %v2102_v14  ;;  %v2103_v17 = vadd.f32 %v1893_v15, %v437_v11  ;;  %v446_v11 = vld [vmem:[#allocation2 + $0xc0] sm:$0xff] }
 0x20c   : > { %2167 = vst [vmem:[#allocation2 + $0x78] sm:$0xff] %v2103_v17  ;;  %v447_v17 = vld [vmem:[#allocation2 + $0xc8] sm:$0xff] }
 0x20d   : > { %v1608_v18 = vpop.f32.mrb[32].mxu0  ;;  %v1897_v20 = vpop.f32.mrb[32].mxu1 }
 0x20e   : > { %v1610_v21 = vpop.f32.mrb[33].mxu0  ;;  %v1898_v22 = vadd.f32 %v1897_v20, %v1608_v18  ;;  %v1899_v23 = vpop.f32.mrb[33].mxu1 }
 0x20f   : > { %v1611_v24 = vpop.f32.mrb[34].mxu0  ;;  %v1900_v26 = vpop.f32.mrb[34].mxu1 }
 0x210   : > { %v1613_v27 = vpop.f32.mrb[35].mxu0  ;;  %v2104_v28 = vadd.f32 %v1898_v22, %v438_v19  ;;  %v1901_v29 = vadd.f32 %v1900_v26, %v1611_v24  ;;  %v1902_v30 = vpop.f32.mrb[35].mxu1 }
 0x212   : > { %2168 = vst [vmem:[#allocation2 + $0x80] sm:$0xff] %v2104_v28  ;;  %v2105_v31 = vadd.f32 %v1901_v29, %v439_v25  ;;  %v448_v25 = vld [vmem:[#allocation2 + $0xd0] sm:$0xff] }
 0x214   : > { %2169 = vst [vmem:[#allocation2 + $0x88] sm:$0xff] %v2105_v31  ;;  %v449_v31 = vld [vmem:[#allocation2 + $0xd8] sm:$0xff] }
 0x215   : > { %v1616_v32 = vpop.f32.mrb[36].mxu0  ;;  %v1905_v34 = vpop.f32.mrb[36].mxu1 }
 0x216   : > { %v1618_v35 = vpop.f32.mrb[37].mxu0  ;;  %v1906_v36 = vadd.f32 %v1905_v34, %v1616_v32  ;;  %v1907_v37 = vpop.f32.mrb[37].mxu1 }
 0x217   : > { %v1619_v38 = vpop.f32.mrb[38].mxu0  ;;  %v1908_v40 = vpop.f32.mrb[38].mxu1 }
 0x218   : > { %v1621_v41 = vpop.f32.mrb[39].mxu0  ;;  %v2106_v42 = vadd.f32 %v1906_v36, %v440_v33  ;;  %v1909_v43 = vadd.f32 %v1908_v40, %v1619_v38  ;;  %v1910_v44 = vpop.f32.mrb[39].mxu1 }
 0x21a   : > { %2170 = vst [vmem:[#allocation2 + $0x90] sm:$0xff] %v2106_v42  ;;  %v2107_v45 = vadd.f32 %v1909_v43, %v441_v39  ;;  %v450_v39 = vld [vmem:[#allocation2 + $0xe0] sm:$0xff] }
 0x21c   : > { %2171 = vst [vmem:[#allocation2 + $0x98] sm:$0xff] %v2107_v45  ;;  %v451_v45 = vld [vmem:[#allocation2 + $0xe8] sm:$0xff] }
 0x21d   : > { %v1624_v46 = vpop.f32.mrb[40].mxu0  ;;  %v1913_v48 = vpop.f32.mrb[40].mxu1 }
 0x21e   : > { %v1626_v49 = vpop.f32.mrb[41].mxu0  ;;  %v1914_v50 = vadd.f32 %v1913_v48, %v1624_v46  ;;  %v1915_v51 = vpop.f32.mrb[41].mxu1 }
 0x21f   : > { %v1627_v52 = vpop.f32.mrb[42].mxu0  ;;  %v1916_v54 = vpop.f32.mrb[42].mxu1 }
 0x220   : > { %v1629_v55 = vpop.f32.mrb[43].mxu0  ;;  %v2108_v56 = vadd.f32 %v1914_v50, %v442_v47  ;;  %v1917_v57 = vadd.f32 %v1916_v54, %v1627_v52  ;;  %v1918_v58 = vpop.f32.mrb[43].mxu1 }
 0x222   : > { %2172 = vst [vmem:[#allocation2 + $0xa0] sm:$0xff] %v2108_v56  ;;  %v2109_v59 = vadd.f32 %v1917_v57, %v443_v53  ;;  %v452_v53 = vld [vmem:[#allocation2 + $0xf0] sm:$0xff] }
 0x224   : > { %2173 = vst [vmem:[#allocation2 + $0xa8] sm:$0xff] %v2109_v59  ;;  %v453_v59 = vld [vmem:[#allocation2 + $0xf8] sm:$0xff] }
 0x225   : > { %v1632_v60 = vpop.f32.mrb[44].mxu0  ;;  %v1921_v62 = vpop.f32.mrb[44].mxu1 }
 0x226   : > { %v1634_v63 = vpop.f32.mrb[45].mxu0  ;;  %v1922_v0 = vadd.f32 %v1921_v62, %v1632_v60  ;;  %v1923_v1 = vpop.f32.mrb[45].mxu1 }
 0x227   : > { %v1635_v2 = vpop.f32.mrb[46].mxu0  ;;  %v1924_v4 = vpop.f32.mrb[46].mxu1 }
 0x228   : > { %v1637_v5 = vpop.f32.mrb[47].mxu0  ;;  %v2110_v6 = vadd.f32 %v1922_v0, %v444_v61  ;;  %v1925_v7 = vadd.f32 %v1924_v4, %v1635_v2  ;;  %v1926_v8 = vpop.f32.mrb[47].mxu1 }
 0x22a   : > { %2174 = vst [vmem:[#allocation2 + $0xb0] sm:$0xff] %v2110_v6  ;;  %v2111_v9 = vadd.f32 %v1925_v7, %v445_v3  ;;  %v454_v3 = vld [vmem:[#allocation2 + $0x100] sm:$0xff] }
 0x22c   : > { %2175 = vst [vmem:[#allocation2 + $0xb8] sm:$0xff] %v2111_v9  ;;  %v455_v9 = vld [vmem:[#allocation2 + $0x108] sm:$0xff] }
 0x22d   : > { %v1640_v10 = vpop.f32.mrb[48].mxu0  ;;  %v1929_v12 = vpop.f32.mrb[48].mxu1 }
 0x22e   : > { %v1642_v13 = vpop.f32.mrb[49].mxu0  ;;  %v1930_v14 = vadd.f32 %v1929_v12, %v1640_v10  ;;  %v1931_v15 = vpop.f32.mrb[49].mxu1 }
 0x22f   : > { %v1643_v16 = vpop.f32.mrb[50].mxu0  ;;  %v1932_v18 = vpop.f32.mrb[50].mxu1 }
 0x230   : > { %v1645_v19 = vpop.f32.mrb[51].mxu0  ;;  %v2112_v20 = vadd.f32 %v1930_v14, %v446_v11  ;;  %v1933_v21 = vadd.f32 %v1932_v18, %v1643_v16  ;;  %v1934_v22 = vpop.f32.mrb[51].mxu1 }
 0x232   : > { %2176 = vst [vmem:[#allocation2 + $0xc0] sm:$0xff] %v2112_v20  ;;  %v2113_v23 = vadd.f32 %v1933_v21, %v447_v17  ;;  %v456_v17 = vld [vmem:[#allocation2 + $0x110] sm:$0xff] }
 0x234   : > { %2177 = vst [vmem:[#allocation2 + $0xc8] sm:$0xff] %v2113_v23  ;;  %v457_v23 = vld [vmem:[#allocation2 + $0x118] sm:$0xff] }
 0x235   : > { %v1648_v24 = vpop.f32.mrb[52].mxu0  ;;  %v1937_v26 = vpop.f32.mrb[52].mxu1 }
 0x236   : > { %v1650_v27 = vpop.f32.mrb[53].mxu0  ;;  %v1938_v28 = vadd.f32 %v1937_v26, %v1648_v24  ;;  %v1939_v29 = vpop.f32.mrb[53].mxu1 }
 0x237   : > { %v1651_v30 = vpop.f32.mrb[54].mxu0  ;;  %v1940_v32 = vpop.f32.mrb[54].mxu1 }
 0x238   : > { %v1653_v33 = vpop.f32.mrb[55].mxu0  ;;  %v2114_v34 = vadd.f32 %v1938_v28, %v448_v25  ;;  %v1941_v35 = vadd.f32 %v1940_v32, %v1651_v30  ;;  %v1942_v36 = vpop.f32.mrb[55].mxu1 }
 0x23a   : > { %2178 = vst [vmem:[#allocation2 + $0xd0] sm:$0xff] %v2114_v34  ;;  %v2115_v37 = vadd.f32 %v1941_v35, %v449_v31  ;;  %v458_v31 = vld [vmem:[#allocation2 + $0x120] sm:$0xff] }
 0x23c   : > { %2179 = vst [vmem:[#allocation2 + $0xd8] sm:$0xff] %v2115_v37  ;;  %v459_v37 = vld [vmem:[#allocation2 + $0x128] sm:$0xff] }
 0x23d   : > { %v1656_v38 = vpop.f32.mrb[56].mxu0  ;;  %v1945_v40 = vpop.f32.mrb[56].mxu1 }
 0x23e   : > { %v1658_v41 = vpop.f32.mrb[57].mxu0  ;;  %v1946_v42 = vadd.f32 %v1945_v40, %v1656_v38  ;;  %v1947_v43 = vpop.f32.mrb[57].mxu1 }
 0x23f   : > { %v1659_v44 = vpop.f32.mrb[58].mxu0  ;;  %v1948_v46 = vpop.f32.mrb[58].mxu1 }
 0x240   : > { %v1661_v47 = vpop.f32.mrb[59].mxu0  ;;  %v2116_v48 = vadd.f32 %v1946_v42, %v450_v39  ;;  %v1949_v49 = vadd.f32 %v1948_v46, %v1659_v44  ;;  %v1950_v50 = vpop.f32.mrb[59].mxu1 }
 0x242   : > { %2180 = vst [vmem:[#allocation2 + $0xe0] sm:$0xff] %v2116_v48  ;;  %v2117_v51 = vadd.f32 %v1949_v49, %v451_v45  ;;  %v460_v45 = vld [vmem:[#allocation2 + $0x130] sm:$0xff] }
 0x244   : > { %2181 = vst [vmem:[#allocation2 + $0xe8] sm:$0xff] %v2117_v51  ;;  %v461_v51 = vld [vmem:[#allocation2 + $0x138] sm:$0xff] }
 0x245   : > { %v1664_v52 = vpop.f32.mrb[60].mxu0  ;;  %v1953_v54 = vpop.f32.mrb[60].mxu1 }
 0x246   : > { %v1666_v55 = vpop.f32.mrb[61].mxu0  ;;  %v1954_v56 = vadd.f32 %v1953_v54, %v1664_v52  ;;  %v1955_v57 = vpop.f32.mrb[61].mxu1 }
 0x247   : > { %v1667_v58 = vpop.f32.mrb[62].mxu0  ;;  %v1956_v60 = vpop.f32.mrb[62].mxu1 }
 0x248   : > { %v1669_v61 = vpop.f32.mrb[63].mxu0  ;;  %v2118_v62 = vadd.f32 %v1954_v56, %v452_v53  ;;  %v1957_v63 = vadd.f32 %v1956_v60, %v1667_v58  ;;  %v1958_v0 = vpop.f32.mrb[63].mxu1 }
 0x24a   : > { %2182 = vst [vmem:[#allocation2 + $0xf0] sm:$0xff] %v2118_v62  ;;  %v2119_v1 = vadd.f32 %v1957_v63, %v453_v59  ;;  %v462_v59 = vld [vmem:[#allocation2 + $0x140] sm:$0xff] }
 0x24c   : > { %2183 = vst [vmem:[#allocation2 + $0xf8] sm:$0xff] %v2119_v1  ;;  %v463_v1 = vld [vmem:[#allocation2 + $0x148] sm:$0xff] }
 0x24d   : > { %v1672_v2 = vpop.f32.mrb[64].mxu0  ;;  %v1961_v4 = vpop.f32.mrb[64].mxu1 }
 0x24e   : > { %v1674_v5 = vpop.f32.mrb[65].mxu0  ;;  %v1962_v6 = vadd.f32 %v1961_v4, %v1672_v2  ;;  %v1963_v7 = vpop.f32.mrb[65].mxu1 }
 0x24f   : > { %v1675_v8 = vpop.f32.mrb[66].mxu0  ;;  %v1964_v10 = vpop.f32.mrb[66].mxu1 }
 0x250   : > { %v1677_v11 = vpop.f32.mrb[67].mxu0  ;;  %v2120_v12 = vadd.f32 %v1962_v6, %v454_v3  ;;  %v1965_v13 = vadd.f32 %v1964_v10, %v1675_v8  ;;  %v1966_v14 = vpop.f32.mrb[67].mxu1 }
 0x252   : > { %2184 = vst [vmem:[#allocation2 + $0x100] sm:$0xff] %v2120_v12  ;;  %v2121_v15 = vadd.f32 %v1965_v13, %v455_v9  ;;  %v464_v9 = vld [vmem:[#allocation2 + $0x150] sm:$0xff] }
 0x254   : > { %2185 = vst [vmem:[#allocation2 + $0x108] sm:$0xff] %v2121_v15  ;;  %v465_v15 = vld [vmem:[#allocation2 + $0x158] sm:$0xff] }
 0x255   : > { %v1680_v16 = vpop.f32.mrb[68].mxu0  ;;  %v1969_v18 = vpop.f32.mrb[68].mxu1 }
 0x256   : > { %v1682_v19 = vpop.f32.mrb[69].mxu0  ;;  %v1970_v20 = vadd.f32 %v1969_v18, %v1680_v16  ;;  %v1971_v21 = vpop.f32.mrb[69].mxu1 }
 0x257   : > { %v1683_v22 = vpop.f32.mrb[70].mxu0  ;;  %v1972_v24 = vpop.f32.mrb[70].mxu1 }
 0x258   : > { %v1685_v25 = vpop.f32.mrb[71].mxu0  ;;  %v2122_v26 = vadd.f32 %v1970_v20, %v456_v17  ;;  %v1973_v27 = vadd.f32 %v1972_v24, %v1683_v22  ;;  %v1974_v28 = vpop.f32.mrb[71].mxu1 }
 0x25a   : > { %2186 = vst [vmem:[#allocation2 + $0x110] sm:$0xff] %v2122_v26  ;;  %v2123_v29 = vadd.f32 %v1973_v27, %v457_v23  ;;  %v466_v23 = vld [vmem:[#allocation2 + $0x160] sm:$0xff] }
 0x25c   : > { %2187 = vst [vmem:[#allocation2 + $0x118] sm:$0xff] %v2123_v29  ;;  %v467_v29 = vld [vmem:[#allocation2 + $0x168] sm:$0xff] }
 0x25d   : > { %v1688_v30 = vpop.f32.mrb[72].mxu0  ;;  %v1977_v32 = vpop.f32.mrb[72].mxu1 }
 0x25e   : > { %v1690_v33 = vpop.f32.mrb[73].mxu0  ;;  %v1978_v34 = vadd.f32 %v1977_v32, %v1688_v30  ;;  %v1979_v35 = vpop.f32.mrb[73].mxu1 }
 0x25f   : > { %v1691_v36 = vpop.f32.mrb[74].mxu0  ;;  %v1980_v38 = vpop.f32.mrb[74].mxu1 }
 0x260   : > { %v1693_v39 = vpop.f32.mrb[75].mxu0  ;;  %v2124_v40 = vadd.f32 %v1978_v34, %v458_v31  ;;  %v1981_v41 = vadd.f32 %v1980_v38, %v1691_v36  ;;  %v1982_v42 = vpop.f32.mrb[75].mxu1 }
 0x262   : > { %2188 = vst [vmem:[#allocation2 + $0x120] sm:$0xff] %v2124_v40  ;;  %v2125_v43 = vadd.f32 %v1981_v41, %v459_v37  ;;  %v468_v37 = vld [vmem:[#allocation2 + $0x170] sm:$0xff] }
 0x264   : > { %2189 = vst [vmem:[#allocation2 + $0x128] sm:$0xff] %v2125_v43  ;;  %v469_v43 = vld [vmem:[#allocation2 + $0x178] sm:$0xff] }
 0x265   : > { %v1696_v44 = vpop.f32.mrb[76].mxu0  ;;  %v1985_v46 = vpop.f32.mrb[76].mxu1 }
 0x266   : > { %v1698_v47 = vpop.f32.mrb[77].mxu0  ;;  %v1986_v48 = vadd.f32 %v1985_v46, %v1696_v44  ;;  %v1987_v49 = vpop.f32.mrb[77].mxu1 }
 0x267   : > { %v1699_v50 = vpop.f32.mrb[78].mxu0  ;;  %v1988_v52 = vpop.f32.mrb[78].mxu1 }
 0x268   : > { %v1701_v53 = vpop.f32.mrb[79].mxu0  ;;  %v2126_v54 = vadd.f32 %v1986_v48, %v460_v45  ;;  %v1989_v55 = vadd.f32 %v1988_v52, %v1699_v50  ;;  %v1990_v56 = vpop.f32.mrb[79].mxu1 }
 0x26a   : > { %2190 = vst [vmem:[#allocation2 + $0x130] sm:$0xff] %v2126_v54  ;;  %v2127_v57 = vadd.f32 %v1989_v55, %v461_v51  ;;  %v470_v51 = vld [vmem:[#allocation2 + $0x180] sm:$0xff] }
 0x26c   : > { %2191 = vst [vmem:[#allocation2 + $0x138] sm:$0xff] %v2127_v57  ;;  %v471_v57 = vld [vmem:[#allocation2 + $0x188] sm:$0xff] }
 0x26d   : > { %v1704_v58 = vpop.f32.mrb[80].mxu0  ;;  %v1993_v60 = vpop.f32.mrb[80].mxu1 }
 0x26e   : > { %v1706_v61 = vpop.f32.mrb[81].mxu0  ;;  %v1994_v62 = vadd.f32 %v1993_v60, %v1704_v58  ;;  %v1995_v63 = vpop.f32.mrb[81].mxu1 }
 0x26f   : > { %v1707_v0 = vpop.f32.mrb[82].mxu0  ;;  %v1996_v2 = vpop.f32.mrb[82].mxu1 }
 0x270   : > { %v1709_v3 = vpop.f32.mrb[83].mxu0  ;;  %v2128_v4 = vadd.f32 %v1994_v62, %v462_v59  ;;  %v1997_v5 = vadd.f32 %v1996_v2, %v1707_v0  ;;  %v1998_v6 = vpop.f32.mrb[83].mxu1 }
 0x272   : > { %2192 = vst [vmem:[#allocation2 + $0x140] sm:$0xff] %v2128_v4  ;;  %v2129_v7 = vadd.f32 %v1997_v5, %v463_v1  ;;  %v472_v1 = vld [vmem:[#allocation2 + $0x190] sm:$0xff] }
 0x274   : > { %2193 = vst [vmem:[#allocation2 + $0x148] sm:$0xff] %v2129_v7  ;;  %v473_v7 = vld [vmem:[#allocation2 + $0x198] sm:$0xff] }
 0x275   : > { %v1712_v8 = vpop.f32.mrb[84].mxu0  ;;  %v2001_v10 = vpop.f32.mrb[84].mxu1 }
 0x276   : > { %v1714_v11 = vpop.f32.mrb[85].mxu0  ;;  %v2002_v12 = vadd.f32 %v2001_v10, %v1712_v8  ;;  %v2003_v13 = vpop.f32.mrb[85].mxu1 }
 0x277   : > { %v1715_v14 = vpop.f32.mrb[86].mxu0  ;;  %v2004_v16 = vpop.f32.mrb[86].mxu1 }
 0x278   : > { %v1717_v17 = vpop.f32.mrb[87].mxu0  ;;  %v2130_v18 = vadd.f32 %v2002_v12, %v464_v9  ;;  %v2005_v19 = vadd.f32 %v2004_v16, %v1715_v14  ;;  %v2006_v20 = vpop.f32.mrb[87].mxu1 }
 0x27a   : > { %2194 = vst [vmem:[#allocation2 + $0x150] sm:$0xff] %v2130_v18  ;;  %v2131_v21 = vadd.f32 %v2005_v19, %v465_v15  ;;  %v474_v15 = vld [vmem:[#allocation2 + $0x1a0] sm:$0xff] }
 0x27c   : > { %2195 = vst [vmem:[#allocation2 + $0x158] sm:$0xff] %v2131_v21  ;;  %v475_v21 = vld [vmem:[#allocation2 + $0x1a8] sm:$0xff] }
 0x27d   : > { %v1720_v22 = vpop.f32.mrb[88].mxu0  ;;  %v2009_v24 = vpop.f32.mrb[88].mxu1 }
 0x27e   : > { %v1722_v25 = vpop.f32.mrb[89].mxu0  ;;  %v2010_v26 = vadd.f32 %v2009_v24, %v1720_v22  ;;  %v2011_v27 = vpop.f32.mrb[89].mxu1 }
 0x27f   : > { %v1723_v28 = vpop.f32.mrb[90].mxu0  ;;  %v2012_v30 = vpop.f32.mrb[90].mxu1 }
 0x280   : > { %v1725_v31 = vpop.f32.mrb[91].mxu0  ;;  %v2132_v32 = vadd.f32 %v2010_v26, %v466_v23  ;;  %v2013_v33 = vadd.f32 %v2012_v30, %v1723_v28  ;;  %v2014_v34 = vpop.f32.mrb[91].mxu1 }
 0x282   : > { %2196 = vst [vmem:[#allocation2 + $0x160] sm:$0xff] %v2132_v32  ;;  %v2133_v35 = vadd.f32 %v2013_v33, %v467_v29  ;;  %v476_v29 = vld [vmem:[#allocation2 + $0x1b0] sm:$0xff] }
 0x284   : > { %2197 = vst [vmem:[#allocation2 + $0x168] sm:$0xff] %v2133_v35  ;;  %v477_v35 = vld [vmem:[#allocation2 + $0x1b8] sm:$0xff] }
 0x285   : > { %v1728_v36 = vpop.f32.mrb[92].mxu0  ;;  %v2017_v38 = vpop.f32.mrb[92].mxu1 }
 0x286   : > { %v1730_v39 = vpop.f32.mrb[93].mxu0  ;;  %v2018_v40 = vadd.f32 %v2017_v38, %v1728_v36  ;;  %v2019_v41 = vpop.f32.mrb[93].mxu1 }
 0x287   : > { %v1731_v42 = vpop.f32.mrb[94].mxu0  ;;  %v2020_v44 = vpop.f32.mrb[94].mxu1 }
 0x288   : > { %v1733_v45 = vpop.f32.mrb[95].mxu0  ;;  %v2134_v46 = vadd.f32 %v2018_v40, %v468_v37  ;;  %v2021_v47 = vadd.f32 %v2020_v44, %v1731_v42  ;;  %v2022_v48 = vpop.f32.mrb[95].mxu1 }
 0x28a   : > { %2198 = vst [vmem:[#allocation2 + $0x170] sm:$0xff] %v2134_v46  ;;  %v2135_v49 = vadd.f32 %v2021_v47, %v469_v43  ;;  %v478_v43 = vld [vmem:[#allocation2 + $0x1c0] sm:$0xff] }
 0x28c   : > { %2199 = vst [vmem:[#allocation2 + $0x178] sm:$0xff] %v2135_v49  ;;  %v479_v49 = vld [vmem:[#allocation2 + $0x1c8] sm:$0xff] }
 0x28d   : > { %v1736_v50 = vpop.f32.mrb[96].mxu0  ;;  %v2025_v52 = vpop.f32.mrb[96].mxu1 }
 0x28e   : > { %v1738_v53 = vpop.f32.mrb[97].mxu0  ;;  %v2026_v54 = vadd.f32 %v2025_v52, %v1736_v50  ;;  %v2027_v55 = vpop.f32.mrb[97].mxu1 }
 0x28f   : > { %v1739_v56 = vpop.f32.mrb[98].mxu0  ;;  %v2028_v58 = vpop.f32.mrb[98].mxu1 }
 0x290   : > { %v1741_v59 = vpop.f32.mrb[99].mxu0  ;;  %v2136_v60 = vadd.f32 %v2026_v54, %v470_v51  ;;  %v2029_v61 = vadd.f32 %v2028_v58, %v1739_v56  ;;  %v2030_v62 = vpop.f32.mrb[99].mxu1 }
 0x292   : > { %2200 = vst [vmem:[#allocation2 + $0x180] sm:$0xff] %v2136_v60  ;;  %v2137_v63 = vadd.f32 %v2029_v61, %v471_v57  ;;  %v480_v57 = vld [vmem:[#allocation2 + $0x1d0] sm:$0xff] }
 0x294   : > { %2201 = vst [vmem:[#allocation2 + $0x188] sm:$0xff] %v2137_v63  ;;  %v481_v63 = vld [vmem:[#allocation2 + $0x1d8] sm:$0xff] }
 0x295   : > { %v1744_v0 = vpop.f32.mrb[100].mxu0  ;;  %v2033_v2 = vpop.f32.mrb[100].mxu1 }
 0x296   : > { %v1746_v3 = vpop.f32.mrb[101].mxu0  ;;  %v2034_v4 = vadd.f32 %v2033_v2, %v1744_v0  ;;  %v2035_v5 = vpop.f32.mrb[101].mxu1 }
 0x297   : > { %v1747_v6 = vpop.f32.mrb[102].mxu0  ;;  %v2036_v8 = vpop.f32.mrb[102].mxu1 }
 0x298   : > { %v1749_v9 = vpop.f32.mrb[103].mxu0  ;;  %v2138_v10 = vadd.f32 %v2034_v4, %v472_v1  ;;  %v2037_v11 = vadd.f32 %v2036_v8, %v1747_v6  ;;  %v2038_v12 = vpop.f32.mrb[103].mxu1 }
 0x29a   : > { %2202 = vst [vmem:[#allocation2 + $0x190] sm:$0xff] %v2138_v10  ;;  %v2139_v13 = vadd.f32 %v2037_v11, %v473_v7  ;;  %v482_v7 = vld [vmem:[#allocation2 + $0x1e0] sm:$0xff] }
 0x29c   : > { %2203 = vst [vmem:[#allocation2 + $0x198] sm:$0xff] %v2139_v13  ;;  %v483_v13 = vld [vmem:[#allocation2 + $0x1e8] sm:$0xff] }
 0x29d   : > { %v1752_v14 = vpop.f32.mrb[104].mxu0  ;;  %v2041_v16 = vpop.f32.mrb[104].mxu1 }
 0x29e   : > { %v1754_v17 = vpop.f32.mrb[105].mxu0  ;;  %v2042_v18 = vadd.f32 %v2041_v16, %v1752_v14  ;;  %v2043_v19 = vpop.f32.mrb[105].mxu1 }
 0x29f   : > { %v1755_v20 = vpop.f32.mrb[106].mxu0  ;;  %v2044_v22 = vpop.f32.mrb[106].mxu1 }
 0x2a0   : > { %v1757_v23 = vpop.f32.mrb[107].mxu0  ;;  %v2140_v24 = vadd.f32 %v2042_v18, %v474_v15  ;;  %v2045_v25 = vadd.f32 %v2044_v22, %v1755_v20  ;;  %v2046_v26 = vpop.f32.mrb[107].mxu1 }
 0x2a2   : > { %2204 = vst [vmem:[#allocation2 + $0x1a0] sm:$0xff] %v2140_v24  ;;  %v2141_v27 = vadd.f32 %v2045_v25, %v475_v21  ;;  %v484_v21 = vld [vmem:[#allocation2 + $0x1f0] sm:$0xff] }
 0x2a4   : > { %2205 = vst [vmem:[#allocation2 + $0x1a8] sm:$0xff] %v2141_v27  ;;  %v485_v27 = vld [vmem:[#allocation2 + $0x1f8] sm:$0xff] }
 0x2a5   : > { %v1760_v28 = vpop.f32.mrb[108].mxu0  ;;  %v2049_v30 = vpop.f32.mrb[108].mxu1 }
 0x2a6   : > { %v1762_v31 = vpop.f32.mrb[109].mxu0  ;;  %v2050_v32 = vadd.f32 %v2049_v30, %v1760_v28  ;;  %v2051_v33 = vpop.f32.mrb[109].mxu1 }
 0x2a7   : > { %v1763_v34 = vpop.f32.mrb[110].mxu0  ;;  %v2052_v36 = vpop.f32.mrb[110].mxu1 }
 0x2a8   : > { %v1765_v37 = vpop.f32.mrb[111].mxu0  ;;  %v2142_v38 = vadd.f32 %v2050_v32, %v476_v29  ;;  %v2053_v39 = vadd.f32 %v2052_v36, %v1763_v34  ;;  %v2054_v40 = vpop.f32.mrb[111].mxu1  ;;  %v2220_v34 = vld [vmem:[#allocation2] sm:$0xff] (!%p3295_p9) }
 0x2a9   : > { %v4821_v36 = vld [vmem:[#allocation8] ss:$0 sm:$0xff] (!%p3295_p9)  ;;  %v2745_v40 = vmul.f32 (!%p3295_p9), %v2220_v34, %v2220_v34 }
 0x2aa   : > { %2206 = vst [vmem:[#allocation2 + $0x1b0] sm:$0xff] %v2142_v38  ;;  %v2143_v41 = vadd.f32 %v2053_v39, %v477_v35  ;;  %v2221_v35 = vld [vmem:[#allocation2 + $0x8] sm:$0xff] (!%p3295_p9)  ;;  %v2291_v37 = vadd.f32 (!%p3295_p9), %v4821_v36, %v2220_v34 }
 0x2ab   : > { %v2292_v38 = vadd.f32 (!%p3295_p9), %v4821_v36, %v2221_v35  ;;  %v2675_v39 = vadd.f32 (!%p3295_p9), %v2221_v35, %v2220_v34 }
 0x2ac   : > { %2207 = vst [vmem:[#allocation2 + $0x1b8] sm:$0xff] %v2143_v41  ;;  %v2222_v41 = vld [vmem:[#allocation2 + $0x10] sm:$0xff] (!%p3295_p9) }
 0x2ad   : > { %v1768_v42 = vpop.f32.mrb[112].mxu0  ;;  %v2057_v44 = vpop.f32.mrb[112].mxu1 }
 0x2ae   : > { %v1770_v45 = vpop.f32.mrb[113].mxu0  ;;  %v2058_v46 = vadd.f32 %v2057_v44, %v1768_v42  ;;  %v2059_v47 = vpop.f32.mrb[113].mxu1  ;;  %v2223_v42 = vld [vmem:[#allocation2 + $0x18] sm:$0xff] (!%p3295_p9)  ;;  %v2293_v44 = vadd.f32 (!%p3295_p9), %v4821_v36, %v2222_v41 }
 0x2af   : > { %v1771_v48 = vpop.f32.mrb[114].mxu0  ;;  %v2060_v50 = vpop.f32.mrb[114].mxu1  ;;  %v2294_v45 = vadd.f32 (!%p3295_p9), %v4821_v36, %v2223_v42  ;;  %v2224_v47 = vld [vmem:[#allocation2 + $0x20] sm:$0xff] (!%p3295_p9) }
 0x2b0   : > { %v1773_v51 = vpop.f32.mrb[115].mxu0  ;;  %v2144_v52 = vadd.f32 %v2058_v46, %v478_v43  ;;  %v2061_v53 = vadd.f32 %v2060_v50, %v1771_v48  ;;  %v2062_v54 = vpop.f32.mrb[115].mxu1  ;;  %v2746_v43 = vmul.f32 (!%p3295_p9), %v2221_v35, %v2221_v35  ;;  %v2747_v46 = vmul.f32 (!%p3295_p9), %v2222_v41, %v2222_v41  ;;  %v2225_v50 = vld [vmem:[#allocation2 + $0x28] sm:$0xff] (!%p3295_p9) }
 0x2b1   : > { %v3436_v48 = vpack.c.bf16 (!%p3295_p9), %v2292_v38, %v2291_v37  ;;  %v2295_v51 = vadd.f32 (!%p3295_p9), %v4821_v36, %v2224_v47  ;;  %v2748_v54 = vmul.f32 (!%p3295_p9), %v2223_v42, %v2223_v42  ;;  %v4869_v38 = vld [vmem:[#allocation2 + $0x90] sm:$0xff] (!%p3295_p9) }
 0x2b2   : > { %2208 = vst [vmem:[#allocation2 + $0x1c0] sm:$0xff] %v2144_v52  ;;  %v2145_v55 = vadd.f32 %v2061_v53, %v479_v49  ;;  %v2676_v49 = vadd.f32 (!%p3295_p9), %v2675_v39, %v2222_v41  ;;  %v2809_v52 = vadd.f32 (!%p3295_p9), %v2746_v43, %v2745_v40  ;;  %v3441_v53 = vpack.c.bf16 (!%p3295_p9), %v2294_v45, %v2293_v44  ;;  %v4871_v39 = vld [vmem:[#allocation2 + $0x98] sm:$0xff] (!%p3295_p9) }
 0x2b3   : > { %3437 = vst [vmem:[%s4559_s16] sm:$0xff] (!%p3295_p9), %v3436_v48   ;;  %v2309_v41 = vadd.f32 (!%p3295_p9), %v4821_v36, %v4869_v38 }
 0x2b4   : > { %2209 = vst [vmem:[#allocation2 + $0x1c8] sm:$0xff] %v2145_v55  ;;  %v2296_v55 = vadd.f32 (!%p3295_p9), %v4821_v36, %v2225_v50  ;;  %3593 = vst [vmem:[%s4559_s16 + $0x8] sm:$0xff] (!%p3295_p9), %v3441_v53  }
 0x2b5   : > { %v1776_v56 = vpop.f32.mrb[116].mxu0  ;;  %v2065_v58 = vpop.f32.mrb[116].mxu1 }
 0x2b6   : > { %v1778_v59 = vpop.f32.mrb[117].mxu0  ;;  %v2066_v60 = vadd.f32 %v2065_v58, %v1776_v56  ;;  %v2067_v61 = vpop.f32.mrb[117].mxu1  ;;  %v2226_v56 = vld [vmem:[#allocation2 + $0x30] sm:$0xff] (!%p3295_p9)  ;;  %v2677_v58 = vadd.f32 (!%p3295_p9), %v2676_v49, %v2223_v42  ;;  %v2310_v42 = vadd.f32 (!%p3295_p9), %v4821_v36, %v4871_v39 }
 0x2b7   : > { %v1779_v62 = vpop.f32.mrb[118].mxu0  ;;  %v2068_v0 = vpop.f32.mrb[118].mxu1  ;;  %v2297_v59 = vadd.f32 (!%p3295_p9), %v4821_v36, %v2226_v56  ;;  %v2810_v61 = vadd.f32 (!%p3295_p9), %v2809_v52, %v2747_v46  ;;  %v4878_v46 = vld [vmem:[#allocation2 + $0xa0] sm:$0xff] (!%p3295_p9)  ;;  %v4886_v52 = vld [vmem:[#allocation2 + $0xb0] sm:$0xff] (!%p3295_p9) }
 0x2b8   : > { %v1781_v1 = vpop.f32.mrb[119].mxu0  ;;  %v2146_v2 = vadd.f32 %v2066_v60, %v480_v57  ;;  %v2069_v3 = vadd.f32 %v2068_v0, %v1779_v62  ;;  %v2070_v4 = vpop.f32.mrb[119].mxu1  ;;  %v2227_v57 = vld [vmem:[#allocation2 + $0x38] sm:$0xff] (!%p3295_p9)  ;;  %v3446_v62 = vpack.c.bf16 (!%p3295_p9), %v2296_v55, %v2295_v51  ;;  %v2228_v0 = vld [vmem:[#allocation2 + $0x40] sm:$0xff] (!%p3295_p9)  ;;  %v3481_v49 = vpack.c.bf16 (!%p3295_p9), %v2310_v42, %v2309_v41 }
 0x2b9   : > { %v2298_v60 = vadd.f32 (!%p3295_p9), %v4821_v36, %v2227_v57  ;;  %v2229_v1 = vld [vmem:[#allocation2 + $0x48] sm:$0xff] (!%p3295_p9)  ;;  %v2299_v4 = vadd.f32 (!%p3295_p9), %v4821_v36, %v2228_v0  ;;  %v2753_v34 = vmul.f32 (!%p3295_p9), %v2228_v0, %v2228_v0  ;;  %v4889_v55 = vld [vmem:[#allocation2 + $0xb8] sm:$0xff] (!%p3295_p9) }
 0x2ba   : > { %2210 = vst [vmem:[#allocation2 + $0x1d0] sm:$0xff] %v2146_v2  ;;  %v2147_v5 = vadd.f32 %v2069_v3, %v481_v63  ;;  %v2749_v63 = vmul.f32 (!%p3295_p9), %v2224_v47, %v2224_v47  ;;  %v2678_v2 = vadd.f32 (!%p3295_p9), %v2677_v58, %v2224_v47  ;;  %3594 = vst [vmem:[%s4559_s16 + $0x10] sm:$0xff] (!%p3295_p9), %v3446_v62   ;;  %v4880_v47 = vld [vmem:[#allocation2 + $0xa8] sm:$0xff] (!%p3295_p9) }
 0x2bb   : > { %v3451_v3 = vpack.c.bf16 (!%p3295_p9), %v2298_v60, %v2297_v59  ;;  %v2754_v44 = vmul.f32 (!%p3295_p9), %v2229_v1, %v2229_v1  ;;  %v2312_v51 = vadd.f32 (!%p3295_p9), %v4821_v36, %v4880_v47  ;;  %3601 = vst [vmem:[%s4559_s16 + $0x48] sm:$0xff] (!%p3295_p9), %v3481_v49   ;;  %v2314_v59 = vadd.f32 (!%p3295_p9), %v4821_v36, %v4889_v55  ;;  %v4896_v60 = vld [vmem:[#allocation2 + $0xc0] sm:$0xff] (!%p3295_p9) }
 0x2bc   : > { %2211 = vst [vmem:[#allocation2 + $0x1d8] sm:$0xff] %v2147_v5  ;;  %v2300_v5 = vadd.f32 (!%p3295_p9), %v4821_v36, %v2229_v1  ;;  %v4965_v49 = vld [vmem:[#allocation2 + $0x120] sm:$0xff] (!%p3295_p9) }
 0x2bd   : > { %v1784_v6 = vpop.f32.mrb[120].mxu0  ;;  %v2073_v8 = vpop.f32.mrb[120].mxu1  ;;  %3595 = vst [vmem:[%s4559_s16 + $0x18] sm:$0xff] (!%p3295_p9), %v3451_v3  }
 0x2be   : > { %v1786_v9 = vpop.f32.mrb[121].mxu0  ;;  %v2074_v10 = vadd.f32 %v2073_v8, %v1784_v6  ;;  %v2075_v11 = vpop.f32.mrb[121].mxu1  ;;  %v2230_v6 = vld [vmem:[#allocation2 + $0x50] sm:$0xff] (!%p3295_p9)  ;;  %v2750_v8 = vmul.f32 (!%p3295_p9), %v2225_v50, %v2225_v50 }
 0x2bf   : > { %v1787_v12 = vpop.f32.mrb[122].mxu0  ;;  %v2076_v14 = vpop.f32.mrb[122].mxu1  ;;  %v4836_v9 = vld [vmem:[#allocation2 + $0x58] sm:$0xff] (!%p3295_p9)  ;;  %v2679_v11 = vadd.f32 (!%p3295_p9), %v2678_v2, %v2225_v50  ;;  %v2311_v50 = vadd.f32 (!%p3295_p9), %v4821_v36, %v4878_v46 }
 0x2c0   : > { %v1789_v15 = vpop.f32.mrb[123].mxu0  ;;  %v2148_v16 = vadd.f32 %v2074_v10, %v482_v7  ;;  %v2077_v17 = vadd.f32 %v2076_v14, %v1787_v12  ;;  %v2078_v18 = vpop.f32.mrb[123].mxu1  ;;  %v2811_v7 = vadd.f32 (!%p3295_p9), %v2810_v61, %v2748_v54  ;;  %v2301_v10 = vadd.f32 (!%p3295_p9), %v4821_v36, %v2230_v6  ;;  %v4842_v14 = vld [vmem:[#allocation2 + $0x60] sm:$0xff] (!%p3295_p9)  ;;  %v4898_v61 = vld [vmem:[#allocation2 + $0xc8] sm:$0xff] (!%p3295_p9) }
 0x2c1   : > { %v3456_v12 = vpack.c.bf16 (!%p3295_p9), %v2300_v5, %v2299_v4  ;;  %v4844_v15 = vld [vmem:[#allocation2 + $0x68] sm:$0xff] (!%p3295_p9)  ;;  %v2303_v18 = vadd.f32 (!%p3295_p9), %v4821_v36, %v4842_v14  ;;  %v2755_v54 = vmul.f32 (!%p3295_p9), %v2230_v6, %v2230_v6  ;;  %v3486_v58 = vpack.c.bf16 (!%p3295_p9), %v2312_v51, %v2311_v50  ;;  %v4910_v5 = vld [vmem:[#allocation2 + $0xd0] sm:$0xff] (!%p3295_p9) }
 0x2c2   : > { %2212 = vst [vmem:[#allocation2 + $0x1e0] sm:$0xff] %v2148_v16  ;;  %v2149_v19 = vadd.f32 %v2077_v17, %v483_v13  ;;  %v2302_v13 = vadd.f32 (!%p3295_p9), %v4821_v36, %v4836_v9  ;;  %v2812_v16 = vadd.f32 (!%p3295_p9), %v2811_v7, %v2749_v63  ;;  %v2751_v17 = vmul.f32 (!%p3295_p9), %v2226_v56, %v2226_v56  ;;  %v4967_v50 = vld [vmem:[#allocation2 + $0x128] sm:$0xff] (!%p3295_p9) }
 0x2c3   : > { %3596 = vst [vmem:[%s4559_s16 + $0x20] sm:$0xff] (!%p3295_p9), %v3456_v12   ;;  %v2756_v63 = vmul.f32 (!%p3295_p9), %v4836_v9, %v4836_v9  ;;  %v2757_v3 = vmul.f32 (!%p3295_p9), %v4842_v14, %v4842_v14  ;;  %3602 = vst [vmem:[%s4559_s16 + $0x50] sm:$0xff] (!%p3295_p9), %v3486_v58   ;;  %v4918_v12 = vld [vmem:[#allocation2 + $0xe0] sm:$0xff] (!%p3295_p9) }
 0x2c4   : > { %2213 = vst [vmem:[#allocation2 + $0x1e8] sm:$0xff] %v2149_v19  ;;  %v2304_v19 = vadd.f32 (!%p3295_p9), %v4821_v36, %v4844_v15 }
 0x2c5   : > { %v1792_v20 = vpop.f32.mrb[124].mxu0  ;;  %v2081_v22 = vpop.f32.mrb[124].mxu1 }
 0x2c6   : > { %v1794_v23 = vpop.f32.mrb[125].mxu0  ;;  %v2082_v24 = vadd.f32 %v2081_v22, %v1792_v20  ;;  %v2083_v25 = vpop.f32.mrb[125].mxu1  ;;  %2219 = sbr.rel (%p3295_p9) target bundleno = 845 (0x34d), region = 52  ;;  %v2680_v20 = vadd.f32 (!%p3295_p9), %v2679_v11, %v2226_v56  ;;  %v3461_v22 = vpack.c.bf16 (!%p3295_p9), %v2302_v13, %v2301_v10  ;;  %v2313_v56 = vadd.f32 (!%p3295_p9), %v4821_v36, %v4886_v52  ;;  %v4922_v13 = vld [vmem:[#allocation2 + $0xe8] sm:$0xff] (!%p3295_p9) }
 0x2c7   : > { %v1795_v26 = vpop.f32.mrb[126].mxu0  ;;  %v2084_v28 = vpop.f32.mrb[126].mxu1  ;;  %v4851_v23 = vld [vmem:[#allocation2 + $0x70] sm:$0xff] (!%p3295_p9)  ;;  %v2813_v25 = vadd.f32 (!%p3295_p9), %v2812_v16, %v2750_v8  ;;  %v2317_v10 = vadd.f32 (!%p3295_p9), %v4821_v36, %v4910_v5  ;;  %v2319_v16 = vadd.f32 (!%p3295_p9), %v4821_v36, %v4918_v12 }
 0x2c8   : > { %v1797_v29 = vpop.f32.mrb[127].mxu0  ;;  %v2150_v30 = vadd.f32 %v2082_v24, %v484_v21  ;;  %v2085_v31 = vadd.f32 %v2084_v28, %v1795_v26  ;;  %v2086_v32 = vpop.f32.mrb[127].mxu1  ;;  %v2752_v21 = vmul.f32 (!%p3295_p9), %v2227_v57, %v2227_v57  ;;  %v4853_v24 = vld [vmem:[#allocation2 + $0x78] sm:$0xff] (!%p3295_p9)  ;;  %v3466_v26 = vpack.c.bf16 (!%p3295_p9), %v2304_v19, %v2303_v18  ;;  %3597 = vst [vmem:[%s4559_s16 + $0x28] sm:$0xff] (!%p3295_p9), %v3461_v22  }
 0x2c9   : > { %v2306_v28 = vadd.f32 (!%p3295_p9), %v4821_v36, %v4853_v24  ;;  %v4859_v29 = vld [vmem:[#allocation2 + $0x80] sm:$0xff] (!%p3295_p9)  ;;  %v3491_v4 = vpack.c.bf16 (!%p3295_p9), %v2314_v59, %v2313_v56  ;;  %v2758_v18 = vmul.f32 (!%p3295_p9), %v4844_v15, %v4844_v15  ;;  %v4933_v22 = vld [vmem:[#allocation2 + $0xf8] sm:$0xff] (!%p3295_p9)  ;;  %v2760_v42 = vmul.f32 (!%p3295_p9), %v4853_v24, %v4853_v24  ;;  %v4979_v59 = vld [vmem:[#allocation2 + $0x130] sm:$0xff] (!%p3295_p9) }
 0x2ca   : > { %2214 = vst [vmem:[#allocation2 + $0x1f0] sm:$0xff] %v2150_v30  ;;  %v2151_v33 = vadd.f32 %v2085_v31, %v485_v27  ;;  %v2305_v27 = vadd.f32 (!%p3295_p9), %v4821_v36, %v4851_v23  ;;  %v2681_v30 = vadd.f32 (!%p3295_p9), %v2680_v20, %v2227_v57  ;;  %v4862_v31 = vld [vmem:[#allocation2 + $0x88] sm:$0xff] (!%p3295_p9)  ;;  %v2307_v32 = vadd.f32 (!%p3295_p9), %v4821_v36, %v4859_v29 }
 0x2cb   : > { %3598 = vst [vmem:[%s4559_s16 + $0x30] sm:$0xff] (!%p3295_p9), %v3466_v26   ;;  %v2308_v37 = vadd.f32 (!%p3295_p9), %v4821_v36, %v4862_v31  ;;  %3603 = vst [vmem:[%s4559_s16 + $0x58] sm:$0xff] (!%p3295_p9), %v3491_v4   ;;  %v2320_v20 = vadd.f32 (!%p3295_p9), %v4821_v36, %v4922_v13  ;;  %v2322_v26 = vadd.f32 (!%p3295_p9), %v4821_v36, %v4933_v22  ;;  %v4991_v4 = vld [vmem:[#allocation2 + $0x148] sm:$0xff] (!%p3295_p9) }
 0x2cc   : > { %2215 = vst [vmem:[#allocation2 + $0x1f8] sm:$0xff] %v2151_v33  ;;  %v2814_v33 = vadd.f32 (!%p3295_p9), %v2813_v25, %v2751_v17  ;;  %v3471_v35 = vpack.c.bf16 (!%p3295_p9), %v2306_v28, %v2305_v27  ;;  %v2682_v40 = vadd.f32 (!%p3295_p9), %v2681_v30, %v2228_v0  ;;  %v2315_v0 = vadd.f32 (!%p3295_p9), %v4821_v36, %v4896_v60 }
 0x2cd   : > { %v3476_v45 = vpack.c.bf16 %v2308_v37, %v2307_v32  ;;  %v2759_v28 = vmul.f32 %v4851_v23, %v4851_v23  ;;  %v3506_v30 = vpack.c.bf16 %v2320_v20, %v2319_v16  ;;  %v4943_v32 = vld [vmem:[#allocation2 + $0x100] sm:$0xff]  ;;  %v5000_v16 = vld [vmem:[#allocation2 + $0x150] sm:$0xff] }
 0x2ce   : > { %v2815_v43 = vadd.f32 %v2814_v33, %v2752_v21  ;;  %3599 = vst [vmem:[%s4559_s16 + $0x38] sm:$0xff] %v3471_v35   ;;  %v2683_v48 = vadd.f32 %v2682_v40, %v2229_v1  ;;  %v2316_v1 = vadd.f32 %v4821_v36, %v4898_v61  ;;  %v4931_v21 = vld [vmem:[#allocation2 + $0xf0] sm:$0xff]  ;;  %v4945_v33 = vld [vmem:[#allocation2 + $0x108] sm:$0xff]  ;;  %v2323_v35 = vadd.f32 %v4821_v36, %v4943_v32 }
 0x2cf   : > { %3600 = vst [vmem:[%s4559_s16 + $0x40] sm:$0xff] %v3476_v45   ;;  %v2321_v25 = vadd.f32 %v4821_v36, %v4931_v21  ;;  %v2324_v37 = vadd.f32 %v4821_v36, %v4945_v33  ;;  %v4952_v40 = vld [vmem:[#allocation2 + $0x110] sm:$0xff]  ;;  %3606 = vst [vmem:[%s4559_s16 + $0x70] sm:$0xff] %v3506_v30  }
 0x2d0   : > { %v2816_v53 = vadd.f32 %v2815_v43, %v2753_v34  ;;  %v2684_v57 = vadd.f32 %v2683_v48, %v2230_v6  ;;  %v4912_v6 = vld [vmem:[#allocation2 + $0xd8] sm:$0xff]  ;;  %v3496_v8 = vpack.c.bf16 %v2316_v1, %v2315_v0  ;;  %v2329_v1 = vadd.f32 %v4821_v36, %v4979_v59 }
 0x2d1   : > { %v2318_v11 = vadd.f32 %v4821_v36, %v4912_v6  ;;  %v3511_v34 = vpack.c.bf16 %v2322_v26, %v2321_v25  ;;  %v4957_v43 = vld [vmem:[#allocation2 + $0x118] sm:$0xff]  ;;  %v3516_v45 = vpack.c.bf16 %v2324_v37, %v2323_v35  ;;  %v5012_v26 = vld [vmem:[#allocation2 + $0x160] sm:$0xff]  ;;  %v2765_v37 = vmul.f32 %v4878_v46, %v4878_v46 }
 0x2d2   : > { %v2817_v62 = vadd.f32 %v2816_v53, %v2754_v44  ;;  %v2685_v2 = vadd.f32 %v2684_v57, %v4836_v9  ;;  %3604 = vst [vmem:[%s4559_s16 + $0x60] sm:$0xff] %v3496_v8   ;;  %v2326_v48 = vadd.f32 %v4821_v36, %v4957_v43  ;;  %v2761_v53 = vmul.f32 %v4859_v29, %v4859_v29 }
 0x2d3   : > { %v3501_v19 = vpack.c.bf16 %v2318_v11, %v2317_v10  ;;  %3607 = vst [vmem:[%s4559_s16 + $0x78] sm:$0xff] %v3511_v34   ;;  %v2762_v57 = vmul.f32 %v4862_v31, %v4862_v31  ;;  %3608 = vst [vmem:[%s4559_s16 + $0x80] sm:$0xff] %v3516_v45   ;;  %v2763_v10 = vmul.f32 %v4869_v38, %v4869_v38  ;;  %v5021_v34 = vld [vmem:[#allocation2 + $0x170] sm:$0xff]  ;;  %v5034_v45 = vld [vmem:[#allocation2 + $0x180] sm:$0xff] }
 0x2d4   : > { %v2818_v7 = vadd.f32 %v2817_v62, %v2755_v54  ;;  %v2686_v9 = vadd.f32 %v2685_v2, %v4842_v14  ;;  %v2327_v54 = vadd.f32 %v4821_v36, %v4965_v49  ;;  %v4981_v62 = vld [vmem:[#allocation2 + $0x138] sm:$0xff]  ;;  %v2335_v30 = vadd.f32 %v4821_v36, %v5012_v26 }
 0x2d5   : > { %3605 = vst [vmem:[%s4559_s16 + $0x68] sm:$0xff] %v3501_v19   ;;  %v2330_v2 = vadd.f32 %v4821_v36, %v4981_v62 }
 0x2d6   : > { %v2819_v17 = vadd.f32 %v2818_v7, %v2756_v63  ;;  %v2687_v14 = vadd.f32 %v2686_v9, %v4844_v15  ;;  %v2332_v9 = vadd.f32 %v4821_v36, %v4991_v4 }
 0x2d7   : > { %v3531_v11 = vpack.c.bf16 %v2330_v2, %v2329_v1 }
 0x2d8   : > { %v2820_v27 = vadd.f32 %v2819_v17, %v2757_v3  ;;  %v2688_v15 = vadd.f32 %v2687_v14, %v4851_v23  ;;  %v2325_v23 = vadd.f32 %v4821_v36, %v4952_v40  ;;  %v4987_v3 = vld [vmem:[#allocation2 + $0x140] sm:$0xff]  ;;  %v5002_v17 = vld [vmem:[#allocation2 + $0x158] sm:$0xff]  ;;  %v2764_v14 = vmul.f32 %v4871_v39, %v4871_v39 }
 0x2d9   : > { %v2331_v7 = vadd.f32 %v4821_v36, %v4987_v3  ;;  %v2334_v19 = vadd.f32 %v4821_v36, %v5002_v17  ;;  %3611 = vst [vmem:[%s4559_s16 + $0x98] sm:$0xff] %v3531_v11  }
 0x2da   : > { %v2821_v41 = vadd.f32 %v2820_v27, %v2758_v18  ;;  %v2689_v44 = vadd.f32 %v2688_v15, %v4853_v24  ;;  %v2328_v24 = vadd.f32 %v4821_v36, %v4967_v50  ;;  %v3521_v58 = vpack.c.bf16 %v2326_v48, %v2325_v23  ;;  %v5014_v27 = vld [vmem:[#allocation2 + $0x168] sm:$0xff] }
 0x2db   : > { %v2333_v18 = vadd.f32 %v4821_v36, %v5000_v16  ;;  %v3536_v25 = vpack.c.bf16 %v2332_v9, %v2331_v7  ;;  %v2336_v15 = vadd.f32 %v4821_v36, %v5014_v27  ;;  %v5036_v48 = vld [vmem:[#allocation2 + $0x188] sm:$0xff]  ;;  %v5056_v7 = vld [vmem:[#allocation2 + $0x1a0] sm:$0xff]  ;;  %v2768_v9 = vmul.f32 %v4889_v55, %v4889_v55 }
 0x2dc   : > { %v2822_v51 = vadd.f32 %v2821_v41, %v2759_v28  ;;  %v2690_v56 = vadd.f32 %v2689_v44, %v4859_v29  ;;  %v3526_v0 = vpack.c.bf16 %v2328_v24, %v2327_v54  ;;  %3609 = vst [vmem:[%s4559_s16 + $0x88] sm:$0xff] %v3521_v58   ;;  %v5026_v41 = vld [vmem:[#allocation2 + $0x178] sm:$0xff]  ;;  %v2339_v54 = vadd.f32 %v4821_v36, %v5034_v45  ;;  %v5048_v58 = vld [vmem:[#allocation2 + $0x190] sm:$0xff] }
 0x2dd   : > { %v3541_v28 = vpack.c.bf16 %v2334_v19, %v2333_v18  ;;  %3612 = vst [vmem:[%s4559_s16 + $0xa0] sm:$0xff] %v3536_v25   ;;  %v3546_v23 = vpack.c.bf16 %v2336_v15, %v2335_v30  ;;  %v2338_v44 = vadd.f32 %v4821_v36, %v5026_v41  ;;  %v2341_v2 = vadd.f32 %v4821_v36, %v5048_v58  ;;  %v5069_v19 = vld [vmem:[#allocation2 + $0x1b0] sm:$0xff]  ;;  %v5081_v15 = vld [vmem:[#allocation2 + $0x1c0] sm:$0xff] }
 0x2de   : > { %v2823_v63 = vadd.f32 %v2822_v51, %v2760_v42  ;;  %v2691_v29 = vadd.f32 %v2690_v56, %v4862_v31  ;;  %3610 = vst [vmem:[%s4559_s16 + $0x90] sm:$0xff] %v3526_v0   ;;  %v2767_v56 = vmul.f32 %v4886_v52, %v4886_v52 }
 0x2df   : > { %3613 = vst [vmem:[%s4559_s16 + $0xa8] sm:$0xff] %v3541_v28   ;;  %3614 = vst [vmem:[%s4559_s16 + $0xb0] sm:$0xff] %v3546_v23   ;;  %v2769_v28 = vmul.f32 %v4896_v60, %v4896_v60  ;;  %v5090_v23 = vld [vmem:[#allocation2 + $0x1d0] sm:$0xff] }
 0x2e0   : > { %v2824_v8 = vadd.f32 %v2823_v63, %v2761_v53  ;;  %v2692_v31 = vadd.f32 %v2691_v29, %v4869_v38  ;;  %v2766_v53 = vmul.f32 %v4880_v47, %v4880_v47  ;;  %v5050_v63 = vld [vmem:[#allocation2 + $0x198] sm:$0xff] }
 0x2e1   : > { %v2342_v29 = vadd.f32 %v4821_v36, %v5050_v63 }
 0x2e2   : > { %v2825_v20 = vadd.f32 %v2824_v8, %v2762_v57  ;;  %v2693_v38 = vadd.f32 %v2692_v31, %v4871_v39  ;;  %v2337_v39 = vadd.f32 %v4821_v36, %v5021_v34  ;;  %v5060_v8 = vld [vmem:[#allocation2 + $0x1a8] sm:$0xff] }
 0x2e3   : > { %v3561_v31 = vpack.c.bf16 %v2342_v29, %v2341_v2  ;;  %v2344_v18 = vadd.f32 %v4821_v36, %v5060_v8 }
 0x2e4   : > { %v2826_v35 = vadd.f32 %v2825_v20, %v2763_v10  ;;  %v2694_v42 = vadd.f32 %v2693_v38, %v4878_v46  ;;  %v2340_v46 = vadd.f32 %v4821_v36, %v5036_v48  ;;  %v3551_v57 = vpack.c.bf16 %v2338_v44, %v2337_v39  ;;  %v5071_v20 = vld [vmem:[#allocation2 + $0x1b8] sm:$0xff] }
 0x2e5   : > { %v2343_v10 = vadd.f32 %v4821_v36, %v5056_v7  ;;  %v2346_v25 = vadd.f32 %v4821_v36, %v5071_v20  ;;  %3617 = vst [vmem:[%s4559_s16 + $0xc8] sm:$0xff] %v3561_v31   ;;  %v2347_v39 = vadd.f32 %v4821_v36, %v5081_v15 }
 0x2e6   : > { %v2827_v51 = vadd.f32 %v2826_v35, %v2764_v14  ;;  %v2695_v24 = vadd.f32 %v2694_v42, %v4880_v47  ;;  %v3556_v1 = vpack.c.bf16 %v2340_v46, %v2339_v54  ;;  %3615 = vst [vmem:[%s4559_s16 + $0xb8] sm:$0xff] %v3551_v57   ;;  %v2345_v14 = vadd.f32 %v4821_v36, %v5069_v19  ;;  %v5083_v35 = vld [vmem:[#allocation2 + $0x1c8] sm:$0xff] }
 0x2e7   : > { %v3566_v30 = vpack.c.bf16 %v2344_v18, %v2343_v10  ;;  %v2348_v42 = vadd.f32 %v4821_v36, %v5083_v35  ;;  %v5105_v57 = vld [vmem:[#allocation2 + $0x1e8] sm:$0xff] }
 0x2e8   : > { %v2828_v0 = vadd.f32 %v2827_v51, %v2765_v37  ;;  %v2696_v47 = vadd.f32 %v2695_v24, %v4886_v52  ;;  %3616 = vst [vmem:[%s4559_s16 + $0xc0] sm:$0xff] %v3556_v1   ;;  %v3571_v37 = vpack.c.bf16 %v2346_v25, %v2345_v14  ;;  %v2770_v51 = vmul.f32 %v4898_v61, %v4898_v61 }
 0x2e9   : > { %3618 = vst [vmem:[%s4559_s16 + $0xd0] sm:$0xff] %v3566_v30   ;;  %v3576_v46 = vpack.c.bf16 %v2348_v42, %v2347_v39  ;;  %v2771_v1 = vmul.f32 %v4910_v5, %v4910_v5 }
 0x2ea   : > { %v2829_v11 = vadd.f32 %v2828_v0, %v2766_v53  ;;  %v2697_v52 = vadd.f32 %v2696_v47, %v4889_v55  ;;  %v5095_v53 = vld [vmem:[#allocation2 + $0x1d8] sm:$0xff]  ;;  %3619 = vst [vmem:[%s4559_s16 + $0xd8] sm:$0xff] %v3571_v37   ;;  %v2772_v47 = vmul.f32 %v4912_v6, %v4912_v6  ;;  %v2774_v37 = vmul.f32 %v4922_v13, %v4922_v13 }
 0x2eb   : > { %v2350_v24 = vadd.f32 %v4821_v36, %v5095_v53  ;;  %3620 = vst [vmem:[%s4559_s16 + $0xe0] sm:$0xff] %v3576_v46  }
 0x2ec   : > { %v2830_v38 = vadd.f32 %v2829_v11, %v2767_v56  ;;  %v2698_v55 = vadd.f32 %v2697_v52, %v4896_v60  ;;  %v2349_v60 = vadd.f32 %v4821_v36, %v5090_v23  ;;  %v5103_v56 = vld [vmem:[#allocation2 + $0x1e0] sm:$0xff]  ;;  %v5117_v11 = vld [vmem:[#allocation2 + $0x1f0] sm:$0xff] }
 0x2ed   : > { %v2351_v2 = vadd.f32 %v4821_v36, %v5103_v56  ;;  %v2353_v52 = vadd.f32 %v4821_v36, %v5117_v11 }
 0x2ee   : > { %v2831_v44 = vadd.f32 %v2830_v38, %v2768_v9  ;;  %v2699_v54 = vadd.f32 %v2698_v55, %v4898_v61  ;;  %v2352_v61 = vadd.f32 %v4821_v36, %v5105_v57  ;;  %v3581_v10 = vpack.c.bf16 %v2350_v24, %v2349_v60  ;;  %v5119_v9 = vld [vmem:[#allocation2 + $0x1f8] sm:$0xff] }
 0x2ef   : > { %v2354_v14 = vadd.f32 %v4821_v36, %v5119_v9  ;;  %v2773_v38 = vmul.f32 %v4918_v12, %v4918_v12  ;;  %v2775_v36 = vmul.f32 %v4931_v21, %v4931_v21 }
 0x2f0   : > { %v2832_v0 = vadd.f32 %v2831_v44, %v2769_v28  ;;  %v2700_v29 = vadd.f32 %v2699_v54, %v4910_v5  ;;  %v3586_v18 = vpack.c.bf16 %v2352_v61, %v2351_v2  ;;  %3621 = vst [vmem:[%s4559_s16 + $0xe8] sm:$0xff] %v3581_v10   ;;  %v2777_v54 = vmul.f32 %v4943_v32, %v4943_v32 }
 0x2f1   : > { %v3591_v28 = vpack.c.bf16 %v2354_v14, %v2353_v52 }
 0x2f2   : > { %v2833_v31 = vadd.f32 %v2832_v0, %v2770_v51  ;;  %v2701_v5 = vadd.f32 %v2700_v29, %v4912_v6  ;;  %3622 = vst [vmem:[%s4559_s16 + $0xf0] sm:$0xff] %v3586_v18   ;;  %v2776_v51 = vmul.f32 %v4933_v22, %v4933_v22 }
 0x2f3   : > { %3623 = vst [vmem:[%s4559_s16 + $0xf8] sm:$0xff] %v3591_v28  }
 0x2f4   : > { %v2834_v25 = vadd.f32 %v2833_v31, %v2771_v1  ;;  %v2702_v30 = vadd.f32 %v2701_v5, %v4918_v12 }
 0x2f6   : > { %v2835_v55 = vadd.f32 %v2834_v25, %v2772_v47  ;;  %v2703_v39 = vadd.f32 %v2702_v30, %v4922_v13  ;;  %v2778_v13 = vmul.f32 %v4945_v33, %v4945_v33 }
 0x2f8   : > { %v2836_v42 = vadd.f32 %v2835_v55, %v2773_v38  ;;  %v2704_v6 = vadd.f32 %v2703_v39, %v4931_v21  ;;  %v2779_v21 = vmul.f32 %v4952_v40, %v4952_v40 }
 0x2fa   : > { %v2837_v44 = vadd.f32 %v2836_v42, %v2774_v37  ;;  %v2705_v60 = vadd.f32 %v2704_v6, %v4933_v22  ;;  %v2780_v22 = vmul.f32 %v4957_v43, %v4957_v43 }
 0x2fc   : > { %v2838_v12 = vadd.f32 %v2837_v44, %v2775_v36  ;;  %v2706_v46 = vadd.f32 %v2705_v60, %v4943_v32  ;;  %v2781_v32 = vmul.f32 %v4965_v49, %v4965_v49 }
 0x2fe   : > { %v2839_v24 = vadd.f32 %v2838_v12, %v2776_v51  ;;  %v2707_v0 = vadd.f32 %v2706_v46, %v4945_v33  ;;  %v2782_v33 = vmul.f32 %v4967_v50, %v4967_v50 }
 0x300   : > { %v2840_v1 = vadd.f32 %v2839_v24, %v2777_v54  ;;  %v2708_v2 = vadd.f32 %v2707_v0, %v4952_v40  ;;  %v2783_v40 = vmul.f32 %v4979_v59, %v4979_v59 }
 0x302   : > { %v2841_v61 = vadd.f32 %v2840_v1, %v2778_v13  ;;  %v2709_v29 = vadd.f32 %v2708_v2, %v4957_v43  ;;  %v2784_v43 = vmul.f32 %v4981_v62, %v4981_v62 }
 0x304   : > { %v2842_v47 = vadd.f32 %v2841_v61, %v2779_v21  ;;  %v2710_v10 = vadd.f32 %v2709_v29, %v4965_v49  ;;  %v2785_v49 = vmul.f32 %v4987_v3, %v4987_v3 }
 0x306   : > { %v2843_v31 = vadd.f32 %v2842_v47, %v2780_v22  ;;  %v2711_v18 = vadd.f32 %v2710_v10, %v4967_v50  ;;  %v2786_v50 = vmul.f32 %v4991_v4, %v4991_v4 }
 0x308   : > { %v2844_v52 = vadd.f32 %v2843_v31, %v2781_v32  ;;  %v2712_v14 = vadd.f32 %v2711_v18, %v4979_v59  ;;  %v2787_v59 = vmul.f32 %v5000_v16, %v5000_v16 }
 0x30a   : > { %v2845_v5 = vadd.f32 %v2844_v52, %v2782_v33  ;;  %v2713_v25 = vadd.f32 %v2712_v14, %v4981_v62  ;;  %v2788_v62 = vmul.f32 %v5002_v17, %v5002_v17 }
 0x30c   : > { %v2846_v38 = vadd.f32 %v2845_v5, %v2783_v40  ;;  %v2714_v28 = vadd.f32 %v2713_v25, %v4987_v3  ;;  %v2789_v3 = vmul.f32 %v5012_v26, %v5012_v26 }
 0x30e   : > { %v2847_v30 = vadd.f32 %v2846_v38, %v2784_v43  ;;  %v2715_v55 = vadd.f32 %v2714_v28, %v4991_v4  ;;  %v2790_v4 = vmul.f32 %v5014_v27, %v5014_v27 }
 0x310   : > { %v2848_v37 = vadd.f32 %v2847_v30, %v2785_v49  ;;  %v2716_v39 = vadd.f32 %v2715_v55, %v5000_v16  ;;  %v2791_v16 = vmul.f32 %v5021_v34, %v5021_v34 }
 0x312   : > { %v2849_v42 = vadd.f32 %v2848_v37, %v2786_v50  ;;  %v2717_v36 = vadd.f32 %v2716_v39, %v5002_v17  ;;  %v2792_v17 = vmul.f32 %v5026_v41, %v5026_v41 }
 0x314   : > { %v2850_v6 = vadd.f32 %v2849_v42, %v2787_v59  ;;  %v2718_v44 = vadd.f32 %v2717_v36, %v5012_v26  ;;  %v2793_v26 = vmul.f32 %v5034_v45, %v5034_v45 }
 0x316   : > { %v2851_v51 = vadd.f32 %v2850_v6, %v2788_v62  ;;  %v2719_v60 = vadd.f32 %v2718_v44, %v5014_v27  ;;  %v2794_v27 = vmul.f32 %v5036_v48, %v5036_v48 }
 0x318   : > { %v2852_v12 = vadd.f32 %v2851_v51, %v2789_v3  ;;  %v2720_v54 = vadd.f32 %v2719_v60, %v5021_v34  ;;  %v2795_v34 = vmul.f32 %v5048_v58, %v5048_v58 }
 0x31a   : > { %v2853_v46 = vadd.f32 %v2852_v12, %v2790_v4  ;;  %v2721_v24 = vadd.f32 %v2720_v54, %v5026_v41  ;;  %v2796_v41 = vmul.f32 %v5050_v63, %v5050_v63 }
 0x31c   : > { %v2854_v13 = vadd.f32 %v2853_v46, %v2791_v16  ;;  %v2722_v0 = vadd.f32 %v2721_v24, %v5034_v45  ;;  %v2797_v45 = vmul.f32 %v5056_v7, %v5056_v7 }
 0x31e   : > { %v2855_v1 = vadd.f32 %v2854_v13, %v2792_v17  ;;  %v2723_v21 = vadd.f32 %v2722_v0, %v5036_v48  ;;  %v2798_v48 = vmul.f32 %v5060_v8, %v5060_v8 }
 0x320   : > { %v2856_v2 = vadd.f32 %v2855_v1, %v2793_v26  ;;  %v2724_v61 = vadd.f32 %v2723_v21, %v5048_v58  ;;  %v2799_v58 = vmul.f32 %v5069_v19, %v5069_v19 }
 0x322   : > { %v2857_v22 = vadd.f32 %v2856_v2, %v2794_v27  ;;  %v2725_v29 = vadd.f32 %v2724_v61, %v5050_v63  ;;  %v2800_v63 = vmul.f32 %v5071_v20, %v5071_v20 }
 0x324   : > { %v2858_v47 = vadd.f32 %v2857_v22, %v2795_v34  ;;  %v2726_v32 = vadd.f32 %v2725_v29, %v5056_v7  ;;  %v2801_v7 = vmul.f32 %v5081_v15, %v5081_v15 }
 0x326   : > { %v2859_v10 = vadd.f32 %v2858_v47, %v2796_v41  ;;  %v2727_v31 = vadd.f32 %v2726_v32, %v5060_v8  ;;  %v2802_v8 = vmul.f32 %v5083_v35, %v5083_v35 }
 0x328   : > { %v2860_v33 = vadd.f32 %v2859_v10, %v2797_v45  ;;  %v2728_v18 = vadd.f32 %v2727_v31, %v5069_v19  ;;  %v2803_v19 = vmul.f32 %v5090_v23, %v5090_v23 }
 0x32a   : > { %v2861_v52 = vadd.f32 %v2860_v33, %v2798_v48  ;;  %v2729_v40 = vadd.f32 %v2728_v18, %v5071_v20  ;;  %v2804_v20 = vmul.f32 %v5095_v53, %v5095_v53 }
 0x32c   : > { %v2862_v14 = vadd.f32 %v2861_v52, %v2799_v58  ;;  %v2730_v5 = vadd.f32 %v2729_v40, %v5081_v15  ;;  %v2805_v15 = vmul.f32 %v5103_v56, %v5103_v56 }
 0x32e   : > { %v2863_v43 = vadd.f32 %v2862_v14, %v2800_v63  ;;  %v2731_v25 = vadd.f32 %v2730_v5, %v5083_v35  ;;  %v2806_v35 = vmul.f32 %v5105_v57, %v5105_v57 }
 0x330   : > { %v2864_v38 = vadd.f32 %v2863_v43, %v2801_v7  ;;  %v2732_v49 = vadd.f32 %v2731_v25, %v5090_v23  ;;  %v2807_v23 = vmul.f32 %v5117_v11, %v5117_v11 }
 0x332   : > { %v2865_v28 = vadd.f32 %v2864_v38, %v2802_v8  ;;  %v2733_v30 = vadd.f32 %v2732_v49, %v5095_v53  ;;  %v2808_v53 = vmul.f32 %v5119_v9, %v5119_v9 }
 0x334   : > { %v2866_v50 = vadd.f32 %v2865_v28, %v2803_v19  ;;  %v2734_v55 = vadd.f32 %v2733_v30, %v5103_v56 }
 0x336   : > { %v2867_v37 = vadd.f32 %v2866_v50, %v2804_v20  ;;  %v2735_v59 = vadd.f32 %v2734_v55, %v5105_v57 }
 0x338   : > { %v2868_v39 = vadd.f32 %v2867_v37, %v2805_v15  ;;  %v2736_v42 = vadd.f32 %v2735_v59, %v5117_v11 }
 0x33a   : > { %v2869_v62 = vadd.f32 %v2868_v39, %v2806_v35  ;;  %v2737_v36 = vadd.f32 %v2736_v42, %v5119_v9 }
 0x33c   : > { %v2870_v56 = vadd.f32 %v2869_v62, %v2807_v23  ;;  %v2738_v6 = vrot.slane %v2737_v36, 4 }
 0x33e   : > { %v2871_v3 = vadd.f32 %v2870_v56, %v2808_v53  ;;  %v2739_v44 = vadd.f32 %v2738_v6, %v2737_v36 }
 0x340   : > { %v2872_v51 = vrot.slane %v2871_v3, 4  ;;  %v2740_v57 = vrot.slane %v2739_v44, 2 }
 0x342   : > { %v2873_v4 = vadd.f32 %v2872_v51, %v2871_v3  ;;  %v2741_v60 = vadd.f32 %v2740_v57, %v2739_v44 }
 0x344   : > { %v2874_v12 = vrot.slane %v2873_v4, 2  ;;  %v2742_v16 = vrot.slane %v2741_v60, 1 }
 0x346   : > { %v2875_v54 = vadd.f32 %v2874_v12, %v2873_v4  ;;  %v2743_v11 = vadd.f32 %v2742_v16, %v2741_v60 }
 0x348   : > { %v2876_v46 = vrot.slane %v2875_v54, 1  ;;  %2744 = vst [vmem:[%s342_s14] sm:$0x1] %v2743_v11 }
 0x34a   : > { %v2877_v17 = vadd.f32 %v2876_v46, %v2875_v54 }
 0x34c   : > { %2878 = vst [vmem:[%s348_s0] sm:$0x1] %v2877_v17 }
 0x34d PF: > { %s3364_s24 = sshll.u32 %s4251_s25, 4  ;;  %s5421_s4 = sld [smem:[#allocation29_spill]] }
 0x34e   : > { %s2920_s20 = sshll.u32 %s342_s14, 4  ;;  %s5253_s18 = scalar_lea.sflag [#allocation11], %s301_s30  ;;  %s2921_s20 = int_to_ptr.vmem [resolvable:$true] %s2920_s20 }
 0x34f   : > { %s4073_s17 = scalar_lea.vmem %s2921_s20, 16  ;;  %p5422_p4 = scmp.ne.s32.totalorder %s5405_s15, 0 }
 0x350   : > { %p4074_p6 = scmp.ne.s32.totalorder %s2921_s20, %s4073_s17  ;;  %s4275_s13 = smov [#allocation10]  }
 0x351   : > { %s4077_s21 = sshll.u32 %s4275_s13, 4  ;;  %s4078_s21 = int_to_ptr.vmem [resolvable:$false] %s4077_s21 }
 0x352   : > { %p4075_p10 = pnand %p4074_p6, %p5422_p4  ;;  %s4079_s6 = scalar_lea.vmem %s4078_s21, 32 }
 0x353   : > { %s5247_s23 = scalar_lea.hbm %s5421_s4, %s3364_s24  ;;  %p4080_p5 = scmp.lt.s32.totalorder %s2921_s20, %s4078_s21 }
 0x354   : > { %p4076_p11 = pneg %p4075_p10  ;;  %p4081_p13 = scmp.lt.s32.totalorder %s4079_s6, %s4073_s17 }
 0x356   : > { %p4082_p1 = por %p4081_p13, %p4080_p5 }
 0x358   : > { %p4083_p2 = pnand %p4082_p1, %p4076_p11 }
 0x35a   : > { %4086 = shalt.err (!%p4083_p2)
}
 0x35b   : > { %s4087_s29 = scalar_lea.hbm %s5247_s23, 16  ;;  %s4091_s30 = scalar_lea.hbm %s5421_s4, 64 }
 0x35c   : > { %p4088_p12 = scmp.ne.s32.totalorder %s5247_s23, %s4087_s29  ;;  %p4092_p3 = scmp.lt.u32.totalorder %s5247_s23, %s5421_s4 }
 0x35d   : > { %p4093_p8 = scmp.lt.u32.totalorder %s4091_s30, %s4087_s29  ;;  %p4095_p6 = scmp.lt.u32.totalorder %s4087_s29, %s5247_s23 }
 0x35e   : > { %p4089_p0 = pnand %p4088_p12, %p5422_p4 }
 0x35f   : > { %p4094_p9 = por %p4093_p8, %p4092_p3 }
 0x360   : > { %p4090_p7 = pneg %p4089_p0 }
 0x361   : > { %p4096_p10 = por %p4095_p6, %p4094_p9 }
 0x363   : > { %p4097_p11 = pnand %p4096_p10, %p4090_p7 }
 0x365   : > { %4100 = shalt.err (!%p4097_p11)
}
 0x366   : > { %3633 = dma.vmem_to_hbm [thread:$0]  (%p5422_p4), %s2921_s20, 16, %s5247_s23, %s5253_s18  }
 0x367   : > { %s3432_s11 = sshll.u32 %s4251_s25, 12  ;;  %s2903_s10 = sshll.u32 %s4559_s16, 4  ;;  %s5280_s10 = int_to_ptr.vmem [resolvable:$true] %s2903_s10 }
 0x368   : > { %s5423_s2 = sld [smem:[#allocation28_spill]]  ;;  %s2880_s13 = scalar_lea.sflag [#allocation5], %s4556_s5 }
 0x369   : > { %s4101_s21 = scalar_lea.vmem %s5280_s10, 4096  ;;  %s4276_s6 = smov [#allocation9]  }
 0x36a   : > { %p4102_p5 = scmp.ne.s32.totalorder %s5280_s10, %s4101_s21  ;;  %s4105_s23 = sshll.u32 %s4276_s6, 4  ;;  %s4106_s23 = int_to_ptr.vmem [resolvable:$false] %s4105_s23 }
 0x36b   : > { %s4107_s16 = scalar_lea.vmem %s4106_s23, 8192  ;;  %p4108_p2 = scmp.lt.s32.totalorder %s5280_s10, %s4106_s23 }
 0x36c   : > { %p4103_p13 = pnand %p4102_p5, %p5422_p4  ;;  %p4109_p12 = scmp.lt.s32.totalorder %s4107_s16, %s4101_s21 }
 0x36e   : > { %s5278_s17 = scalar_lea.hbm %s5423_s2, %s3432_s11  ;;  %p4104_p1 = pneg %p4103_p13 }
 0x36f   : > { %p4110_p0 = por %p4109_p12, %p4108_p2 }
 0x371   : > { %p4111_p7 = pnand %p4110_p0, %p4104_p1 }
 0x373   : > { %4114 = shalt.err (!%p4111_p7)
}
 0x374   : > { %s4115_s20 = scalar_lea.hbm %s5278_s17, 4096  ;;  %s4119_s8 = scalar_lea.hbm %s5423_s2, 16384 }
 0x375   : > { %p4116_p3 = scmp.ne.s32.totalorder %s5278_s17, %s4115_s20  ;;  %p4120_p6 = scmp.lt.u32.totalorder %s5278_s17, %s5423_s2 }
 0x376   : > { %p4121_p10 = scmp.lt.u32.totalorder %s4119_s8, %s4115_s20  ;;  %p4123_p5 = scmp.lt.u32.totalorder %s4115_s20, %s5278_s17 }
 0x377   : > { %p4117_p8 = pnand %p4116_p3, %p5422_p4 }
 0x378   : > { %p4122_p11 = por %p4121_p10, %p4120_p6 }
 0x379   : > { %p4118_p9 = pneg %p4117_p8 }
 0x37a   : > { %p4124_p13 = por %p4123_p5, %p4122_p11 }
 0x37c   : > { %p4125_p1 = pnand %p4124_p13, %p4118_p9 }
 0x37e   : > { %4128 = shalt.err (!%p4125_p1)
}
 0x37f   : > { %s4277_s9 = smov 64   ;;  %s4278_s11 = smov 4  }
 0x380   : > { %3632 = dma.vmem_to_hbm [thread:$0]  (%p5422_p4), %s5280_s10, 4096, %s5278_s17, %s2880_s13, %s4277_s9, %s4277_s9, %s4278_s11  }
 0x381   : > { %s5424_s21 = sld [smem:[#allocation30_spill]]  ;;  %s2934_s16 = sshll.u32 %s348_s0, 4  ;;  %s2935_s16 = int_to_ptr.vmem [resolvable:$true] %s2934_s16 }
 0x382   : > { %s4129_s20 = scalar_lea.vmem %s2935_s16, 16  ;;  %s4279_s29 = smov [#allocation12]  }
 0x383   : > { %p4130_p2 = scmp.ne.s32.totalorder %s2935_s16, %s4129_s20  ;;  %s4133_s7 = sshll.u32 %s4279_s29, 4  ;;  %s4134_s7 = int_to_ptr.vmem [resolvable:$false] %s4133_s7 }
 0x384   : > { %s4135_s8 = scalar_lea.vmem %s4134_s7, 32  ;;  %p4136_p7 = scmp.lt.s32.totalorder %s2935_s16, %s4134_s7 }
 0x385   : > { %p4131_p12 = pnand %p4130_p2, %p5422_p4  ;;  %p4137_p3 = scmp.lt.s32.totalorder %s4135_s8, %s4129_s20 }
 0x387   : > { %s5425_s6 = smov %s5424_s21  ;;  %s5311_s23 = scalar_lea.hbm %s5424_s21, %s3364_s24 }
 0x388   : > { %p4132_p0 = pneg %p4131_p12  ;;  %p4138_p8 = por %p4137_p3, %p4136_p7 }
 0x38a   : > { %p4139_p9 = pnand %p4138_p8, %p4132_p0 }
 0x38c   : > { %4142 = shalt.err (!%p4139_p9)
}
 0x38d   : > { %s4143_s25 = scalar_lea.hbm %s5311_s23, 16  ;;  %s4147_s24 = scalar_lea.hbm %s5425_s6, 64 }
 0x38e   : > { %p4144_p6 = scmp.ne.s32.totalorder %s5311_s23, %s4143_s25  ;;  %p4148_p5 = scmp.lt.u32.totalorder %s5311_s23, %s5425_s6 }
 0x38f   : > { %p4149_p13 = scmp.lt.u32.totalorder %s4147_s24, %s4143_s25  ;;  %p4151_p2 = scmp.lt.u32.totalorder %s4143_s25, %s5311_s23 }
 0x390   : > { %p4145_p10 = pnand %p4144_p6, %p5422_p4 }
 0x391   : > { %p4150_p1 = por %p4149_p13, %p4148_p5 }
 0x392   : > { %p4146_p11 = pneg %p4145_p10 }
 0x393   : > { %p4152_p12 = por %p4151_p2, %p4150_p1 }
 0x395   : > { %p4153_p0 = pnand %p4152_p12, %p4146_p11 }
 0x397   : > { %4156 = shalt.err (!%p4153_p0)
}
 0x398   : > { %3634 = dma.vmem_to_hbm [thread:$0]  (%p5422_p4), %s2935_s16, 16, %s5311_s23, %s5253_s18  }
 0x399 PF: > { %s5426_s13 = sld [smem:[#allocation18_spill]]  ;;  %s5427_s30 = sld [smem:[#allocation25_spill]] }
 0x39a   : > { %p3662_p7 = scmp.ge.s32.totalorder %s4263_s28, 2 }
 0x39f   : > { %s2946_s3 = sand.u32 1, %s5426_s13   ;;  %p5428_p3 = scmp.ne.s32.totalorder %s5427_s30, 0 }
 0x3a0   : > { %s2947_s9 = scalar_lea.sflag [#allocation5], %s2946_s3 }
 0x3a1   : > { %p3650_p8 = pnand %p3662_p7, %p5428_p3 }
 0x3a3   : > { %4214 = dma.done.wait (!%p3650_p8), %s2947_s9, 4096  }
 0x3a4   : > { %4216 = vsyncadd (!%p3650_p8), %s2947_s9, 4294963200  ;;  %s5429_s11 = sadd.s32 4294967294, %s4263_s28  }
 0x3a5   : > { %s2955_s14 = sand.u32 1, %s5429_s11  }
 0x3a6   : > { %s2956_s12 = scalar_lea.sflag [#allocation11], %s2955_s14 }
 0x3a7   : > { %4218 = dma.done.wait (!%p3650_p8), %s2956_s12, 32  }
 0x3a8   : > { %4220 = vsyncadd (!%p3650_p8), %s2956_s12, 4294967264  ;;  %s28_s28 = sadd.s32 1, %s4263_s28   ;;  %s5430_s15 = sld [smem:[#allocation19_spill]] }
 0x3a9   : > { %p25_p4 = scmp.ge.s32.totalorder %s28_s28, 10   ;;  %s5431_s20 = sld [smem:[#allocation23_spill]] }
 0x3aa   : > { %s5432_s23 = sld [smem:[#allocation20_spill]]  ;;  %s5433_s16 = sld [smem:[#allocation24_spill]] }
 0x3ab   : > { %s5434_s29 = sld [smem:[#allocation21_spill]]  ;;  %s5435_s7 = sld [smem:[#allocation22_spill]] }
 0x3ac   : > { %s5436_s18 = smov %s4227_s19  ;;  %s5438_s21 = smov %s4239_s22 }
 0x3ad   : > { %s5441_s24 = smov %s4255_s26  ;;  %s5442_s25 = smov %s4259_s27 }
 0x3ae   : > { %s5437_s19 = smov %s5430_s15  ;;  %27 = sbr.rel (!%p25_p4) target bundleno = 19 (0x13), region = 134 }
 0x3b0   : > { %s5439_s22 = smov %s5432_s23  ;;  %s5440_s23 = smov %s5433_s16 }
 0x3b1   : > { %s5443_s26 = smov %s5434_s29  ;;  %s5444_s27 = smov %s5435_s7 }
 0x3b5   :  { %2968 = vsyncpa [#allocation4], 1 }
 0x3b6   :  { %2970 = vsyncpa [#allocation4 + $0x1], 1 }
 0x3b7   :  { %2971 = vsyncpa [#allocation7], 1 }
 0x3b8   :  { %2973 = vsyncpa [#allocation7 + $0x1], 1 }
 0x3b9   :  { %2974 = vsyncpa [#allocation5], 1 }
 0x3ba   :  { %2976 = vsyncpa [#allocation5 + $0x1], 1 }
 0x3bb   :  { %2977 = vsyncpa [#allocation11], 1 }
 0x3bc   :  { %2979 = vsyncpa [#allocation11 + $0x1], 1 }

// kernel: fwd.6
= control target key start
LH: loop header
LB: loop body
LE: loop exit
PB: predicated region body
PF: predicated region fallthrough
CT: control target
= control target key end

     0   :  { %8 = vsyncpa [#allocation3], 0  ;;  %s3488_s0 = inlined_call_operand.hbm [shape: bf16[2048,128], index: 0, kind: input, shape index: {}]   ;;  %s3489_s1 = inlined_call_operand.hbm [shape: f32[1,128], index: 1, kind: input, shape index: {}]   ;;  %s3490_s2 = inlined_call_operand.hbm [shape: f32[1,128], index: 2, kind: input, shape index: {}]   ;;  %s3491_s3 = inlined_call_operand.hbm [shape: bf16[2048,128], index: 3, kind: output, shape index: {}]  }
   0x1   :  { %10 = vsyncpa [#allocation3 + $0x1], 0 }
   0x2   :  { %11 = vsyncpa [#allocation6], 0 }
   0x3   :  { %12 = vsyncpa [#allocation4], 0 }
   0x4   :  { %14 = vsyncpa [#allocation4 + $0x1], 0  ;;  %s2855_s12 = smov 0   ;;  %s2857_s13 = smov 0  }
   0x5   :  { %s2859_s14 = smov 0   ;;  %s2861_s15 = smov 0  }
   0x6 LB: > { %s2876_s16 = sadd.s32 4294967295, %s2825_s15   ;;  %s1616_s17 = sadd.s32 4294967294, %s2825_s15   ;;  %s2825_s15 = sphi %s2861_s15, %s3516_s15   ;;  %s2821_s14 = sphi %s2859_s14, %s3515_s14   ;;  %s2817_s13 = sphi %s2857_s13, %s3514_s13   ;;  %s2813_s12 = sphi %s2855_s12, %s3513_s12  }
   0x7   : > { %s2880_s18 = sadd.s32 1, %s2825_s15   ;;  %s27_s19 = sadd.s32 1, %s2821_s14 }
   0x8   : > { %s24_s20 = ssub.s32 %s2825_s15, %s2880_s18  ;;  %p34_p0 = scmp.ne.s32.totalorder %s2821_s14, %s2817_s13 }
   0x9   : > { %p25_p1 = scmp.eq.s32.totalorder %s24_s20, 0  ;;  %p35_p2 = scmp.eq.s32.totalorder %s2825_s15, 0 }
   0xa   : > { %p40_p3 = scmp.ne.s32.totalorder %s2817_s13, %s2813_s12  ;;  %p3492_p4 = scmp.eq.s32.totalorder %s2876_s16, 0 }
   0xb   : > { %s2892_s21 = scalar_select %p25_p1, %s2821_s14, %s27_s19  }
   0xc   : > { %p2894_p5 = por %p35_p2, %p34_p0  ;;  %p2900_p6 = por %p3492_p4, %p40_p3 }
   0xd   : > { %p106_p7 = scmp.eq.s32.totalorder %s2876_s16, 1  ;;  %p112_p8 = scmp.eq.s32.totalorder %s1616_s17, 1 }
   0xe   : > { %s3498_s23 = scalar_select %p2900_p6, 1, 0 }
   0xf   : > { %p1617_p9 = scmp.ge.s32.totalorder %s2825_s15, 1  ;;  %p119_p10 = scmp.lt.s32.totalorder %s2825_s15, 3 }
  0x10   : > { %p2907_p11 = por %p106_p7, %p34_p0  ;;  %p2911_p12 = por %p112_p8, %p40_p3 }
  0x11   : > { %p2915_p13 = pnand %p1617_p9, %p119_p10  ;;  %s2827_s27 = smov [#allocation5]  }
  0x12   : > { %s3499_s24 = scalar_select %p2907_p11, 1, 0 }
  0x13   : > { %s3500_s25 = scalar_select %p2911_p12, 1, 0 }
  0x14   : > { %s3501_s26 = scalar_select %p2915_p13, 1, 0 }
  0x15   : > { %p2608_p2 = pneg %p2915_p13  ;;  %s132_s28 = sshll.u32 %s2827_s27, 4  ;;  %s133_s28 = int_to_ptr.vmem [resolvable:$true] %s132_s28 }
  0x16   : > { %p2625_p4 = scmp.lt.s32.totalorder %s2825_s15, 2  ;;  %p3502_p0 = scmp.eq.s32.totalorder %s2876_s16, 0 }
  0x17   : > { %s2828_s4 = smov [#allocation7]   ;;  %s2669_s8 = scalar_lea.hbm %s3489_s1, 16 }
  0x18   : > { %p2925_p7 = pnand %p2608_p2, %p3502_p0  ;;  %p2931_p3 = pnand %p2625_p4, %p2894_p5 }
  0x19   : > { %s143_s5 = sshll.u32 %s2828_s4, 4  ;;  %p2670_p8 = scmp.ne.s32.totalorder %s3489_s1, %s2669_s8  ;;  %s2935_s5 = int_to_ptr.vmem [resolvable:$true] %s143_s5 }
  0x1a   : > { %s3504_s30 = scalar_select %p2931_p3, 1, 0 }
  0x1b   : > { %p2671_p9 = pneg %p2925_p7  ;;  %p2676_p10 = scmp.lt.u32.totalorder %s2669_s8, %s3489_s1 }
  0x1d   : > { %p2672_p4 = pnand %p2671_p9, %p2670_p8 }
  0x1f   : > { %p2673_p5 = pneg %p2672_p4 }
  0x21   : > { %p2678_p2 = pnand %p2676_p10, %p2673_p5 }
  0x23   : > { %2681 = shalt.err (!%p2678_p2)
}
  0x24   : > { %s2682_s19 = scalar_lea.vmem %s133_s28, 16  ;;  %s2689_s20 = scalar_lea.vmem %s133_s28, 32 }
  0x25   : > { %p2683_p0 = scmp.ne.s32.totalorder %s133_s28, %s2682_s19  ;;  %p2690_p11 = scmp.lt.s32.totalorder %s133_s28, %s133_s28 }
  0x26   : > { %p2691_p6 = scmp.lt.s32.totalorder %s2689_s20, %s2682_s19 }
  0x27   : > { %p2685_p1 = pnand %p2683_p0, %p2671_p9 }
  0x28   : > { %p2692_p13 = por %p2691_p6, %p2690_p11 }
  0x29   : > { %p2686_p12 = pneg %p2685_p1 }
  0x2b   : > { %p2693_p3 = pnand %p2692_p13, %p2686_p12 }
  0x2d   : > { %2696 = shalt.err (!%p2693_p3)
}
  0x2e   : > { %2611 = dma.hbm_to_vmem [thread:$0]  (!%p2925_p7), %s3489_s1, 16, %s133_s28, [#allocation6]  }
  0x2f   : > { %s154_s4 = sand.u32 1, %s2821_s14   ;;  %s2697_s8 = scalar_lea.hbm %s3490_s2, 16 }
  0x30   : > { %p2698_p1 = scmp.ne.s32.totalorder %s3490_s2, %s2697_s8  ;;  %p2704_p12 = scmp.lt.u32.totalorder %s2697_s8, %s3490_s2 }
  0x32   : > { %p2700_p6 = pnand %p2698_p1, %p2671_p9 }
  0x34   : > { %p2701_p11 = pneg %p2700_p6 }
  0x36   : > { %p2706_p13 = pnand %p2704_p12, %p2701_p11 }
  0x38   : > { %2709 = shalt.err (!%p2706_p13)
}
  0x39   : > { %s2710_s28 = scalar_lea.vmem %s2935_s5, 16  ;;  %s2717_s19 = scalar_lea.vmem %s2935_s5, 32 }
  0x3a   : > { %p2711_p3 = scmp.ne.s32.totalorder %s2935_s5, %s2710_s28  ;;  %p2718_p5 = scmp.lt.s32.totalorder %s2935_s5, %s2935_s5 }
  0x3b   : > { %p2719_p10 = scmp.lt.s32.totalorder %s2717_s19, %s2710_s28 }
  0x3c   : > { %p2713_p8 = pnand %p2711_p3, %p2671_p9 }
  0x3d   : > { %p2720_p2 = por %p2719_p10, %p2718_p5 }
  0x3e   : > { %p2714_p4 = pneg %p2713_p8 }
  0x40   : > { %p2721_p0 = pnand %p2720_p2, %p2714_p4 }
  0x42   : > { %2724 = shalt.err (!%p2721_p0)
}
  0x43   : > { %2614 = dma.hbm_to_vmem [thread:$0]  (!%p2925_p7), %s3490_s2, 16, %s2935_s5, [#allocation6]  }
  0x44   : > { %s1621_s27 = sshll.u32 %s154_s4, 9  ;;  %s1764_s6 = sshll.u32 %s2825_s15, 13 }
  0x45   : > { %s2990_s9 = scalar_lea.hbm %s3488_s0, %s1764_s6  ;;  %s158_s29 = scalar_lea.vmem [#allocation2], %s1621_s27 }
  0x46   : > { %s165_s10 = sshll.u32 %s158_s29, 4  ;;  %s2994_s11 = scalar_lea.sflag [#allocation3], %s154_s4  ;;  %s2992_s10 = int_to_ptr.vmem [resolvable:$true] %s165_s10 }
  0x47   : > { %s2725_s17 = scalar_lea.hbm %s2990_s9, 8192  ;;  %p3505_p7 = scmp.ne.s32.totalorder %s3504_s30, 0 }
  0x48   : > { %p2726_p9 = scmp.ne.s32.totalorder %s2990_s9, %s2725_s17  ;;  %s2730_s19 = scalar_lea.hbm %s3488_s0, 16384 }
  0x49   : > { %p2727_p1 = pneg %p3505_p7  ;;  %p2731_p12 = scmp.lt.u32.totalorder %s2990_s9, %s3488_s0 }
  0x4a   : > { %p2732_p13 = scmp.lt.u32.totalorder %s2730_s19, %s2725_s17  ;;  %p2734_p8 = scmp.lt.u32.totalorder %s2725_s17, %s2990_s9 }
  0x4b   : > { %p2728_p6 = pnand %p2727_p1, %p2726_p9 }
  0x4c   : > { %p2733_p3 = por %p2732_p13, %p2731_p12 }
  0x4d   : > { %p2729_p11 = pneg %p2728_p6 }
  0x4e   : > { %p2735_p4 = por %p2734_p8, %p2733_p3 }
  0x50   : > { %p2736_p5 = pnand %p2735_p4, %p2729_p11 }
  0x52   : > { %2739 = shalt.err (!%p2736_p5)
}
  0x53   : > { %s2740_s4 = scalar_lea.vmem %s2992_s10, 8192  ;;  %s2829_s27 = smov [#allocation2]  }
  0x54   : > { %p2741_p10 = scmp.ne.s32.totalorder %s2992_s10, %s2740_s4  ;;  %s2745_s6 = sshll.u32 %s2829_s27, 4  ;;  %s2746_s6 = int_to_ptr.vmem [resolvable:$false] %s2745_s6 }
  0x55   : > { %s2747_s7 = scalar_lea.vmem %s2746_s6, 16384  ;;  %p2748_p9 = scmp.lt.s32.totalorder %s2992_s10, %s2746_s6 }
  0x56   : > { %p2743_p2 = pnand %p2741_p10, %p2727_p1  ;;  %p2749_p6 = scmp.lt.s32.totalorder %s2747_s7, %s2740_s4 }
  0x58   : > { %p2744_p0 = pneg %p2743_p2  ;;  %p2750_p12 = por %p2749_p6, %p2748_p9 }
  0x5a   : > { %p2751_p13 = pnand %p2750_p12, %p2744_p0 }
  0x5c   : > { %2754 = shalt.err (!%p2751_p13)
}
  0x5d   : > { %s2830_s8 = smov 64   ;;  %s2831_s29 = smov 4  }
  0x5e   : > { %2618 = dma.hbm_to_vmem [thread:$0]  (!%p3505_p7), %s2990_s9, 8192, %s2992_s10, %s2994_s11, %s2830_s8, %s2830_s8, %s2831_s29  }
  0x5f   : > { %p3506_p1 = scmp.ne.s32.totalorder %s3501_s26, 0 }
  0x60   : > { %s3025_s17 = sand.u32 (!%p3506_p1), 1, %s2817_s13   ;;  %p3507_p11 = scmp.ne.s32.totalorder (!%p3506_p1), %s3498_s23, 0 }
  0x61   : > { %177 = sbr.rel (%p3506_p1) target bundleno = 273 (0x111), region = 32  ;;  %s1625_s5 = sshll.u32 (!%p3506_p1), %s3025_s17, 9 }
  0x62   : > { %s180_s28 = scalar_lea.sflag (!%p3506_p1), [#allocation3], %s3025_s17  ;;  %s3031_s19 = scalar_lea.vmem (!%p3506_p1), [#allocation2], %s1625_s5 }
  0x68   : > { %2800 = dma.done.wait (%p3507_p11), %s180_s28, 8192  }
  0x69   : > { %2802 = vsyncadd (%p3507_p11), %s180_s28, 4294959104  ;;  %p3508_p7 = scmp.eq.s32.totalorder %s2876_s16, 0 }
  0x6b   : > { %2804 = dma.done.wait (%p3508_p7), [#allocation6], 32   ;;  %p3509_p3 = pmov %p3508_p7 }
  0x6c   : > { %v1895_v0 = vld [vmem:[%s3031_s19] sm:$0xff]   ;;  %v2470_v4 = vld [vmem:[%s3031_s19 + $0x8] sm:$0xff]   ;;  %v2471_v5 = vld [vmem:[%s3031_s19 + $0x10] sm:$0xff]   ;;  %s3071_s23 = scalar_lea.vmem [#allocation8], %s1625_s5  ;;  %s1893_s26 = sshll.u32 %s2876_s16, 13 }
  0x6d   : > { %2806 = vsyncadd (%p3509_p3), [#allocation6], 4294967264  ;;  %v3042_v1 = vld [vmem:[#allocation5] ss:$0 sm:$0xff]  ;;  %v1896_v2 = vunpack.c.l.bf16 %v1895_v0  ;;  %v1897_v3 = vunpack.c.h.bf16 %v1895_v0  ;;  %v2472_v6 = vld [vmem:[%s3031_s19 + $0x18] sm:$0xff]   ;;  %v1900_v8 = vunpack.c.l.bf16 %v2470_v4  ;;  %v1901_v9 = vunpack.c.h.bf16 %v2470_v4  ;;  %s1524_s30 = sshll.u32 %s3071_s23, 4  ;;  %s3441_s11 = scalar_lea.hbm %s3491_s3, %s1893_s26  ;;  %s3443_s30 = int_to_ptr.vmem [resolvable:$true] %s1524_s30 }
  0x6e   : > { %v3047_v7 = vld [vmem:[#allocation7] ss:$0 sm:$0xff]  ;;  %v1904_v10 = vunpack.c.l.bf16 %v2471_v5  ;;  %v1905_v11 = vunpack.c.h.bf16 %v2471_v5  ;;  %v1908_v14 = vunpack.c.l.bf16 %v2472_v6  ;;  %v1909_v15 = vunpack.c.h.bf16 %v2472_v6  ;;  %v2474_v33 = vld [vmem:[%s3031_s19 + $0x28] sm:$0xff]   ;;  %v2475_v38 = vld [vmem:[%s3031_s19 + $0x30] sm:$0xff]   ;;  %s1511_s20 = scalar_lea.sflag [#allocation4], %s3025_s17  ;;  %s2755_s22 = scalar_lea.vmem %s3443_s30, 8192 }
  0x6f   : > { %v479_v12 = vmul.f32 %v1896_v2, %v3042_v1  ;;  %v480_v13 = vmul.f32 %v1897_v3, %v3042_v1  ;;  %v481_v16 = vmul.f32 %v1900_v8, %v3042_v1  ;;  %v482_v17 = vmul.f32 %v1901_v9, %v3042_v1  ;;  %v2473_v28 = vld [vmem:[%s3031_s19 + $0x20] sm:$0xff]   ;;  %v2476_v43 = vld [vmem:[%s3031_s19 + $0x38] sm:$0xff]   ;;  %p2756_p8 = scmp.ne.s32.totalorder %s3443_s30, %s2755_s22  ;;  %p3510_p4 = scmp.ne.s32.totalorder %s3499_s24, 0 }
  0x70   : > { %v483_v18 = vmul.f32 %v1904_v10, %v3042_v1  ;;  %v484_v19 = vmul.f32 %v1905_v11, %v3042_v1  ;;  %v485_v22 = vmul.f32 %v1908_v14, %v3042_v1  ;;  %v486_v23 = vmul.f32 %v1909_v15, %v3042_v1  ;;  %v2477_v0 = vld [vmem:[%s3031_s19 + $0x40] sm:$0xff]   ;;  %v2478_v11 = vld [vmem:[%s3031_s19 + $0x48] sm:$0xff]   ;;  %s2832_s16 = smov [#allocation8]  }
  0x71   : > { %v614_v20 = vadd.f32 %v3047_v7, %v479_v12  ;;  %v615_v21 = vadd.f32 %v3047_v7, %v480_v13  ;;  %v616_v24 = vadd.f32 %v3047_v7, %v481_v16  ;;  %v617_v25 = vadd.f32 %v3047_v7, %v482_v17  ;;  %v2479_v16 = vld [vmem:[%s3031_s19 + $0x50] sm:$0xff]   ;;  %p2757_p5 = pnand %p2756_p8, %p3510_p4  ;;  %s2759_s4 = sshll.u32 %s2832_s16, 4  ;;  %s2760_s4 = int_to_ptr.vmem [resolvable:$false] %s2759_s4 }
  0x72   : > { %v618_v26 = vadd.f32 %v3047_v7, %v483_v18  ;;  %v619_v27 = vadd.f32 %v3047_v7, %v484_v19  ;;  %v620_v31 = vadd.f32 %v3047_v7, %v485_v22  ;;  %v621_v32 = vadd.f32 %v3047_v7, %v486_v23  ;;  %s2761_s27 = scalar_lea.vmem %s2760_s4, 16384  ;;  %p2762_p2 = scmp.lt.s32.totalorder %s3443_s30, %s2760_s4 }
  0x73   : > { %v742_v29 = vmax.f32 %v614_v20, 0.0  ;;  %v743_v30 = vmax.f32 %v615_v21, 0.0  ;;  %v744_v34 = vmax.f32 %v616_v24, 0.0  ;;  %v745_v35 = vmax.f32 %v617_v25, 0.0  ;;  %v2480_v25 = vld [vmem:[%s3031_s19 + $0x58] sm:$0xff]   ;;  %p2758_p10 = pneg %p2757_p5  ;;  %p2763_p0 = scmp.lt.s32.totalorder %s2761_s27, %s2755_s22 }
  0x74   : > { %v746_v36 = vmax.f32 %v618_v26, 0.0  ;;  %v747_v37 = vmax.f32 %v619_v27, 0.0  ;;  %v748_v40 = vmax.f32 %v620_v31, 0.0  ;;  %v749_v41 = vmax.f32 %v621_v32, 0.0 }
  0x75   : > { %v2153_v39 = vpack.c.bf16 %v743_v30, %v742_v29  ;;  %v1912_v42 = vunpack.c.l.bf16 %v2473_v28  ;;  %v2158_v44 = vpack.c.bf16 %v745_v35, %v744_v34  ;;  %v1913_v46 = vunpack.c.h.bf16 %v2473_v28  ;;  %p2764_p9 = por %p2763_p0, %p2762_p2 }
  0x76   : > { %v2163_v45 = vpack.c.bf16 %v747_v37, %v746_v36  ;;  %v1916_v47 = vunpack.c.l.bf16 %v2474_v33  ;;  %v2168_v48 = vpack.c.bf16 %v749_v41, %v748_v40  ;;  %v1917_v50 = vunpack.c.h.bf16 %v2474_v33 }
  0x77   : > { %2154 = vst [vmem:[%s3071_s23] sm:$0xff] %v2153_v39   ;;  %v487_v49 = vmul.f32 %v1912_v42, %v3042_v1  ;;  %v1920_v51 = vunpack.c.l.bf16 %v2475_v38  ;;  %2533 = vst [vmem:[%s3071_s23 + $0x8] sm:$0xff] %v2158_v44   ;;  %v488_v52 = vmul.f32 %v1913_v46, %v3042_v1  ;;  %v1921_v54 = vunpack.c.h.bf16 %v2475_v38  ;;  %v2481_v38 = vld [vmem:[%s3031_s19 + $0x60] sm:$0xff]   ;;  %p2765_p6 = pnand %p2764_p9, %p2758_p10 }
  0x78   : > { %2534 = vst [vmem:[%s3071_s23 + $0x10] sm:$0xff] %v2163_v45   ;;  %v489_v53 = vmul.f32 %v1916_v47, %v3042_v1  ;;  %v1924_v55 = vunpack.c.l.bf16 %v2476_v43  ;;  %2535 = vst [vmem:[%s3071_s23 + $0x18] sm:$0xff] %v2168_v48   ;;  %v490_v57 = vmul.f32 %v1917_v50, %v3042_v1  ;;  %v1925_v59 = vunpack.c.h.bf16 %v2476_v43 }
  0x79   : > { %v622_v56 = vadd.f32 %v3047_v7, %v487_v49  ;;  %v491_v58 = vmul.f32 %v1920_v51, %v3042_v1  ;;  %v623_v60 = vadd.f32 %v3047_v7, %v488_v52  ;;  %v492_v62 = vmul.f32 %v1921_v54, %v3042_v1  ;;  %v2482_v51 = vld [vmem:[%s3031_s19 + $0x68] sm:$0xff]  }
  0x7a   : > { %v624_v61 = vadd.f32 %v3047_v7, %v489_v53  ;;  %v493_v63 = vmul.f32 %v1924_v55, %v3042_v1  ;;  %v625_v3 = vadd.f32 %v3047_v7, %v490_v57  ;;  %v494_v5 = vmul.f32 %v1925_v59, %v3042_v1 }
  0x7b   : > { %v750_v2 = vmax.f32 %v622_v56, 0.0  ;;  %v626_v4 = vadd.f32 %v3047_v7, %v491_v58  ;;  %v751_v6 = vmax.f32 %v623_v60, 0.0  ;;  %v627_v9 = vadd.f32 %v3047_v7, %v492_v62  ;;  %v2483_v60 = vld [vmem:[%s3031_s19 + $0x70] sm:$0xff]  }
  0x7c   : > { %v752_v8 = vmax.f32 %v624_v61, 0.0  ;;  %v628_v10 = vadd.f32 %v3047_v7, %v493_v63  ;;  %v753_v12 = vmax.f32 %v625_v3, 0.0  ;;  %v629_v14 = vadd.f32 %v3047_v7, %v494_v5 }
  0x7d   : > { %v754_v13 = vmax.f32 %v626_v4, 0.0  ;;  %v1928_v15 = vunpack.c.l.bf16 %v2477_v0  ;;  %v2173_v17 = vpack.c.bf16 %v751_v6, %v750_v2  ;;  %v755_v18 = vmax.f32 %v627_v9, 0.0  ;;  %v2484_v2 = vld [vmem:[%s3031_s19 + $0x78] sm:$0xff]  }
  0x7e   : > { %v756_v19 = vmax.f32 %v628_v10, 0.0  ;;  %v1929_v20 = vunpack.c.h.bf16 %v2477_v0  ;;  %v2178_v21 = vpack.c.bf16 %v753_v12, %v752_v8  ;;  %v757_v22 = vmax.f32 %v629_v14, 0.0  ;;  %v2485_v12 = vld [vmem:[%s3031_s19 + $0x80] sm:$0xff]  }
  0x7f   : > { %v495_v23 = vmul.f32 %v1928_v15, %v3042_v1  ;;  %v1932_v24 = vunpack.c.l.bf16 %v2478_v11  ;;  %2536 = vst [vmem:[%s3071_s23 + $0x20] sm:$0xff] %v2173_v17   ;;  %v2183_v26 = vpack.c.bf16 %v755_v18, %v754_v13  ;;  %v1933_v28 = vunpack.c.h.bf16 %v2478_v11 }
  0x80   : > { %v496_v27 = vmul.f32 %v1929_v20, %v3042_v1  ;;  %v1936_v29 = vunpack.c.l.bf16 %v2479_v16  ;;  %2537 = vst [vmem:[%s3071_s23 + $0x28] sm:$0xff] %v2178_v21   ;;  %v2188_v30 = vpack.c.bf16 %v757_v22, %v756_v19  ;;  %v1937_v33 = vunpack.c.h.bf16 %v2479_v16 }
  0x81   : > { %v630_v31 = vadd.f32 %v3047_v7, %v495_v23  ;;  %v497_v32 = vmul.f32 %v1932_v24, %v3042_v1  ;;  %2538 = vst [vmem:[%s3071_s23 + $0x30] sm:$0xff] %v2183_v26   ;;  %v498_v35 = vmul.f32 %v1933_v28, %v3042_v1  ;;  %v1940_v37 = vunpack.c.l.bf16 %v2480_v25 }
  0x82   : > { %v631_v34 = vadd.f32 %v3047_v7, %v496_v27  ;;  %v499_v36 = vmul.f32 %v1936_v29, %v3042_v1  ;;  %2539 = vst [vmem:[%s3071_s23 + $0x38] sm:$0xff] %v2188_v30   ;;  %v500_v41 = vmul.f32 %v1937_v33, %v3042_v1  ;;  %v1941_v42 = vunpack.c.h.bf16 %v2480_v25  ;;  %v2486_v29 = vld [vmem:[%s3031_s19 + $0x88] sm:$0xff]  }
  0x83   : > { %v758_v39 = vmax.f32 %v630_v31, 0.0  ;;  %v632_v40 = vadd.f32 %v3047_v7, %v497_v32  ;;  %v633_v44 = vadd.f32 %v3047_v7, %v498_v35  ;;  %v501_v46 = vmul.f32 %v1940_v37, %v3042_v1 }
  0x84   : > { %v759_v43 = vmax.f32 %v631_v34, 0.0  ;;  %v634_v45 = vadd.f32 %v3047_v7, %v499_v36  ;;  %v635_v48 = vadd.f32 %v3047_v7, %v500_v41  ;;  %v502_v49 = vmul.f32 %v1941_v42, %v3042_v1  ;;  %v2487_v34 = vld [vmem:[%s3031_s19 + $0x90] sm:$0xff]  }
  0x85   : > { %v760_v47 = vmax.f32 %v632_v40, 0.0  ;;  %v1944_v50 = vunpack.c.l.bf16 %v2481_v38  ;;  %v761_v53 = vmax.f32 %v633_v44, 0.0  ;;  %v636_v55 = vadd.f32 %v3047_v7, %v501_v46 }
  0x86   : > { %v2193_v52 = vpack.c.bf16 %v759_v43, %v758_v39  ;;  %v762_v54 = vmax.f32 %v634_v45, 0.0  ;;  %v763_v56 = vmax.f32 %v635_v48, 0.0  ;;  %v637_v57 = vadd.f32 %v3047_v7, %v502_v49  ;;  %v2488_v43 = vld [vmem:[%s3031_s19 + $0x98] sm:$0xff]  }
  0x87   : > { %v1945_v58 = vunpack.c.h.bf16 %v2481_v38  ;;  %v503_v59 = vmul.f32 %v1944_v50, %v3042_v1  ;;  %v2198_v61 = vpack.c.bf16 %v761_v53, %v760_v47  ;;  %v764_v62 = vmax.f32 %v636_v55, 0.0 }
  0x88   : > { %2540 = vst [vmem:[%s3071_s23 + $0x40] sm:$0xff] %v2193_v52   ;;  %v1948_v63 = vunpack.c.l.bf16 %v2482_v51  ;;  %v1949_v0 = vunpack.c.h.bf16 %v2482_v51  ;;  %v2203_v3 = vpack.c.bf16 %v763_v56, %v762_v54  ;;  %v765_v4 = vmax.f32 %v637_v57, 0.0  ;;  %v2489_v56 = vld [vmem:[%s3031_s19 + $0xa0] sm:$0xff]  }
  0x89   : > { %v504_v5 = vmul.f32 %v1945_v58, %v3042_v1  ;;  %v638_v6 = vadd.f32 %v3047_v7, %v503_v59  ;;  %2541 = vst [vmem:[%s3071_s23 + $0x48] sm:$0xff] %v2198_v61   ;;  %v1952_v10 = vunpack.c.l.bf16 %v2483_v60  ;;  %v1953_v11 = vunpack.c.h.bf16 %v2483_v60 }
  0x8a   : > { %v505_v8 = vmul.f32 %v1948_v63, %v3042_v1  ;;  %v506_v9 = vmul.f32 %v1949_v0, %v3042_v1  ;;  %2542 = vst [vmem:[%s3071_s23 + $0x50] sm:$0xff] %v2203_v3   ;;  %v2208_v13 = vpack.c.bf16 %v765_v4, %v764_v62  ;;  %v1956_v16 = vunpack.c.l.bf16 %v2484_v2 }
  0x8b   : > { %v639_v14 = vadd.f32 %v3047_v7, %v504_v5  ;;  %v766_v15 = vmax.f32 %v638_v6, 0.0  ;;  %v507_v19 = vmul.f32 %v1952_v10, %v3042_v1  ;;  %v508_v20 = vmul.f32 %v1953_v11, %v3042_v1 }
  0x8c   : > { %v640_v17 = vadd.f32 %v3047_v7, %v505_v8  ;;  %v641_v18 = vadd.f32 %v3047_v7, %v506_v9  ;;  %2543 = vst [vmem:[%s3071_s23 + $0x58] sm:$0xff] %v2208_v13   ;;  %v1957_v22 = vunpack.c.h.bf16 %v2484_v2  ;;  %v509_v23 = vmul.f32 %v1956_v16, %v3042_v1  ;;  %v2490_v2 = vld [vmem:[%s3031_s19 + $0xa8] sm:$0xff]   ;;  %v2491_v16 = vld [vmem:[%s3031_s19 + $0xb0] sm:$0xff]  }
  0x8d   : > { %v767_v21 = vmax.f32 %v639_v14, 0.0  ;;  %v1960_v24 = vunpack.c.l.bf16 %v2485_v12  ;;  %v642_v27 = vadd.f32 %v3047_v7, %v507_v19  ;;  %v643_v28 = vadd.f32 %v3047_v7, %v508_v20 }
  0x8e   : > { %v768_v25 = vmax.f32 %v640_v17, 0.0  ;;  %v769_v26 = vmax.f32 %v641_v18, 0.0  ;;  %v510_v31 = vmul.f32 %v1957_v22, %v3042_v1  ;;  %v644_v32 = vadd.f32 %v3047_v7, %v509_v23 }
  0x8f   : > { %v2213_v30 = vpack.c.bf16 %v767_v21, %v766_v15  ;;  %v1961_v33 = vunpack.c.h.bf16 %v2485_v12  ;;  %v770_v36 = vmax.f32 %v642_v27, 0.0  ;;  %v771_v37 = vmax.f32 %v643_v28, 0.0  ;;  %v2492_v21 = vld [vmem:[%s3031_s19 + $0xb8] sm:$0xff]  }
  0x90   : > { %v2218_v35 = vpack.c.bf16 %v769_v26, %v768_v25  ;;  %v511_v38 = vmul.f32 %v1960_v24, %v3042_v1  ;;  %v645_v39 = vadd.f32 %v3047_v7, %v510_v31  ;;  %v772_v40 = vmax.f32 %v644_v32, 0.0 }
  0x91   : > { %2544 = vst [vmem:[%s3071_s23 + $0x60] sm:$0xff] %v2213_v30   ;;  %v512_v41 = vmul.f32 %v1961_v33, %v3042_v1  ;;  %v1964_v42 = vunpack.c.l.bf16 %v2486_v29  ;;  %v2223_v44 = vpack.c.bf16 %v771_v37, %v770_v36  ;;  %v1965_v46 = vunpack.c.h.bf16 %v2486_v29 }
  0x92   : > { %2545 = vst [vmem:[%s3071_s23 + $0x68] sm:$0xff] %v2218_v35   ;;  %v646_v45 = vadd.f32 %v3047_v7, %v511_v38  ;;  %v1968_v47 = vunpack.c.l.bf16 %v2487_v34  ;;  %v773_v48 = vmax.f32 %v645_v39, 0.0  ;;  %v1969_v51 = vunpack.c.h.bf16 %v2487_v34  ;;  %v2493_v34 = vld [vmem:[%s3031_s19 + $0xc0] sm:$0xff]  }
  0x93   : > { %v647_v49 = vadd.f32 %v3047_v7, %v512_v41  ;;  %v513_v50 = vmul.f32 %v1964_v42, %v3042_v1  ;;  %2546 = vst [vmem:[%s3071_s23 + $0x70] sm:$0xff] %v2223_v44   ;;  %v514_v53 = vmul.f32 %v1965_v46, %v3042_v1  ;;  %v1972_v55 = vunpack.c.l.bf16 %v2488_v43 }
  0x94   : > { %v774_v52 = vmax.f32 %v646_v45, 0.0  ;;  %v515_v54 = vmul.f32 %v1968_v47, %v3042_v1  ;;  %v2228_v57 = vpack.c.bf16 %v773_v48, %v772_v40  ;;  %v516_v60 = vmul.f32 %v1969_v51, %v3042_v1  ;;  %v2494_v47 = vld [vmem:[%s3031_s19 + $0xc8] sm:$0xff]  }
  0x95   : > { %v775_v58 = vmax.f32 %v647_v49, 0.0  ;;  %v648_v59 = vadd.f32 %v3047_v7, %v513_v50  ;;  %v649_v61 = vadd.f32 %v3047_v7, %v514_v53  ;;  %v1973_v63 = vunpack.c.h.bf16 %v2488_v43 }
  0x96   : > { %v650_v62 = vadd.f32 %v3047_v7, %v515_v54  ;;  %v517_v0 = vmul.f32 %v1972_v55, %v3042_v1  ;;  %2547 = vst [vmem:[%s3071_s23 + $0x78] sm:$0xff] %v2228_v57   ;;  %v651_v5 = vadd.f32 %v3047_v7, %v516_v60  ;;  %v1976_v6 = vunpack.c.l.bf16 %v2489_v56 }
  0x97   : > { %v2233_v3 = vpack.c.bf16 %v775_v58, %v774_v52  ;;  %v776_v4 = vmax.f32 %v648_v59, 0.0  ;;  %v777_v8 = vmax.f32 %v649_v61, 0.0  ;;  %v518_v10 = vmul.f32 %v1973_v63, %v3042_v1  ;;  %v2495_v52 = vld [vmem:[%s3031_s19 + $0xd0] sm:$0xff]   ;;  %v2496_v61 = vld [vmem:[%s3031_s19 + $0xd8] sm:$0xff]  }
  0x98   : > { %v778_v9 = vmax.f32 %v650_v62, 0.0  ;;  %v652_v11 = vadd.f32 %v3047_v7, %v517_v0  ;;  %v779_v12 = vmax.f32 %v651_v5, 0.0  ;;  %v1977_v13 = vunpack.c.h.bf16 %v2489_v56 }
  0x99   : > { %2548 = vst [vmem:[%s3071_s23 + $0x80] sm:$0xff] %v2233_v3   ;;  %v519_v14 = vmul.f32 %v1976_v6, %v3042_v1  ;;  %v1980_v15 = vunpack.c.l.bf16 %v2490_v2  ;;  %v2238_v17 = vpack.c.bf16 %v777_v8, %v776_v4  ;;  %v653_v18 = vadd.f32 %v3047_v7, %v518_v10 }
  0x9a   : > { %v780_v19 = vmax.f32 %v652_v11, 0.0  ;;  %v1981_v20 = vunpack.c.h.bf16 %v2490_v2  ;;  %v2243_v22 = vpack.c.bf16 %v779_v12, %v778_v9  ;;  %v520_v23 = vmul.f32 %v1977_v13, %v3042_v1  ;;  %v2497_v12 = vld [vmem:[%s3031_s19 + $0xe0] sm:$0xff]  }
  0x9b   : > { %v654_v24 = vadd.f32 %v3047_v7, %v519_v14  ;;  %v521_v25 = vmul.f32 %v1980_v15, %v3042_v1  ;;  %2549 = vst [vmem:[%s3071_s23 + $0x88] sm:$0xff] %v2238_v17   ;;  %v781_v26 = vmax.f32 %v653_v18, 0.0  ;;  %v1984_v28 = vunpack.c.l.bf16 %v2491_v16 }
  0x9c   : > { %v522_v27 = vmul.f32 %v1981_v20, %v3042_v1  ;;  %v1985_v29 = vunpack.c.h.bf16 %v2491_v16  ;;  %2550 = vst [vmem:[%s3071_s23 + $0x90] sm:$0xff] %v2243_v22   ;;  %v655_v30 = vadd.f32 %v3047_v7, %v520_v23  ;;  %v1988_v33 = vunpack.c.l.bf16 %v2492_v21 }
  0x9d   : > { %v782_v31 = vmax.f32 %v654_v24, 0.0  ;;  %v656_v32 = vadd.f32 %v3047_v7, %v521_v25  ;;  %v2248_v35 = vpack.c.bf16 %v781_v26, %v780_v19  ;;  %v523_v37 = vmul.f32 %v1984_v28, %v3042_v1 }
  0x9e   : > { %v657_v36 = vadd.f32 %v3047_v7, %v522_v27  ;;  %v524_v38 = vmul.f32 %v1985_v29, %v3042_v1  ;;  %v783_v39 = vmax.f32 %v655_v30, 0.0  ;;  %v1989_v41 = vunpack.c.h.bf16 %v2492_v21  ;;  %v2498_v21 = vld [vmem:[%s3031_s19 + $0xe8] sm:$0xff]  }
  0x9f   : > { %v784_v40 = vmax.f32 %v656_v32, 0.0  ;;  %v525_v42 = vmul.f32 %v1988_v33, %v3042_v1  ;;  %2551 = vst [vmem:[%s3071_s23 + $0x98] sm:$0xff] %v2248_v35   ;;  %v658_v44 = vadd.f32 %v3047_v7, %v523_v37  ;;  %v1992_v46 = vunpack.c.l.bf16 %v2493_v34 }
  0xa0   : > { %v785_v43 = vmax.f32 %v657_v36, 0.0  ;;  %v659_v45 = vadd.f32 %v3047_v7, %v524_v38  ;;  %v2253_v48 = vpack.c.bf16 %v783_v39, %v782_v31  ;;  %v526_v49 = vmul.f32 %v1989_v41, %v3042_v1  ;;  %v2500_v39 = vld [vmem:[%s3031_s19 + $0xf8] sm:$0xff]  }
  0xa1   : > { %v660_v50 = vadd.f32 %v3047_v7, %v525_v42  ;;  %v1993_v51 = vunpack.c.h.bf16 %v2493_v34  ;;  %v786_v54 = vmax.f32 %v658_v44, 0.0  ;;  %v527_v56 = vmul.f32 %v1992_v46, %v3042_v1  ;;  %v2499_v34 = vld [vmem:[%s3031_s19 + $0xf0] sm:$0xff]  }
  0xa2   : > { %v2258_v53 = vpack.c.bf16 %v785_v43, %v784_v40  ;;  %v787_v55 = vmax.f32 %v659_v45, 0.0  ;;  %2552 = vst [vmem:[%s3071_s23 + $0xa0] sm:$0xff] %v2253_v48   ;;  %v661_v57 = vadd.f32 %v3047_v7, %v526_v49  ;;  %v1996_v60 = vunpack.c.l.bf16 %v2494_v47 }
  0xa3   : > { %v788_v58 = vmax.f32 %v660_v50, 0.0  ;;  %v528_v59 = vmul.f32 %v1993_v51, %v3042_v1  ;;  %v662_v63 = vadd.f32 %v3047_v7, %v527_v56  ;;  %v1997_v0 = vunpack.c.h.bf16 %v2494_v47 }
  0xa4   : > { %2553 = vst [vmem:[%s3071_s23 + $0xa8] sm:$0xff] %v2258_v53   ;;  %v2263_v62 = vpack.c.bf16 %v787_v55, %v786_v54  ;;  %v2000_v2 = vunpack.c.l.bf16 %v2495_v52  ;;  %v789_v3 = vmax.f32 %v661_v57, 0.0  ;;  %v529_v5 = vmul.f32 %v1996_v60, %v3042_v1 }
  0xa5   : > { %v663_v4 = vadd.f32 %v3047_v7, %v528_v59  ;;  %v2001_v6 = vunpack.c.h.bf16 %v2495_v52  ;;  %v790_v8 = vmax.f32 %v662_v63, 0.0  ;;  %v530_v9 = vmul.f32 %v1997_v0, %v3042_v1  ;;  %v2501_v52 = vld [vmem:[%s3031_s19 + $0x100] sm:$0xff]  }
  0xa6   : > { %2554 = vst [vmem:[%s3071_s23 + $0xb0] sm:$0xff] %v2263_v62   ;;  %v531_v10 = vmul.f32 %v2000_v2, %v3042_v1  ;;  %v2004_v11 = vunpack.c.l.bf16 %v2496_v61  ;;  %v2268_v13 = vpack.c.bf16 %v789_v3, %v788_v58  ;;  %v664_v15 = vadd.f32 %v3047_v7, %v529_v5  ;;  %v2502_v2 = vld [vmem:[%s3031_s19 + $0x108] sm:$0xff]  }
  0xa7   : > { %v791_v14 = vmax.f32 %v663_v4, 0.0  ;;  %v532_v16 = vmul.f32 %v2001_v6, %v3042_v1  ;;  %v665_v17 = vadd.f32 %v3047_v7, %v530_v9  ;;  %v2005_v19 = vunpack.c.h.bf16 %v2496_v61 }
  0xa8   : > { %v666_v18 = vadd.f32 %v3047_v7, %v531_v10  ;;  %v533_v20 = vmul.f32 %v2004_v11, %v3042_v1  ;;  %2555 = vst [vmem:[%s3071_s23 + $0xb8] sm:$0xff] %v2268_v13   ;;  %v792_v23 = vmax.f32 %v664_v15, 0.0  ;;  %v2008_v25 = vunpack.c.l.bf16 %v2497_v12 }
  0xa9   : > { %v2273_v22 = vpack.c.bf16 %v791_v14, %v790_v8  ;;  %v667_v24 = vadd.f32 %v3047_v7, %v532_v16  ;;  %v793_v26 = vmax.f32 %v665_v17, 0.0  ;;  %v534_v28 = vmul.f32 %v2005_v19, %v3042_v1  ;;  %v2503_v8 = vld [vmem:[%s3031_s19 + $0x110] sm:$0xff]   ;;  %v2504_v17 = vld [vmem:[%s3031_s19 + $0x118] sm:$0xff]  }
  0xaa   : > { %v794_v27 = vmax.f32 %v666_v18, 0.0  ;;  %v668_v29 = vadd.f32 %v3047_v7, %v533_v20  ;;  %v2009_v31 = vunpack.c.h.bf16 %v2497_v12  ;;  %v535_v32 = vmul.f32 %v2008_v25, %v3042_v1 }
  0xab   : > { %2556 = vst [vmem:[%s3071_s23 + $0xc0] sm:$0xff] %v2273_v22   ;;  %v795_v30 = vmax.f32 %v667_v24, 0.0  ;;  %v2012_v33 = vunpack.c.l.bf16 %v2498_v21  ;;  %v2278_v35 = vpack.c.bf16 %v793_v26, %v792_v23  ;;  %v669_v36 = vadd.f32 %v3047_v7, %v534_v28 }
  0xac   : > { %v796_v37 = vmax.f32 %v668_v29, 0.0  ;;  %v2013_v38 = vunpack.c.h.bf16 %v2498_v21  ;;  %v536_v41 = vmul.f32 %v2009_v31, %v3042_v1  ;;  %v670_v42 = vadd.f32 %v3047_v7, %v535_v32 }
  0xad   : > { %v2283_v40 = vpack.c.bf16 %v795_v30, %v794_v27  ;;  %v537_v43 = vmul.f32 %v2012_v33, %v3042_v1  ;;  %2557 = vst [vmem:[%s3071_s23 + $0xc8] sm:$0xff] %v2278_v35   ;;  %v797_v44 = vmax.f32 %v669_v36, 0.0  ;;  %v2016_v46 = vunpack.c.l.bf16 %v2499_v34  ;;  %v2505_v30 = vld [vmem:[%s3031_s19 + $0x120] sm:$0xff]  }
  0xae   : > { %v538_v45 = vmul.f32 %v2013_v38, %v3042_v1  ;;  %v2017_v47 = vunpack.c.h.bf16 %v2499_v34  ;;  %v671_v48 = vadd.f32 %v3047_v7, %v536_v41  ;;  %v798_v49 = vmax.f32 %v670_v42, 0.0 }
  0xaf   : > { %2558 = vst [vmem:[%s3071_s23 + $0xd0] sm:$0xff] %v2283_v40   ;;  %v672_v50 = vadd.f32 %v3047_v7, %v537_v43  ;;  %v2020_v51 = vunpack.c.l.bf16 %v2500_v39  ;;  %v2288_v53 = vpack.c.bf16 %v797_v44, %v796_v37  ;;  %v539_v55 = vmul.f32 %v2016_v46, %v3042_v1 }
  0xb0   : > { %v673_v54 = vadd.f32 %v3047_v7, %v538_v45  ;;  %v540_v56 = vmul.f32 %v2017_v47, %v3042_v1  ;;  %v799_v57 = vmax.f32 %v671_v48, 0.0  ;;  %v2021_v59 = vunpack.c.h.bf16 %v2500_v39  ;;  %v2506_v39 = vld [vmem:[%s3031_s19 + $0x128] sm:$0xff]  }
  0xb1   : > { %v800_v58 = vmax.f32 %v672_v50, 0.0  ;;  %v541_v60 = vmul.f32 %v2020_v51, %v3042_v1  ;;  %2559 = vst [vmem:[%s3071_s23 + $0xd8] sm:$0xff] %v2288_v53   ;;  %v674_v62 = vadd.f32 %v3047_v7, %v539_v55  ;;  %v2024_v0 = vunpack.c.l.bf16 %v2501_v52 }
  0xb2   : > { %v801_v61 = vmax.f32 %v673_v54, 0.0  ;;  %v675_v63 = vadd.f32 %v3047_v7, %v540_v56  ;;  %v2293_v3 = vpack.c.bf16 %v799_v57, %v798_v49  ;;  %v542_v4 = vmul.f32 %v2021_v59, %v3042_v1  ;;  %v2508_v57 = vld [vmem:[%s3031_s19 + $0x138] sm:$0xff]  }
  0xb3   : > { %v676_v5 = vadd.f32 %v3047_v7, %v541_v60  ;;  %v2025_v6 = vunpack.c.h.bf16 %v2501_v52  ;;  %v802_v10 = vmax.f32 %v674_v62, 0.0  ;;  %v543_v12 = vmul.f32 %v2024_v0, %v3042_v1  ;;  %v2507_v52 = vld [vmem:[%s3031_s19 + $0x130] sm:$0xff]  }
  0xb4   : > { %v2298_v9 = vpack.c.bf16 %v801_v61, %v800_v58  ;;  %v803_v11 = vmax.f32 %v675_v63, 0.0  ;;  %2560 = vst [vmem:[%s3071_s23 + $0xe0] sm:$0xff] %v2293_v3   ;;  %v677_v13 = vadd.f32 %v3047_v7, %v542_v4  ;;  %v2028_v16 = vunpack.c.l.bf16 %v2502_v2 }
  0xb5   : > { %v804_v14 = vmax.f32 %v676_v5, 0.0  ;;  %v544_v15 = vmul.f32 %v2025_v6, %v3042_v1  ;;  %v678_v19 = vadd.f32 %v3047_v7, %v543_v12  ;;  %v2029_v20 = vunpack.c.h.bf16 %v2502_v2 }
  0xb6   : > { %2561 = vst [vmem:[%s3071_s23 + $0xe8] sm:$0xff] %v2298_v9   ;;  %v2303_v18 = vpack.c.bf16 %v803_v11, %v802_v10  ;;  %v2032_v21 = vunpack.c.l.bf16 %v2503_v8  ;;  %v805_v22 = vmax.f32 %v677_v13, 0.0  ;;  %v545_v24 = vmul.f32 %v2028_v16, %v3042_v1 }
  0xb7   : > { %v679_v23 = vadd.f32 %v3047_v7, %v544_v15  ;;  %v2033_v25 = vunpack.c.h.bf16 %v2503_v8  ;;  %v806_v26 = vmax.f32 %v678_v19, 0.0  ;;  %v546_v27 = vmul.f32 %v2029_v20, %v3042_v1  ;;  %v2509_v8 = vld [vmem:[%s3031_s19 + $0x140] sm:$0xff]  }
  0xb8   : > { %2562 = vst [vmem:[%s3071_s23 + $0xf0] sm:$0xff] %v2303_v18   ;;  %v547_v28 = vmul.f32 %v2032_v21, %v3042_v1  ;;  %v2036_v29 = vunpack.c.l.bf16 %v2504_v17  ;;  %v2308_v31 = vpack.c.bf16 %v805_v22, %v804_v14  ;;  %v680_v33 = vadd.f32 %v3047_v7, %v545_v24  ;;  %v2510_v21 = vld [vmem:[%s3031_s19 + $0x148] sm:$0xff]  }
  0xb9   : > { %v807_v32 = vmax.f32 %v679_v23, 0.0  ;;  %v548_v34 = vmul.f32 %v2033_v25, %v3042_v1  ;;  %v681_v35 = vadd.f32 %v3047_v7, %v546_v27  ;;  %v2037_v37 = vunpack.c.h.bf16 %v2504_v17 }
  0xba   : > { %v682_v36 = vadd.f32 %v3047_v7, %v547_v28  ;;  %v549_v38 = vmul.f32 %v2036_v29, %v3042_v1  ;;  %2563 = vst [vmem:[%s3071_s23 + $0xf8] sm:$0xff] %v2308_v31   ;;  %v808_v41 = vmax.f32 %v680_v33, 0.0  ;;  %v2040_v43 = vunpack.c.l.bf16 %v2505_v30 }
  0xbb   : > { %v2313_v40 = vpack.c.bf16 %v807_v32, %v806_v26  ;;  %v683_v42 = vadd.f32 %v3047_v7, %v548_v34  ;;  %v809_v44 = vmax.f32 %v681_v35, 0.0  ;;  %v550_v46 = vmul.f32 %v2037_v37, %v3042_v1  ;;  %v2511_v26 = vld [vmem:[%s3031_s19 + $0x150] sm:$0xff]   ;;  %v2512_v35 = vld [vmem:[%s3031_s19 + $0x158] sm:$0xff]  }
  0xbc   : > { %v810_v45 = vmax.f32 %v682_v36, 0.0  ;;  %v684_v47 = vadd.f32 %v3047_v7, %v549_v38  ;;  %v2041_v49 = vunpack.c.h.bf16 %v2505_v30  ;;  %v551_v50 = vmul.f32 %v2040_v43, %v3042_v1 }
  0xbd   : > { %2564 = vst [vmem:[%s3071_s23 + $0x100] sm:$0xff] %v2313_v40   ;;  %v811_v48 = vmax.f32 %v683_v42, 0.0  ;;  %v2044_v51 = vunpack.c.l.bf16 %v2506_v39  ;;  %v2318_v53 = vpack.c.bf16 %v809_v44, %v808_v41  ;;  %v685_v54 = vadd.f32 %v3047_v7, %v550_v46 }
  0xbe   : > { %v812_v55 = vmax.f32 %v684_v47, 0.0  ;;  %v2045_v56 = vunpack.c.h.bf16 %v2506_v39  ;;  %v552_v59 = vmul.f32 %v2041_v49, %v3042_v1  ;;  %v686_v60 = vadd.f32 %v3047_v7, %v551_v50 }
  0xbf   : > { %v2323_v58 = vpack.c.bf16 %v811_v48, %v810_v45  ;;  %v553_v61 = vmul.f32 %v2044_v51, %v3042_v1  ;;  %2565 = vst [vmem:[%s3071_s23 + $0x108] sm:$0xff] %v2318_v53   ;;  %v813_v62 = vmax.f32 %v685_v54, 0.0  ;;  %v2048_v0 = vunpack.c.l.bf16 %v2507_v52  ;;  %v2513_v48 = vld [vmem:[%s3031_s19 + $0x160] sm:$0xff]  }
  0xc0   : > { %v554_v63 = vmul.f32 %v2045_v56, %v3042_v1  ;;  %v2049_v2 = vunpack.c.h.bf16 %v2507_v52  ;;  %v687_v3 = vadd.f32 %v3047_v7, %v552_v59  ;;  %v814_v4 = vmax.f32 %v686_v60, 0.0 }
  0xc1   : > { %2566 = vst [vmem:[%s3071_s23 + $0x110] sm:$0xff] %v2323_v58   ;;  %v688_v5 = vadd.f32 %v3047_v7, %v553_v61  ;;  %v2052_v6 = vunpack.c.l.bf16 %v2508_v57  ;;  %v2328_v9 = vpack.c.bf16 %v813_v62, %v812_v55  ;;  %v555_v11 = vmul.f32 %v2048_v0, %v3042_v1 }
  0xc2   : > { %v689_v10 = vadd.f32 %v3047_v7, %v554_v63  ;;  %v556_v12 = vmul.f32 %v2049_v2, %v3042_v1  ;;  %v815_v13 = vmax.f32 %v687_v3, 0.0  ;;  %v2053_v15 = vunpack.c.h.bf16 %v2508_v57  ;;  %v2514_v57 = vld [vmem:[%s3031_s19 + $0x168] sm:$0xff]  }
  0xc3   : > { %v816_v14 = vmax.f32 %v688_v5, 0.0  ;;  %v557_v16 = vmul.f32 %v2052_v6, %v3042_v1  ;;  %2567 = vst [vmem:[%s3071_s23 + $0x118] sm:$0xff] %v2328_v9   ;;  %v690_v18 = vadd.f32 %v3047_v7, %v555_v11  ;;  %v2056_v20 = vunpack.c.l.bf16 %v2509_v8 }
  0xc4   : > { %v817_v17 = vmax.f32 %v689_v10, 0.0  ;;  %v691_v19 = vadd.f32 %v3047_v7, %v556_v12  ;;  %v2333_v22 = vpack.c.bf16 %v815_v13, %v814_v4  ;;  %v558_v23 = vmul.f32 %v2053_v15, %v3042_v1  ;;  %v2516_v13 = vld [vmem:[%s3031_s19 + $0x178] sm:$0xff]  }
  0xc5   : > { %v692_v24 = vadd.f32 %v3047_v7, %v557_v16  ;;  %v2057_v25 = vunpack.c.h.bf16 %v2509_v8  ;;  %v818_v28 = vmax.f32 %v690_v18, 0.0  ;;  %v559_v30 = vmul.f32 %v2056_v20, %v3042_v1  ;;  %v2515_v8 = vld [vmem:[%s3031_s19 + $0x170] sm:$0xff]  }
  0xc6   : > { %v2338_v27 = vpack.c.bf16 %v817_v17, %v816_v14  ;;  %v819_v29 = vmax.f32 %v691_v19, 0.0  ;;  %2568 = vst [vmem:[%s3071_s23 + $0x120] sm:$0xff] %v2333_v22   ;;  %v693_v31 = vadd.f32 %v3047_v7, %v558_v23  ;;  %v2060_v34 = vunpack.c.l.bf16 %v2510_v21 }
  0xc7   : > { %v820_v32 = vmax.f32 %v692_v24, 0.0  ;;  %v560_v33 = vmul.f32 %v2057_v25, %v3042_v1  ;;  %v694_v37 = vadd.f32 %v3047_v7, %v559_v30  ;;  %v2061_v38 = vunpack.c.h.bf16 %v2510_v21 }
  0xc8   : > { %2569 = vst [vmem:[%s3071_s23 + $0x128] sm:$0xff] %v2338_v27   ;;  %v2343_v36 = vpack.c.bf16 %v819_v29, %v818_v28  ;;  %v2064_v39 = vunpack.c.l.bf16 %v2511_v26  ;;  %v821_v40 = vmax.f32 %v693_v31, 0.0  ;;  %v561_v42 = vmul.f32 %v2060_v34, %v3042_v1 }
  0xc9   : > { %v695_v41 = vadd.f32 %v3047_v7, %v560_v33  ;;  %v2065_v43 = vunpack.c.h.bf16 %v2511_v26  ;;  %v822_v44 = vmax.f32 %v694_v37, 0.0  ;;  %v562_v45 = vmul.f32 %v2061_v38, %v3042_v1  ;;  %v2517_v26 = vld [vmem:[%s3031_s19 + $0x180] sm:$0xff]  }
  0xca   : > { %2570 = vst [vmem:[%s3071_s23 + $0x130] sm:$0xff] %v2343_v36   ;;  %v563_v46 = vmul.f32 %v2064_v39, %v3042_v1  ;;  %v2068_v47 = vunpack.c.l.bf16 %v2512_v35  ;;  %v2348_v49 = vpack.c.bf16 %v821_v40, %v820_v32  ;;  %v696_v51 = vadd.f32 %v3047_v7, %v561_v42  ;;  %v2518_v39 = vld [vmem:[%s3031_s19 + $0x188] sm:$0xff]  }
  0xcb   : > { %v823_v50 = vmax.f32 %v695_v41, 0.0  ;;  %v564_v52 = vmul.f32 %v2065_v43, %v3042_v1  ;;  %v697_v53 = vadd.f32 %v3047_v7, %v562_v45  ;;  %v2069_v55 = vunpack.c.h.bf16 %v2512_v35  ;;  %v3332_v41 = vld [vmem:[#allocation5] ss:$0 sm:$0xff]  ;;  %v3335_v43 = vld [vmem:[#allocation7] ss:$0 sm:$0xff]  ;;  %v2519_v45 = vld [vmem:[%s3031_s19 + $0x190] sm:$0xff]  }
  0xcc   : > { %v698_v54 = vadd.f32 %v3047_v7, %v563_v46  ;;  %v565_v56 = vmul.f32 %v2068_v47, %v3042_v1  ;;  %2571 = vst [vmem:[%s3071_s23 + $0x138] sm:$0xff] %v2348_v49   ;;  %v824_v59 = vmax.f32 %v696_v51, 0.0  ;;  %v2072_v61 = vunpack.c.l.bf16 %v2513_v48 }
  0xcd   : > { %v2353_v58 = vpack.c.bf16 %v823_v50, %v822_v44  ;;  %v699_v60 = vadd.f32 %v3047_v7, %v564_v52  ;;  %v825_v62 = vmax.f32 %v697_v53, 0.0  ;;  %v566_v0 = vmul.f32 %v2069_v55, %v3042_v1  ;;  %v2520_v53 = vld [vmem:[%s3031_s19 + $0x198] sm:$0xff]  }
  0xce   : > { %v826_v63 = vmax.f32 %v698_v54, 0.0  ;;  %v700_v2 = vadd.f32 %v3047_v7, %v565_v56  ;;  %v2073_v4 = vunpack.c.h.bf16 %v2513_v48  ;;  %v567_v5 = vmul.f32 %v2072_v61, %v3042_v1 }
  0xcf   : > { %2572 = vst [vmem:[%s3071_s23 + $0x140] sm:$0xff] %v2353_v58   ;;  %v827_v3 = vmax.f32 %v699_v60, 0.0  ;;  %v2076_v6 = vunpack.c.l.bf16 %v2514_v57  ;;  %v2358_v9 = vpack.c.bf16 %v825_v62, %v824_v59  ;;  %v701_v10 = vadd.f32 %v3047_v7, %v566_v0 }
  0xd0   : > { %v828_v11 = vmax.f32 %v700_v2, 0.0  ;;  %v2077_v12 = vunpack.c.h.bf16 %v2514_v57  ;;  %v568_v15 = vmul.f32 %v2073_v4, %v3042_v1  ;;  %v702_v16 = vadd.f32 %v3047_v7, %v567_v5 }
  0xd1   : > { %v2363_v14 = vpack.c.bf16 %v827_v3, %v826_v63  ;;  %v569_v17 = vmul.f32 %v2076_v6, %v3042_v1  ;;  %2573 = vst [vmem:[%s3071_s23 + $0x148] sm:$0xff] %v2358_v9   ;;  %v829_v18 = vmax.f32 %v701_v10, 0.0  ;;  %v2080_v20 = vunpack.c.l.bf16 %v2515_v8  ;;  %v2521_v3 = vld [vmem:[%s3031_s19 + $0x1a0] sm:$0xff]  }
  0xd2   : > { %v570_v19 = vmul.f32 %v2077_v12, %v3042_v1  ;;  %v2081_v21 = vunpack.c.h.bf16 %v2515_v8  ;;  %v703_v22 = vadd.f32 %v3047_v7, %v568_v15  ;;  %v830_v23 = vmax.f32 %v702_v16, 0.0 }
  0xd3   : > { %2574 = vst [vmem:[%s3071_s23 + $0x150] sm:$0xff] %v2363_v14   ;;  %v704_v24 = vadd.f32 %v3047_v7, %v569_v17  ;;  %v2084_v25 = vunpack.c.l.bf16 %v2516_v13  ;;  %v2368_v27 = vpack.c.bf16 %v829_v18, %v828_v11  ;;  %v571_v29 = vmul.f32 %v2080_v20, %v3042_v1 }
  0xd4   : > { %v705_v28 = vadd.f32 %v3047_v7, %v570_v19  ;;  %v572_v30 = vmul.f32 %v2081_v21, %v3042_v1  ;;  %v831_v31 = vmax.f32 %v703_v22, 0.0  ;;  %v2085_v33 = vunpack.c.h.bf16 %v2516_v13  ;;  %v2522_v13 = vld [vmem:[%s3031_s19 + $0x1a8] sm:$0xff]  }
  0xd5   : > { %v832_v32 = vmax.f32 %v704_v24, 0.0  ;;  %v573_v34 = vmul.f32 %v2084_v25, %v3042_v1  ;;  %2575 = vst [vmem:[%s3071_s23 + $0x158] sm:$0xff] %v2368_v27   ;;  %v706_v36 = vadd.f32 %v3047_v7, %v571_v29  ;;  %v2088_v38 = vunpack.c.l.bf16 %v2517_v26 }
  0xd6   : > { %v833_v35 = vmax.f32 %v705_v28, 0.0  ;;  %v707_v37 = vadd.f32 %v3047_v7, %v572_v30  ;;  %v2373_v40 = vpack.c.bf16 %v831_v31, %v830_v23  ;;  %v574_v42 = vmul.f32 %v3332_v41, %v2085_v33  ;;  %v2524_v31 = vld [vmem:[%s3031_s19 + $0x1b8] sm:$0xff]  }
  0xd7   : > { %v708_v1 = vadd.f32 %v3335_v43, %v573_v34  ;;  %v2089_v44 = vunpack.c.h.bf16 %v2517_v26  ;;  %v834_v47 = vmax.f32 %v706_v36, 0.0  ;;  %v575_v7 = vmul.f32 %v3332_v41, %v2088_v38  ;;  %v2523_v26 = vld [vmem:[%s3031_s19 + $0x1b0] sm:$0xff]  }
  0xd8   : > { %v2378_v46 = vpack.c.bf16 %v833_v35, %v832_v32  ;;  %v835_v48 = vmax.f32 %v707_v37, 0.0  ;;  %2576 = vst [vmem:[%s3071_s23 + $0x160] sm:$0xff] %v2373_v40   ;;  %v709_v49 = vadd.f32 %v3335_v43, %v574_v42  ;;  %v2092_v52 = vunpack.c.l.bf16 %v2518_v39 }
  0xd9   : > { %v836_v50 = vmax.f32 %v708_v1, 0.0  ;;  %v576_v51 = vmul.f32 %v3332_v41, %v2089_v44  ;;  %v710_v55 = vadd.f32 %v3335_v43, %v575_v7  ;;  %v2093_v56 = vunpack.c.h.bf16 %v2518_v39 }
  0xda   : > { %2577 = vst [vmem:[%s3071_s23 + $0x168] sm:$0xff] %v2378_v46   ;;  %v2383_v54 = vpack.c.bf16 %v835_v48, %v834_v47  ;;  %v2096_v57 = vunpack.c.l.bf16 %v2519_v45  ;;  %v837_v58 = vmax.f32 %v709_v49, 0.0  ;;  %v577_v60 = vmul.f32 %v3332_v41, %v2092_v52 }
  0xdb   : > { %v711_v59 = vadd.f32 %v3335_v43, %v576_v51  ;;  %v2097_v61 = vunpack.c.h.bf16 %v2519_v45  ;;  %v838_v62 = vmax.f32 %v710_v55, 0.0  ;;  %v578_v63 = vmul.f32 %v3332_v41, %v2093_v56  ;;  %v2525_v45 = vld [vmem:[%s3031_s19 + $0x1c0] sm:$0xff]  }
  0xdc   : > { %2578 = vst [vmem:[%s3071_s23 + $0x170] sm:$0xff] %v2383_v54   ;;  %v579_v0 = vmul.f32 %v3332_v41, %v2096_v57  ;;  %v2100_v2 = vunpack.c.l.bf16 %v2520_v53  ;;  %v2388_v4 = vpack.c.bf16 %v837_v58, %v836_v50  ;;  %v712_v6 = vadd.f32 %v3335_v43, %v577_v60  ;;  %v2526_v57 = vld [vmem:[%s3031_s19 + $0x1c8] sm:$0xff]  }
  0xdd   : > { %v839_v5 = vmax.f32 %v711_v59, 0.0  ;;  %v580_v8 = vmul.f32 %v3332_v41, %v2097_v61  ;;  %v713_v9 = vadd.f32 %v3335_v43, %v578_v63  ;;  %v2101_v11 = vunpack.c.h.bf16 %v2520_v53 }
  0xde   : > { %v714_v10 = vadd.f32 %v3335_v43, %v579_v0  ;;  %v581_v12 = vmul.f32 %v3332_v41, %v2100_v2  ;;  %2579 = vst [vmem:[%s3071_s23 + $0x178] sm:$0xff] %v2388_v4   ;;  %v840_v15 = vmax.f32 %v712_v6, 0.0  ;;  %v2104_v17 = vunpack.c.l.bf16 %v2521_v3 }
  0xdf   : > { %v2393_v14 = vpack.c.bf16 %v839_v5, %v838_v62  ;;  %v715_v16 = vadd.f32 %v3335_v43, %v580_v8  ;;  %v841_v18 = vmax.f32 %v713_v9, 0.0  ;;  %v582_v20 = vmul.f32 %v3332_v41, %v2101_v11  ;;  %v2527_v62 = vld [vmem:[%s3031_s19 + $0x1d0] sm:$0xff]   ;;  %v2528_v9 = vld [vmem:[%s3031_s19 + $0x1d8] sm:$0xff]  }
  0xe0   : > { %v842_v19 = vmax.f32 %v714_v10, 0.0  ;;  %v716_v21 = vadd.f32 %v3335_v43, %v581_v12  ;;  %v2105_v23 = vunpack.c.h.bf16 %v2521_v3  ;;  %v583_v24 = vmul.f32 %v3332_v41, %v2104_v17 }
  0xe1   : > { %2580 = vst [vmem:[%s3071_s23 + $0x180] sm:$0xff] %v2393_v14   ;;  %v843_v22 = vmax.f32 %v715_v16, 0.0  ;;  %v2108_v25 = vunpack.c.l.bf16 %v2522_v13  ;;  %v2398_v27 = vpack.c.bf16 %v841_v18, %v840_v15  ;;  %v717_v28 = vadd.f32 %v3335_v43, %v582_v20 }
  0xe2   : > { %v844_v29 = vmax.f32 %v716_v21, 0.0  ;;  %v2109_v30 = vunpack.c.h.bf16 %v2522_v13  ;;  %v584_v33 = vmul.f32 %v3332_v41, %v2105_v23  ;;  %v718_v34 = vadd.f32 %v3335_v43, %v583_v24 }
  0xe3   : > { %v2403_v32 = vpack.c.bf16 %v843_v22, %v842_v19  ;;  %v585_v35 = vmul.f32 %v3332_v41, %v2108_v25  ;;  %2581 = vst [vmem:[%s3071_s23 + $0x188] sm:$0xff] %v2398_v27   ;;  %v845_v36 = vmax.f32 %v717_v28, 0.0  ;;  %v2112_v38 = vunpack.c.l.bf16 %v2523_v26  ;;  %v2529_v22 = vld [vmem:[%s3031_s19 + $0x1e0] sm:$0xff]  }
  0xe4   : > { %v586_v37 = vmul.f32 %v3332_v41, %v2109_v30  ;;  %v2113_v39 = vunpack.c.h.bf16 %v2523_v26  ;;  %v719_v40 = vadd.f32 %v3335_v43, %v584_v33  ;;  %v846_v42 = vmax.f32 %v718_v34, 0.0 }
  0xe5   : > { %2582 = vst [vmem:[%s3071_s23 + $0x190] sm:$0xff] %v2403_v32   ;;  %v720_v1 = vadd.f32 %v3335_v43, %v585_v35  ;;  %v2116_v44 = vunpack.c.l.bf16 %v2524_v31  ;;  %v2408_v46 = vpack.c.bf16 %v845_v36, %v844_v29  ;;  %v587_v48 = vmul.f32 %v3332_v41, %v2112_v38 }
  0xe6   : > { %v721_v47 = vadd.f32 %v3335_v43, %v586_v37  ;;  %v588_v7 = vmul.f32 %v3332_v41, %v2113_v39  ;;  %v847_v49 = vmax.f32 %v719_v40, 0.0  ;;  %v2117_v51 = vunpack.c.h.bf16 %v2524_v31  ;;  %v2530_v31 = vld [vmem:[%s3031_s19 + $0x1e8] sm:$0xff]  }
  0xe7   : > { %v848_v50 = vmax.f32 %v720_v1, 0.0  ;;  %v589_v52 = vmul.f32 %v3332_v41, %v2116_v44  ;;  %2583 = vst [vmem:[%s3071_s23 + $0x198] sm:$0xff] %v2408_v46   ;;  %v722_v54 = vadd.f32 %v3335_v43, %v587_v48  ;;  %v2120_v56 = vunpack.c.l.bf16 %v2525_v45 }
  0xe8   : > { %v849_v53 = vmax.f32 %v721_v47, 0.0  ;;  %v723_v55 = vadd.f32 %v3335_v43, %v588_v7  ;;  %v2413_v58 = vpack.c.bf16 %v847_v49, %v846_v42  ;;  %v590_v59 = vmul.f32 %v3332_v41, %v2117_v51  ;;  %v2532_v49 = vld [vmem:[%s3031_s19 + $0x1f8] sm:$0xff]  }
  0xe9   : > { %v724_v60 = vadd.f32 %v3335_v43, %v589_v52  ;;  %v2121_v61 = vunpack.c.h.bf16 %v2525_v45  ;;  %v850_v0 = vmax.f32 %v722_v54, 0.0  ;;  %v591_v3 = vmul.f32 %v3332_v41, %v2120_v56  ;;  %v2531_v45 = vld [vmem:[%s3031_s19 + $0x1f0] sm:$0xff]  }
  0xea   : > { %v2418_v63 = vpack.c.bf16 %v849_v53, %v848_v50  ;;  %v851_v2 = vmax.f32 %v723_v55, 0.0  ;;  %2584 = vst [vmem:[%s3071_s23 + $0x1a0] sm:$0xff] %v2413_v58   ;;  %v725_v4 = vadd.f32 %v3335_v43, %v590_v59  ;;  %v2124_v8 = vunpack.c.l.bf16 %v2526_v57 }
  0xeb   : > { %v852_v5 = vmax.f32 %v724_v60, 0.0  ;;  %v592_v6 = vmul.f32 %v3332_v41, %v2121_v61  ;;  %v726_v11 = vadd.f32 %v3335_v43, %v591_v3  ;;  %v2125_v12 = vunpack.c.h.bf16 %v2526_v57 }
  0xec   : > { %2585 = vst [vmem:[%s3071_s23 + $0x1a8] sm:$0xff] %v2418_v63   ;;  %v2423_v10 = vpack.c.bf16 %v851_v2, %v850_v0  ;;  %v2128_v13 = vunpack.c.l.bf16 %v2527_v62  ;;  %v853_v14 = vmax.f32 %v725_v4, 0.0  ;;  %v593_v16 = vmul.f32 %v3332_v41, %v2124_v8 }
  0xed   : > { %v727_v15 = vadd.f32 %v3335_v43, %v592_v6  ;;  %v2129_v17 = vunpack.c.h.bf16 %v2527_v62  ;;  %v854_v18 = vmax.f32 %v726_v11, 0.0  ;;  %v594_v19 = vmul.f32 %v3332_v41, %v2125_v12 }
  0xee   : > { %2586 = vst [vmem:[%s3071_s23 + $0x1b0] sm:$0xff] %v2423_v10   ;;  %v595_v20 = vmul.f32 %v3332_v41, %v2128_v13  ;;  %v2132_v21 = vunpack.c.l.bf16 %v2528_v9  ;;  %v2428_v23 = vpack.c.bf16 %v853_v14, %v852_v5  ;;  %v728_v25 = vadd.f32 %v3335_v43, %v593_v16 }
  0xef   : > { %v855_v24 = vmax.f32 %v727_v15, 0.0  ;;  %v596_v26 = vmul.f32 %v3332_v41, %v2129_v17  ;;  %v729_v27 = vadd.f32 %v3335_v43, %v594_v19  ;;  %v2133_v29 = vunpack.c.h.bf16 %v2528_v9 }
  0xf0   : > { %v730_v28 = vadd.f32 %v3335_v43, %v595_v20  ;;  %v597_v30 = vmul.f32 %v3332_v41, %v2132_v21  ;;  %2587 = vst [vmem:[%s3071_s23 + $0x1b8] sm:$0xff] %v2428_v23   ;;  %v856_v33 = vmax.f32 %v728_v25, 0.0  ;;  %v2136_v35 = vunpack.c.l.bf16 %v2529_v22 }
  0xf1   : > { %v2433_v32 = vpack.c.bf16 %v855_v24, %v854_v18  ;;  %v731_v34 = vadd.f32 %v3335_v43, %v596_v26  ;;  %v857_v36 = vmax.f32 %v729_v27, 0.0  ;;  %v598_v38 = vmul.f32 %v3332_v41, %v2133_v29 }
  0xf2   : > { %v858_v37 = vmax.f32 %v730_v28, 0.0  ;;  %v732_v39 = vadd.f32 %v3335_v43, %v597_v30  ;;  %v2137_v42 = vunpack.c.h.bf16 %v2529_v22  ;;  %v599_v1 = vmul.f32 %v3332_v41, %v2136_v35 }
  0xf3   : > { %2588 = vst [vmem:[%s3071_s23 + $0x1c0] sm:$0xff] %v2433_v32   ;;  %v859_v40 = vmax.f32 %v731_v34, 0.0  ;;  %v2140_v44 = vunpack.c.l.bf16 %v2530_v31  ;;  %v2438_v46 = vpack.c.bf16 %v857_v36, %v856_v33  ;;  %v733_v47 = vadd.f32 %v3335_v43, %v598_v38 }
  0xf4   : > { %v860_v48 = vmax.f32 %v732_v39, 0.0  ;;  %v2141_v7 = vunpack.c.h.bf16 %v2530_v31  ;;  %v600_v51 = vmul.f32 %v3332_v41, %v2137_v42  ;;  %v734_v52 = vadd.f32 %v3335_v43, %v599_v1 }
  0xf5   : > { %v2443_v50 = vpack.c.bf16 %v859_v40, %v858_v37  ;;  %v601_v53 = vmul.f32 %v3332_v41, %v2140_v44  ;;  %2589 = vst [vmem:[%s3071_s23 + $0x1c8] sm:$0xff] %v2438_v46   ;;  %v861_v54 = vmax.f32 %v733_v47, 0.0  ;;  %v2144_v56 = vunpack.c.l.bf16 %v2531_v45 }
  0xf6   : > { %v602_v55 = vmul.f32 %v3332_v41, %v2141_v7  ;;  %v2145_v57 = vunpack.c.h.bf16 %v2531_v45  ;;  %v735_v58 = vadd.f32 %v3335_v43, %v600_v51  ;;  %v862_v59 = vmax.f32 %v734_v52, 0.0 }
  0xf7   : > { %2590 = vst [vmem:[%s3071_s23 + $0x1d0] sm:$0xff] %v2443_v50   ;;  %v736_v60 = vadd.f32 %v3335_v43, %v601_v53  ;;  %v2148_v61 = vunpack.c.l.bf16 %v2532_v49  ;;  %v2448_v62 = vpack.c.bf16 %v861_v54, %v860_v48  ;;  %v603_v0 = vmul.f32 %v3332_v41, %v2144_v56 }
  0xf8   : > { %v737_v63 = vadd.f32 %v3335_v43, %v602_v55  ;;  %v604_v2 = vmul.f32 %v3332_v41, %v2145_v57  ;;  %v863_v3 = vmax.f32 %v735_v58, 0.0  ;;  %v2149_v5 = vunpack.c.h.bf16 %v2532_v49 }
  0xf9   : > { %v864_v4 = vmax.f32 %v736_v60, 0.0  ;;  %v605_v6 = vmul.f32 %v3332_v41, %v2148_v61  ;;  %2591 = vst [vmem:[%s3071_s23 + $0x1d8] sm:$0xff] %v2448_v62   ;;  %v738_v9 = vadd.f32 %v3335_v43, %v603_v0 }
  0xfa   : > { %v865_v8 = vmax.f32 %v737_v63, 0.0  ;;  %v739_v10 = vadd.f32 %v3335_v43, %v604_v2  ;;  %v2453_v11 = vpack.c.bf16 %v863_v3, %v862_v59  ;;  %v606_v12 = vmul.f32 %v3332_v41, %v2149_v5 }
  0xfb   : > { %v740_v13 = vadd.f32 %v3335_v43, %v605_v6  ;;  %v866_v15 = vmax.f32 %v738_v9, 0.0 }
  0xfc   : > { %v2458_v14 = vpack.c.bf16 %v865_v8, %v864_v4  ;;  %v867_v16 = vmax.f32 %v739_v10, 0.0  ;;  %2592 = vst [vmem:[%s3071_s23 + $0x1e0] sm:$0xff] %v2453_v11   ;;  %v741_v17 = vadd.f32 %v3335_v43, %v606_v12 }
  0xfd   : > { %v868_v18 = vmax.f32 %v740_v13, 0.0 }
  0xfe   : > { %2593 = vst [vmem:[%s3071_s23 + $0x1e8] sm:$0xff] %v2458_v14   ;;  %v2463_v19 = vpack.c.bf16 %v867_v16, %v866_v15  ;;  %v869_v20 = vmax.f32 %v741_v17, 0.0 }
 0x100   : > { %2594 = vst [vmem:[%s3071_s23 + $0x1f0] sm:$0xff] %v2463_v19   ;;  %v2468_v41 = vpack.c.bf16 %v869_v20, %v868_v18 }
 0x102   : > { %2595 = vst [vmem:[%s3071_s23 + $0x1f8] sm:$0xff] %v2468_v41  }
 0x103   : > { %2768 = shalt.err (!%p2765_p6)
}
 0x104   : > { %s2769_s6 = scalar_lea.hbm %s3441_s11, 8192  ;;  %s2773_s29 = scalar_lea.hbm %s3491_s3, 16384 }
 0x105   : > { %p2770_p12 = scmp.ne.s32.totalorder %s3441_s11, %s2769_s6  ;;  %p2774_p11 = scmp.lt.u32.totalorder %s3441_s11, %s3491_s3 }
 0x106   : > { %p2775_p7 = scmp.lt.u32.totalorder %s2773_s29, %s2769_s6  ;;  %p2777_p8 = scmp.lt.u32.totalorder %s2769_s6, %s3441_s11 }
 0x107   : > { %p2771_p13 = pnand %p2770_p12, %p3510_p4 }
 0x108   : > { %p2776_p3 = por %p2775_p7, %p2774_p11 }
 0x109   : > { %p2772_p1 = pneg %p2771_p13 }
 0x10a   : > { %p2778_p5 = por %p2777_p8, %p2776_p3 }
 0x10c   : > { %p2779_p10 = pnand %p2778_p5, %p2772_p1 }
 0x10e   : > { %2782 = shalt.err (!%p2779_p10)
}
 0x10f   : > { %s2833_s19 = smov 64   ;;  %s2834_s23 = smov 4  }
 0x110   : > { %2606 = dma.vmem_to_hbm [thread:$0]  (%p3510_p4), %s3443_s30, 8192, %s3441_s11, %s1511_s20, %s2833_s19, %s2833_s19, %s2834_s23  }
 0x111 PF: > { %s1539_s26 = sand.u32 1, %s2813_s12   ;;  %p3511_p2 = scmp.ne.s32.totalorder %s3500_s25, 0 }
 0x112   : > { %p3512_p0 = scmp.ge.s32.totalorder %s2825_s15, 2  ;;  %s1540_s9 = scalar_lea.sflag [#allocation4], %s1539_s26 }
 0x114   : > { %p2620_p9 = pnand %p3512_p0, %p3511_p2 }
 0x116   : > { %2808 = dma.done.wait (!%p2620_p9), %s1540_s9, 8192  }
 0x117   : > { %2810 = vsyncadd (!%p2620_p9), %s1540_s9, 4294959104  ;;  %p17_p6 = scmp.ge.s32.totalorder %s2880_s18, 4   ;;  %s3513_s12 = smov %s2817_s13 }
 0x118   : > { %s3514_s13 = smov %s2821_s14  ;;  %s3515_s14 = smov %s2892_s21 }
 0x119   : > { %s3516_s15 = smov %s2880_s18  ;;  %19 = sbr.rel (!%p17_p6) target bundleno = 6 (0x6), region = 85 }
 0x120   :  { %1545 = vsyncpa [#allocation3], 1 }
 0x121   :  { %1547 = vsyncpa [#allocation3 + $0x1], 1 }
 0x122   :  { %1548 = vsyncpa [#allocation6], 1 }
 0x123   :  { %1549 = vsyncpa [#allocation4], 1 }
 0x124   :  { %1551 = vsyncpa [#allocation4 + $0x1], 1 }

// kernel: fwd.7
= control target key start
LH: loop header
LB: loop body
LE: loop exit
PB: predicated region body
PF: predicated region fallthrough
CT: control target
= control target key end

     0   :  { %s5505_s0 = inlined_call_operand.hbm [shape: bf16[4,2048,512], index: 0, kind: input, shape index: {}]   ;;  %s5506_s1 = inlined_call_operand.hbm [shape: bf16[4,512,32], index: 1, kind: input, shape index: {}]   ;;  %s5507_s2 = inlined_call_operand.hbm [shape: f32[1,32], index: 2, kind: input, shape index: {}]   ;;  %s5508_s3 = inlined_call_operand.hbm [shape: bf16[4,2048,32], index: 3, kind: output, shape index: {0}]   ;;  %s5509_s4 = inlined_call_operand.hbm [shape: f32[4,4,1,32], index: 4, kind: output, shape index: {1}]   ;;  %s5510_s5 = inlined_call_operand.hbm [shape: f32[4,4,1,32], index: 5, kind: output, shape index: {2}]  }
   0x1   :  { %5534 = sst [smem:[#allocation27_spill]] %s5507_s2 }
   0x2   :  { %5535 = sst [smem:[#allocation28_spill]] %s5508_s3 }
   0x3   :  { %5536 = sst [smem:[#allocation29_spill]] %s5509_s4 }
   0x4   :  { %5537 = sst [smem:[#allocation30_spill]] %s5510_s5 }
   0x5   :  { %11 = vsyncpa [#allocation4], 0 }
   0x6   :  { %13 = vsyncpa [#allocation4 + $0x1], 0 }
   0x7   :  { %14 = vsyncpa [#allocation7], 0 }
   0x8   :  { %16 = vsyncpa [#allocation7 + $0x1], 0 }
   0x9   :  { %17 = vsyncpa [#allocation5], 0 }
   0xa   :  { %19 = vsyncpa [#allocation5 + $0x1], 0 }
   0xb   :  { %20 = vsyncpa [#allocation11], 0 }
   0xc   :  { %22 = vsyncpa [#allocation11 + $0x1], 0  ;;  %s4256_s18 = smov 0   ;;  %s4258_s19 = smov 0  }
   0xd   :  { %s4260_s20 = smov 0   ;;  %s4262_s21 = smov 0  }
   0xe   :  { %s4264_s22 = smov 0   ;;  %s4266_s23 = smov 0  }
   0xf   :  { %s4268_s24 = smov 0   ;;  %s4270_s25 = smov 0  }
  0x10   :  { %s4272_s26 = smov 0   ;;  %s4274_s27 = smov 0  }
  0x11   :  { %s4276_s28 = smov 0  }
  0x12 LB: > { %5538 = sst [smem:[#allocation18_spill]] %s4174_s19  ;;  %s4310_s29 = sadd.s32 4294967295, %s4210_s28   ;;  %s4210_s28 = sphi %s4276_s28, %s28_s28   ;;  %s4206_s27 = sphi %s4274_s27, %s5595_s27   ;;  %s4202_s26 = sphi %s4272_s26, %s5586_s26   ;;  %s4198_s25 = sphi %s4270_s25, %s5594_s25   ;;  %s4194_s24 = sphi %s4268_s24, %s5593_s24   ;;  %s4190_s23 = sphi %s4266_s23, %s5592_s23   ;;  %s4186_s22 = sphi %s4264_s22, %s5591_s22   ;;  %s4182_s21 = sphi %s4262_s21, %s5590_s21   ;;  %s4178_s20 = sphi %s4260_s20, %s5589_s20   ;;  %s4174_s19 = sphi %s4258_s19, %s5588_s19   ;;  %s4170_s18 = sphi %s4256_s18, %s5587_s18  }
  0x13   : > { %5539 = sst [smem:[#allocation19_spill]] %s4182_s21  ;;  %s5512_s30 = sadd.s32 4294967294, %s4210_s28  }
  0x14   : > { %5540 = sst [smem:[#allocation20_spill]] %s4194_s24  ;;  %p65_p0 = scmp.ne.s32.totalorder %s4190_s23, %s4186_s22 }
  0x15   : > { %5541 = sst [smem:[#allocation21_spill]] %s4198_s25  ;;  %p66_p1 = scmp.eq.s32.totalorder %s4210_s28, 0 }
  0x16   : > { %5542 = sst [smem:[#allocation22_spill]] %s4202_s26  ;;  %p71_p2 = scmp.ne.s32.totalorder %s4186_s22, %s4182_s21 }
  0x17   : > { %p5516_p3 = scmp.eq.s32.totalorder %s4310_s29, 0  ;;  %p4322_p4 = por %p66_p1, %p65_p0 }
  0x18   : > { %p93_p6 = scmp.ne.s32.totalorder %s4178_s20, %s4174_s19  ;;  %p99_p7 = scmp.ne.s32.totalorder %s4174_s19, %s4170_s18 }
  0x19   : > { %s5543_s6 = scalar_select %p4322_p4, 1, 0 }
  0x1a   : > { %p4329_p5 = por %p5516_p3, %p71_p2  ;;  %p146_p8 = scmp.eq.s32.totalorder %s4310_s29, 15 }
  0x1b   : > { %p4337_p9 = por %p93_p6, %p66_p1  ;;  %p152_p10 = scmp.eq.s32.totalorder %s5512_s30, 15 }
  0x1c   : > { %s5544_s8 = scalar_select %p4329_p5, 1, 0 }
  0x1d   : > { %p4345_p11 = por %p99_p7, %p5516_p3  ;;  %p4352_p12 = por %p146_p8, %p65_p0 }
  0x1e   : > { %p4356_p13 = por %p152_p10, %p71_p2  ;;  %p3253_p1 = scmp.ge.s32.totalorder %s4210_s28, 1 }
  0x1f   : > { %s5546_s10 = scalar_select %p4345_p11, 1, 0 }
  0x20   : > { %s5548_s11 = scalar_select %p4352_p12, 1, 0 }
  0x21   : > { %5547 = sst [smem:[#allocation23_spill]] %s5546_s10  ;;  %p215_p6 = scmp.lt.s32.totalorder %s4210_s28, 17 }
  0x22   : > { %5549 = sst [smem:[#allocation24_spill]] %s5548_s11  ;;  %s4212_s14 = smov [#allocation8]  }
  0x23   : > { %s5550_s12 = scalar_select %p4356_p13, 1, 0 }
  0x24   : > { %p4362_p5 = pnand %p3253_p1, %p215_p6  ;;  %s228_s15 = sshll.u32 %s4212_s14, 4  ;;  %s229_s15 = int_to_ptr.vmem [resolvable:$true] %s228_s15 }
  0x25   : > { %5551 = sst [smem:[#allocation25_spill]] %s5550_s12  ;;  %p5518_p7 = scmp.lt.s32.totalorder %s4210_s28, 16 }
  0x26   : > { %s5552_s13 = scalar_select %p4362_p5, 1, 0 }
  0x27   : > { %p3584_p0 = pneg %p4362_p5  ;;  %p4373_p8 = pnand %p5518_p7, %p4337_p9 }
  0x28   : > { %s43_s18 = sadd.s32 1, %s4202_s26  ;;  %s5555_s2 = sld [smem:[#allocation27_spill]] }
  0x29   : > { %s5553_s16 = scalar_select %p4373_p8, 1, 0 }
  0x2a   : > { %p4379_p2 = pnand %p3584_p0, %p5516_p3 }
  0x2c   : > { %p3934_p9 = pneg %p4379_p2 }
  0x2e   : > { %s3932_s14 = scalar_lea.hbm %s5555_s2, 16 }
  0x2f   : > { %p3933_p10 = scmp.ne.s32.totalorder %s5555_s2, %s3932_s14  ;;  %p3939_p0 = scmp.lt.u32.totalorder %s3932_s14, %s5555_s2 }
  0x31   : > { %p3935_p1 = pnand %p3934_p9, %p3933_p10 }
  0x33   : > { %p3936_p6 = pneg %p3935_p1 }
  0x35   : > { %p3941_p3 = pnand %p3939_p0, %p3936_p6 }
  0x37   : > { %3944 = shalt.err (!%p3941_p3)
}
  0x38   : > { %s3945_s4 = scalar_lea.vmem %s229_s15, 16  ;;  %s3952_s30 = scalar_lea.vmem %s229_s15, 32 }
  0x39   : > { %p3946_p7 = scmp.ne.s32.totalorder %s229_s15, %s3945_s4  ;;  %p3953_p11 = scmp.lt.s32.totalorder %s229_s15, %s229_s15 }
  0x3a   : > { %p3954_p5 = scmp.lt.s32.totalorder %s3952_s30, %s3945_s4 }
  0x3b   : > { %p3948_p13 = pnand %p3946_p7, %p3934_p9 }
  0x3c   : > { %p3955_p8 = por %p3954_p5, %p3953_p11 }
  0x3d   : > { %p3949_p12 = pneg %p3948_p13 }
  0x3f   : > { %p3956_p4 = pnand %p3955_p8, %p3949_p12 }
  0x41   : > { %3959 = shalt.err (!%p3956_p4)
}
  0x42   : > { %3587 = dma.hbm_to_vmem [thread:$0]  (!%p4379_p2), %s5555_s2, 16, %s229_s15, [#allocation7]  }
  0x43   : > { %p45_p3 = scmp.ge.s32.totalorder %s43_s18, 4  ;;  %s47_s5 = sadd.s32 1, %s4206_s27 }
  0x44   : > { %s58_s4 = sadd.s32 1, %s4190_s23  ;;  %s239_s12 = sand.u32 1, %s4190_s23  }
  0x45   : > { %s5597_s18 = smov (%p45_p3, %s43_s18), 0  ;;  %s5599_s5 = smov (!%p45_p3, %s47_s5), %s4206_s27 }
  0x46   : > { %5556 = sst [smem:[#allocation26_spill]] %s5597_s18  ;;  %s52_s17 = ssub.s32 %s4202_s26, %s5597_s18 }
  0x47   : > { %p49_p4 = scmp.ge.s32.totalorder %s5599_s5, 4  ;;  %s3256_s14 = sshll.u32 %s239_s12, 10 }
  0x48   : > { %s3504_s9 = sshll.u32 %s4202_s26, 8  ;;  %s3259_s15 = sshll.u32 %s4206_s27, 10 }
  0x49   : > { %s5601_s5 = smov (%p49_p4, %s5599_s5), 0  ;;  %s243_s30 = scalar_lea.vmem [#allocation3], %s3256_s14 }
  0x4a   : > { %s255_s21 = sshll.u32 %s243_s30, 4  ;;  %s51_s7 = ssub.s32 %s4206_s27, %s5601_s5  ;;  %s4427_s21 = int_to_ptr.vmem [resolvable:$true] %s255_s21 }
  0x4b   : > { %s252_s2 = sadd.s32 %s3504_s9, %s3259_s15  ;;  %s53_s11 = sor.u32 %s52_s17, %s51_s7 }
  0x4c   : > { %p84_p5 = scmp.eq.s32.totalorder %s51_s7, 0  ;;  %p56_p11 = scmp.eq.s32.totalorder %s53_s11, 0 }
  0x4d   : > { %s3260_s3 = sshll.u32 %s252_s2, 6  ;;  %s5557_s25 = sadd.s32 1, %s4178_s20 }
  0x4e   : > { %s4417_s18 = scalar_select %p84_p5, %s4178_s20, %s5557_s25  }
  0x4f   : > { %s4420_s24 = scalar_select %p56_p11, %s4190_s23, %s58_s4  }
  0x50   : > { %s4425_s19 = scalar_lea.hbm %s5505_s0, %s3260_s3  ;;  %p5558_p12 = scmp.ne.s32.totalorder %s5543_s6, 0 }
  0x51   : > { %p5559_p13 = scmp.lt.s32.totalorder %s4210_s28, 16  ;;  %s265_s25 = sand.u32 1, %s4210_s28  }
  0x52   : > { %s4438_s11 = scalar_lea.sflag [#allocation4], %s239_s12  ;;  %s3960_s26 = scalar_lea.hbm %s4425_s19, 16384 }
  0x53   : > { %p4433_p7 = pnand %p5559_p13, %p5558_p12  ;;  %p3961_p8 = scmp.ne.s32.totalorder %s4425_s19, %s3960_s26 }
  0x54   : > { %s3965_s10 = scalar_lea.hbm %s5505_s0, 262144  ;;  %p3966_p1 = scmp.lt.u32.totalorder %s4425_s19, %s5505_s0 }
  0x55   : > { %p3962_p2 = pneg %p4433_p7  ;;  %p3967_p6 = scmp.lt.u32.totalorder %s3965_s10, %s3960_s26 }
  0x56   : > { %p3969_p3 = scmp.lt.u32.totalorder %s3960_s26, %s4425_s19 }
  0x57   : > { %p3963_p10 = pnand %p3962_p2, %p3961_p8  ;;  %p3968_p0 = por %p3967_p6, %p3966_p1 }
  0x59   : > { %p3964_p9 = pneg %p3963_p10  ;;  %p3970_p4 = por %p3969_p3, %p3968_p0 }
  0x5b   : > { %p3971_p5 = pnand %p3970_p4, %p3964_p9 }
  0x5d   : > { %3974 = shalt.err (!%p3971_p5)
}
  0x5e   : > { %s3975_s12 = scalar_lea.vmem %s4427_s21, 16384  ;;  %s4213_s14 = smov [#allocation3]  }
  0x5f   : > { %p3976_p11 = scmp.ne.s32.totalorder %s4427_s21, %s3975_s12  ;;  %s3980_s9 = sshll.u32 %s4213_s14, 4  ;;  %s3981_s9 = int_to_ptr.vmem [resolvable:$false] %s3980_s9 }
  0x60   : > { %s3982_s15 = scalar_lea.vmem %s3981_s9, 32768  ;;  %p3983_p8 = scmp.lt.s32.totalorder %s4427_s21, %s3981_s9 }
  0x61   : > { %p3978_p12 = pnand %p3976_p11, %p3962_p2  ;;  %p3984_p10 = scmp.lt.s32.totalorder %s3982_s15, %s3975_s12 }
  0x63   : > { %p3979_p13 = pneg %p3978_p12  ;;  %p3985_p1 = por %p3984_p10, %p3983_p8 }
  0x65   : > { %p3986_p6 = pnand %p3985_p1, %p3979_p13 }
  0x67   : > { %3989 = shalt.err (!%p3986_p6)
}
  0x68   : > { %s4214_s30 = smov 256   ;;  %s4215_s7 = smov 16  }
  0x69   : > { %3591 = dma.hbm_to_vmem [thread:$0]  (!%p4433_p7), %s4425_s19, 16384, %s4427_s21, %s4438_s11, %s4214_s30, %s4214_s30, %s4215_s7  }
  0x6a   : > { %s267_s26 = sand.u32 1, %s4178_s20   ;;  %s3505_s3 = sshll.u32 %s4206_s27, 12 }
  0x6b   : > { %s3261_s6 = sshll.u32 %s267_s26, 8  ;;  %s4471_s17 = scalar_lea.hbm %s5506_s1, %s3505_s3 }
  0x6c   : > { %s269_s12 = scalar_lea.vmem [#allocation6], %s3261_s6  ;;  %s4477_s9 = scalar_lea.sflag [#allocation7], %s265_s25 }
  0x6d   : > { %s278_s14 = sshll.u32 %s269_s12, 4  ;;  %s3990_s19 = scalar_lea.hbm %s4471_s17, 4096  ;;  %s4473_s14 = int_to_ptr.vmem [resolvable:$true] %s278_s14 }
  0x6e   : > { %p3991_p7 = scmp.ne.s32.totalorder %s4471_s17, %s3990_s19  ;;  %p5561_p2 = scmp.ne.s32.totalorder %s5553_s16, 0 }
  0x6f   : > { %s3995_s11 = scalar_lea.hbm %s5506_s1, 16384  ;;  %p3996_p4 = scmp.lt.u32.totalorder %s4471_s17, %s5506_s1 }
  0x70   : > { %p3992_p9 = pneg %p5561_p2  ;;  %p3997_p5 = scmp.lt.u32.totalorder %s3995_s11, %s3990_s19 }
  0x71   : > { %p3999_p12 = scmp.lt.u32.totalorder %s3990_s19, %s4471_s17 }
  0x72   : > { %p3993_p0 = pnand %p3992_p9, %p3991_p7  ;;  %p3998_p11 = por %p3997_p5, %p3996_p4 }
  0x74   : > { %p3994_p3 = pneg %p3993_p0  ;;  %p4000_p13 = por %p3999_p12, %p3998_p11 }
  0x76   : > { %p4001_p8 = pnand %p4000_p13, %p3994_p3 }
  0x78   : > { %4004 = shalt.err (!%p4001_p8)
}
  0x79   : > { %s4005_s25 = scalar_lea.vmem %s4473_s14, 4096  ;;  %s4216_s7 = smov [#allocation6]  }
  0x7a   : > { %p4006_p10 = scmp.ne.s32.totalorder %s4473_s14, %s4005_s25  ;;  %s4010_s26 = sshll.u32 %s4216_s7, 4  ;;  %s4011_s26 = int_to_ptr.vmem [resolvable:$false] %s4010_s26 }
  0x7b   : > { %s4012_s3 = scalar_lea.vmem %s4011_s26, 8192  ;;  %p4013_p7 = scmp.lt.s32.totalorder %s4473_s14, %s4011_s26 }
  0x7c   : > { %p4008_p1 = pnand %p4006_p10, %p3992_p9  ;;  %p4014_p0 = scmp.lt.s32.totalorder %s4012_s3, %s4005_s25 }
  0x7e   : > { %p4009_p6 = pneg %p4008_p1  ;;  %p4015_p4 = por %p4014_p0, %p4013_p7 }
  0x80   : > { %p4016_p5 = pnand %p4015_p4, %p4009_p6 }
  0x82   : > { %4019 = shalt.err (!%p4016_p5)
}
  0x83   : > { %s4217_s6 = smov 64   ;;  %s4218_s10 = smov 4  }
  0x84   : > { %3594 = dma.hbm_to_vmem [thread:$0]  (!%p5561_p2), %s4471_s17, 4096, %s4473_s14, %s4477_s9, %s4217_s6, %s4217_s6, %s4218_s10  }
  0x85   : > { %p5562_p9 = scmp.ne.s32.totalorder %s5552_s13, 0 }
  0x86   : > { %s4508_s4 = sand.u32 (!%p5562_p9), 1, %s4186_s22   ;;  %p5563_p3 = scmp.ne.s32.totalorder (!%p5562_p9), %s5544_s8, 0 }
  0x87   : > { %290 = sbr.rel (%p5562_p9) target bundleno = 768 (0x300), region = 32  ;;  %s3265_s12 = sshll.u32 (!%p5562_p9), %s4508_s4, 10 }
  0x88   : > { %s293_s19 = scalar_lea.sflag (!%p5562_p9), [#allocation4], %s4508_s4  ;;  %s4512_s21 = scalar_lea.vmem (!%p5562_p9), [#allocation3], %s3265_s12 }
  0x8e   : > { %4149 = dma.done.wait (%p5563_p3), %s293_s19, 16384  }
  0x8f   : > { %4151 = vsyncadd (%p5563_p3), %s293_s19, 4294950912  ;;  %s5564_s16 = sld [smem:[#allocation18_spill]]  ;;  %s5565_s13 = sld [smem:[#allocation23_spill]] }
  0x90   : > { %s301_s17 = sand.u32 1, %s4310_s29  }
  0x91   : > { %s302_s2 = scalar_lea.sflag [#allocation7], %s301_s17 }
  0x95   : > { %s303_s14 = sand.u32 1, %s5564_s16   ;;  %p5566_p2 = scmp.ne.s32.totalorder %s5565_s13, 0 }
  0x96   : > { %s3266_s9 = sshll.u32 %s303_s14, 8 }
  0x97   : > { %s4522_s11 = scalar_lea.vmem [#allocation6], %s3266_s9 }
  0x98   : > { %4153 = dma.done.wait (%p5566_p2), %s302_s2, 4096  }
  0x99   : > { %4155 = vsyncadd (%p5566_p2), %s302_s2, 4294963200  ;;  %p5567_p11 = scmp.eq.s32.totalorder %s4310_s29, 0 }
  0x9b   : > { %4157 = dma.done.wait (%p5567_p11), [#allocation7], 16   ;;  %p5568_p12 = pmov %p5567_p11 }
  0x9c   : > { %v4219_v0 = vmov 0   ;;  %v3706_v1 = vld [vmem:[%s4522_s11] sm:$0xff]   ;;  %v3708_v3 = vld [vmem:[%s4522_s11 + $0x8] sm:$0xff]   ;;  %v3710_v5 = vld [vmem:[%s4522_s11 + $0x10] sm:$0xff]   ;;  %vm358_vm0 = vcmask 261120   ;;  %s3268_s8 = sshll.u32 %s4508_s4, 8 }
  0x9d   : > { %4159 = vsyncadd (%p5568_p12), [#allocation7], 4294967280  ;;  %1511 = vmatprep.subr.bf16.mxu0 %v4219_v0  ;;  %1800 = vmatprep.subr.bf16.mxu1 %v4219_v0  ;;  %v3707_v2 = vld [vmem:[%s4522_s11 + $0x80] sm:$0xff]   ;;  %v3709_v4 = vld [vmem:[%s4522_s11 + $0x88] sm:$0xff]   ;;  %vm2612_vm1 = vcmask 257024   ;;  %s4867_s15 = scalar_lea.vmem [#allocation9], %s3268_s8 }
  0x9e   : > { %1512 = vmatpush1.bf16.msra.mxu0 %v3706_v1  ;;  %1801 = vmatpush1.bf16.msra.mxu1 %v3707_v2  ;;  %v3711_v6 = vld [vmem:[%s4522_s11 + $0x90] sm:$0xff]   ;;  %v3712_v7 = vld [vmem:[%s4522_s11 + $0x18] sm:$0xff]   ;;  %v3714_v9 = vld [vmem:[%s4522_s11 + $0x20] sm:$0xff]   ;;  %s5569_s30 = sld [smem:[#allocation20_spill]]  ;;  %s5570_s25 = sld [smem:[#allocation21_spill]] }
  0x9f   : > { %1513 = vmatprep.subr.bf16.mxu0 %v4219_v0  ;;  %1802 = vmatprep.subr.bf16.mxu1 %v4219_v0  ;;  %v3713_v8 = vld [vmem:[%s4522_s11 + $0x98] sm:$0xff]   ;;  %v3715_v10 = vld [vmem:[%s4522_s11 + $0xa0] sm:$0xff]   ;;  %v3716_v11 = vld [vmem:[%s4522_s11 + $0x28] sm:$0xff]   ;;  %s3034_s10 = sshll.u32 %s4867_s15, 4  ;;  %s5573_s13 = sld [smem:[#allocation24_spill]]  ;;  %s5360_s10 = int_to_ptr.vmem [resolvable:$true] %s3034_s10 }
  0xa0   : > { %v3717_v12 = vld [vmem:[%s4522_s11 + $0xa8] sm:$0xff]   ;;  %v3718_v13 = vld [vmem:[%s4522_s11 + $0x30] sm:$0xff]   ;;  %v3720_v15 = vld [vmem:[%s4522_s11 + $0x38] sm:$0xff]   ;;  %s3011_s2 = scalar_lea.sflag [#allocation5], %s4508_s4  ;;  %s4221_s8 = smov [#allocation9]  }
  0xa1   : > { %v3719_v14 = vld [vmem:[%s4522_s11 + $0xb0] sm:$0xff]   ;;  %v3721_v16 = vld [vmem:[%s4522_s11 + $0xb8] sm:$0xff]   ;;  %v3722_v17 = vld [vmem:[%s4522_s11 + $0x40] sm:$0xff]  }
  0xa2   : > { %1514 = vmatpush1.bf16.msra.mxu0 %v3708_v3  ;;  %1803 = vmatpush1.bf16.msra.mxu1 %v3709_v4  ;;  %v3723_v18 = vld [vmem:[%s4522_s11 + $0xc0] sm:$0xff]   ;;  %v3724_v20 = vld [vmem:[%s4522_s11 + $0x48] sm:$0xff]   ;;  %v3726_v23 = vld [vmem:[%s4522_s11 + $0x50] sm:$0xff]  }
  0xa3   : > { %1515 = vmatprep.subr.bf16.mxu0 %v4219_v0  ;;  %1804 = vmatprep.subr.bf16.mxu1 %v4219_v0  ;;  %v3740_v19 = vld [vmem:[%s4512_s21 + $0x4] ss:$16 sps:$4 sm:$0xff]   ;;  %v3743_v21 = vld [vmem:[%s4512_s21 + $0xc] ss:$16 sps:$4 sm:$0xff]   ;;  %v3738_v35 = vld [vmem:[%s4512_s21] ss:$16 sps:$4 sm:$0xff]  }
  0xa4   : > { %v3725_v22 = vld [vmem:[%s4522_s11 + $0xc8] sm:$0xff]   ;;  %1543 = vmatprep.mubr.bf16.mxu0 %v3740_v19  ;;  %1832 = vmatprep.mubr.bf16.mxu1 %v3743_v21  ;;  %v3727_v24 = vld [vmem:[%s4522_s11 + $0xd0] sm:$0xff]   ;;  %v3728_v25 = vld [vmem:[%s4522_s11 + $0x58] sm:$0xff]   ;;  %s3495_s7 = sshll.u32 %s5569_s30, 6  ;;  %s3496_s26 = sshll.u32 %s5570_s25, 8 }
  0xa5   : > { %v3729_v26 = vld [vmem:[%s4522_s11 + $0xd8] sm:$0xff]   ;;  %v3730_v27 = vld [vmem:[%s4522_s11 + $0x60] sm:$0xff]   ;;  %v3732_v29 = vld [vmem:[%s4522_s11 + $0x68] sm:$0xff]   ;;  %s3031_s3 = sadd.s32 %s3496_s26, %s3495_s7  ;;  %s3498_s9 = sshll.u32 %s5570_s25, 2 }
  0xa6   : > { %1516 = vmatpush1.bf16.msra.mxu0 %v3710_v5  ;;  %1805 = vmatpush1.bf16.msra.mxu1 %v3711_v6  ;;  %v3731_v28 = vld [vmem:[%s4522_s11 + $0xe0] sm:$0xff]   ;;  %v3733_v30 = vld [vmem:[%s4522_s11 + $0xe8] sm:$0xff]   ;;  %v3734_v31 = vld [vmem:[%s4522_s11 + $0x70] sm:$0xff]   ;;  %s3497_s6 = sshll.u32 %s3031_s3, 6  ;;  %p5574_p8 = scmp.ne.s32.totalorder %s5573_s13, 0 }
  0xa7   : > { %1517 = vmatprep.subr.bf16.mxu0 %v4219_v0  ;;  %1806 = vmatprep.subr.bf16.mxu1 %v4219_v0  ;;  %v3735_v32 = vld [vmem:[%s4522_s11 + $0xf0] sm:$0xff]   ;;  %v3736_v33 = vld [vmem:[%s4522_s11 + $0x78] sm:$0xff]   ;;  %s4024_s7 = sshll.u32 %s4221_s8, 4  ;;  %s4025_s7 = int_to_ptr.vmem [resolvable:$false] %s4024_s7 }
  0xa8   : > { %v3737_v34 = vld [vmem:[%s4522_s11 + $0xf8] sm:$0xff]   ;;  %v3744_v37 = vld [vmem:[%s4512_s21 + $0x24] ss:$16 sps:$4 sm:$0xff]   ;;  %v3748_v39 = vld [vmem:[%s4512_s21 + $0x20] ss:$16 sps:$4 sm:$0xff]   ;;  %s4020_s11 = scalar_lea.vmem %s5360_s10, 4096  ;;  %p4027_p6 = scmp.lt.s32.totalorder %s5360_s10, %s4025_s7 }
  0xa9   : > { %v3741_v36 = vld [vmem:[%s4512_s21 + $0x8] ss:$16 sps:$4 sm:$0xff]   ;;  %v3746_v38 = vld [vmem:[%s4512_s21 + $0x2c] ss:$16 sps:$4 sm:$0xff]   ;;  %v3750_v41 = vld [vmem:[%s4512_s21 + $0x44] ss:$16 sps:$4 sm:$0xff]   ;;  %p4021_p13 = scmp.ne.s32.totalorder %s5360_s10, %s4020_s11 }
  0xaa   : > { %1518 = vmatpush1.bf16.msra.mxu0 %v3712_v7  ;;  %1807 = vmatpush1.bf16.msra.mxu1 %v3713_v8  ;;  %v3749_v40 = vld [vmem:[%s4512_s21 + $0x28] ss:$16 sps:$4 sm:$0xff]   ;;  %v3752_v42 = vld [vmem:[%s4512_s21 + $0x4c] ss:$16 sps:$4 sm:$0xff]   ;;  %v3754_v43 = vld [vmem:[%s4512_s21 + $0x40] ss:$16 sps:$4 sm:$0xff]  }
  0xab   : > { %1519 = vmatprep.subr.bf16.mxu0 %v4219_v0  ;;  %1808 = vmatprep.subr.bf16.mxu1 %v4219_v0  ;;  %v3755_v44 = vld [vmem:[%s4512_s21 + $0x48] ss:$16 sps:$4 sm:$0xff]   ;;  %v3756_v45 = vld [vmem:[%s4512_s21 + $0x64] ss:$16 sps:$4 sm:$0xff]   ;;  %v3758_v46 = vld [vmem:[%s4512_s21 + $0x6c] ss:$16 sps:$4 sm:$0xff]   ;;  %p4022_p10 = pnand %p4021_p13, %p5574_p8 }
  0xac   : > { %v3760_v47 = vld [vmem:[%s4512_s21 + $0x60] ss:$16 sps:$4 sm:$0xff]   ;;  %v3761_v48 = vld [vmem:[%s4512_s21 + $0x68] ss:$16 sps:$4 sm:$0xff]   ;;  %v3762_v49 = vld [vmem:[%s4512_s21 + $0x84] ss:$16 sps:$4 sm:$0xff]  }
  0xad   : > { %v3764_v50 = vld [vmem:[%s4512_s21 + $0x8c] ss:$16 sps:$4 sm:$0xff]   ;;  %v3766_v51 = vld [vmem:[%s4512_s21 + $0x80] ss:$16 sps:$4 sm:$0xff]   ;;  %v3767_v52 = vld [vmem:[%s4512_s21 + $0x88] ss:$16 sps:$4 sm:$0xff]   ;;  %p4023_p1 = pneg %p4022_p10 }
  0xae   : > { %1520 = vmatpush1.bf16.msra.mxu0 %v3714_v9  ;;  %1809 = vmatpush1.bf16.msra.mxu1 %v3715_v10  ;;  %v3768_v53 = vld [vmem:[%s4512_s21 + $0xa4] ss:$16 sps:$4 sm:$0xff]   ;;  %v3770_v54 = vld [vmem:[%s4512_s21 + $0xac] ss:$16 sps:$4 sm:$0xff]   ;;  %v3772_v55 = vld [vmem:[%s4512_s21 + $0xa0] ss:$16 sps:$4 sm:$0xff]  }
  0xaf   : > { %1521 = vmatprep.subr.bf16.mxu0 %v4219_v0  ;;  %1810 = vmatprep.subr.bf16.mxu1 %v4219_v0  ;;  %v3773_v56 = vld [vmem:[%s4512_s21 + $0xa8] ss:$16 sps:$4 sm:$0xff]   ;;  %v3774_v57 = vld [vmem:[%s4512_s21 + $0xc4] ss:$16 sps:$4 sm:$0xff]   ;;  %v3776_v58 = vld [vmem:[%s4512_s21 + $0xcc] ss:$16 sps:$4 sm:$0xff]  }
  0xb0   : > { %v3778_v59 = vld [vmem:[%s4512_s21 + $0xc0] ss:$16 sps:$4 sm:$0xff]   ;;  %v3779_v60 = vld [vmem:[%s4512_s21 + $0xc8] ss:$16 sps:$4 sm:$0xff]   ;;  %v3780_v61 = vld [vmem:[%s4512_s21 + $0xe4] ss:$16 sps:$4 sm:$0xff]  }
  0xb1   : > { %v3782_v62 = vld [vmem:[%s4512_s21 + $0xec] ss:$16 sps:$4 sm:$0xff]   ;;  %v3784_v63 = vld [vmem:[%s4512_s21 + $0xe0] ss:$16 sps:$4 sm:$0xff]   ;;  %v3786_v1 = vld [vmem:[%s4512_s21 + $0x104] ss:$16 sps:$4 sm:$0xff]  }
  0xb2   : > { %1522 = vmatpush1.bf16.msra.mxu0 %v3716_v11  ;;  %1811 = vmatpush1.bf16.msra.mxu1 %v3717_v12  ;;  %v3788_v2 = vld [vmem:[%s4512_s21 + $0x10c] ss:$16 sps:$4 sm:$0xff]   ;;  %v3790_v3 = vld [vmem:[%s4512_s21 + $0x100] ss:$16 sps:$4 sm:$0xff]   ;;  %v3791_v4 = vld [vmem:[%s4512_s21 + $0x108] ss:$16 sps:$4 sm:$0xff]  }
  0xb3   : > { %1523 = vmatprep.subr.bf16.mxu0 %v4219_v0  ;;  %1812 = vmatprep.subr.bf16.mxu1 %v4219_v0  ;;  %v3792_v5 = vld [vmem:[%s4512_s21 + $0x124] ss:$16 sps:$4 sm:$0xff]   ;;  %v3794_v6 = vld [vmem:[%s4512_s21 + $0x12c] ss:$16 sps:$4 sm:$0xff]   ;;  %v3796_v7 = vld [vmem:[%s4512_s21 + $0x120] ss:$16 sps:$4 sm:$0xff]  }
  0xb4   : > { %v3797_v8 = vld [vmem:[%s4512_s21 + $0x128] ss:$16 sps:$4 sm:$0xff]   ;;  %v3798_v9 = vld [vmem:[%s4512_s21 + $0x144] ss:$16 sps:$4 sm:$0xff]   ;;  %v3800_v10 = vld [vmem:[%s4512_s21 + $0x14c] ss:$16 sps:$4 sm:$0xff]  }
  0xb5   : > { %v4639_v11 = vld [vmem:[%s4512_s21 + $0x140] ss:$16 sps:$4 sm:$0xff]   ;;  %v4642_v12 = vld [vmem:[%s4512_s21 + $0x148] ss:$16 sps:$4 sm:$0xff]   ;;  %v3812_v19 = vld [vmem:[%s4512_s21 + $0x18c] ss:$16 sps:$4 sm:$0xff]  }
  0xb6   : > { %1524 = vmatpush1.bf16.msra.mxu0 %v3718_v13  ;;  %1813 = vmatpush1.bf16.msra.mxu1 %v3719_v14  ;;  %v4645_v13 = vld [vmem:[%s4512_s21 + $0x164] ss:$16 sps:$4 sm:$0xff]   ;;  %v4648_v14 = vld [vmem:[%s4512_s21 + $0x16c] ss:$16 sps:$4 sm:$0xff]   ;;  %v3815_v21 = vld [vmem:[%s4512_s21 + $0x188] ss:$16 sps:$4 sm:$0xff]  }
  0xb7   : > { %1525 = vmatprep.subr.bf16.mxu0 %v4219_v0  ;;  %1814 = vmatprep.subr.bf16.mxu1 %v4219_v0  ;;  %s4026_s26 = scalar_lea.vmem %s4025_s7, 8192 }
  0xb8   : > { %p4028_p7 = scmp.lt.s32.totalorder %s4026_s26, %s4020_s11 }
  0xba   : > { %1526 = vmatpush1.bf16.msra.mxu0 %v3720_v15  ;;  %1815 = vmatpush1.bf16.msra.mxu1 %v3721_v16  ;;  %v4220_v15 = vmov 0.0   ;;  %v3808_v16 = vld [vmem:[%s4512_s21 + $0x160] ss:$16 sps:$4 sm:$0xff]   ;;  %p4029_p0 = por %p4028_p7, %p4027_p6 }
  0xbb   : > { %1527 = vmatprep.subr.bf16.mxu0 %v4219_v0  ;;  %1816 = vmatprep.subr.bf16.mxu1 %v4219_v0  ;;  %359 = vst.msk [vmem:[#allocation2] sm:$0xff] %vm358_vm0, %v4220_v15  ;;  %360 = vst.msk [vmem:[#allocation2 + $0x8] sm:$0xff] %vm358_vm0, %v4220_v15 }
  0xbc   : > { %361 = vst.msk [vmem:[#allocation2 + $0x10] sm:$0xff] %vm358_vm0, %v4220_v15  ;;  %362 = vst.msk [vmem:[#allocation2 + $0x18] sm:$0xff] %vm358_vm0, %v4220_v15  ;;  %p4030_p4 = pnand %p4029_p0, %p4023_p1 }
  0xbd   : > { %363 = vst.msk [vmem:[#allocation2 + $0x20] sm:$0xff] %vm358_vm0, %v4220_v15  ;;  %364 = vst.msk [vmem:[#allocation2 + $0x28] sm:$0xff] %vm358_vm0, %v4220_v15 }
  0xbe   : > { %1528 = vmatpush1.bf16.msra.mxu0 %v3722_v17  ;;  %1817 = vmatpush1.bf16.msra.mxu1 %v3723_v18  ;;  %365 = vst.msk [vmem:[#allocation2 + $0x30] sm:$0xff] %vm358_vm0, %v4220_v15  ;;  %366 = vst.msk [vmem:[#allocation2 + $0x38] sm:$0xff] %vm358_vm0, %v4220_v15  ;;  %v3809_v17 = vld [vmem:[%s4512_s21 + $0x168] ss:$16 sps:$4 sm:$0xff]   ;;  %v3810_v18 = vld [vmem:[%s4512_s21 + $0x184] ss:$16 sps:$4 sm:$0xff]  }
  0xbf   : > { %1529 = vmatprep.subr.bf16.mxu0 %v4219_v0  ;;  %1818 = vmatprep.subr.bf16.mxu1 %v4219_v0  ;;  %367 = vst.msk [vmem:[#allocation2 + $0x40] sm:$0xff] %vm358_vm0, %v4220_v15  ;;  %368 = vst.msk [vmem:[#allocation2 + $0x48] sm:$0xff] %vm358_vm0, %v4220_v15 }
  0xc0   : > { %369 = vst.msk [vmem:[#allocation2 + $0x50] sm:$0xff] %vm358_vm0, %v4220_v15  ;;  %370 = vst.msk [vmem:[#allocation2 + $0x58] sm:$0xff] %vm358_vm0, %v4220_v15 }
  0xc1   : > { %371 = vst.msk [vmem:[#allocation2 + $0x60] sm:$0xff] %vm358_vm0, %v4220_v15  ;;  %372 = vst.msk [vmem:[#allocation2 + $0x68] sm:$0xff] %vm358_vm0, %v4220_v15 }
  0xc2   : > { %1530 = vmatpush1.bf16.msra.mxu0 %v3724_v20  ;;  %1819 = vmatpush1.bf16.msra.mxu1 %v3725_v22  ;;  %373 = vst.msk [vmem:[#allocation2 + $0x70] sm:$0xff] %vm358_vm0, %v4220_v15  ;;  %374 = vst.msk [vmem:[#allocation2 + $0x78] sm:$0xff] %vm358_vm0, %v4220_v15  ;;  %v3814_v20 = vld [vmem:[%s4512_s21 + $0x180] ss:$16 sps:$4 sm:$0xff]   ;;  %v3816_v22 = vld [vmem:[%s4512_s21 + $0x1a4] ss:$16 sps:$4 sm:$0xff]  }
  0xc3   : > { %1531 = vmatprep.subr.bf16.mxu0 %v4219_v0  ;;  %1820 = vmatprep.subr.bf16.mxu1 %v4219_v0  ;;  %375 = vst.msk [vmem:[#allocation2 + $0x80] sm:$0xff] %vm358_vm0, %v4220_v15  ;;  %376 = vst.msk [vmem:[#allocation2 + $0x88] sm:$0xff] %vm358_vm0, %v4220_v15 }
  0xc4   : > { %377 = vst.msk [vmem:[#allocation2 + $0x90] sm:$0xff] %vm358_vm0, %v4220_v15  ;;  %378 = vst.msk [vmem:[#allocation2 + $0x98] sm:$0xff] %vm358_vm0, %v4220_v15 }
  0xc5   : > { %379 = vst.msk [vmem:[#allocation2 + $0xa0] sm:$0xff] %vm358_vm0, %v4220_v15  ;;  %380 = vst.msk [vmem:[#allocation2 + $0xa8] sm:$0xff] %vm358_vm0, %v4220_v15 }
  0xc6   : > { %1532 = vmatpush1.bf16.msra.mxu0 %v3726_v23  ;;  %1821 = vmatpush1.bf16.msra.mxu1 %v3727_v24  ;;  %381 = vst.msk [vmem:[#allocation2 + $0xb0] sm:$0xff] %vm358_vm0, %v4220_v15  ;;  %382 = vst.msk [vmem:[#allocation2 + $0xb8] sm:$0xff] %vm358_vm0, %v4220_v15  ;;  %v3818_v23 = vld [vmem:[%s4512_s21 + $0x1ac] ss:$16 sps:$4 sm:$0xff]   ;;  %v3820_v24 = vld [vmem:[%s4512_s21 + $0x1a0] ss:$16 sps:$4 sm:$0xff]  }
  0xc7   : > { %1533 = vmatprep.subr.bf16.mxu0 %v4219_v0  ;;  %1822 = vmatprep.subr.bf16.mxu1 %v4219_v0  ;;  %383 = vst.msk [vmem:[#allocation2 + $0xc0] sm:$0xff] %vm358_vm0, %v4220_v15  ;;  %384 = vst.msk [vmem:[#allocation2 + $0xc8] sm:$0xff] %vm358_vm0, %v4220_v15 }
  0xc8   : > { %385 = vst.msk [vmem:[#allocation2 + $0xd0] sm:$0xff] %vm358_vm0, %v4220_v15  ;;  %386 = vst.msk [vmem:[#allocation2 + $0xd8] sm:$0xff] %vm358_vm0, %v4220_v15 }
  0xc9   : > { %387 = vst.msk [vmem:[#allocation2 + $0xe0] sm:$0xff] %vm358_vm0, %v4220_v15  ;;  %388 = vst.msk [vmem:[#allocation2 + $0xe8] sm:$0xff] %vm358_vm0, %v4220_v15 }
  0xca   : > { %1534 = vmatpush1.bf16.msra.mxu0 %v3728_v25  ;;  %1823 = vmatpush1.bf16.msra.mxu1 %v3729_v26  ;;  %389 = vst.msk [vmem:[#allocation2 + $0xf0] sm:$0xff] %vm358_vm0, %v4220_v15  ;;  %390 = vst.msk [vmem:[#allocation2 + $0xf8] sm:$0xff] %vm358_vm0, %v4220_v15  ;;  %v3821_v25 = vld [vmem:[%s4512_s21 + $0x1a8] ss:$16 sps:$4 sm:$0xff]   ;;  %v3822_v26 = vld [vmem:[%s4512_s21 + $0x1c4] ss:$16 sps:$4 sm:$0xff]  }
  0xcb   : > { %1535 = vmatprep.subr.bf16.mxu0 %v4219_v0  ;;  %1824 = vmatprep.subr.bf16.mxu1 %v4219_v0  ;;  %391 = vst.msk [vmem:[#allocation2 + $0x100] sm:$0xff] %vm358_vm0, %v4220_v15  ;;  %392 = vst.msk [vmem:[#allocation2 + $0x108] sm:$0xff] %vm358_vm0, %v4220_v15 }
  0xcc   : > { %393 = vst.msk [vmem:[#allocation2 + $0x110] sm:$0xff] %vm358_vm0, %v4220_v15  ;;  %394 = vst.msk [vmem:[#allocation2 + $0x118] sm:$0xff] %vm358_vm0, %v4220_v15 }
  0xcd   : > { %395 = vst.msk [vmem:[#allocation2 + $0x120] sm:$0xff] %vm358_vm0, %v4220_v15  ;;  %396 = vst.msk [vmem:[#allocation2 + $0x128] sm:$0xff] %vm358_vm0, %v4220_v15 }
  0xce   : > { %1536 = vmatpush1.bf16.msra.mxu0 %v3730_v27  ;;  %1825 = vmatpush1.bf16.msra.mxu1 %v3731_v28  ;;  %397 = vst.msk [vmem:[#allocation2 + $0x130] sm:$0xff] %vm358_vm0, %v4220_v15  ;;  %398 = vst.msk [vmem:[#allocation2 + $0x138] sm:$0xff] %vm358_vm0, %v4220_v15  ;;  %v3824_v27 = vld [vmem:[%s4512_s21 + $0x1cc] ss:$16 sps:$4 sm:$0xff]   ;;  %v3826_v28 = vld [vmem:[%s4512_s21 + $0x1c0] ss:$16 sps:$4 sm:$0xff]  }
  0xcf   : > { %1537 = vmatprep.subr.bf16.mxu0 %v4219_v0  ;;  %1826 = vmatprep.subr.bf16.mxu1 %v4219_v0  ;;  %399 = vst.msk [vmem:[#allocation2 + $0x140] sm:$0xff] %vm358_vm0, %v4220_v15  ;;  %400 = vst.msk [vmem:[#allocation2 + $0x148] sm:$0xff] %vm358_vm0, %v4220_v15 }
  0xd0   : > { %401 = vst.msk [vmem:[#allocation2 + $0x150] sm:$0xff] %vm358_vm0, %v4220_v15  ;;  %402 = vst.msk [vmem:[#allocation2 + $0x158] sm:$0xff] %vm358_vm0, %v4220_v15 }
  0xd1   : > { %403 = vst.msk [vmem:[#allocation2 + $0x160] sm:$0xff] %vm358_vm0, %v4220_v15  ;;  %404 = vst.msk [vmem:[#allocation2 + $0x168] sm:$0xff] %vm358_vm0, %v4220_v15 }
  0xd2   : > { %1538 = vmatpush1.bf16.msra.mxu0 %v3732_v29  ;;  %1827 = vmatpush1.bf16.msra.mxu1 %v3733_v30  ;;  %405 = vst.msk [vmem:[#allocation2 + $0x170] sm:$0xff] %vm358_vm0, %v4220_v15  ;;  %406 = vst.msk [vmem:[#allocation2 + $0x178] sm:$0xff] %vm358_vm0, %v4220_v15  ;;  %v3827_v29 = vld [vmem:[%s4512_s21 + $0x1c8] ss:$16 sps:$4 sm:$0xff]   ;;  %v3828_v30 = vld [vmem:[%s4512_s21 + $0x1e4] ss:$16 sps:$4 sm:$0xff]  }
  0xd3   : > { %1539 = vmatprep.subr.bf16.mxu0 %v4219_v0  ;;  %1828 = vmatprep.subr.bf16.mxu1 %v4219_v0  ;;  %407 = vst.msk [vmem:[#allocation2 + $0x180] sm:$0xff] %vm358_vm0, %v4220_v15  ;;  %408 = vst.msk [vmem:[#allocation2 + $0x188] sm:$0xff] %vm358_vm0, %v4220_v15 }
  0xd4   : > { %409 = vst.msk [vmem:[#allocation2 + $0x190] sm:$0xff] %vm358_vm0, %v4220_v15  ;;  %410 = vst.msk [vmem:[#allocation2 + $0x198] sm:$0xff] %vm358_vm0, %v4220_v15 }
  0xd5   : > { %411 = vst.msk [vmem:[#allocation2 + $0x1a0] sm:$0xff] %vm358_vm0, %v4220_v15  ;;  %412 = vst.msk [vmem:[#allocation2 + $0x1a8] sm:$0xff] %vm358_vm0, %v4220_v15 }
  0xd6   : > { %1540 = vmatpush1.bf16.msra.mxu0 %v3734_v31  ;;  %1829 = vmatpush1.bf16.msra.mxu1 %v3735_v32  ;;  %413 = vst.msk [vmem:[#allocation2 + $0x1b0] sm:$0xff] %vm358_vm0, %v4220_v15  ;;  %414 = vst.msk [vmem:[#allocation2 + $0x1b8] sm:$0xff] %vm358_vm0, %v4220_v15  ;;  %v3830_v31 = vld [vmem:[%s4512_s21 + $0x1ec] ss:$16 sps:$4 sm:$0xff]   ;;  %v3832_v32 = vld [vmem:[%s4512_s21 + $0x1e0] ss:$16 sps:$4 sm:$0xff]  }
  0xd7   : > { %1541 = vmatprep.subr.bf16.mxu0 %v4219_v0  ;;  %1830 = vmatprep.subr.bf16.mxu1 %v4219_v0  ;;  %v3785_v0 = vld [vmem:[%s4512_s21 + $0xe8] ss:$16 sps:$4 sm:$0xff]   ;;  %415 = vst.msk [vmem:[#allocation2 + $0x1c0] sm:$0xff] %vm358_vm0, %v4220_v15  ;;  %416 = vst.msk [vmem:[#allocation2 + $0x1c8] sm:$0xff] %vm358_vm0, %v4220_v15 }
  0xd8   : > { %417 = vst.msk [vmem:[#allocation2 + $0x1d0] sm:$0xff] %vm358_vm0, %v4220_v15  ;;  %418 = vst.msk [vmem:[#allocation2 + $0x1d8] sm:$0xff] %vm358_vm0, %v4220_v15 }
  0xd9   : > { %419 = vst.msk [vmem:[#allocation2 + $0x1e0] sm:$0xff] %vm358_vm0, %v4220_v15  ;;  %420 = vst.msk [vmem:[#allocation2 + $0x1e8] sm:$0xff] %vm358_vm0, %v4220_v15 }
  0xda   : > { %1542 = vmatpush1.bf16.msra.mxu0 %v3736_v33  ;;  %1831 = vmatpush1.bf16.msra.mxu1 %v3737_v34  ;;  %421 = vst.msk [vmem:[#allocation2 + $0x1f0] sm:$0xff] %vm358_vm0, %v4220_v15  ;;  %422 = vst.msk [vmem:[#allocation2 + $0x1f8] sm:$0xff] %vm358_vm0, %v4220_v15  ;;  %v3833_v33 = vld [vmem:[%s4512_s21 + $0x1e8] ss:$16 sps:$4 sm:$0xff]   ;;  %v3834_v34 = vld [vmem:[%s4512_s21 + $0x204] ss:$16 sps:$4 sm:$0xff]  }
  0xdb   : > { %v3902_v15 = vld [vmem:[%s4512_s21 + $0x36c] ss:$16 sps:$4 sm:$0xff]  }
  0xdd   : > { %1544 = vmatmul.mubr.bf16.vlgmr.msra.gmra.mrb[0].mxu0 %v3738_v35  ;;  %1833 = vmatmul.mubr.bf16.vlgmr.msra.gmra.mrb[0].mxu1 %v3741_v36  ;;  %v3836_v35 = vld [vmem:[%s4512_s21 + $0x20c] ss:$16 sps:$4 sm:$0xff]   ;;  %v3838_v36 = vld [vmem:[%s4512_s21 + $0x200] ss:$16 sps:$4 sm:$0xff]  }
  0xde   : > { %1551 = vmatprep.mubr.bf16.mxu0 %v3744_v37  ;;  %1840 = vmatprep.mubr.bf16.mxu1 %v3746_v38  ;;  %v3839_v37 = vld [vmem:[%s4512_s21 + $0x208] ss:$16 sps:$4 sm:$0xff]   ;;  %v3840_v38 = vld [vmem:[%s4512_s21 + $0x224] ss:$16 sps:$4 sm:$0xff]  }
  0xe5   : > { %1552 = vmatmul.mubr.bf16.gmra.mrb[4].mxu0 %v3748_v39  ;;  %1841 = vmatmul.mubr.bf16.gmra.mrb[4].mxu1 %v3749_v40  ;;  %v3842_v39 = vld [vmem:[%s4512_s21 + $0x22c] ss:$16 sps:$4 sm:$0xff]   ;;  %v3844_v40 = vld [vmem:[%s4512_s21 + $0x220] ss:$16 sps:$4 sm:$0xff]  }
  0xe6   : > { %1559 = vmatprep.mubr.bf16.mxu0 %v3750_v41  ;;  %1848 = vmatprep.mubr.bf16.mxu1 %v3752_v42  ;;  %v3845_v41 = vld [vmem:[%s4512_s21 + $0x228] ss:$16 sps:$4 sm:$0xff]   ;;  %v3846_v42 = vld [vmem:[%s4512_s21 + $0x244] ss:$16 sps:$4 sm:$0xff]  }
  0xed   : > { %1560 = vmatmul.mubr.bf16.gmra.mrb[8].mxu0 %v3754_v43  ;;  %1849 = vmatmul.mubr.bf16.gmra.mrb[8].mxu1 %v3755_v44  ;;  %v3848_v43 = vld [vmem:[%s4512_s21 + $0x24c] ss:$16 sps:$4 sm:$0xff]   ;;  %v3850_v44 = vld [vmem:[%s4512_s21 + $0x240] ss:$16 sps:$4 sm:$0xff]  }
  0xee   : > { %1567 = vmatprep.mubr.bf16.mxu0 %v3756_v45  ;;  %1856 = vmatprep.mubr.bf16.mxu1 %v3758_v46  ;;  %v3851_v45 = vld [vmem:[%s4512_s21 + $0x248] ss:$16 sps:$4 sm:$0xff]   ;;  %v3852_v46 = vld [vmem:[%s4512_s21 + $0x264] ss:$16 sps:$4 sm:$0xff]  }
  0xf5   : > { %1568 = vmatmul.mubr.bf16.gmra.mrb[12].mxu0 %v3760_v47  ;;  %1857 = vmatmul.mubr.bf16.gmra.mrb[12].mxu1 %v3761_v48  ;;  %v3854_v47 = vld [vmem:[%s4512_s21 + $0x26c] ss:$16 sps:$4 sm:$0xff]   ;;  %v3856_v48 = vld [vmem:[%s4512_s21 + $0x260] ss:$16 sps:$4 sm:$0xff]  }
  0xf6   : > { %1575 = vmatprep.mubr.bf16.mxu0 %v3762_v49  ;;  %1864 = vmatprep.mubr.bf16.mxu1 %v3764_v50  ;;  %v3857_v49 = vld [vmem:[%s4512_s21 + $0x268] ss:$16 sps:$4 sm:$0xff]   ;;  %v3858_v50 = vld [vmem:[%s4512_s21 + $0x284] ss:$16 sps:$4 sm:$0xff]  }
  0xfd   : > { %1576 = vmatmul.mubr.bf16.gmra.mrb[16].mxu0 %v3766_v51  ;;  %1865 = vmatmul.mubr.bf16.gmra.mrb[16].mxu1 %v3767_v52  ;;  %v3860_v51 = vld [vmem:[%s4512_s21 + $0x28c] ss:$16 sps:$4 sm:$0xff]   ;;  %v3862_v52 = vld [vmem:[%s4512_s21 + $0x280] ss:$16 sps:$4 sm:$0xff]  }
  0xfe   : > { %1583 = vmatprep.mubr.bf16.mxu0 %v3768_v53  ;;  %1872 = vmatprep.mubr.bf16.mxu1 %v3770_v54  ;;  %v3863_v53 = vld [vmem:[%s4512_s21 + $0x288] ss:$16 sps:$4 sm:$0xff]   ;;  %v3864_v54 = vld [vmem:[%s4512_s21 + $0x2a4] ss:$16 sps:$4 sm:$0xff]  }
 0x105   : > { %1584 = vmatmul.mubr.bf16.gmra.mrb[20].mxu0 %v3772_v55  ;;  %1873 = vmatmul.mubr.bf16.gmra.mrb[20].mxu1 %v3773_v56  ;;  %v3866_v55 = vld [vmem:[%s4512_s21 + $0x2ac] ss:$16 sps:$4 sm:$0xff]   ;;  %v3868_v56 = vld [vmem:[%s4512_s21 + $0x2a0] ss:$16 sps:$4 sm:$0xff]  }
 0x106   : > { %1591 = vmatprep.mubr.bf16.mxu0 %v3774_v57  ;;  %1880 = vmatprep.mubr.bf16.mxu1 %v3776_v58  ;;  %v3869_v57 = vld [vmem:[%s4512_s21 + $0x2a8] ss:$16 sps:$4 sm:$0xff]   ;;  %v3870_v58 = vld [vmem:[%s4512_s21 + $0x2c4] ss:$16 sps:$4 sm:$0xff]  }
 0x10d   : > { %1592 = vmatmul.mubr.bf16.gmra.mrb[24].mxu0 %v3778_v59  ;;  %1881 = vmatmul.mubr.bf16.gmra.mrb[24].mxu1 %v3779_v60  ;;  %v3872_v59 = vld [vmem:[%s4512_s21 + $0x2cc] ss:$16 sps:$4 sm:$0xff]   ;;  %v3874_v60 = vld [vmem:[%s4512_s21 + $0x2c0] ss:$16 sps:$4 sm:$0xff]  }
 0x10e   : > { %1599 = vmatprep.mubr.bf16.mxu0 %v3780_v61  ;;  %1888 = vmatprep.mubr.bf16.mxu1 %v3782_v62  ;;  %v3875_v61 = vld [vmem:[%s4512_s21 + $0x2c8] ss:$16 sps:$4 sm:$0xff]   ;;  %v3876_v62 = vld [vmem:[%s4512_s21 + $0x2e4] ss:$16 sps:$4 sm:$0xff]  }
 0x115   : > { %1600 = vmatmul.mubr.bf16.gmra.mrb[28].mxu0 %v3784_v63  ;;  %1889 = vmatmul.mubr.bf16.gmra.mrb[28].mxu1 %v3785_v0  ;;  %v3878_v63 = vld [vmem:[%s4512_s21 + $0x2ec] ss:$16 sps:$4 sm:$0xff]   ;;  %v3880_v0 = vld [vmem:[%s4512_s21 + $0x2e0] ss:$16 sps:$4 sm:$0xff]  }
 0x116   : > { %1607 = vmatprep.mubr.bf16.mxu0 %v3786_v1  ;;  %1896 = vmatprep.mubr.bf16.mxu1 %v3788_v2  ;;  %v3881_v1 = vld [vmem:[%s4512_s21 + $0x2e8] ss:$16 sps:$4 sm:$0xff]   ;;  %v3882_v2 = vld [vmem:[%s4512_s21 + $0x304] ss:$16 sps:$4 sm:$0xff]  }
 0x11d   : > { %1608 = vmatmul.mubr.bf16.gmra.mrb[32].mxu0 %v3790_v3  ;;  %1897 = vmatmul.mubr.bf16.gmra.mrb[32].mxu1 %v3791_v4  ;;  %v3884_v3 = vld [vmem:[%s4512_s21 + $0x30c] ss:$16 sps:$4 sm:$0xff]   ;;  %v3886_v4 = vld [vmem:[%s4512_s21 + $0x300] ss:$16 sps:$4 sm:$0xff]  }
 0x11e   : > { %1615 = vmatprep.mubr.bf16.mxu0 %v3792_v5  ;;  %1904 = vmatprep.mubr.bf16.mxu1 %v3794_v6  ;;  %v3887_v5 = vld [vmem:[%s4512_s21 + $0x308] ss:$16 sps:$4 sm:$0xff]   ;;  %v3888_v6 = vld [vmem:[%s4512_s21 + $0x324] ss:$16 sps:$4 sm:$0xff]  }
 0x125   : > { %1616 = vmatmul.mubr.bf16.gmra.mrb[36].mxu0 %v3796_v7  ;;  %1905 = vmatmul.mubr.bf16.gmra.mrb[36].mxu1 %v3797_v8  ;;  %v3890_v7 = vld [vmem:[%s4512_s21 + $0x32c] ss:$16 sps:$4 sm:$0xff]   ;;  %v3892_v8 = vld [vmem:[%s4512_s21 + $0x320] ss:$16 sps:$4 sm:$0xff]  }
 0x126   : > { %1623 = vmatprep.mubr.bf16.mxu0 %v3798_v9  ;;  %1912 = vmatprep.mubr.bf16.mxu1 %v3800_v10  ;;  %v3893_v9 = vld [vmem:[%s4512_s21 + $0x328] ss:$16 sps:$4 sm:$0xff]   ;;  %v3894_v10 = vld [vmem:[%s4512_s21 + $0x344] ss:$16 sps:$4 sm:$0xff]  }
 0x12d   : > { %1624 = vmatmul.mubr.bf16.gmra.mrb[40].mxu0 %v4639_v11  ;;  %1913 = vmatmul.mubr.bf16.gmra.mrb[40].mxu1 %v4642_v12  ;;  %v3896_v11 = vld [vmem:[%s4512_s21 + $0x34c] ss:$16 sps:$4 sm:$0xff]   ;;  %v3898_v12 = vld [vmem:[%s4512_s21 + $0x340] ss:$16 sps:$4 sm:$0xff]  }
 0x12e   : > { %1631 = vmatprep.mubr.bf16.mxu0 %v4645_v13  ;;  %1920 = vmatprep.mubr.bf16.mxu1 %v4648_v14  ;;  %v3899_v13 = vld [vmem:[%s4512_s21 + $0x348] ss:$16 sps:$4 sm:$0xff]   ;;  %v3900_v14 = vld [vmem:[%s4512_s21 + $0x364] ss:$16 sps:$4 sm:$0xff]  }
 0x135   : > { %1632 = vmatmul.mubr.bf16.gmra.mrb[44].mxu0 %v3808_v16  ;;  %1921 = vmatmul.mubr.bf16.gmra.mrb[44].mxu1 %v3809_v17  ;;  %v423_v17 = vld [vmem:[#allocation2] sm:$0xff] }
 0x136   : > { %1639 = vmatprep.mubr.bf16.mxu0 %v3810_v18  ;;  %1928 = vmatprep.mubr.bf16.mxu1 %v3812_v19 }
 0x13d   : > { %1640 = vmatmul.mubr.bf16.gmra.mrb[48].mxu0 %v3814_v20  ;;  %1929 = vmatmul.mubr.bf16.gmra.mrb[48].mxu1 %v3815_v21  ;;  %v3904_v20 = vld [vmem:[%s4512_s21 + $0x360] ss:$16 sps:$4 sm:$0xff]  }
 0x13e   : > { %1647 = vmatprep.mubr.bf16.mxu0 %v3816_v22  ;;  %1936 = vmatprep.mubr.bf16.mxu1 %v3818_v23 }
 0x145   : > { %1648 = vmatmul.mubr.bf16.gmra.mrb[52].mxu0 %v3820_v24  ;;  %1937 = vmatmul.mubr.bf16.gmra.mrb[52].mxu1 %v3821_v25  ;;  %v3905_v24 = vld [vmem:[%s4512_s21 + $0x368] ss:$16 sps:$4 sm:$0xff]   ;;  %v3906_v25 = vld [vmem:[%s4512_s21 + $0x384] ss:$16 sps:$4 sm:$0xff]  }
 0x146   : > { %1655 = vmatprep.mubr.bf16.mxu0 %v3822_v26  ;;  %1944 = vmatprep.mubr.bf16.mxu1 %v3824_v27  ;;  %v424_v26 = vld [vmem:[#allocation2 + $0x8] sm:$0xff] }
 0x14d   : > { %1656 = vmatmul.mubr.bf16.gmra.mrb[56].mxu0 %v3826_v28  ;;  %1945 = vmatmul.mubr.bf16.gmra.mrb[56].mxu1 %v3827_v29  ;;  %v3908_v29 = vld [vmem:[%s4512_s21 + $0x38c] ss:$16 sps:$4 sm:$0xff]  }
 0x14e   : > { %1663 = vmatprep.mubr.bf16.mxu0 %v3828_v30  ;;  %1952 = vmatprep.mubr.bf16.mxu1 %v3830_v31 }
 0x155   : > { %1664 = vmatmul.mubr.bf16.gmra.mrb[60].mxu0 %v3832_v32  ;;  %1953 = vmatmul.mubr.bf16.gmra.mrb[60].mxu1 %v3833_v33 }
 0x156   : > { %1671 = vmatprep.mubr.bf16.mxu0 %v3834_v34  ;;  %1960 = vmatprep.mubr.bf16.mxu1 %v3836_v35  ;;  %v425_v35 = vld [vmem:[#allocation2 + $0x10] sm:$0xff] }
 0x15d   : > { %1672 = vmatmul.mubr.bf16.gmra.mrb[64].mxu0 %v3838_v36  ;;  %1961 = vmatmul.mubr.bf16.gmra.mrb[64].mxu1 %v3839_v37  ;;  %v4852_v36 = vld [vmem:[#allocation8] ss:$0 sm:$0xff] }
 0x15e   : > { %1679 = vmatprep.mubr.bf16.mxu0 %v3840_v38  ;;  %1968 = vmatprep.mubr.bf16.mxu1 %v3842_v39  ;;  %v3910_v39 = vld [vmem:[%s4512_s21 + $0x380] ss:$16 sps:$4 sm:$0xff]  }
 0x165   : > { %1680 = vmatmul.mubr.bf16.gmra.mrb[68].mxu0 %v3844_v40  ;;  %1969 = vmatmul.mubr.bf16.gmra.mrb[68].mxu1 %v3845_v41 }
 0x166   : > { %1687 = vmatprep.mubr.bf16.mxu0 %v3846_v42  ;;  %1976 = vmatprep.mubr.bf16.mxu1 %v3848_v43  ;;  %v3911_v43 = vld [vmem:[%s4512_s21 + $0x388] ss:$16 sps:$4 sm:$0xff]  }
 0x16d   : > { %1688 = vmatmul.mubr.bf16.gmra.mrb[72].mxu0 %v3850_v44  ;;  %1977 = vmatmul.mubr.bf16.gmra.mrb[72].mxu1 %v3851_v45  ;;  %v3912_v44 = vld [vmem:[%s4512_s21 + $0x3a4] ss:$16 sps:$4 sm:$0xff]   ;;  %v426_v45 = vld [vmem:[#allocation2 + $0x18] sm:$0xff] }
 0x16e   : > { %1695 = vmatprep.mubr.bf16.mxu0 %v3852_v46  ;;  %1984 = vmatprep.mubr.bf16.mxu1 %v3854_v47 }
 0x175   : > { %1696 = vmatmul.mubr.bf16.gmra.mrb[76].mxu0 %v3856_v48  ;;  %1985 = vmatmul.mubr.bf16.gmra.mrb[76].mxu1 %v3857_v49  ;;  %v3914_v48 = vld [vmem:[%s4512_s21 + $0x3ac] ss:$16 sps:$4 sm:$0xff]  }
 0x176   : > { %1703 = vmatprep.mubr.bf16.mxu0 %v3858_v50  ;;  %1992 = vmatprep.mubr.bf16.mxu1 %v3860_v51 }
 0x17d   : > { %1704 = vmatmul.mubr.bf16.gmra.mrb[80].mxu0 %v3862_v52  ;;  %1993 = vmatmul.mubr.bf16.gmra.mrb[80].mxu1 %v3863_v53 }
 0x17e   : > { %1711 = vmatprep.mubr.bf16.mxu0 %v3864_v54  ;;  %2000 = vmatprep.mubr.bf16.mxu1 %v3866_v55 }
 0x185   : > { %1712 = vmatmul.mubr.bf16.gmra.mrb[84].mxu0 %v3868_v56  ;;  %2001 = vmatmul.mubr.bf16.gmra.mrb[84].mxu1 %v3869_v57 }
 0x186   : > { %1719 = vmatprep.mubr.bf16.mxu0 %v3870_v58  ;;  %2008 = vmatprep.mubr.bf16.mxu1 %v3872_v59 }
 0x18d   : > { %1720 = vmatmul.mubr.bf16.gmra.mrb[88].mxu0 %v3874_v60  ;;  %2009 = vmatmul.mubr.bf16.gmra.mrb[88].mxu1 %v3875_v61 }
 0x18e   : > { %1727 = vmatprep.mubr.bf16.mxu0 %v3876_v62  ;;  %2016 = vmatprep.mubr.bf16.mxu1 %v3878_v63  ;;  %v427_v62 = vld [vmem:[#allocation2 + $0x20] sm:$0xff] }
 0x195   : > { %1728 = vmatmul.mubr.bf16.gmra.mrb[92].mxu0 %v3880_v0  ;;  %2017 = vmatmul.mubr.bf16.gmra.mrb[92].mxu1 %v3881_v1 }
 0x196   : > { %1735 = vmatprep.mubr.bf16.mxu0 %v3882_v2  ;;  %2024 = vmatprep.mubr.bf16.mxu1 %v3884_v3  ;;  %v3916_v3 = vld [vmem:[%s4512_s21 + $0x3a0] ss:$16 sps:$4 sm:$0xff]  }
 0x19d   : > { %1736 = vmatmul.mubr.bf16.gmra.mrb[96].mxu0 %v3886_v4  ;;  %2025 = vmatmul.mubr.bf16.gmra.mrb[96].mxu1 %v3887_v5  ;;  %v3917_v4 = vld [vmem:[%s4512_s21 + $0x3a8] ss:$16 sps:$4 sm:$0xff]  }
 0x19e   : > { %1743 = vmatprep.mubr.bf16.mxu0 %v3888_v6  ;;  %2032 = vmatprep.mubr.bf16.mxu1 %v3890_v7 }
 0x1a5   : > { %1744 = vmatmul.mubr.bf16.gmra.mrb[100].mxu0 %v3892_v8  ;;  %2033 = vmatmul.mubr.bf16.gmra.mrb[100].mxu1 %v3893_v9  ;;  %v428_v9 = vld [vmem:[#allocation2 + $0x28] sm:$0xff] }
 0x1a6   : > { %1751 = vmatprep.mubr.bf16.mxu0 %v3894_v10  ;;  %2040 = vmatprep.mubr.bf16.mxu1 %v3896_v11  ;;  %v3918_v10 = vld [vmem:[%s4512_s21 + $0x3c4] ss:$16 sps:$4 sm:$0xff]  }
 0x1ad   : > { %1752 = vmatmul.mubr.bf16.gmra.mrb[104].mxu0 %v3898_v12  ;;  %2041 = vmatmul.mubr.bf16.gmra.mrb[104].mxu1 %v3899_v13 }
 0x1ae   : > { %1759 = vmatprep.mubr.bf16.mxu0 %v3900_v14  ;;  %2048 = vmatprep.mubr.bf16.mxu1 %v3902_v15  ;;  %v3920_v15 = vld [vmem:[%s4512_s21 + $0x3cc] ss:$16 sps:$4 sm:$0xff]  }
 0x1b0   : > { %v1545_v16 = vpop.f32.mrb[0].mxu0  ;;  %v1834_v18 = vpop.f32.mrb[0].mxu1 }
 0x1b1   : > { %v1547_v19 = vpop.f32.mrb[1].mxu0  ;;  %v1835_v21 = vadd.f32 %v1834_v18, %v1545_v16  ;;  %v1836_v22 = vpop.f32.mrb[1].mxu1 }
 0x1b2   : > { %v1548_v23 = vpop.f32.mrb[2].mxu0  ;;  %v1837_v27 = vpop.f32.mrb[2].mxu1 }
 0x1b3   : > { %v1550_v28 = vpop.f32.mrb[3].mxu0  ;;  %v2089_v30 = vadd.f32 %v1835_v21, %v423_v17  ;;  %v1838_v31 = vadd.f32 %v1837_v27, %v1548_v23  ;;  %v1839_v32 = vpop.f32.mrb[3].mxu1 }
 0x1b5   : > { %1760 = vmatmul.mubr.bf16.gmra.mrb[108].mxu0 %v3904_v20  ;;  %2154 = vst.msk [vmem:[#allocation2] sm:$0xff] %vm358_vm0, %v2089_v30  ;;  %v2090_v33 = vadd.f32 %v1838_v31, %v424_v26  ;;  %2049 = vmatmul.mubr.bf16.gmra.mrb[108].mxu1 %v3905_v24 }
 0x1b6   : > { %1767 = vmatprep.mubr.bf16.mxu0 %v3906_v25  ;;  %2056 = vmatprep.mubr.bf16.mxu1 %v3908_v29 }
 0x1b7   : > { %2155 = vst.msk [vmem:[#allocation2 + $0x8] sm:$0xff] %vm358_vm0, %v2090_v33 }
 0x1b8   : > { %v1553_v34 = vpop.f32.mrb[4].mxu0  ;;  %v1842_v37 = vpop.f32.mrb[4].mxu1 }
 0x1b9   : > { %v1555_v38 = vpop.f32.mrb[5].mxu0  ;;  %v1843_v40 = vadd.f32 %v1842_v37, %v1553_v34  ;;  %v1844_v41 = vpop.f32.mrb[5].mxu1 }
 0x1ba   : > { %v1556_v42 = vpop.f32.mrb[6].mxu0  ;;  %v1845_v46 = vpop.f32.mrb[6].mxu1 }
 0x1bb   : > { %v1558_v47 = vpop.f32.mrb[7].mxu0  ;;  %v2091_v49 = vadd.f32 %v1843_v40, %v425_v35  ;;  %v1846_v50 = vadd.f32 %v1845_v46, %v1556_v42  ;;  %v1847_v51 = vpop.f32.mrb[7].mxu1  ;;  %v429_v35 = vld [vmem:[#allocation2 + $0x30] sm:$0xff] }
 0x1bc   : > { %v2221_v52 = vld [vmem:[#allocation2] sm:$0xff]  ;;  %v430_v47 = vld [vmem:[#allocation2 + $0x38] sm:$0xff] }
 0x1bd   : > { %1768 = vmatmul.mubr.bf16.gmra.mrb[112].mxu0 %v3910_v39  ;;  %v2292_v53 = vadd.f32 %v4852_v36, %v2221_v52  ;;  %2156 = vst.msk [vmem:[#allocation2 + $0x10] sm:$0xff] %vm358_vm0, %v2091_v49  ;;  %v2092_v54 = vadd.f32 %v1846_v50, %v426_v45  ;;  %2057 = vmatmul.mubr.bf16.gmra.mrb[112].mxu1 %v3911_v43  ;;  %v2677_v58 = vsel %vm358_vm0, %v2221_v52, 0.0  ;;  %v3922_v39 = vld [vmem:[%s4512_s21 + $0x3c0] ss:$16 sps:$4 sm:$0xff]   ;;  %v3924_v45 = vld [vmem:[%s4512_s21 + $0x3e4] ss:$16 sps:$4 sm:$0xff]  }
 0x1be   : > { %1775 = vmatprep.mubr.bf16.mxu0 %v3912_v44  ;;  %v2812_v55 = vmul.f32 %v2221_v52, %v2221_v52  ;;  %v2222_v56 = vld [vmem:[#allocation2 + $0x8] sm:$0xff]  ;;  %2064 = vmatprep.mubr.bf16.mxu1 %v3914_v48 }
 0x1bf   : > { %v3506_v57 = vpack.c.bf16 %v2292_v53, %v2292_v53  ;;  %v2293_v59 = vadd.f32 %v4852_v36, %v2222_v56  ;;  %v2678_v60 = vsel %vm358_vm0, %v2222_v56, 0.0  ;;  %2157 = vst.msk [vmem:[#allocation2 + $0x18] sm:$0xff] %vm358_vm0, %v2092_v54  ;;  %v2813_v0 = vmul.f32 %v2222_v56, %v2222_v56  ;;  %v3923_v44 = vld [vmem:[%s4512_s21 + $0x3c8] ss:$16 sps:$4 sm:$0xff]   ;;  %v3926_v50 = vld [vmem:[%s4512_s21 + $0x3ec] ss:$16 sps:$4 sm:$0xff]  }
 0x1c0   : > { %v1561_v61 = vpop.f32.mrb[8].mxu0  ;;  %v2679_v63 = vadd.f32 %v2678_v60, %v2677_v58  ;;  %v1850_v1 = vpop.f32.mrb[8].mxu1  ;;  %v2876_v11 = vsel %vm358_vm0, %v2812_v55, 0.0 }
 0x1c1   : > { %v1563_v2 = vpop.f32.mrb[9].mxu0  ;;  %2613 = vst.msk [vmem:[%s4867_s15] sm:$0xf] %vm2612_vm1, %v3506_v57  ;;  %v3507_v5 = vpack.c.bf16 %v2293_v59, %v2293_v59  ;;  %v1851_v6 = vadd.f32 %v1850_v1, %v1561_v61  ;;  %v1852_v7 = vpop.f32.mrb[9].mxu1  ;;  %v2877_v12 = vsel %vm358_vm0, %v2813_v0, 0.0 }
 0x1c2   : > { %v1564_v8 = vpop.f32.mrb[10].mxu0  ;;  %v1853_v13 = vpop.f32.mrb[10].mxu1  ;;  %v2878_v16 = vadd.f32 %v2877_v12, %v2876_v11 }
 0x1c3   : > { %v1566_v14 = vpop.f32.mrb[11].mxu0  ;;  %2614 = vst.msk [vmem:[%s4867_s15 + $0x4] sm:$0xf] %vm2612_vm1, %v3507_v5  ;;  %v2093_v17 = vadd.f32 %v1851_v6, %v427_v62  ;;  %v1854_v18 = vadd.f32 %v1853_v13, %v1564_v8  ;;  %v1855_v19 = vpop.f32.mrb[11].mxu1  ;;  %v431_v6 = vld [vmem:[#allocation2 + $0x40] sm:$0xff] }
 0x1c4   : > { %v2223_v20 = vld [vmem:[#allocation2 + $0x10] sm:$0xff]  ;;  %v3929_v14 = vld [vmem:[%s4512_s21 + $0x3e8] ss:$16 sps:$4 sm:$0xff]  }
 0x1c5   : > { %1776 = vmatmul.mubr.bf16.gmra.mrb[116].mxu0 %v3916_v3  ;;  %v2294_v21 = vadd.f32 %v4852_v36, %v2223_v20  ;;  %v2680_v22 = vsel %vm358_vm0, %v2223_v20, 0.0  ;;  %v2814_v23 = vmul.f32 %v2223_v20, %v2223_v20  ;;  %2158 = vst.msk [vmem:[#allocation2 + $0x20] sm:$0xff] %vm358_vm0, %v2093_v17  ;;  %v2094_v24 = vadd.f32 %v1854_v18, %v428_v9  ;;  %v3928_v9 = vld [vmem:[%s4512_s21 + $0x3e0] ss:$16 sps:$4 sm:$0xff]   ;;  %s5571_s21 = sld [smem:[#allocation28_spill]] }
 0x1c6   : > { %2065 = vmatmul.mubr.bf16.gmra.mrb[116].mxu1 %v3917_v4  ;;  %1783 = vmatprep.mubr.bf16.mxu0 %v3918_v10  ;;  %v2681_v25 = vadd.f32 %v2680_v22, %v2679_v63  ;;  %v2224_v26 = vld [vmem:[#allocation2 + $0x18] sm:$0xff] }
 0x1c7   : > { %2072 = vmatprep.mubr.bf16.mxu1 %v3920_v15  ;;  %v3508_v27 = vpack.c.bf16 %v2294_v21, %v2294_v21  ;;  %v2879_v28 = vsel %vm358_vm0, %v2814_v23, 0.0  ;;  %v2295_v29 = vadd.f32 %v4852_v36, %v2224_v26  ;;  %v2682_v30 = vsel %vm358_vm0, %v2224_v26, 0.0  ;;  %2159 = vst.msk [vmem:[#allocation2 + $0x28] sm:$0xff] %vm358_vm0, %v2094_v24 }
 0x1c8   : > { %v1569_v31 = vpop.f32.mrb[12].mxu0  ;;  %v2880_v32 = vadd.f32 %v2879_v28, %v2878_v16  ;;  %v2683_v33 = vadd.f32 %v2682_v30, %v2681_v25  ;;  %v2815_v34 = vmul.f32 %v2224_v26, %v2224_v26  ;;  %v1858_v37 = vpop.f32.mrb[12].mxu1  ;;  %v432_v16 = vld [vmem:[#allocation2 + $0x48] sm:$0xff] }
 0x1c9   : > { %v1571_v38 = vpop.f32.mrb[13].mxu0  ;;  %2615 = vst.msk [vmem:[%s4867_s15 + $0x8] sm:$0xf] %vm2612_vm1, %v3508_v27  ;;  %v3509_v40 = vpack.c.bf16 %v2295_v29, %v2295_v29  ;;  %v1859_v41 = vadd.f32 %v1858_v37, %v1569_v31  ;;  %v1860_v42 = vpop.f32.mrb[13].mxu1 }
 0x1ca   : > { %v1572_v43 = vpop.f32.mrb[14].mxu0  ;;  %v2881_v46 = vsel %vm358_vm0, %v2815_v34, 0.0  ;;  %v1861_v48 = vpop.f32.mrb[14].mxu1 }
 0x1cb   : > { %v1574_v49 = vpop.f32.mrb[15].mxu0  ;;  %2616 = vst.msk [vmem:[%s4867_s15 + $0xc] sm:$0xf] %vm2612_vm1, %v3509_v40  ;;  %v2882_v51 = vadd.f32 %v2881_v46, %v2880_v32  ;;  %v2095_v52 = vadd.f32 %v1859_v41, %v429_v35  ;;  %v1862_v53 = vadd.f32 %v1861_v48, %v1572_v43  ;;  %v1863_v54 = vpop.f32.mrb[15].mxu1  ;;  %s5572_s16 = smov %s5571_s21  ;;  %s5358_s14 = scalar_lea.hbm %s5571_s21, %s3497_s6 }
 0x1cc   : > { %v2225_v55 = vld [vmem:[#allocation2 + $0x20] sm:$0xff] }
 0x1cd   : > { %1784 = vmatmul.mubr.bf16.gmra.mrb[120].mxu0 %v3922_v39  ;;  %v2296_v56 = vadd.f32 %v4852_v36, %v2225_v55  ;;  %v2684_v57 = vsel %vm358_vm0, %v2225_v55, 0.0  ;;  %v2816_v58 = vmul.f32 %v2225_v55, %v2225_v55  ;;  %2160 = vst.msk [vmem:[#allocation2 + $0x30] sm:$0xff] %vm358_vm0, %v2095_v52  ;;  %v2096_v59 = vadd.f32 %v1862_v53, %v430_v47  ;;  %v433_v39 = vld [vmem:[#allocation2 + $0x50] sm:$0xff]  ;;  %v434_v47 = vld [vmem:[#allocation2 + $0x58] sm:$0xff] }
 0x1ce   : > { %2073 = vmatmul.mubr.bf16.gmra.mrb[120].mxu1 %v3923_v44  ;;  %1791 = vmatprep.mubr.bf16.mxu0 %v3924_v45  ;;  %v2685_v60 = vadd.f32 %v2684_v57, %v2683_v33  ;;  %v2226_v61 = vld [vmem:[#allocation2 + $0x28] sm:$0xff] }
 0x1cf   : > { %2080 = vmatprep.mubr.bf16.mxu1 %v3926_v50  ;;  %v3510_v62 = vpack.c.bf16 %v2296_v56, %v2296_v56  ;;  %v2883_v63 = vsel %vm358_vm0, %v2816_v58, 0.0  ;;  %v2297_v0 = vadd.f32 %v4852_v36, %v2226_v61  ;;  %v2686_v1 = vsel %vm358_vm0, %v2226_v61, 0.0  ;;  %2161 = vst.msk [vmem:[#allocation2 + $0x38] sm:$0xff] %vm358_vm0, %v2096_v59 }
 0x1d0   : > { %v1577_v2 = vpop.f32.mrb[16].mxu0  ;;  %v2884_v3 = vadd.f32 %v2883_v63, %v2882_v51  ;;  %v2687_v4 = vadd.f32 %v2686_v1, %v2685_v60  ;;  %v2817_v5 = vmul.f32 %v2226_v61, %v2226_v61  ;;  %v1866_v7 = vpop.f32.mrb[16].mxu1 }
 0x1d1   : > { %v1579_v8 = vpop.f32.mrb[17].mxu0  ;;  %2617 = vst.msk [vmem:[%s4867_s15 + $0x10] sm:$0xf] %vm2612_vm1, %v3510_v62  ;;  %v3511_v10 = vpack.c.bf16 %v2297_v0, %v2297_v0  ;;  %v1867_v11 = vadd.f32 %v1866_v7, %v1577_v2  ;;  %v1868_v12 = vpop.f32.mrb[17].mxu1 }
 0x1d2   : > { %v1580_v13 = vpop.f32.mrb[18].mxu0  ;;  %v2885_v15 = vsel %vm358_vm0, %v2817_v5, 0.0  ;;  %v1869_v17 = vpop.f32.mrb[18].mxu1  ;;  %v435_v5 = vld [vmem:[#allocation2 + $0x60] sm:$0xff] }
 0x1d3   : > { %v1582_v18 = vpop.f32.mrb[19].mxu0  ;;  %2618 = vst.msk [vmem:[%s4867_s15 + $0x14] sm:$0xf] %vm2612_vm1, %v3511_v10  ;;  %v2886_v19 = vadd.f32 %v2885_v15, %v2884_v3  ;;  %v2097_v20 = vadd.f32 %v1867_v11, %v431_v6  ;;  %v1870_v21 = vadd.f32 %v1869_v17, %v1580_v13  ;;  %v1871_v22 = vpop.f32.mrb[19].mxu1  ;;  %v436_v13 = vld [vmem:[#allocation2 + $0x68] sm:$0xff] }
 0x1d4   : > { %v2227_v23 = vld [vmem:[#allocation2 + $0x30] sm:$0xff] }
 0x1d5   : > { %1792 = vmatmul.mubr.bf16.gmra.mrb[124].mxu0 %v3928_v9  ;;  %v2298_v24 = vadd.f32 %v4852_v36, %v2227_v23  ;;  %v2688_v25 = vsel %vm358_vm0, %v2227_v23, 0.0  ;;  %v2818_v26 = vmul.f32 %v2227_v23, %v2227_v23  ;;  %2162 = vst.msk [vmem:[#allocation2 + $0x40] sm:$0xff] %vm358_vm0, %v2097_v20  ;;  %v2098_v27 = vadd.f32 %v1870_v21, %v432_v16 }
 0x1d6   : > { %2081 = vmatmul.mubr.bf16.gmra.mrb[124].mxu1 %v3929_v14  ;;  %v2689_v28 = vadd.f32 %v2688_v25, %v2687_v4  ;;  %v2228_v29 = vld [vmem:[#allocation2 + $0x38] sm:$0xff] }
 0x1d7   : > { %v3512_v30 = vpack.c.bf16 %v2298_v24, %v2298_v24  ;;  %v2887_v31 = vsel %vm358_vm0, %v2818_v26, 0.0  ;;  %v2299_v32 = vadd.f32 %v4852_v36, %v2228_v29  ;;  %v2690_v33 = vsel %vm358_vm0, %v2228_v29, 0.0  ;;  %2163 = vst.msk [vmem:[#allocation2 + $0x48] sm:$0xff] %vm358_vm0, %v2098_v27 }
 0x1d8   : > { %v1585_v34 = vpop.f32.mrb[20].mxu0  ;;  %v2888_v35 = vadd.f32 %v2887_v31, %v2886_v19  ;;  %v2691_v37 = vadd.f32 %v2690_v33, %v2689_v28  ;;  %v2819_v38 = vmul.f32 %v2228_v29, %v2228_v29  ;;  %v1874_v40 = vpop.f32.mrb[20].mxu1 }
 0x1d9   : > { %v1587_v41 = vpop.f32.mrb[21].mxu0  ;;  %2619 = vst.msk [vmem:[%s4867_s15 + $0x18] sm:$0xf] %vm2612_vm1, %v3512_v30  ;;  %v3513_v42 = vpack.c.bf16 %v2299_v32, %v2299_v32  ;;  %v1875_v43 = vadd.f32 %v1874_v40, %v1585_v34  ;;  %v1876_v44 = vpop.f32.mrb[21].mxu1 }
 0x1da   : > { %v1588_v45 = vpop.f32.mrb[22].mxu0  ;;  %v2889_v46 = vsel %vm358_vm0, %v2819_v38, 0.0  ;;  %v1877_v48 = vpop.f32.mrb[22].mxu1  ;;  %v438_v44 = vld [vmem:[#allocation2 + $0x78] sm:$0xff] }
 0x1db   : > { %v1590_v49 = vpop.f32.mrb[23].mxu0  ;;  %2620 = vst.msk [vmem:[%s4867_s15 + $0x1c] sm:$0xf] %vm2612_vm1, %v3513_v42  ;;  %v2890_v50 = vadd.f32 %v2889_v46, %v2888_v35  ;;  %v2099_v51 = vadd.f32 %v1875_v43, %v433_v39  ;;  %v1878_v52 = vadd.f32 %v1877_v48, %v1588_v45  ;;  %v1879_v53 = vpop.f32.mrb[23].mxu1  ;;  %v437_v35 = vld [vmem:[#allocation2 + $0x70] sm:$0xff] }
 0x1dc   : > { %v2229_v54 = vld [vmem:[#allocation2 + $0x40] sm:$0xff] }
 0x1dd   : > { %v2300_v55 = vadd.f32 %v4852_v36, %v2229_v54  ;;  %v2692_v56 = vsel %vm358_vm0, %v2229_v54, 0.0  ;;  %v2820_v57 = vmul.f32 %v2229_v54, %v2229_v54  ;;  %2164 = vst.msk [vmem:[#allocation2 + $0x50] sm:$0xff] %vm358_vm0, %v2099_v51  ;;  %v2100_v58 = vadd.f32 %v1878_v52, %v434_v47 }
 0x1de   : > { %v2693_v59 = vadd.f32 %v2692_v56, %v2691_v37  ;;  %v2230_v60 = vld [vmem:[#allocation2 + $0x48] sm:$0xff] }
 0x1df   : > { %v3514_v61 = vpack.c.bf16 %v2300_v55, %v2300_v55  ;;  %v2891_v62 = vsel %vm358_vm0, %v2820_v57, 0.0  ;;  %v2301_v63 = vadd.f32 %v4852_v36, %v2230_v60  ;;  %v2694_v0 = vsel %vm358_vm0, %v2230_v60, 0.0  ;;  %2165 = vst.msk [vmem:[#allocation2 + $0x58] sm:$0xff] %vm358_vm0, %v2100_v58 }
 0x1e0   : > { %v1593_v1 = vpop.f32.mrb[24].mxu0  ;;  %v2892_v2 = vadd.f32 %v2891_v62, %v2890_v50  ;;  %v2695_v3 = vadd.f32 %v2694_v0, %v2693_v59  ;;  %v2821_v4 = vmul.f32 %v2230_v60, %v2230_v60  ;;  %v1882_v6 = vpop.f32.mrb[24].mxu1 }
 0x1e1   : > { %v1595_v7 = vpop.f32.mrb[25].mxu0  ;;  %2621 = vst.msk [vmem:[%s4867_s15 + $0x20] sm:$0xf] %vm2612_vm1, %v3514_v61  ;;  %v3515_v8 = vpack.c.bf16 %v2301_v63, %v2301_v63  ;;  %v1883_v9 = vadd.f32 %v1882_v6, %v1593_v1  ;;  %v1884_v10 = vpop.f32.mrb[25].mxu1 }
 0x1e2   : > { %v1596_v11 = vpop.f32.mrb[26].mxu0  ;;  %v2893_v12 = vsel %vm358_vm0, %v2821_v4, 0.0  ;;  %v1885_v14 = vpop.f32.mrb[26].mxu1  ;;  %v440_v10 = vld [vmem:[#allocation2 + $0x88] sm:$0xff] }
 0x1e3   : > { %v1598_v15 = vpop.f32.mrb[27].mxu0  ;;  %2622 = vst.msk [vmem:[%s4867_s15 + $0x24] sm:$0xf] %vm2612_vm1, %v3515_v8  ;;  %v2894_v16 = vadd.f32 %v2893_v12, %v2892_v2  ;;  %v2101_v17 = vadd.f32 %v1883_v9, %v435_v5  ;;  %v1886_v18 = vadd.f32 %v1885_v14, %v1596_v11  ;;  %v1887_v19 = vpop.f32.mrb[27].mxu1  ;;  %v439_v2 = vld [vmem:[#allocation2 + $0x80] sm:$0xff] }
 0x1e4   : > { %v2231_v20 = vld [vmem:[#allocation2 + $0x50] sm:$0xff] }
 0x1e5   : > { %v2302_v21 = vadd.f32 %v4852_v36, %v2231_v20  ;;  %v2696_v22 = vsel %vm358_vm0, %v2231_v20, 0.0  ;;  %v2822_v23 = vmul.f32 %v2231_v20, %v2231_v20  ;;  %2166 = vst.msk [vmem:[#allocation2 + $0x60] sm:$0xff] %vm358_vm0, %v2101_v17  ;;  %v2102_v24 = vadd.f32 %v1886_v18, %v436_v13 }
 0x1e6   : > { %v2697_v25 = vadd.f32 %v2696_v22, %v2695_v3  ;;  %v2232_v26 = vld [vmem:[#allocation2 + $0x58] sm:$0xff] }
 0x1e7   : > { %v3516_v27 = vpack.c.bf16 %v2302_v21, %v2302_v21  ;;  %v2895_v28 = vsel %vm358_vm0, %v2822_v23, 0.0  ;;  %v2303_v29 = vadd.f32 %v4852_v36, %v2232_v26  ;;  %v2698_v30 = vsel %vm358_vm0, %v2232_v26, 0.0  ;;  %2167 = vst.msk [vmem:[#allocation2 + $0x68] sm:$0xff] %vm358_vm0, %v2102_v24 }
 0x1e8   : > { %v1601_v31 = vpop.f32.mrb[28].mxu0  ;;  %v2896_v32 = vadd.f32 %v2895_v28, %v2894_v16  ;;  %v2699_v33 = vadd.f32 %v2698_v30, %v2697_v25  ;;  %v2823_v34 = vmul.f32 %v2232_v26, %v2232_v26  ;;  %v1890_v37 = vpop.f32.mrb[28].mxu1 }
 0x1e9   : > { %v1603_v38 = vpop.f32.mrb[29].mxu0  ;;  %2623 = vst.msk [vmem:[%s4867_s15 + $0x28] sm:$0xf] %vm2612_vm1, %v3516_v27  ;;  %v3517_v39 = vpack.c.bf16 %v2303_v29, %v2303_v29  ;;  %v1891_v40 = vadd.f32 %v1890_v37, %v1601_v31  ;;  %v1892_v41 = vpop.f32.mrb[29].mxu1 }
 0x1ea   : > { %v1604_v42 = vpop.f32.mrb[30].mxu0  ;;  %v2897_v43 = vsel %vm358_vm0, %v2823_v34, 0.0  ;;  %v1893_v45 = vpop.f32.mrb[30].mxu1  ;;  %v442_v41 = vld [vmem:[#allocation2 + $0x98] sm:$0xff] }
 0x1eb   : > { %v1606_v46 = vpop.f32.mrb[31].mxu0  ;;  %2624 = vst.msk [vmem:[%s4867_s15 + $0x2c] sm:$0xf] %vm2612_vm1, %v3517_v39  ;;  %v2898_v47 = vadd.f32 %v2897_v43, %v2896_v32  ;;  %v2103_v48 = vadd.f32 %v1891_v40, %v437_v35  ;;  %v1894_v49 = vadd.f32 %v1893_v45, %v1604_v42  ;;  %v1895_v50 = vpop.f32.mrb[31].mxu1  ;;  %v441_v32 = vld [vmem:[#allocation2 + $0x90] sm:$0xff] }
 0x1ec   : > { %v2233_v51 = vld [vmem:[#allocation2 + $0x60] sm:$0xff] }
 0x1ed   : > { %v2304_v52 = vadd.f32 %v4852_v36, %v2233_v51  ;;  %v2700_v53 = vsel %vm358_vm0, %v2233_v51, 0.0  ;;  %v2824_v54 = vmul.f32 %v2233_v51, %v2233_v51  ;;  %2168 = vst.msk [vmem:[#allocation2 + $0x70] sm:$0xff] %vm358_vm0, %v2103_v48  ;;  %v2104_v55 = vadd.f32 %v1894_v49, %v438_v44 }
 0x1ee   : > { %v2701_v56 = vadd.f32 %v2700_v53, %v2699_v33  ;;  %v2234_v57 = vld [vmem:[#allocation2 + $0x68] sm:$0xff] }
 0x1ef   : > { %v3518_v58 = vpack.c.bf16 %v2304_v52, %v2304_v52  ;;  %v2899_v59 = vsel %vm358_vm0, %v2824_v54, 0.0  ;;  %v2305_v60 = vadd.f32 %v4852_v36, %v2234_v57  ;;  %v2702_v61 = vsel %vm358_vm0, %v2234_v57, 0.0  ;;  %2169 = vst.msk [vmem:[#allocation2 + $0x78] sm:$0xff] %vm358_vm0, %v2104_v55 }
 0x1f0   : > { %v1609_v62 = vpop.f32.mrb[32].mxu0  ;;  %v2900_v63 = vadd.f32 %v2899_v59, %v2898_v47  ;;  %v2703_v0 = vadd.f32 %v2702_v61, %v2701_v56  ;;  %v2825_v1 = vmul.f32 %v2234_v57, %v2234_v57  ;;  %v1898_v3 = vpop.f32.mrb[32].mxu1 }
 0x1f1   : > { %v1611_v4 = vpop.f32.mrb[33].mxu0  ;;  %2625 = vst.msk [vmem:[%s4867_s15 + $0x30] sm:$0xf] %vm2612_vm1, %v3518_v58  ;;  %v3519_v5 = vpack.c.bf16 %v2305_v60, %v2305_v60  ;;  %v1899_v6 = vadd.f32 %v1898_v3, %v1609_v62  ;;  %v1900_v7 = vpop.f32.mrb[33].mxu1 }
 0x1f2   : > { %v1612_v8 = vpop.f32.mrb[34].mxu0  ;;  %v2901_v9 = vsel %vm358_vm0, %v2825_v1, 0.0  ;;  %v1901_v11 = vpop.f32.mrb[34].mxu1  ;;  %v444_v7 = vld [vmem:[#allocation2 + $0xa8] sm:$0xff] }
 0x1f3   : > { %v1614_v12 = vpop.f32.mrb[35].mxu0  ;;  %2626 = vst.msk [vmem:[%s4867_s15 + $0x34] sm:$0xf] %vm2612_vm1, %v3519_v5  ;;  %v2902_v13 = vadd.f32 %v2901_v9, %v2900_v63  ;;  %v2105_v14 = vadd.f32 %v1899_v6, %v439_v2  ;;  %v1902_v15 = vadd.f32 %v1901_v11, %v1612_v8  ;;  %v1903_v16 = vpop.f32.mrb[35].mxu1  ;;  %v443_v63 = vld [vmem:[#allocation2 + $0xa0] sm:$0xff] }
 0x1f4   : > { %v2235_v17 = vld [vmem:[#allocation2 + $0x70] sm:$0xff] }
 0x1f5   : > { %v2306_v18 = vadd.f32 %v4852_v36, %v2235_v17  ;;  %v2704_v19 = vsel %vm358_vm0, %v2235_v17, 0.0  ;;  %v2826_v20 = vmul.f32 %v2235_v17, %v2235_v17  ;;  %2170 = vst.msk [vmem:[#allocation2 + $0x80] sm:$0xff] %vm358_vm0, %v2105_v14  ;;  %v2106_v21 = vadd.f32 %v1902_v15, %v440_v10 }
 0x1f6   : > { %v2705_v22 = vadd.f32 %v2704_v19, %v2703_v0  ;;  %v2236_v23 = vld [vmem:[#allocation2 + $0x78] sm:$0xff] }
 0x1f7   : > { %v3520_v24 = vpack.c.bf16 %v2306_v18, %v2306_v18  ;;  %v2903_v25 = vsel %vm358_vm0, %v2826_v20, 0.0  ;;  %v2307_v26 = vadd.f32 %v4852_v36, %v2236_v23  ;;  %v2706_v27 = vsel %vm358_vm0, %v2236_v23, 0.0  ;;  %2171 = vst.msk [vmem:[#allocation2 + $0x88] sm:$0xff] %vm358_vm0, %v2106_v21 }
 0x1f8   : > { %v1617_v28 = vpop.f32.mrb[36].mxu0  ;;  %v2904_v29 = vadd.f32 %v2903_v25, %v2902_v13  ;;  %v2707_v30 = vadd.f32 %v2706_v27, %v2705_v22  ;;  %v2827_v31 = vmul.f32 %v2236_v23, %v2236_v23  ;;  %v1906_v33 = vpop.f32.mrb[36].mxu1 }
 0x1f9   : > { %v1619_v34 = vpop.f32.mrb[37].mxu0  ;;  %2627 = vst.msk [vmem:[%s4867_s15 + $0x38] sm:$0xf] %vm2612_vm1, %v3520_v24  ;;  %v3521_v35 = vpack.c.bf16 %v2307_v26, %v2307_v26  ;;  %v1907_v37 = vadd.f32 %v1906_v33, %v1617_v28  ;;  %v1908_v38 = vpop.f32.mrb[37].mxu1 }
 0x1fa   : > { %v1620_v39 = vpop.f32.mrb[38].mxu0  ;;  %v2905_v40 = vsel %vm358_vm0, %v2827_v31, 0.0  ;;  %v1909_v42 = vpop.f32.mrb[38].mxu1  ;;  %v446_v38 = vld [vmem:[#allocation2 + $0xb8] sm:$0xff] }
 0x1fb   : > { %v1622_v43 = vpop.f32.mrb[39].mxu0  ;;  %2628 = vst.msk [vmem:[%s4867_s15 + $0x3c] sm:$0xf] %vm2612_vm1, %v3521_v35  ;;  %v2906_v44 = vadd.f32 %v2905_v40, %v2904_v29  ;;  %v2107_v45 = vadd.f32 %v1907_v37, %v441_v32  ;;  %v1910_v46 = vadd.f32 %v1909_v42, %v1620_v39  ;;  %v1911_v47 = vpop.f32.mrb[39].mxu1  ;;  %v445_v29 = vld [vmem:[#allocation2 + $0xb0] sm:$0xff] }
 0x1fc   : > { %v2237_v48 = vld [vmem:[#allocation2 + $0x80] sm:$0xff] }
 0x1fd   : > { %v2308_v49 = vadd.f32 %v4852_v36, %v2237_v48  ;;  %v2708_v50 = vsel %vm358_vm0, %v2237_v48, 0.0  ;;  %v2828_v51 = vmul.f32 %v2237_v48, %v2237_v48  ;;  %2172 = vst.msk [vmem:[#allocation2 + $0x90] sm:$0xff] %vm358_vm0, %v2107_v45  ;;  %v2108_v52 = vadd.f32 %v1910_v46, %v442_v41 }
 0x1fe   : > { %v2709_v53 = vadd.f32 %v2708_v50, %v2707_v30  ;;  %v2238_v54 = vld [vmem:[#allocation2 + $0x88] sm:$0xff] }
 0x1ff   : > { %v3522_v55 = vpack.c.bf16 %v2308_v49, %v2308_v49  ;;  %v2907_v56 = vsel %vm358_vm0, %v2828_v51, 0.0  ;;  %v2309_v57 = vadd.f32 %v4852_v36, %v2238_v54  ;;  %v2710_v58 = vsel %vm358_vm0, %v2238_v54, 0.0  ;;  %2173 = vst.msk [vmem:[#allocation2 + $0x98] sm:$0xff] %vm358_vm0, %v2108_v52 }
 0x200   : > { %v1625_v59 = vpop.f32.mrb[40].mxu0  ;;  %v2908_v60 = vadd.f32 %v2907_v56, %v2906_v44  ;;  %v2711_v61 = vadd.f32 %v2710_v58, %v2709_v53  ;;  %v2829_v62 = vmul.f32 %v2238_v54, %v2238_v54  ;;  %v1914_v0 = vpop.f32.mrb[40].mxu1 }
 0x201   : > { %v1627_v1 = vpop.f32.mrb[41].mxu0  ;;  %2629 = vst.msk [vmem:[%s4867_s15 + $0x40] sm:$0xf] %vm2612_vm1, %v3522_v55  ;;  %v3523_v2 = vpack.c.bf16 %v2309_v57, %v2309_v57  ;;  %v1915_v3 = vadd.f32 %v1914_v0, %v1625_v59  ;;  %v1916_v4 = vpop.f32.mrb[41].mxu1 }
 0x202   : > { %v1628_v5 = vpop.f32.mrb[42].mxu0  ;;  %v2909_v6 = vsel %vm358_vm0, %v2829_v62, 0.0  ;;  %v1917_v8 = vpop.f32.mrb[42].mxu1  ;;  %v448_v4 = vld [vmem:[#allocation2 + $0xc8] sm:$0xff] }
 0x203   : > { %v1630_v9 = vpop.f32.mrb[43].mxu0  ;;  %2630 = vst.msk [vmem:[%s4867_s15 + $0x44] sm:$0xf] %vm2612_vm1, %v3523_v2  ;;  %v2910_v10 = vadd.f32 %v2909_v6, %v2908_v60  ;;  %v2109_v11 = vadd.f32 %v1915_v3, %v443_v63  ;;  %v1918_v12 = vadd.f32 %v1917_v8, %v1628_v5  ;;  %v1919_v13 = vpop.f32.mrb[43].mxu1  ;;  %v447_v60 = vld [vmem:[#allocation2 + $0xc0] sm:$0xff] }
 0x204   : > { %v2239_v14 = vld [vmem:[#allocation2 + $0x90] sm:$0xff] }
 0x205   : > { %v2310_v15 = vadd.f32 %v4852_v36, %v2239_v14  ;;  %v2712_v16 = vsel %vm358_vm0, %v2239_v14, 0.0  ;;  %v2830_v17 = vmul.f32 %v2239_v14, %v2239_v14  ;;  %2174 = vst.msk [vmem:[#allocation2 + $0xa0] sm:$0xff] %vm358_vm0, %v2109_v11  ;;  %v2110_v18 = vadd.f32 %v1918_v12, %v444_v7 }
 0x206   : > { %v2713_v19 = vadd.f32 %v2712_v16, %v2711_v61  ;;  %v2240_v20 = vld [vmem:[#allocation2 + $0x98] sm:$0xff] }
 0x207   : > { %v3524_v21 = vpack.c.bf16 %v2310_v15, %v2310_v15  ;;  %v2911_v22 = vsel %vm358_vm0, %v2830_v17, 0.0  ;;  %v2311_v23 = vadd.f32 %v4852_v36, %v2240_v20  ;;  %v2714_v24 = vsel %vm358_vm0, %v2240_v20, 0.0  ;;  %2175 = vst.msk [vmem:[#allocation2 + $0xa8] sm:$0xff] %vm358_vm0, %v2110_v18 }
 0x208   : > { %v1633_v25 = vpop.f32.mrb[44].mxu0  ;;  %v2912_v26 = vadd.f32 %v2911_v22, %v2910_v10  ;;  %v2715_v27 = vadd.f32 %v2714_v24, %v2713_v19  ;;  %v2831_v28 = vmul.f32 %v2240_v20, %v2240_v20  ;;  %v1922_v30 = vpop.f32.mrb[44].mxu1 }
 0x209   : > { %v1635_v31 = vpop.f32.mrb[45].mxu0  ;;  %2631 = vst.msk [vmem:[%s4867_s15 + $0x48] sm:$0xf] %vm2612_vm1, %v3524_v21  ;;  %v3525_v32 = vpack.c.bf16 %v2311_v23, %v2311_v23  ;;  %v1923_v33 = vadd.f32 %v1922_v30, %v1633_v25  ;;  %v1924_v34 = vpop.f32.mrb[45].mxu1 }
 0x20a   : > { %v1636_v35 = vpop.f32.mrb[46].mxu0  ;;  %v2913_v37 = vsel %vm358_vm0, %v2831_v28, 0.0  ;;  %v1925_v39 = vpop.f32.mrb[46].mxu1  ;;  %v450_v34 = vld [vmem:[#allocation2 + $0xd8] sm:$0xff] }
 0x20b   : > { %v1638_v40 = vpop.f32.mrb[47].mxu0  ;;  %2632 = vst.msk [vmem:[%s4867_s15 + $0x4c] sm:$0xf] %vm2612_vm1, %v3525_v32  ;;  %v2914_v41 = vadd.f32 %v2913_v37, %v2912_v26  ;;  %v2111_v42 = vadd.f32 %v1923_v33, %v445_v29  ;;  %v1926_v43 = vadd.f32 %v1925_v39, %v1636_v35  ;;  %v1927_v44 = vpop.f32.mrb[47].mxu1  ;;  %v449_v26 = vld [vmem:[#allocation2 + $0xd0] sm:$0xff] }
 0x20c   : > { %v2241_v45 = vld [vmem:[#allocation2 + $0xa0] sm:$0xff] }
 0x20d   : > { %v2312_v46 = vadd.f32 %v4852_v36, %v2241_v45  ;;  %v2716_v47 = vsel %vm358_vm0, %v2241_v45, 0.0  ;;  %v2832_v48 = vmul.f32 %v2241_v45, %v2241_v45  ;;  %2176 = vst.msk [vmem:[#allocation2 + $0xb0] sm:$0xff] %vm358_vm0, %v2111_v42  ;;  %v2112_v49 = vadd.f32 %v1926_v43, %v446_v38 }
 0x20e   : > { %v2717_v50 = vadd.f32 %v2716_v47, %v2715_v27  ;;  %v2242_v51 = vld [vmem:[#allocation2 + $0xa8] sm:$0xff] }
 0x20f   : > { %v3526_v52 = vpack.c.bf16 %v2312_v46, %v2312_v46  ;;  %v2915_v53 = vsel %vm358_vm0, %v2832_v48, 0.0  ;;  %v2313_v54 = vadd.f32 %v4852_v36, %v2242_v51  ;;  %v2718_v55 = vsel %vm358_vm0, %v2242_v51, 0.0  ;;  %2177 = vst.msk [vmem:[#allocation2 + $0xb8] sm:$0xff] %vm358_vm0, %v2112_v49 }
 0x210   : > { %v1641_v56 = vpop.f32.mrb[48].mxu0  ;;  %v2916_v57 = vadd.f32 %v2915_v53, %v2914_v41  ;;  %v2719_v58 = vadd.f32 %v2718_v55, %v2717_v50  ;;  %v2833_v59 = vmul.f32 %v2242_v51, %v2242_v51  ;;  %v1930_v61 = vpop.f32.mrb[48].mxu1 }
 0x211   : > { %v1643_v62 = vpop.f32.mrb[49].mxu0  ;;  %2633 = vst.msk [vmem:[%s4867_s15 + $0x50] sm:$0xf] %vm2612_vm1, %v3526_v52  ;;  %v3527_v63 = vpack.c.bf16 %v2313_v54, %v2313_v54  ;;  %v1931_v0 = vadd.f32 %v1930_v61, %v1641_v56  ;;  %v1932_v1 = vpop.f32.mrb[49].mxu1 }
 0x212   : > { %v1644_v2 = vpop.f32.mrb[50].mxu0  ;;  %v2917_v3 = vsel %vm358_vm0, %v2833_v59, 0.0  ;;  %v1933_v5 = vpop.f32.mrb[50].mxu1  ;;  %v452_v1 = vld [vmem:[#allocation2 + $0xe8] sm:$0xff] }
 0x213   : > { %v1646_v6 = vpop.f32.mrb[51].mxu0  ;;  %2634 = vst.msk [vmem:[%s4867_s15 + $0x54] sm:$0xf] %vm2612_vm1, %v3527_v63  ;;  %v2918_v7 = vadd.f32 %v2917_v3, %v2916_v57  ;;  %v2113_v8 = vadd.f32 %v1931_v0, %v447_v60  ;;  %v1934_v9 = vadd.f32 %v1933_v5, %v1644_v2  ;;  %v1935_v10 = vpop.f32.mrb[51].mxu1  ;;  %v451_v57 = vld [vmem:[#allocation2 + $0xe0] sm:$0xff] }
 0x214   : > { %v2243_v11 = vld [vmem:[#allocation2 + $0xb0] sm:$0xff] }
 0x215   : > { %v2314_v12 = vadd.f32 %v4852_v36, %v2243_v11  ;;  %v2720_v13 = vsel %vm358_vm0, %v2243_v11, 0.0  ;;  %v2834_v14 = vmul.f32 %v2243_v11, %v2243_v11  ;;  %2178 = vst.msk [vmem:[#allocation2 + $0xc0] sm:$0xff] %vm358_vm0, %v2113_v8  ;;  %v2114_v15 = vadd.f32 %v1934_v9, %v448_v4 }
 0x216   : > { %v2721_v16 = vadd.f32 %v2720_v13, %v2719_v58  ;;  %v2244_v17 = vld [vmem:[#allocation2 + $0xb8] sm:$0xff] }
 0x217   : > { %v3528_v18 = vpack.c.bf16 %v2314_v12, %v2314_v12  ;;  %v2919_v19 = vsel %vm358_vm0, %v2834_v14, 0.0  ;;  %v2315_v20 = vadd.f32 %v4852_v36, %v2244_v17  ;;  %v2722_v21 = vsel %vm358_vm0, %v2244_v17, 0.0  ;;  %2179 = vst.msk [vmem:[#allocation2 + $0xc8] sm:$0xff] %vm358_vm0, %v2114_v15 }
 0x218   : > { %v1649_v22 = vpop.f32.mrb[52].mxu0  ;;  %v2920_v23 = vadd.f32 %v2919_v19, %v2918_v7  ;;  %v2723_v24 = vadd.f32 %v2722_v21, %v2721_v16  ;;  %v2835_v25 = vmul.f32 %v2244_v17, %v2244_v17  ;;  %v1938_v27 = vpop.f32.mrb[52].mxu1 }
 0x219   : > { %v1651_v28 = vpop.f32.mrb[53].mxu0  ;;  %2635 = vst.msk [vmem:[%s4867_s15 + $0x58] sm:$0xf] %vm2612_vm1, %v3528_v18  ;;  %v3529_v29 = vpack.c.bf16 %v2315_v20, %v2315_v20  ;;  %v1939_v30 = vadd.f32 %v1938_v27, %v1649_v22  ;;  %v1940_v31 = vpop.f32.mrb[53].mxu1 }
 0x21a   : > { %v1652_v32 = vpop.f32.mrb[54].mxu0  ;;  %v2921_v33 = vsel %vm358_vm0, %v2835_v25, 0.0  ;;  %v1941_v35 = vpop.f32.mrb[54].mxu1 }
 0x21b   : > { %v1654_v37 = vpop.f32.mrb[55].mxu0  ;;  %2636 = vst.msk [vmem:[%s4867_s15 + $0x5c] sm:$0xf] %vm2612_vm1, %v3529_v29  ;;  %v2922_v38 = vadd.f32 %v2921_v33, %v2920_v23  ;;  %v2115_v39 = vadd.f32 %v1939_v30, %v449_v26  ;;  %v1942_v40 = vadd.f32 %v1941_v35, %v1652_v32  ;;  %v1943_v41 = vpop.f32.mrb[55].mxu1  ;;  %v453_v23 = vld [vmem:[#allocation2 + $0xf0] sm:$0xff]  ;;  %v454_v30 = vld [vmem:[#allocation2 + $0xf8] sm:$0xff] }
 0x21c   : > { %v2245_v42 = vld [vmem:[#allocation2 + $0xc0] sm:$0xff] }
 0x21d   : > { %v2316_v43 = vadd.f32 %v4852_v36, %v2245_v42  ;;  %v2724_v44 = vsel %vm358_vm0, %v2245_v42, 0.0  ;;  %v2836_v45 = vmul.f32 %v2245_v42, %v2245_v42  ;;  %2180 = vst.msk [vmem:[#allocation2 + $0xd0] sm:$0xff] %vm358_vm0, %v2115_v39  ;;  %v2116_v46 = vadd.f32 %v1942_v40, %v450_v34  ;;  %v5039_v39 = vld [vmem:[#allocation8] ss:$0 sm:$0xff] }
 0x21e   : > { %v2725_v47 = vadd.f32 %v2724_v44, %v2723_v24  ;;  %v2246_v48 = vld [vmem:[#allocation2 + $0xc8] sm:$0xff] }
 0x21f   : > { %v3530_v49 = vpack.c.bf16 %v2316_v43, %v2316_v43  ;;  %v2923_v50 = vsel %vm358_vm0, %v2836_v45, 0.0  ;;  %v2317_v51 = vadd.f32 %v4852_v36, %v2246_v48  ;;  %v2726_v52 = vsel %vm358_vm0, %v2246_v48, 0.0  ;;  %2181 = vst.msk [vmem:[#allocation2 + $0xd8] sm:$0xff] %vm358_vm0, %v2116_v46 }
 0x220   : > { %v1657_v53 = vpop.f32.mrb[56].mxu0  ;;  %v2924_v54 = vadd.f32 %v2923_v50, %v2922_v38  ;;  %v2727_v55 = vadd.f32 %v2726_v52, %v2725_v47  ;;  %v2837_v56 = vmul.f32 %v2246_v48, %v2246_v48  ;;  %v1946_v58 = vpop.f32.mrb[56].mxu1 }
 0x221   : > { %v1659_v59 = vpop.f32.mrb[57].mxu0  ;;  %2637 = vst.msk [vmem:[%s4867_s15 + $0x60] sm:$0xf] %vm2612_vm1, %v3530_v49  ;;  %v3531_v60 = vpack.c.bf16 %v2317_v51, %v2317_v51  ;;  %v1947_v61 = vadd.f32 %v1946_v58, %v1657_v53  ;;  %v1948_v62 = vpop.f32.mrb[57].mxu1 }
 0x222   : > { %v1660_v63 = vpop.f32.mrb[58].mxu0  ;;  %v2925_v0 = vsel %vm358_vm0, %v2837_v56, 0.0  ;;  %v1949_v2 = vpop.f32.mrb[58].mxu1  ;;  %v456_v62 = vld [vmem:[#allocation2 + $0x108] sm:$0xff] }
 0x223   : > { %v1662_v3 = vpop.f32.mrb[59].mxu0  ;;  %2638 = vst.msk [vmem:[%s4867_s15 + $0x64] sm:$0xf] %vm2612_vm1, %v3531_v60  ;;  %v2926_v4 = vadd.f32 %v2925_v0, %v2924_v54  ;;  %v2117_v5 = vadd.f32 %v1947_v61, %v451_v57  ;;  %v1950_v6 = vadd.f32 %v1949_v2, %v1660_v63  ;;  %v1951_v7 = vpop.f32.mrb[59].mxu1  ;;  %v455_v54 = vld [vmem:[#allocation2 + $0x100] sm:$0xff] }
 0x224   : > { %v2247_v8 = vld [vmem:[#allocation2 + $0xd0] sm:$0xff] }
 0x225   : > { %v2318_v9 = vadd.f32 %v4852_v36, %v2247_v8  ;;  %v2728_v10 = vsel %vm358_vm0, %v2247_v8, 0.0  ;;  %v2838_v11 = vmul.f32 %v2247_v8, %v2247_v8  ;;  %2182 = vst.msk [vmem:[#allocation2 + $0xe0] sm:$0xff] %vm358_vm0, %v2117_v5  ;;  %v2118_v12 = vadd.f32 %v1950_v6, %v452_v1 }
 0x226   : > { %v2729_v13 = vadd.f32 %v2728_v10, %v2727_v55  ;;  %v2248_v14 = vld [vmem:[#allocation2 + $0xd8] sm:$0xff] }
 0x227   : > { %v3532_v15 = vpack.c.bf16 %v2318_v9, %v2318_v9  ;;  %v2927_v16 = vsel %vm358_vm0, %v2838_v11, 0.0  ;;  %v2319_v17 = vadd.f32 %v4852_v36, %v2248_v14  ;;  %v2730_v18 = vsel %vm358_vm0, %v2248_v14, 0.0  ;;  %2183 = vst.msk [vmem:[#allocation2 + $0xe8] sm:$0xff] %vm358_vm0, %v2118_v12 }
 0x228   : > { %v1665_v19 = vpop.f32.mrb[60].mxu0  ;;  %v2928_v20 = vadd.f32 %v2927_v16, %v2926_v4  ;;  %v2731_v21 = vadd.f32 %v2730_v18, %v2729_v13  ;;  %v2839_v22 = vmul.f32 %v2248_v14, %v2248_v14  ;;  %v1954_v24 = vpop.f32.mrb[60].mxu1 }
 0x229   : > { %v1667_v25 = vpop.f32.mrb[61].mxu0  ;;  %2639 = vst.msk [vmem:[%s4867_s15 + $0x68] sm:$0xf] %vm2612_vm1, %v3532_v15  ;;  %v3533_v26 = vpack.c.bf16 %v2319_v17, %v2319_v17  ;;  %v1955_v27 = vadd.f32 %v1954_v24, %v1665_v19  ;;  %v1956_v28 = vpop.f32.mrb[61].mxu1 }
 0x22a   : > { %v1668_v29 = vpop.f32.mrb[62].mxu0  ;;  %v2929_v36 = vsel %vm358_vm0, %v2839_v22, 0.0  ;;  %v1957_v31 = vpop.f32.mrb[62].mxu1  ;;  %v458_v28 = vld [vmem:[#allocation2 + $0x118] sm:$0xff] }
 0x22b   : > { %v1670_v32 = vpop.f32.mrb[63].mxu0  ;;  %2640 = vst.msk [vmem:[%s4867_s15 + $0x6c] sm:$0xf] %vm2612_vm1, %v3533_v26  ;;  %v2930_v33 = vadd.f32 %v2929_v36, %v2928_v20  ;;  %v2119_v34 = vadd.f32 %v1955_v27, %v453_v23  ;;  %v1958_v35 = vadd.f32 %v1957_v31, %v1668_v29  ;;  %v1959_v37 = vpop.f32.mrb[63].mxu1  ;;  %v457_v20 = vld [vmem:[#allocation2 + $0x110] sm:$0xff] }
 0x22c   : > { %v2249_v38 = vld [vmem:[#allocation2 + $0xe0] sm:$0xff] }
 0x22d   : > { %v2320_v40 = vadd.f32 %v5039_v39, %v2249_v38  ;;  %v2732_v41 = vsel %vm358_vm0, %v2249_v38, 0.0  ;;  %v2840_v42 = vmul.f32 %v2249_v38, %v2249_v38  ;;  %2184 = vst.msk [vmem:[#allocation2 + $0xf0] sm:$0xff] %vm358_vm0, %v2119_v34  ;;  %v2120_v43 = vadd.f32 %v1958_v35, %v454_v30 }
 0x22e   : > { %v2733_v44 = vadd.f32 %v2732_v41, %v2731_v21  ;;  %v2250_v45 = vld [vmem:[#allocation2 + $0xe8] sm:$0xff] }
 0x22f   : > { %v3534_v46 = vpack.c.bf16 %v2320_v40, %v2320_v40  ;;  %v2931_v47 = vsel %vm358_vm0, %v2840_v42, 0.0  ;;  %v2321_v48 = vadd.f32 %v5039_v39, %v2250_v45  ;;  %v2734_v49 = vsel %vm358_vm0, %v2250_v45, 0.0  ;;  %2185 = vst.msk [vmem:[#allocation2 + $0xf8] sm:$0xff] %vm358_vm0, %v2120_v43  ;;  %v459_v43 = vld [vmem:[#allocation2 + $0x120] sm:$0xff] }
 0x230   : > { %v1673_v50 = vpop.f32.mrb[64].mxu0  ;;  %v2932_v51 = vadd.f32 %v2931_v47, %v2930_v33  ;;  %v2735_v52 = vadd.f32 %v2734_v49, %v2733_v44  ;;  %v2841_v53 = vmul.f32 %v2250_v45, %v2250_v45  ;;  %v1962_v55 = vpop.f32.mrb[64].mxu1 }
 0x231   : > { %v1675_v56 = vpop.f32.mrb[65].mxu0  ;;  %2641 = vst.msk [vmem:[%s4867_s15 + $0x70] sm:$0xf] %vm2612_vm1, %v3534_v46  ;;  %v3535_v57 = vpack.c.bf16 %v2321_v48, %v2321_v48  ;;  %v1963_v58 = vadd.f32 %v1962_v55, %v1673_v50  ;;  %v1964_v59 = vpop.f32.mrb[65].mxu1  ;;  %v460_v50 = vld [vmem:[#allocation2 + $0x128] sm:$0xff] }
 0x232   : > { %v1676_v60 = vpop.f32.mrb[66].mxu0  ;;  %v2933_v61 = vsel %vm358_vm0, %v2841_v53, 0.0  ;;  %v1965_v63 = vpop.f32.mrb[66].mxu1 }
 0x233   : > { %v1678_v0 = vpop.f32.mrb[67].mxu0  ;;  %2642 = vst.msk [vmem:[%s4867_s15 + $0x74] sm:$0xf] %vm2612_vm1, %v3535_v57  ;;  %v2934_v1 = vadd.f32 %v2933_v61, %v2932_v51  ;;  %v2121_v2 = vadd.f32 %v1963_v58, %v455_v54  ;;  %v1966_v3 = vadd.f32 %v1965_v63, %v1676_v60  ;;  %v1967_v4 = vpop.f32.mrb[67].mxu1  ;;  %v461_v63 = vld [vmem:[#allocation2 + $0x130] sm:$0xff] }
 0x234   : > { %v2251_v5 = vld [vmem:[#allocation2 + $0xf0] sm:$0xff] }
 0x235   : > { %v2322_v6 = vadd.f32 %v5039_v39, %v2251_v5  ;;  %v2736_v7 = vsel %vm358_vm0, %v2251_v5, 0.0  ;;  %v2842_v8 = vmul.f32 %v2251_v5, %v2251_v5  ;;  %2186 = vst.msk [vmem:[#allocation2 + $0x100] sm:$0xff] %vm358_vm0, %v2121_v2  ;;  %v2122_v9 = vadd.f32 %v1966_v3, %v456_v62 }
 0x236   : > { %v2737_v10 = vadd.f32 %v2736_v7, %v2735_v52  ;;  %v2252_v11 = vld [vmem:[#allocation2 + $0xf8] sm:$0xff] }
 0x237   : > { %v3536_v12 = vpack.c.bf16 %v2322_v6, %v2322_v6  ;;  %v2935_v13 = vsel %vm358_vm0, %v2842_v8, 0.0  ;;  %v2323_v14 = vadd.f32 %v5039_v39, %v2252_v11  ;;  %v2738_v15 = vsel %vm358_vm0, %v2252_v11, 0.0  ;;  %2187 = vst.msk [vmem:[#allocation2 + $0x108] sm:$0xff] %vm358_vm0, %v2122_v9  ;;  %v462_v6 = vld [vmem:[#allocation2 + $0x138] sm:$0xff] }
 0x238   : > { %v1681_v16 = vpop.f32.mrb[68].mxu0  ;;  %v2936_v17 = vadd.f32 %v2935_v13, %v2934_v1  ;;  %v5060_v18 = vadd.f32 %v2738_v15, %v2737_v10  ;;  %v2843_v19 = vmul.f32 %v2252_v11, %v2252_v11  ;;  %v1970_v21 = vpop.f32.mrb[68].mxu1 }
 0x239   : > { %v1683_v22 = vpop.f32.mrb[69].mxu0  ;;  %2643 = vst.msk [vmem:[%s4867_s15 + $0x78] sm:$0xf] %vm2612_vm1, %v3536_v12  ;;  %v3537_v23 = vpack.c.bf16 %v2323_v14, %v2323_v14  ;;  %v1971_v24 = vadd.f32 %v1970_v21, %v1681_v16  ;;  %v1972_v25 = vpop.f32.mrb[69].mxu1 }
 0x23a   : > { %v1684_v26 = vpop.f32.mrb[70].mxu0  ;;  %v2937_v27 = vsel %vm358_vm0, %v2843_v19, 0.0  ;;  %v1973_v29 = vpop.f32.mrb[70].mxu1 }
 0x23b   : > { %v1686_v36 = vpop.f32.mrb[71].mxu0  ;;  %2644 = vst.msk [vmem:[%s4867_s15 + $0x7c] sm:$0xf] %vm2612_vm1, %v3537_v23  ;;  %v5067_v30 = vadd.f32 %v2937_v27, %v2936_v17  ;;  %v2123_v31 = vadd.f32 %v1971_v24, %v457_v20  ;;  %v1974_v32 = vadd.f32 %v1973_v29, %v1684_v26  ;;  %v1975_v33 = vpop.f32.mrb[71].mxu1  ;;  %v463_v20 = vld [vmem:[#allocation2 + $0x140] sm:$0xff]  ;;  %v464_v27 = vld [vmem:[#allocation2 + $0x148] sm:$0xff] }
 0x23c   : > { %v5069_v34 = vld [vmem:[#allocation2 + $0x100] sm:$0xff] }
 0x23d   : > { %v2324_v35 = vadd.f32 %v5039_v39, %v5069_v34  ;;  %2188 = vst.msk [vmem:[#allocation2 + $0x110] sm:$0xff] %vm358_vm0, %v2123_v31  ;;  %v2124_v37 = vadd.f32 %v1974_v32, %v458_v28 }
 0x23e   : > { %v5074_v38 = vld [vmem:[#allocation2 + $0x108] sm:$0xff] }
 0x23f   : > { %v3538_v40 = vpack.c.bf16 %v2324_v35, %v2324_v35  ;;  %v2325_v41 = vadd.f32 %v5039_v39, %v5074_v38  ;;  %2189 = vst.msk [vmem:[#allocation2 + $0x118] sm:$0xff] %vm358_vm0, %v2124_v37 }
 0x240   : > { %v1689_v42 = vpop.f32.mrb[72].mxu0  ;;  %v1978_v44 = vpop.f32.mrb[72].mxu1 }
 0x241   : > { %v1691_v45 = vpop.f32.mrb[73].mxu0  ;;  %2645 = vst.msk [vmem:[%s4867_s15 + $0x80] sm:$0xf] %vm2612_vm1, %v3538_v40  ;;  %v3539_v46 = vpack.c.bf16 %v2325_v41, %v2325_v41  ;;  %v1979_v47 = vadd.f32 %v1978_v44, %v1689_v42  ;;  %v1980_v48 = vpop.f32.mrb[73].mxu1  ;;  %v2844_v41 = vmul.f32 %v5069_v34, %v5069_v34 }
 0x242   : > { %v1692_v49 = vpop.f32.mrb[74].mxu0  ;;  %v1981_v51 = vpop.f32.mrb[74].mxu1  ;;  %v465_v45 = vld [vmem:[#allocation2 + $0x150] sm:$0xff]  ;;  %v2740_v48 = vsel %vm358_vm0, %v5069_v34, 0.0 }
 0x243   : > { %v1694_v52 = vpop.f32.mrb[75].mxu0  ;;  %2646 = vst.msk [vmem:[%s4867_s15 + $0x84] sm:$0xf] %vm2612_vm1, %v3539_v46  ;;  %v2125_v53 = vadd.f32 %v1979_v47, %v459_v43  ;;  %v1982_v54 = vadd.f32 %v1981_v51, %v1692_v49  ;;  %v1983_v55 = vpop.f32.mrb[75].mxu1  ;;  %v2741_v34 = vadd.f32 %v2740_v48, %v5060_v18 }
 0x244   : > { %v5083_v56 = vld [vmem:[#allocation2 + $0x110] sm:$0xff] }
 0x245   : > { %v2326_v57 = vadd.f32 %v5039_v39, %v5083_v56  ;;  %2190 = vst.msk [vmem:[#allocation2 + $0x120] sm:$0xff] %vm358_vm0, %v2125_v53  ;;  %v2126_v58 = vadd.f32 %v1982_v54, %v460_v50  ;;  %v466_v53 = vld [vmem:[#allocation2 + $0x158] sm:$0xff] }
 0x246   : > { %v5088_v59 = vld [vmem:[#allocation2 + $0x118] sm:$0xff] }
 0x247   : > { %v3540_v60 = vpack.c.bf16 %v2326_v57, %v2326_v57  ;;  %v2327_v61 = vadd.f32 %v5039_v39, %v5088_v59  ;;  %2191 = vst.msk [vmem:[#allocation2 + $0x128] sm:$0xff] %vm358_vm0, %v2126_v58  ;;  %v2939_v57 = vsel %vm358_vm0, %v2844_v41, 0.0  ;;  %v2845_v58 = vmul.f32 %v5074_v38, %v5074_v38 }
 0x248   : > { %v1697_v62 = vpop.f32.mrb[76].mxu0  ;;  %v1986_v0 = vpop.f32.mrb[76].mxu1 }
 0x249   : > { %v1699_v1 = vpop.f32.mrb[77].mxu0  ;;  %2647 = vst.msk [vmem:[%s4867_s15 + $0x88] sm:$0xf] %vm2612_vm1, %v3540_v60  ;;  %v3541_v2 = vpack.c.bf16 %v2327_v61, %v2327_v61  ;;  %v1987_v3 = vadd.f32 %v1986_v0, %v1697_v62  ;;  %v1988_v4 = vpop.f32.mrb[77].mxu1  ;;  %v2742_v0 = vsel %vm358_vm0, %v5074_v38, 0.0  ;;  %v2941_v18 = vsel %vm358_vm0, %v2845_v58, 0.0 }
 0x24a   : > { %v1700_v5 = vpop.f32.mrb[78].mxu0  ;;  %v1989_v7 = vpop.f32.mrb[78].mxu1  ;;  %v2846_v1 = vmul.f32 %v5083_v56, %v5083_v56  ;;  %v2940_v4 = vadd.f32 %v2939_v57, %v5067_v30 }
 0x24b   : > { %v1702_v8 = vpop.f32.mrb[79].mxu0  ;;  %2648 = vst.msk [vmem:[%s4867_s15 + $0x8c] sm:$0xf] %vm2612_vm1, %v3541_v2  ;;  %v2127_v9 = vadd.f32 %v1987_v3, %v461_v63  ;;  %v1990_v10 = vadd.f32 %v1989_v7, %v1700_v5  ;;  %v1991_v11 = vpop.f32.mrb[79].mxu1 }
 0x24c   : > { %v5097_v12 = vld [vmem:[#allocation2 + $0x120] sm:$0xff]  ;;  %v2943_v30 = vsel %vm358_vm0, %v2846_v1, 0.0 }
 0x24d   : > { %v2328_v13 = vadd.f32 %v5039_v39, %v5097_v12  ;;  %2192 = vst.msk [vmem:[#allocation2 + $0x130] sm:$0xff] %vm358_vm0, %v2127_v9  ;;  %v2128_v14 = vadd.f32 %v1990_v10, %v462_v6  ;;  %v2744_v6 = vsel %vm358_vm0, %v5083_v56, 0.0  ;;  %v2743_v9 = vadd.f32 %v2742_v0, %v2741_v34  ;;  %v467_v10 = vld [vmem:[#allocation2 + $0x160] sm:$0xff] }
 0x24e   : > { %v5102_v15 = vld [vmem:[#allocation2 + $0x128] sm:$0xff] }
 0x24f   : > { %v3542_v16 = vpack.c.bf16 %v2328_v13, %v2328_v13  ;;  %v2329_v17 = vadd.f32 %v5039_v39, %v5102_v15  ;;  %2193 = vst.msk [vmem:[#allocation2 + $0x138] sm:$0xff] %vm358_vm0, %v2128_v14  ;;  %v2847_v14 = vmul.f32 %v5088_v59, %v5088_v59 }
 0x250   : > { %v1705_v19 = vpop.f32.mrb[80].mxu0  ;;  %v1994_v21 = vpop.f32.mrb[80].mxu1 }
 0x251   : > { %v1707_v22 = vpop.f32.mrb[81].mxu0  ;;  %2649 = vst.msk [vmem:[%s4867_s15 + $0x90] sm:$0xf] %vm2612_vm1, %v3542_v16  ;;  %v3543_v23 = vpack.c.bf16 %v2329_v17, %v2329_v17  ;;  %v1995_v24 = vadd.f32 %v1994_v21, %v1705_v19  ;;  %v1996_v25 = vpop.f32.mrb[81].mxu1  ;;  %v2745_v21 = vadd.f32 %v2744_v6, %v2743_v9 }
 0x252   : > { %v1708_v26 = vpop.f32.mrb[82].mxu0  ;;  %v1997_v28 = vpop.f32.mrb[82].mxu1  ;;  %v468_v22 = vld [vmem:[#allocation2 + $0x168] sm:$0xff]  ;;  %v2746_v25 = vsel %vm358_vm0, %v5088_v59, 0.0 }
 0x253   : > { %v1710_v29 = vpop.f32.mrb[83].mxu0  ;;  %2650 = vst.msk [vmem:[%s4867_s15 + $0x94] sm:$0xf] %vm2612_vm1, %v3543_v23  ;;  %v2129_v36 = vadd.f32 %v1995_v24, %v463_v20  ;;  %v1998_v31 = vadd.f32 %v1997_v28, %v1708_v26  ;;  %v1999_v32 = vpop.f32.mrb[83].mxu1  ;;  %v2942_v20 = vadd.f32 %v2941_v18, %v2940_v4  ;;  %v2848_v26 = vmul.f32 %v5097_v12, %v5097_v12 }
 0x254   : > { %v5111_v33 = vld [vmem:[#allocation2 + $0x130] sm:$0xff]  ;;  %v2945_v32 = vsel %vm358_vm0, %v2847_v14, 0.0  ;;  %v2747_v41 = vadd.f32 %v2746_v25, %v2745_v21 }
 0x255   : > { %v2330_v35 = vadd.f32 %v5039_v39, %v5111_v33  ;;  %2194 = vst.msk [vmem:[#allocation2 + $0x140] sm:$0xff] %vm358_vm0, %v2129_v36  ;;  %v2130_v37 = vadd.f32 %v1998_v31, %v464_v27  ;;  %v2944_v36 = vadd.f32 %v2943_v30, %v2942_v20  ;;  %v2752_v1 = vsel %vm358_vm0, %v5111_v33, 0.0 }
 0x256   : > { %v5116_v40 = vld [vmem:[#allocation2 + $0x138] sm:$0xff] }
 0x257   : > { %v3544_v42 = vpack.c.bf16 %v2330_v35, %v2330_v35  ;;  %v2331_v43 = vadd.f32 %v5039_v39, %v5116_v40  ;;  %2195 = vst.msk [vmem:[#allocation2 + $0x148] sm:$0xff] %vm358_vm0, %v2130_v37  ;;  %v2748_v35 = vsel %vm358_vm0, %v5097_v12, 0.0 }
 0x258   : > { %v1713_v44 = vpop.f32.mrb[84].mxu0  ;;  %v2002_v46 = vpop.f32.mrb[84].mxu1  ;;  %v2749_v48 = vadd.f32 %v2748_v35, %v2747_v41 }
 0x259   : > { %v1715_v47 = vpop.f32.mrb[85].mxu0  ;;  %2651 = vst.msk [vmem:[%s4867_s15 + $0x98] sm:$0xf] %vm2612_vm1, %v3544_v42  ;;  %v3545_v49 = vpack.c.bf16 %v2331_v43, %v2331_v43  ;;  %v2003_v50 = vadd.f32 %v2002_v46, %v1713_v44  ;;  %v2004_v51 = vpop.f32.mrb[85].mxu1  ;;  %v2947_v43 = vsel %vm358_vm0, %v2848_v26, 0.0  ;;  %v2849_v44 = vmul.f32 %v5102_v15, %v5102_v15 }
 0x25a   : > { %v1716_v52 = vpop.f32.mrb[86].mxu0  ;;  %v2005_v54 = vpop.f32.mrb[86].mxu1  ;;  %v2946_v47 = vadd.f32 %v2945_v32, %v2944_v36 }
 0x25b   : > { %v1718_v55 = vpop.f32.mrb[87].mxu0  ;;  %2652 = vst.msk [vmem:[%s4867_s15 + $0x9c] sm:$0xf] %vm2612_vm1, %v3545_v49  ;;  %v2131_v60 = vadd.f32 %v2003_v50, %v465_v45  ;;  %v2006_v61 = vadd.f32 %v2005_v54, %v1716_v52  ;;  %v2007_v62 = vpop.f32.mrb[87].mxu1  ;;  %v469_v49 = vld [vmem:[#allocation2 + $0x170] sm:$0xff]  ;;  %v2750_v52 = vsel %vm358_vm0, %v5102_v15, 0.0 }
 0x25c   : > { %v5133_v63 = vld [vmem:[#allocation2 + $0x140] sm:$0xff]  ;;  %v2949_v0 = vsel %vm358_vm0, %v2849_v44, 0.0  ;;  %v2751_v4 = vadd.f32 %v2750_v52, %v2749_v48 }
 0x25d   : > { %v2332_v2 = vadd.f32 %v5039_v39, %v5133_v63  ;;  %2196 = vst.msk [vmem:[#allocation2 + $0x150] sm:$0xff] %vm358_vm0, %v2131_v60  ;;  %v2132_v3 = vadd.f32 %v2006_v61, %v466_v53  ;;  %v2850_v53 = vmul.f32 %v5111_v33, %v5111_v33  ;;  %v2948_v60 = vadd.f32 %v2947_v43, %v2946_v47  ;;  %v470_v61 = vld [vmem:[#allocation2 + $0x178] sm:$0xff] }
 0x25e   : > { %v5143_v5 = vld [vmem:[#allocation2 + $0x148] sm:$0xff]  ;;  %v2753_v9 = vadd.f32 %v2752_v1, %v2751_v4 }
 0x25f   : > { %v3546_v38 = vpack.c.bf16 %v2332_v2, %v2332_v2  ;;  %v2333_v7 = vadd.f32 %v5039_v39, %v5143_v5  ;;  %2197 = vst.msk [vmem:[#allocation2 + $0x158] sm:$0xff] %vm358_vm0, %v2132_v3  ;;  %v2951_v6 = vsel %vm358_vm0, %v2850_v53, 0.0  ;;  %v2950_v33 = vadd.f32 %v2949_v0, %v2948_v60 }
 0x260   : > { %v1721_v8 = vpop.f32.mrb[88].mxu0  ;;  %v2010_v11 = vpop.f32.mrb[88].mxu1  ;;  %v2853_v32 = vmul.f32 %v5143_v5, %v5143_v5  ;;  %v2758_v44 = vsel %vm358_vm0, %v5143_v5, 0.0 }
 0x261   : > { %v1723_v13 = vpop.f32.mrb[89].mxu0  ;;  %2653 = vst.msk [vmem:[%s4867_s15 + $0xa0] sm:$0xf] %vm2612_vm1, %v3546_v38  ;;  %v3547_v56 = vpack.c.bf16 %v2333_v7, %v2333_v7  ;;  %v2011_v16 = vadd.f32 %v2010_v11, %v1721_v8  ;;  %v2012_v17 = vpop.f32.mrb[89].mxu1  ;;  %v2851_v38 = vmul.f32 %v5116_v40, %v5116_v40  ;;  %v2754_v11 = vsel %vm358_vm0, %v5116_v40, 0.0 }
 0x262   : > { %v1724_v19 = vpop.f32.mrb[90].mxu0  ;;  %v2013_v23 = vpop.f32.mrb[90].mxu1  ;;  %v2852_v13 = vmul.f32 %v5133_v63, %v5133_v63  ;;  %v471_v17 = vld [vmem:[#allocation2 + $0x180] sm:$0xff]  ;;  %v2756_v40 = vsel %vm358_vm0, %v5133_v63, 0.0  ;;  %v2755_v26 = vadd.f32 %v2754_v11, %v2753_v9 }
 0x263   : > { %v1726_v24 = vpop.f32.mrb[91].mxu0  ;;  %2654 = vst.msk [vmem:[%s4867_s15 + $0xa4] sm:$0xf] %vm2612_vm1, %v3547_v56  ;;  %v2133_v27 = vadd.f32 %v2011_v16, %v467_v10  ;;  %v2014_v28 = vadd.f32 %v2013_v23, %v1724_v19  ;;  %v2015_v29 = vpop.f32.mrb[91].mxu1  ;;  %v2952_v16 = vadd.f32 %v2951_v6, %v2950_v33  ;;  %v2953_v21 = vsel %vm358_vm0, %v2851_v38, 0.0 }
 0x264   : > { %v5162_v31 = vld [vmem:[#allocation2 + $0x150] sm:$0xff]  ;;  %v2955_v36 = vsel %vm358_vm0, %v2852_v13, 0.0  ;;  %v2757_v41 = vadd.f32 %v2756_v40, %v2755_v26 }
 0x265   : > { %v2334_v37 = vadd.f32 %v5039_v39, %v5162_v31  ;;  %2198 = vst.msk [vmem:[#allocation2 + $0x160] sm:$0xff] %vm358_vm0, %v2133_v27  ;;  %v2134_v59 = vadd.f32 %v2014_v28, %v468_v22  ;;  %v472_v27 = vld [vmem:[#allocation2 + $0x188] sm:$0xff] }
 0x266   : > { %v5170_v42 = vld [vmem:[#allocation2 + $0x158] sm:$0xff]  ;;  %v2759_v53 = vadd.f32 %v2758_v44, %v2757_v41 }
 0x267   : > { %v3548_v45 = vpack.c.bf16 %v2334_v37, %v2334_v37  ;;  %v2335_v46 = vadd.f32 %v5039_v39, %v5170_v42  ;;  %2199 = vst.msk [vmem:[#allocation2 + $0x168] sm:$0xff] %vm358_vm0, %v2134_v59  ;;  %v2954_v59 = vadd.f32 %v2953_v21, %v2952_v16  ;;  %v2855_v60 = vmul.f32 %v5170_v42, %v5170_v42 }
 0x268   : > { %v1729_v12 = vpop.f32.mrb[92].mxu0  ;;  %v2018_v50 = vpop.f32.mrb[92].mxu1  ;;  %v2762_v4 = vsel %vm358_vm0, %v5170_v42, 0.0 }
 0x269   : > { %v1731_v51 = vpop.f32.mrb[93].mxu0  ;;  %2655 = vst.msk [vmem:[%s4867_s15 + $0xa8] sm:$0xf] %vm2612_vm1, %v3548_v45  ;;  %v3549_v54 = vpack.c.bf16 %v2335_v46, %v2335_v46  ;;  %v2019_v55 = vadd.f32 %v2018_v50, %v1729_v12  ;;  %v2020_v57 = vpop.f32.mrb[93].mxu1  ;;  %v2854_v45 = vmul.f32 %v5162_v31, %v5162_v31  ;;  %v2956_v47 = vadd.f32 %v2955_v36, %v2954_v59 }
 0x26a   : > { %v1732_v58 = vpop.f32.mrb[94].mxu0  ;;  %v2021_v62 = vpop.f32.mrb[94].mxu1  ;;  %v2760_v50 = vsel %vm358_vm0, %v5162_v31, 0.0  ;;  %v2961_v11 = vsel %vm358_vm0, %v2855_v60, 0.0 }
 0x26b   : > { %v1734_v34 = vpop.f32.mrb[95].mxu0  ;;  %2656 = vst.msk [vmem:[%s4867_s15 + $0xac] sm:$0xf] %vm2612_vm1, %v3549_v54  ;;  %v2135_v15 = vadd.f32 %v2019_v55, %v469_v49  ;;  %v2022_v2 = vadd.f32 %v2021_v62, %v1732_v58  ;;  %v2023_v3 = vpop.f32.mrb[95].mxu1  ;;  %v2957_v49 = vsel %vm358_vm0, %v2853_v32, 0.0  ;;  %v473_v54 = vld [vmem:[#allocation2 + $0x190] sm:$0xff]  ;;  %v2761_v1 = vadd.f32 %v2760_v50, %v2759_v53 }
 0x26c   : > { %v5189_v18 = vld [vmem:[#allocation2 + $0x160] sm:$0xff]  ;;  %v2959_v58 = vsel %vm358_vm0, %v2854_v45, 0.0  ;;  %v2958_v0 = vadd.f32 %v2957_v49, %v2956_v47 }
 0x26d   : > { %v2336_v7 = vadd.f32 %v5039_v39, %v5189_v18  ;;  %2200 = vst.msk [vmem:[#allocation2 + $0x170] sm:$0xff] %vm358_vm0, %v2135_v15  ;;  %v2136_v8 = vadd.f32 %v2022_v2, %v470_v61  ;;  %v474_v15 = vld [vmem:[#allocation2 + $0x198] sm:$0xff]  ;;  %v2856_v6 = vmul.f32 %v5189_v18, %v5189_v18  ;;  %v2764_v13 = vsel %vm358_vm0, %v5189_v18, 0.0 }
 0x26e   : > { %v5197_v10 = vld [vmem:[#allocation2 + $0x168] sm:$0xff]  ;;  %v2960_v33 = vadd.f32 %v2959_v58, %v2958_v0 }
 0x26f   : > { %v3550_v30 = vpack.c.bf16 %v2336_v7, %v2336_v7  ;;  %v2337_v14 = vadd.f32 %v5039_v39, %v5197_v10  ;;  %2201 = vst.msk [vmem:[#allocation2 + $0x178] sm:$0xff] %vm358_vm0, %v2136_v8  ;;  %v2963_v16 = vsel %vm358_vm0, %v2856_v6, 0.0 }
 0x270   : > { %v1737_v56 = vpop.f32.mrb[96].mxu0  ;;  %v2026_v19 = vpop.f32.mrb[96].mxu1  ;;  %v2962_v21 = vadd.f32 %v2961_v11, %v2960_v33 }
 0x271   : > { %v1739_v20 = vpop.f32.mrb[97].mxu0  ;;  %2657 = vst.msk [vmem:[%s4867_s15 + $0xb0] sm:$0xf] %vm2612_vm1, %v3550_v30  ;;  %v3551_v22 = vpack.c.bf16 %v2337_v14, %v2337_v14  ;;  %v2027_v23 = vadd.f32 %v2026_v19, %v1737_v56  ;;  %v2028_v24 = vpop.f32.mrb[97].mxu1  ;;  %v2763_v14 = vadd.f32 %v2762_v4, %v2761_v1  ;;  %v478_v4 = vld [vmem:[#allocation2 + $0x1b8] sm:$0xff] }
 0x272   : > { %v1740_v25 = vpop.f32.mrb[98].mxu0  ;;  %v2029_v28 = vpop.f32.mrb[98].mxu1  ;;  %v2964_v32 = vadd.f32 %v2963_v16, %v2962_v21 }
 0x273   : > { %v1742_v29 = vpop.f32.mrb[99].mxu0  ;;  %2658 = vst.msk [vmem:[%s4867_s15 + $0xb4] sm:$0xf] %vm2612_vm1, %v3551_v22  ;;  %v2137_v35 = vadd.f32 %v2027_v23, %v471_v17  ;;  %v2030_v37 = vadd.f32 %v2029_v28, %v1740_v25  ;;  %v2031_v63 = vpop.f32.mrb[99].mxu1  ;;  %v2857_v17 = vmul.f32 %v5197_v10, %v5197_v10  ;;  %v2765_v40 = vadd.f32 %v2764_v13, %v2763_v14  ;;  %v475_v22 = vld [vmem:[#allocation2 + $0x1a0] sm:$0xff] }
 0x274   : > { %v5216_v43 = vld [vmem:[#allocation2 + $0x170] sm:$0xff]  ;;  %v2766_v25 = vsel %vm358_vm0, %v5197_v10, 0.0 }
 0x275   : > { %v2338_v46 = vadd.f32 %v5039_v39, %v5216_v43  ;;  %2202 = vst.msk [vmem:[#allocation2 + $0x180] sm:$0xff] %vm358_vm0, %v2137_v35  ;;  %v2138_v12 = vadd.f32 %v2030_v37, %v472_v27  ;;  %v2858_v26 = vmul.f32 %v5216_v43, %v5216_v43  ;;  %v476_v35 = vld [vmem:[#allocation2 + $0x1a8] sm:$0xff]  ;;  %v2965_v59 = vsel %vm358_vm0, %v2857_v17, 0.0 }
 0x276   : > { %v5225_v48 = vld [vmem:[#allocation2 + $0x178] sm:$0xff]  ;;  %v2768_v41 = vsel %vm358_vm0, %v5216_v43, 0.0 }
 0x277   : > { %v3552_v51 = vpack.c.bf16 %v2338_v46, %v2338_v46  ;;  %v2339_v5 = vadd.f32 %v5039_v39, %v5225_v48  ;;  %2203 = vst.msk [vmem:[#allocation2 + $0x188] sm:$0xff] %vm358_vm0, %v2138_v12  ;;  %v2767_v46 = vadd.f32 %v2766_v25, %v2765_v40  ;;  %v2967_v47 = vsel %vm358_vm0, %v2858_v26, 0.0  ;;  %v479_v25 = vld [vmem:[#allocation2 + $0x1c0] sm:$0xff] }
 0x278   : > { %v1745_v52 = vpop.f32.mrb[100].mxu0  ;;  %v2034_v55 = vpop.f32.mrb[100].mxu1  ;;  %v2859_v49 = vmul.f32 %v5225_v48, %v5225_v48  ;;  %v2770_v53 = vsel %vm358_vm0, %v5225_v48, 0.0 }
 0x279   : > { %v1747_v57 = vpop.f32.mrb[101].mxu0  ;;  %2659 = vst.msk [vmem:[%s4867_s15 + $0xb8] sm:$0xf] %vm2612_vm1, %v3552_v51  ;;  %v3553_v31 = vpack.c.bf16 %v2339_v5, %v2339_v5  ;;  %v2035_v61 = vadd.f32 %v2034_v55, %v1745_v52  ;;  %v2036_v62 = vpop.f32.mrb[101].mxu1  ;;  %v2966_v5 = vadd.f32 %v2965_v59, %v2964_v32  ;;  %v2769_v43 = vadd.f32 %v2768_v41, %v2767_v46  ;;  %v480_v41 = vld [vmem:[#allocation2 + $0x1c8] sm:$0xff] }
 0x27a   : > { %v1748_v34 = vpop.f32.mrb[102].mxu0  ;;  %v2037_v2 = vpop.f32.mrb[102].mxu1 }
 0x27b   : > { %v1750_v3 = vpop.f32.mrb[103].mxu0  ;;  %2660 = vst.msk [vmem:[%s4867_s15 + $0xbc] sm:$0xf] %vm2612_vm1, %v3553_v31  ;;  %v2139_v38 = vadd.f32 %v2035_v61, %v473_v54  ;;  %v2038_v7 = vadd.f32 %v2037_v2, %v1748_v34  ;;  %v2039_v8 = vpop.f32.mrb[103].mxu1  ;;  %v2968_v60 = vadd.f32 %v2967_v47, %v2966_v5  ;;  %v477_v31 = vld [vmem:[#allocation2 + $0x1b0] sm:$0xff]  ;;  %v2969_v34 = vsel %vm358_vm0, %v2859_v49, 0.0 }
 0x27c   : > { %v2269_v9 = vld [vmem:[#allocation2 + $0x180] sm:$0xff]  ;;  %v2771_v3 = vadd.f32 %v2770_v53, %v2769_v43 }
 0x27d   : > { %v2340_v30 = vadd.f32 %v5039_v39, %v2269_v9  ;;  %2204 = vst.msk [vmem:[#allocation2 + $0x190] sm:$0xff] %vm358_vm0, %v2139_v38  ;;  %v2140_v42 = vadd.f32 %v2038_v7, %v474_v15  ;;  %v2860_v54 = vmul.f32 %v2269_v9, %v2269_v9  ;;  %v2772_v0 = vsel %vm358_vm0, %v2269_v9, 0.0 }
 0x27e   : > { %v5249_v56 = vld [vmem:[#allocation2 + $0x188] sm:$0xff]  ;;  %v2970_v13 = vadd.f32 %v2969_v34, %v2968_v60 }
 0x27f   : > { %v3554_v19 = vpack.c.bf16 %v2340_v30, %v2340_v30  ;;  %v2341_v20 = vadd.f32 %v5039_v39, %v5249_v56  ;;  %2205 = vst.msk [vmem:[#allocation2 + $0x198] sm:$0xff] %vm358_vm0, %v2140_v42  ;;  %v2971_v7 = vsel %vm358_vm0, %v2860_v54, 0.0  ;;  %v2861_v8 = vmul.f32 %v5249_v56, %v5249_v56 }
 0x280   : > { %v1753_v18 = vpop.f32.mrb[104].mxu0  ;;  %v2042_v23 = vpop.f32.mrb[104].mxu1  ;;  %v2773_v30 = vadd.f32 %v2772_v0, %v2771_v3  ;;  %v2774_v14 = vsel %vm358_vm0, %v5249_v56, 0.0 }
 0x281   : > { %v1755_v24 = vpop.f32.mrb[105].mxu0  ;;  %2661 = vst.msk [vmem:[%s4867_s15 + $0xc0] sm:$0xf] %vm2612_vm1, %v3554_v19  ;;  %v3555_v27 = vpack.c.bf16 %v2341_v20, %v2341_v20  ;;  %v2043_v28 = vadd.f32 %v2042_v23, %v1753_v18  ;;  %v2044_v29 = vpop.f32.mrb[105].mxu1  ;;  %v2972_v20 = vadd.f32 %v2971_v7, %v2970_v13  ;;  %v2973_v21 = vsel %vm358_vm0, %v2861_v8, 0.0  ;;  %v482_v7 = vld [vmem:[#allocation2 + $0x1d8] sm:$0xff] }
 0x282   : > { %v1756_v36 = vpop.f32.mrb[106].mxu0  ;;  %v2045_v37 = vpop.f32.mrb[106].mxu1  ;;  %v2775_v56 = vadd.f32 %v2774_v14, %v2773_v30 }
 0x283   : > { %v1758_v63 = vpop.f32.mrb[107].mxu0  ;;  %2662 = vst.msk [vmem:[%s4867_s15 + $0xc4] sm:$0xf] %vm2612_vm1, %v3555_v27  ;;  %v2141_v10 = vadd.f32 %v2043_v28, %v475_v22  ;;  %v2046_v44 = vadd.f32 %v2045_v37, %v1756_v36  ;;  %v2047_v45 = vpop.f32.mrb[107].mxu1 }
 0x284   : > { %v2271_v12 = vld [vmem:[#allocation2 + $0x190] sm:$0xff]  ;;  %v2974_v63 = vadd.f32 %v2973_v21, %v2972_v20 }
 0x285   : > { %v2342_v50 = vadd.f32 %v5039_v39, %v2271_v12  ;;  %2206 = vst.msk [vmem:[#allocation2 + $0x1a0] sm:$0xff] %vm358_vm0, %v2141_v10  ;;  %v2142_v51 = vadd.f32 %v2046_v44, %v476_v35  ;;  %v2862_v16 = vmul.f32 %v2271_v12, %v2271_v12  ;;  %v2776_v40 = vsel %vm358_vm0, %v2271_v12, 0.0 }
 0x286   : > { %v2272_v52 = vld [vmem:[#allocation2 + $0x198] sm:$0xff]  ;;  %v2777_v59 = vadd.f32 %v2776_v40, %v2775_v56 }
 0x287   : > { %v3556_v55 = vpack.c.bf16 %v2342_v50, %v2342_v50  ;;  %v2343_v57 = vadd.f32 %v5039_v39, %v2272_v52  ;;  %2207 = vst.msk [vmem:[#allocation2 + $0x1a8] sm:$0xff] %vm358_vm0, %v2142_v51  ;;  %v2975_v28 = vsel %vm358_vm0, %v2862_v16, 0.0  ;;  %v2863_v29 = vmul.f32 %v2272_v52, %v2272_v52 }
 0x288   : > { %v1761_v58 = vpop.f32.mrb[108].mxu0  ;;  %v2050_v61 = vpop.f32.mrb[108].mxu1  ;;  %v2778_v45 = vsel %vm358_vm0, %v2272_v52, 0.0  ;;  %v2976_v50 = vadd.f32 %v2975_v28, %v2974_v63  ;;  %v483_v28 = vld [vmem:[#allocation2 + $0x1e0] sm:$0xff] }
 0x289   : > { %v1763_v62 = vpop.f32.mrb[109].mxu0  ;;  %2663 = vst.msk [vmem:[%s4867_s15 + $0xc8] sm:$0xf] %vm2612_vm1, %v3556_v55  ;;  %v3557_v1 = vpack.c.bf16 %v2343_v57, %v2343_v57  ;;  %v2051_v48 = vadd.f32 %v2050_v61, %v1761_v58  ;;  %v2052_v15 = vpop.f32.mrb[109].mxu1  ;;  %v2977_v5 = vsel %vm358_vm0, %v2863_v29, 0.0  ;;  %v2779_v57 = vadd.f32 %v2778_v45, %v2777_v59 }
 0x28a   : > { %v1764_v2 = vpop.f32.mrb[110].mxu0  ;;  %v2053_v6 = vpop.f32.mrb[110].mxu1  ;;  %v481_v62 = vld [vmem:[#allocation2 + $0x1d0] sm:$0xff] }
 0x28b   : > { %v1766_v38 = vpop.f32.mrb[111].mxu0  ;;  %2664 = vst.msk [vmem:[%s4867_s15 + $0xcc] sm:$0xf] %vm2612_vm1, %v3557_v1  ;;  %v2143_v33 = vadd.f32 %v2051_v48, %v477_v31  ;;  %v2054_v11 = vadd.f32 %v2053_v6, %v1764_v2  ;;  %v2055_v9 = vpop.f32.mrb[111].mxu1  ;;  %v2978_v48 = vadd.f32 %v2977_v5, %v2976_v50 }
 0x28c   : > { %v2273_v42 = vld [vmem:[#allocation2 + $0x1a0] sm:$0xff] }
 0x28d   : > { %v2344_v17 = vadd.f32 %v5039_v39, %v2273_v42  ;;  %2208 = vst.msk [vmem:[#allocation2 + $0x1b0] sm:$0xff] %vm358_vm0, %v2143_v33  ;;  %v2144_v19 = vadd.f32 %v2054_v11, %v478_v4  ;;  %v2864_v46 = vmul.f32 %v2273_v42, %v2273_v42  ;;  %v2780_v54 = vsel %vm358_vm0, %v2273_v42, 0.0 }
 0x28e   : > { %v2274_v18 = vld [vmem:[#allocation2 + $0x1a8] sm:$0xff]  ;;  %v2781_v1 = vadd.f32 %v2780_v54, %v2779_v57 }
 0x28f   : > { %v3558_v22 = vpack.c.bf16 %v2344_v17, %v2344_v17  ;;  %v2345_v23 = vadd.f32 %v5039_v39, %v2274_v18  ;;  %2209 = vst.msk [vmem:[#allocation2 + $0x1b8] sm:$0xff] %vm358_vm0, %v2144_v19  ;;  %v2865_v52 = vmul.f32 %v2274_v18, %v2274_v18  ;;  %v2979_v61 = vsel %vm358_vm0, %v2864_v46, 0.0 }
 0x290   : > { %v1769_v24 = vpop.f32.mrb[112].mxu0  ;;  %v2058_v26 = vpop.f32.mrb[112].mxu1  ;;  %v2782_v6 = vsel %vm358_vm0, %v2274_v18, 0.0  ;;  %v2980_v11 = vadd.f32 %v2979_v61, %v2978_v48 }
 0x291   : > { %v1771_v27 = vpop.f32.mrb[113].mxu0  ;;  %2665 = vst.msk [vmem:[%s4867_s15 + $0xd0] sm:$0xf] %vm2612_vm1, %v3558_v22  ;;  %v3559_v36 = vpack.c.bf16 %v2345_v23, %v2345_v23  ;;  %v2059_v32 = vadd.f32 %v2058_v26, %v1769_v24  ;;  %v2060_v35 = vpop.f32.mrb[113].mxu1  ;;  %v2981_v14 = vsel %vm358_vm0, %v2865_v52, 0.0  ;;  %v2783_v17 = vadd.f32 %v2782_v6, %v2781_v1 }
 0x292   : > { %v1772_v37 = vpop.f32.mrb[114].mxu0  ;;  %v2061_v10 = vpop.f32.mrb[114].mxu1  ;;  %v2982_v23 = vadd.f32 %v2981_v14, %v2980_v11  ;;  %v486_v11 = vld [vmem:[#allocation2 + $0x1f8] sm:$0xff] }
 0x293   : > { %v1774_v44 = vpop.f32.mrb[115].mxu0  ;;  %2666 = vst.msk [vmem:[%s4867_s15 + $0xd4] sm:$0xf] %vm2612_vm1, %v3559_v36  ;;  %v2145_v12 = vadd.f32 %v2059_v32, %v479_v25  ;;  %v2062_v47 = vadd.f32 %v2061_v10, %v1772_v37  ;;  %v2063_v49 = vpop.f32.mrb[115].mxu1 }
 0x294   : > { %v2275_v51 = vld [vmem:[#allocation2 + $0x1b0] sm:$0xff]  ;;  %v484_v44 = vld [vmem:[#allocation2 + $0x1e8] sm:$0xff] }
 0x295   : > { %2210 = vst.msk [vmem:[#allocation2 + $0x1c0] sm:$0xff] %vm358_vm0, %v2145_v12  ;;  %v2146_v43 = vadd.f32 %v2062_v47, %v480_v41  ;;  %v2346_v53 = vadd.f32 %v5039_v39, %v2275_v51  ;;  %v2866_v38 = vmul.f32 %v2275_v51, %v2275_v51  ;;  %v2784_v42 = vsel %vm358_vm0, %v2275_v51, 0.0 }
 0x296   : > { %v2276_v55 = vld [vmem:[#allocation2 + $0x1b8] sm:$0xff]  ;;  %v2785_v22 = vadd.f32 %v2784_v42, %v2783_v17 }
 0x297   : > { %2211 = vst.msk [vmem:[#allocation2 + $0x1c8] sm:$0xff] %vm358_vm0, %v2146_v43  ;;  %v2347_v60 = vadd.f32 %v5039_v39, %v2276_v55  ;;  %v3560_v31 = vpack.c.bf16 %v2346_v53, %v2346_v53  ;;  %v2867_v18 = vmul.f32 %v2276_v55, %v2276_v55  ;;  %v2983_v21 = vsel %vm358_vm0, %v2866_v38, 0.0 }
 0x298   : > { %v1777_v58 = vpop.f32.mrb[116].mxu0  ;;  %v2786_v26 = vsel %vm358_vm0, %v2276_v55, 0.0  ;;  %v2984_v32 = vadd.f32 %v2983_v21, %v2982_v23 }
 0x299   : > { %v2066_v34 = vpop.f32.mrb[116].mxu1  ;;  %v1779_v0 = vpop.f32.mrb[117].mxu0  ;;  %v3561_v4 = vpack.c.bf16 %v2347_v60, %v2347_v60  ;;  %2667 = vst.msk [vmem:[%s4867_s15 + $0xd8] sm:$0xf] %vm2612_vm1, %v3560_v31  ;;  %v2985_v10 = vsel %vm358_vm0, %v2867_v18, 0.0  ;;  %v2787_v12 = vadd.f32 %v2786_v26, %v2785_v22 }
 0x29a   : > { %v2067_v15 = vadd.f32 %v2066_v34, %v1777_v58  ;;  %v2068_v2 = vpop.f32.mrb[117].mxu1  ;;  %v1780_v3 = vpop.f32.mrb[118].mxu0  ;;  %v2986_v54 = vadd.f32 %v2985_v10, %v2984_v32 }
 0x29b   : > { %v2069_v8 = vpop.f32.mrb[118].mxu1  ;;  %v1782_v33 = vpop.f32.mrb[119].mxu0  ;;  %2668 = vst.msk [vmem:[%s4867_s15 + $0xdc] sm:$0xf] %vm2612_vm1, %v3561_v4 }
 0x29c   : > { %v2147_v9 = vadd.f32 %v2067_v15, %v481_v62  ;;  %v2070_v13 = vadd.f32 %v2069_v8, %v1780_v3  ;;  %v2071_v30 = vpop.f32.mrb[119].mxu1  ;;  %v2277_v16 = vld [vmem:[#allocation2 + $0x1c0] sm:$0xff]  ;;  %v485_v15 = vld [vmem:[#allocation2 + $0x1f0] sm:$0xff] }
 0x29d   : > { %v2348_v20 = vadd.f32 %v5039_v39, %v2277_v16  ;;  %v2868_v27 = vmul.f32 %v2277_v16, %v2277_v16  ;;  %v2788_v41 = vsel %vm358_vm0, %v2277_v16, 0.0  ;;  %v3931_v62 = vld [vmem:[#allocation8] ss:$0 sm:$0xff] }
 0x29e   : > { %2212 = vst.msk [vmem:[#allocation2 + $0x1d0] sm:$0xff] %vm358_vm0, %v2147_v9  ;;  %v2148_v19 = vadd.f32 %v2070_v13, %v482_v7  ;;  %v2278_v40 = vld [vmem:[#allocation2 + $0x1c8] sm:$0xff]  ;;  %v2789_v53 = vadd.f32 %v2788_v41, %v2787_v12 }
 0x29f   : > { %v2349_v56 = vadd.f32 %v5039_v39, %v2278_v40  ;;  %v3562_v25 = vpack.c.bf16 %v2348_v20, %v2348_v20  ;;  %v2869_v51 = vmul.f32 %v2278_v40, %v2278_v40  ;;  %v2987_v5 = vsel %vm358_vm0, %v2868_v27, 0.0 }
 0x2a0   : > { %2213 = vst.msk [vmem:[#allocation2 + $0x1d8] sm:$0xff] %vm358_vm0, %v2148_v19  ;;  %v1785_v24 = vpop.f32.mrb[120].mxu0  ;;  %v2790_v52 = vsel %vm358_vm0, %v2278_v40, 0.0  ;;  %v2988_v31 = vadd.f32 %v2987_v5, %v2986_v54 }
 0x2a1   : > { %v2074_v29 = vpop.f32.mrb[120].mxu1  ;;  %v1787_v36 = vpop.f32.mrb[121].mxu0  ;;  %v3563_v59 = vpack.c.bf16 %v2349_v56, %v2349_v56  ;;  %2669 = vst.msk [vmem:[%s4867_s15 + $0xe0] sm:$0xf] %vm2612_vm1, %v3562_v25  ;;  %v2989_v48 = vsel %vm358_vm0, %v2869_v51, 0.0 }
 0x2a2   : > { %v2075_v35 = vadd.f32 %v2074_v29, %v1785_v24  ;;  %v2076_v37 = vpop.f32.mrb[121].mxu1  ;;  %v1788_v63 = vpop.f32.mrb[122].mxu0  ;;  %v2990_v42 = vadd.f32 %v2989_v48, %v2988_v31 }
 0x2a3   : > { %v2077_v45 = vpop.f32.mrb[122].mxu1  ;;  %v1790_v46 = vpop.f32.mrb[123].mxu0  ;;  %2670 = vst.msk [vmem:[%s4867_s15 + $0xe4] sm:$0xf] %vm2612_vm1, %v3563_v59 }
 0x2a4   : > { %v2149_v47 = vadd.f32 %v2075_v35, %v483_v28  ;;  %v2078_v49 = vadd.f32 %v2077_v45, %v1788_v63  ;;  %v2079_v50 = vpop.f32.mrb[123].mxu1 }
 0x2a5   : > { %v2279_v43 = vld [vmem:[#allocation2 + $0x1d0] sm:$0xff] }
 0x2a6   : > { %2214 = vst.msk [vmem:[#allocation2 + $0x1e0] sm:$0xff] %vm358_vm0, %v2149_v47  ;;  %v2150_v55 = vadd.f32 %v2078_v49, %v484_v44  ;;  %v2350_v57 = vadd.f32 %v5039_v39, %v2279_v43  ;;  %v2870_v58 = vmul.f32 %v2279_v43, %v2279_v43  ;;  %v2792_v1 = vsel %vm358_vm0, %v2279_v43, 0.0 }
 0x2a7   : > { %v2280_v60 = vld [vmem:[#allocation2 + $0x1d8] sm:$0xff]  ;;  %v2791_v39 = vadd.f32 %v2790_v52, %v2789_v53 }
 0x2a8   : > { %2215 = vst.msk [vmem:[#allocation2 + $0x1e8] sm:$0xff] %vm358_vm0, %v2150_v55  ;;  %v1793_v61 = vpop.f32.mrb[124].mxu0  ;;  %v2351_v34 = vadd.f32 %v3931_v62, %v2280_v60  ;;  %v3564_v0 = vpack.c.bf16 %v2350_v57, %v2350_v57  ;;  %v2871_v4 = vmul.f32 %v2280_v60, %v2280_v60  ;;  %v2991_v33 = vsel %vm358_vm0, %v2870_v58, 0.0 }
 0x2a9   : > { %v2082_v2 = vpop.f32.mrb[124].mxu1  ;;  %v1795_v3 = vpop.f32.mrb[125].mxu0  ;;  %v2793_v30 = vadd.f32 %v2792_v1, %v2791_v39  ;;  %v2794_v19 = vsel %vm358_vm0, %v2280_v60, 0.0  ;;  %v2992_v18 = vadd.f32 %v2991_v33, %v2990_v42 }
 0x2aa   : > { %v2083_v6 = vadd.f32 %v2082_v2, %v1793_v61  ;;  %v2084_v38 = vpop.f32.mrb[125].mxu1  ;;  %v1796_v7 = vpop.f32.mrb[126].mxu0  ;;  %v3565_v8 = vpack.c.bf16 %v2351_v34, %v2351_v34  ;;  %2671 = vst.msk [vmem:[%s4867_s15 + $0xe8] sm:$0xf] %vm2612_vm1, %v3564_v0  ;;  %v2993_v21 = vsel %vm358_vm0, %v2871_v4, 0.0 }
 0x2ab   : > { %v2085_v9 = vpop.f32.mrb[126].mxu1  ;;  %v1798_v13 = vpop.f32.mrb[127].mxu0  ;;  %v2795_v25 = vadd.f32 %v2794_v19, %v2793_v30  ;;  %v2994_v36 = vadd.f32 %v2993_v21, %v2992_v18 }
 0x2ac   : > { %v2151_v14 = vadd.f32 %v2083_v6, %v485_v15  ;;  %v2086_v16 = vadd.f32 %v2085_v9, %v1796_v7  ;;  %v2087_v17 = vpop.f32.mrb[127].mxu1  ;;  %2672 = vst.msk [vmem:[%s4867_s15 + $0xec] sm:$0xf] %vm2612_vm1, %v3565_v8 }
 0x2ad   : > { %v2281_v20 = vld [vmem:[#allocation2 + $0x1e0] sm:$0xff] }
 0x2ae   : > { %2216 = vst.msk [vmem:[#allocation2 + $0x1f0] sm:$0xff] %vm358_vm0, %v2151_v14  ;;  %v2152_v40 = vadd.f32 %v2086_v16, %v486_v11  ;;  %v2352_v22 = vadd.f32 %v3931_v62, %v2281_v20  ;;  %v2796_v23 = vsel %vm358_vm0, %v2281_v20, 0.0  ;;  %v2872_v24 = vmul.f32 %v2281_v20, %v2281_v20 }
 0x2af   : > { %v2282_v56 = vld [vmem:[#allocation2 + $0x1e8] sm:$0xff]  ;;  %v2797_v29 = vadd.f32 %v2796_v23, %v2795_v25 }
 0x2b0   : > { %2217 = vst.msk [vmem:[#allocation2 + $0x1f8] sm:$0xff] %vm358_vm0, %v2152_v40  ;;  %v2353_v26 = vadd.f32 %v3931_v62, %v2282_v56  ;;  %v3566_v27 = vpack.c.bf16 %v2352_v22, %v2352_v22  ;;  %v2873_v28 = vmul.f32 %v2282_v56, %v2282_v56  ;;  %v2995_v32 = vsel %vm358_vm0, %v2872_v24, 0.0 }
 0x2b1   : > { %v2798_v37 = vsel %vm358_vm0, %v2282_v56, 0.0  ;;  %v2996_v63 = vadd.f32 %v2995_v32, %v2994_v36 }
 0x2b2   : > { %v3567_v35 = vpack.c.bf16 %v2353_v26, %v2353_v26  ;;  %2673 = vst.msk [vmem:[%s4867_s15 + $0xf0] sm:$0xf] %vm2612_vm1, %v3566_v27  ;;  %v2997_v59 = vsel %vm358_vm0, %v2873_v28, 0.0  ;;  %v2799_v10 = vadd.f32 %v2798_v37, %v2797_v29 }
 0x2b3   : > { %v2998_v49 = vadd.f32 %v2997_v59, %v2996_v63 }
 0x2b4   : > { %2674 = vst.msk [vmem:[%s4867_s15 + $0xf4] sm:$0xf] %vm2612_vm1, %v3567_v35 }
 0x2b5   : > { %v2283_v41 = vld [vmem:[#allocation2 + $0x1f0] sm:$0xff] }
 0x2b6   : > { %v2354_v44 = vadd.f32 %v3931_v62, %v2283_v41  ;;  %v2800_v45 = vsel %vm358_vm0, %v2283_v41, 0.0  ;;  %v2874_v46 = vmul.f32 %v2283_v41, %v2283_v41 }
 0x2b7   : > { %v2284_v12 = vld [vmem:[#allocation2 + $0x1f8] sm:$0xff]  ;;  %v2801_v47 = vadd.f32 %v2800_v45, %v2799_v10 }
 0x2b8   : > { %v2355_v50 = vadd.f32 %v3931_v62, %v2284_v12  ;;  %v3568_v51 = vpack.c.bf16 %v2354_v44, %v2354_v44  ;;  %v2802_v5 = vsel %vm358_vm0, %v2284_v12, 0.0  ;;  %v2875_v43 = vmul.f32 %v2284_v12, %v2284_v12 }
 0x2b9   : > { %v2803_v53 = vadd.f32 %v2802_v5, %v2801_v47  ;;  %v2999_v54 = vsel %vm358_vm0, %v2874_v46, 0.0 }
 0x2ba   : > { %v3569_v55 = vpack.c.bf16 %v2355_v50, %v2355_v50  ;;  %2675 = vst.msk [vmem:[%s4867_s15 + $0xf8] sm:$0xf] %vm2612_vm1, %v3568_v51  ;;  %v3000_v57 = vadd.f32 %v2999_v54, %v2998_v49  ;;  %v3001_v52 = vsel %vm358_vm0, %v2875_v43, 0.0 }
 0x2bb   : > { %v2804_v58 = vrot.slane %v2803_v53, 4 }
 0x2bc   : > { %2676 = vst.msk [vmem:[%s4867_s15 + $0xfc] sm:$0xf] %vm2612_vm1, %v3569_v55  ;;  %v3002_v60 = vadd.f32 %v3001_v52, %v3000_v57 }
 0x2bd   : > { %v2805_v31 = vadd.f32 %v2804_v58, %v2803_v53 }
 0x2be   : > { %4033 = shalt.err (!%p4030_p4)
}
 0x2bf   : > { %s4034_s15 = scalar_lea.hbm %s5358_s14, 4096  ;;  %s4038_s12 = scalar_lea.hbm %s5572_s16, 65536 }
 0x2c0   : > { %p4035_p5 = scmp.ne.s32.totalorder %s5358_s14, %s4034_s15  ;;  %p4039_p2 = scmp.lt.u32.totalorder %s5358_s14, %s5572_s16 }
 0x2c1   : > { %p4040_p11 = scmp.lt.u32.totalorder %s4038_s12, %s4034_s15  ;;  %p4042_p13 = scmp.lt.u32.totalorder %s4034_s15, %s5358_s14 }
 0x2c2   : > { %p4036_p9 = pnand %p4035_p5, %p5574_p8 }
 0x2c3   : > { %p4041_p12 = por %p4040_p11, %p4039_p2 }
 0x2c4   : > { %p4037_p3 = pneg %p4036_p9 }
 0x2c5   : > { %p4043_p10 = por %p4042_p13, %p4041_p12 }
 0x2c7   : > { %p4044_p1 = pnand %p4043_p10, %p4037_p3 }
 0x2c9   : > { %4047 = shalt.err (!%p4044_p1)
}
 0x2ca   : > { %s4222_s11 = smov 64   ;;  %s4223_s8 = smov 4   ;;  %v3003_v61 = vrot.slane %v3002_v60, 4  ;;  %v2806_v62 = vrot.slane %v2805_v31, 2  ;;  %vm2810_vm2 = vcmask 253952  }
 0x2cb   : > { %3578 = dma.vmem_to_hbm [thread:$0]  (%p5574_p8), %s5360_s10, 4096, %s5358_s14, %s3011_s2, %s4222_s11, %s4222_s11, %s4223_s8  }
 0x2cc   : > { %s3048_s7 = sadd.s32 %s5569_s30, %s3498_s9  ;;  %v3004_v34 = vadd.f32 %v3003_v61, %v3002_v60  ;;  %v2807_v0 = vadd.f32 %v2806_v62, %v2805_v31  ;;  %s342_s15 = scalar_lea.vmem [#allocation10], %s4508_s4 }
 0x2cd   : > { %s3499_s26 = sshll.u32 %s3048_s7, 4  ;;  %s3052_s3 = sshll.u32 %s342_s15, 4  ;;  %s5405_s3 = int_to_ptr.vmem [resolvable:$true] %s3052_s3 }
 0x2ce   : > { %v3005_v1 = vrot.slane %v3004_v34, 2  ;;  %v2808_v48 = vrot.slane %v2807_v0, 1  ;;  %s5533_s6 = scalar_lea.vmem [#allocation12], %s4508_s4  ;;  %s5575_s2 = sld [smem:[#allocation29_spill]] }
 0x2cf   : > { %s3067_s12 = sshll.u32 %s5533_s6, 4  ;;  %s5576_s19 = sld [smem:[#allocation30_spill]]  ;;  %s5413_s12 = int_to_ptr.vmem [resolvable:$true] %s3067_s12 }
 0x2d0   : > { %v3006_v15 = vadd.f32 %v3005_v1, %v3004_v34  ;;  %v2809_v2 = vadd.f32 %v2808_v48, %v2807_v0  ;;  %s5417_s8 = scalar_lea.sflag [#allocation11], %s301_s17  ;;  %s4048_s7 = scalar_lea.vmem %s5405_s3, 16 }
 0x2d1   : > { %p4049_p6 = scmp.ne.s32.totalorder %s5405_s3, %s4048_s7  ;;  %s4224_s10 = smov [#allocation10]  }
 0x2d2   : > { %v3007_v3 = vrot.slane %v3006_v15, 1  ;;  %2811 = vst.msk [vmem:[%s342_s15] sm:$0x1] %vm2810_vm2, %v2809_v2  ;;  %s4052_s14 = sshll.u32 %s4224_s10, 4  ;;  %s4053_s14 = int_to_ptr.vmem [resolvable:$false] %s4052_s14 }
 0x2d3   : > { %p4050_p7 = pnand %p4049_p6, %p5574_p8  ;;  %s4054_s6 = scalar_lea.vmem %s4053_s14, 32 }
 0x2d4   : > { %s5403_s25 = scalar_lea.hbm %s5575_s2, %s3499_s26  ;;  %p4055_p4 = scmp.lt.s32.totalorder %s5405_s3, %s4053_s14 }
 0x2d5   : > { %s5577_s11 = smov %s5576_s19  ;;  %s5411_s21 = scalar_lea.hbm %s5576_s19, %s3499_s26 }
 0x2d6   : > { %p4051_p0 = pneg %p4050_p7  ;;  %p4056_p5 = scmp.lt.s32.totalorder %s4054_s6, %s4048_s7 }
 0x2d8   : > { %p4057_p9 = por %p4056_p5, %p4055_p4 }
 0x2da   : > { %p4058_p3 = pnand %p4057_p9, %p4051_p0 }
 0x2dc   : > { %4061 = shalt.err (!%p4058_p3)
}
 0x2dd   : > { %s4062_s29 = scalar_lea.hbm %s5403_s25, 16  ;;  %s4066_s15 = scalar_lea.hbm %s5575_s2, 256 }
 0x2de   : > { %p4063_p2 = scmp.ne.s32.totalorder %s5403_s25, %s4062_s29  ;;  %p4067_p13 = scmp.lt.u32.totalorder %s5403_s25, %s5575_s2 }
 0x2df   : > { %p4068_p10 = scmp.lt.u32.totalorder %s4066_s15, %s4062_s29  ;;  %p4070_p6 = scmp.lt.u32.totalorder %s4062_s29, %s5403_s25 }
 0x2e0   : > { %p4064_p11 = pnand %p4063_p2, %p5574_p8 }
 0x2e1   : > { %p4069_p1 = por %p4068_p10, %p4067_p13 }
 0x2e2   : > { %p4065_p12 = pneg %p4064_p11 }
 0x2e3   : > { %p4071_p7 = por %p4070_p6, %p4069_p1 }
 0x2e5   : > { %p4072_p0 = pnand %p4071_p7, %p4065_p12 }
 0x2e7   : > { %4075 = shalt.err (!%p4072_p0)
}
 0x2e8   : > { %3579 = dma.vmem_to_hbm [thread:$0]  (%p5574_p8), %s5405_s3, 16, %s5403_s25, %s5417_s8   ;;  %v3008_v39 = vadd.f32 %v3007_v3, %v3006_v15 }
 0x2e9   : > { %s5578_s6 = scalar_lea.vmem [#allocation12], %s4508_s4  ;;  %s4076_s19 = scalar_lea.vmem %s5413_s12, 16 }
 0x2ea   : > { %3009 = vst.msk [vmem:[%s5578_s6] sm:$0x1] %vm2810_vm2, %v3008_v39  ;;  %p4077_p4 = scmp.ne.s32.totalorder %s5413_s12, %s4076_s19  ;;  %s4225_s7 = smov [#allocation12]  }
 0x2eb   : > { %s4080_s10 = sshll.u32 %s4225_s7, 4  ;;  %s4081_s10 = int_to_ptr.vmem [resolvable:$false] %s4080_s10 }
 0x2ec   : > { %p4078_p5 = pnand %p4077_p4, %p5574_p8  ;;  %s4082_s14 = scalar_lea.vmem %s4081_s10, 32 }
 0x2ed   : > { %p4083_p3 = scmp.lt.s32.totalorder %s5413_s12, %s4081_s10  ;;  %p4084_p2 = scmp.lt.s32.totalorder %s4082_s14, %s4076_s19 }
 0x2ee   : > { %p4079_p9 = pneg %p4078_p5 }
 0x2ef   : > { %p4085_p11 = por %p4084_p2, %p4083_p3 }
 0x2f1   : > { %p4086_p12 = pnand %p4085_p11, %p4079_p9 }
 0x2f3   : > { %4089 = shalt.err (!%p4086_p12)
}
 0x2f4   : > { %s4090_s4 = scalar_lea.hbm %s5411_s21, 16  ;;  %s4094_s29 = scalar_lea.hbm %s5577_s11, 256 }
 0x2f5   : > { %p4091_p13 = scmp.ne.s32.totalorder %s5411_s21, %s4090_s4  ;;  %p4095_p6 = scmp.lt.u32.totalorder %s5411_s21, %s5577_s11 }
 0x2f6   : > { %p4096_p7 = scmp.lt.u32.totalorder %s4094_s29, %s4090_s4  ;;  %p4098_p4 = scmp.lt.u32.totalorder %s4090_s4, %s5411_s21 }
 0x2f7   : > { %p4092_p10 = pnand %p4091_p13, %p5574_p8 }
 0x2f8   : > { %p4097_p0 = por %p4096_p7, %p4095_p6 }
 0x2f9   : > { %p4093_p1 = pneg %p4092_p10 }
 0x2fa   : > { %p4099_p5 = por %p4098_p4, %p4097_p0 }
 0x2fc   : > { %p4100_p9 = pnand %p4099_p5, %p4093_p1 }
 0x2fe   : > { %4103 = shalt.err (!%p4100_p9)
}
 0x2ff   : > { %3580 = dma.vmem_to_hbm [thread:$0]  (%p5574_p8), %s5413_s12, 16, %s5411_s21, %s5417_s8  }
 0x300 PF: > { %s5579_s15 = sld [smem:[#allocation19_spill]]  ;;  %s5580_s30 = sld [smem:[#allocation25_spill]] }
 0x301   : > { %p3608_p3 = scmp.ge.s32.totalorder %s4210_s28, 2 }
 0x306   : > { %s3079_s9 = sand.u32 1, %s5579_s15   ;;  %p5581_p2 = scmp.ne.s32.totalorder %s5580_s30, 0 }
 0x307   : > { %s3080_s6 = scalar_lea.sflag [#allocation5], %s3079_s9 }
 0x308   : > { %p3596_p11 = pnand %p3608_p3, %p5581_p2 }
 0x30a   : > { %4161 = dma.done.wait (!%p3596_p11), %s3080_s6, 4096  }
 0x30b   : > { %4163 = vsyncadd (!%p3596_p11), %s3080_s6, 4294963200  ;;  %s5582_s19 = sadd.s32 4294967294, %s4210_s28  }
 0x30c   : > { %s3088_s7 = sand.u32 1, %s5582_s19  }
 0x30d   : > { %s3089_s10 = scalar_lea.sflag [#allocation11], %s3088_s7 }
 0x30e   : > { %4165 = dma.done.wait (!%p3596_p11), %s3089_s10, 32  }
 0x30f   : > { %4167 = vsyncadd (!%p3596_p11), %s3089_s10, 4294967264  ;;  %s28_s28 = sadd.s32 1, %s4210_s28   ;;  %s5583_s13 = sld [smem:[#allocation18_spill]] }
 0x310   : > { %p25_p8 = scmp.ge.s32.totalorder %s28_s28, 18   ;;  %s5584_s12 = smov %s4417_s18 }
 0x311   : > { %s5585_s8 = sld [smem:[#allocation22_spill]]  ;;  %s5586_s26 = sld [smem:[#allocation26_spill]] }
 0x312   : > { %s5588_s19 = smov %s4178_s20  ;;  %s5589_s20 = smov %s5584_s12 }
 0x313   : > { %s5590_s21 = smov %s4186_s22  ;;  %s5591_s22 = smov %s4190_s23 }
 0x314   : > { %s5592_s23 = smov %s4420_s24  ;;  %s5594_s25 = smov %s4206_s27 }
 0x315   : > { %s5587_s18 = smov %s5583_s13  ;;  %s5595_s27 = smov %s5601_s5 }
 0x316   :  { %27 = sbr.rel (!%p25_p8) target bundleno = 18 (0x12), region = 134 }
 0x317   : > { %s5593_s24 = smov %s5585_s8 }
 0x31d   :  { %3101 = vsyncpa [#allocation4], 1 }
 0x31e   :  { %3103 = vsyncpa [#allocation4 + $0x1], 1 }
 0x31f   :  { %3104 = vsyncpa [#allocation7], 1 }
 0x320   :  { %3106 = vsyncpa [#allocation7 + $0x1], 1 }
 0x321   :  { %3107 = vsyncpa [#allocation5], 1 }
 0x322   :  { %3109 = vsyncpa [#allocation5 + $0x1], 1 }
 0x323   :  { %3110 = vsyncpa [#allocation11], 1 }
 0x324   :  { %3112 = vsyncpa [#allocation11 + $0x1], 1 }

// kernel: fwd.9
= control target key start
LH: loop header
LB: loop body
LE: loop exit
PB: predicated region body
PF: predicated region fallthrough
CT: control target
= control target key end

     0   :  { %s3078_s0 = inlined_call_operand.hbm [shape: bf16[4,5120,128], index: 0, kind: input, shape index: {}]   ;;  %s3079_s1 = inlined_call_operand.hbm [shape: bf16[4,128,3], index: 1, kind: input, shape index: {}]   ;;  %s3080_s2 = inlined_call_operand.hbm [shape: f32[1,3], index: 2, kind: input, shape index: {}]   ;;  %s3081_s3 = inlined_call_operand.hbm [shape: f32[4,5120,3], index: 3, kind: output, shape index: {}]  }
   0x1   :  { %3096 = sst [smem:[#allocation21_spill]] %s3080_s2 }
   0x2   :  { %3097 = sst [smem:[#allocation22_spill]] %s3081_s3 }
   0x3   :  { %8 = vsyncpa [#allocation4], 0 }
   0x4   :  { %10 = vsyncpa [#allocation4 + $0x1], 0 }
   0x5   :  { %11 = vsyncpa [#allocation7], 0 }
   0x6   :  { %13 = vsyncpa [#allocation7 + $0x1], 0 }
   0x7   :  { %14 = vsyncpa [#allocation5], 0 }
   0x8   :  { %16 = vsyncpa [#allocation5 + $0x1], 0  ;;  %s2300_s12 = smov 0   ;;  %s2302_s13 = smov 0  }
   0x9   :  { %s2304_s14 = smov 0   ;;  %s2306_s15 = smov 0  }
   0xa   :  { %s2308_s16 = smov 0   ;;  %s2310_s17 = smov 0  }
   0xb   :  { %s2312_s18 = smov 0   ;;  %s2314_s19 = smov 0  }
   0xc   :  { %s2316_s20 = smov 0   ;;  %s2318_s21 = smov 0  }
   0xd   :  { %s2320_s22 = smov 0  }
   0xe LB: > { %3098 = sst [smem:[#allocation14_spill]] %s2241_s15  ;;  %s2354_s23 = sadd.s32 4294967295, %s2269_s22   ;;  %s2269_s22 = sphi %s2320_s22, %s22_s22   ;;  %s2265_s21 = sphi %s2318_s21, %s3143_s21   ;;  %s2261_s20 = sphi %s2316_s20, %s3134_s20   ;;  %s2257_s19 = sphi %s2314_s19, %s3142_s19   ;;  %s2253_s18 = sphi %s2312_s18, %s3141_s18   ;;  %s2249_s17 = sphi %s2310_s17, %s3140_s17   ;;  %s2245_s16 = sphi %s2308_s16, %s3139_s16   ;;  %s2241_s15 = sphi %s2306_s15, %s3138_s15   ;;  %s2237_s14 = sphi %s2304_s14, %s3137_s14   ;;  %s2233_s13 = sphi %s2302_s13, %s3136_s13   ;;  %s2229_s12 = sphi %s2300_s12, %s3135_s12  }
   0xf   : > { %3099 = sst [smem:[#allocation15_spill]] %s2253_s18  ;;  %s1560_s24 = sadd.s32 4294967294, %s2269_s22  }
  0x10   : > { %3100 = sst [smem:[#allocation16_spill]] %s2257_s19  ;;  %p59_p0 = scmp.ne.s32.totalorder %s2249_s17, %s2245_s16 }
  0x11   : > { %3101 = sst [smem:[#allocation17_spill]] %s2261_s20  ;;  %p60_p1 = scmp.eq.s32.totalorder %s2269_s22, 0 }
  0x12   : > { %p65_p2 = scmp.ne.s32.totalorder %s2245_s16, %s2241_s15  ;;  %p3084_p3 = scmp.eq.s32.totalorder %s2354_s23, 0 }
  0x13   : > { %p2366_p4 = por %p60_p1, %p59_p0  ;;  %p87_p6 = scmp.ne.s32.totalorder %s2237_s14, %s2233_s13 }
  0x14   : > { %p2373_p5 = por %p3084_p3, %p65_p2  ;;  %p93_p7 = scmp.ne.s32.totalorder %s2233_s13, %s2229_s12 }
  0x15   : > { %s3102_s25 = scalar_select %p2366_p4, 1, 0 }
  0x16   : > { %s3103_s27 = scalar_select %p2373_p5, 1, 0 }
  0x17   : > { %p140_p8 = scmp.eq.s32.totalorder %s2354_s23, 39  ;;  %p2381_p9 = por %p87_p6, %p60_p1 }
  0x18   : > { %p146_p10 = scmp.eq.s32.totalorder %s1560_s24, 39  ;;  %p2387_p11 = por %p93_p7, %p3084_p3 }
  0x19   : > { %p2394_p12 = por %p140_p8, %p59_p0  ;;  %p1561_p1 = scmp.ge.s32.totalorder %s2269_s22, 1 }
  0x1a   : > { %s3105_s29 = scalar_select %p2387_p11, 1, 0 }
  0x1b   : > { %s3106_s30 = scalar_select %p2394_p12, 1, 0 }
  0x1c   : > { %p2398_p13 = por %p146_p10, %p65_p2  ;;  %p153_p6 = scmp.lt.s32.totalorder %s2269_s22, 41 }
  0x1d   : > { %3107 = sst [smem:[#allocation18_spill]] %s3106_s30  ;;  %s2271_s6 = smov [#allocation8]  }
  0x1e   : > { %s3108_s4 = scalar_select %p2398_p13, 1, 0 }
  0x1f   : > { %p2404_p5 = pnand %p1561_p1, %p153_p6  ;;  %s166_s7 = sshll.u32 %s2271_s6, 4  ;;  %s167_s7 = int_to_ptr.vmem [resolvable:$true] %s166_s7 }
  0x20   : > { %3109 = sst [smem:[#allocation19_spill]] %s3108_s4  ;;  %p3086_p7 = scmp.lt.s32.totalorder %s2269_s22, 40 }
  0x21   : > { %s3110_s5 = scalar_select %p2404_p5, 1, 0 }
  0x22   : > { %p1770_p0 = pneg %p2404_p5  ;;  %p2415_p8 = pnand %p3086_p7, %p2381_p9 }
  0x23   : > { %s37_s10 = sadd.s32 1, %s2261_s20  ;;  %s3113_s2 = sld [smem:[#allocation21_spill]] }
  0x24   : > { %s3111_s8 = scalar_select %p2415_p8, 1, 0 }
  0x25   : > { %p2421_p2 = pnand %p1770_p0, %p3084_p3 }
  0x27   : > { %p2053_p9 = pneg %p2421_p2 }
  0x29   : > { %s2051_s24 = scalar_lea.hbm %s3113_s2, 16 }
  0x2a   : > { %p2052_p10 = scmp.ne.s32.totalorder %s3113_s2, %s2051_s24  ;;  %p2058_p0 = scmp.lt.u32.totalorder %s2051_s24, %s3113_s2 }
  0x2c   : > { %p2054_p1 = pnand %p2053_p9, %p2052_p10 }
  0x2e   : > { %p2055_p6 = pneg %p2054_p1 }
  0x30   : > { %p2060_p3 = pnand %p2058_p0, %p2055_p6 }
  0x32   : > { %2063 = shalt.err (!%p2060_p3)
}
  0x33   : > { %s2064_s15 = scalar_lea.vmem %s167_s7, 16  ;;  %s2071_s11 = scalar_lea.vmem %s167_s7, 32 }
  0x34   : > { %p2065_p7 = scmp.ne.s32.totalorder %s167_s7, %s2064_s15  ;;  %p2072_p11 = scmp.lt.s32.totalorder %s167_s7, %s167_s7 }
  0x35   : > { %p2073_p5 = scmp.lt.s32.totalorder %s2071_s11, %s2064_s15 }
  0x36   : > { %p2067_p13 = pnand %p2065_p7, %p2053_p9 }
  0x37   : > { %p2074_p8 = por %p2073_p5, %p2072_p11 }
  0x38   : > { %p2068_p12 = pneg %p2067_p13 }
  0x3a   : > { %p2075_p4 = pnand %p2074_p8, %p2068_p12 }
  0x3c   : > { %2078 = shalt.err (!%p2075_p4)
}
  0x3d   : > { %1773 = dma.hbm_to_vmem [thread:$0]  (!%p2421_p2), %s3113_s2, 16, %s167_s7, [#allocation7]  }
  0x3e   : > { %p39_p3 = scmp.ge.s32.totalorder %s37_s10, 10  ;;  %s41_s4 = sadd.s32 1, %s2265_s21 }
  0x3f   : > { %s52_s15 = sadd.s32 1, %s2249_s17  ;;  %s177_s24 = sand.u32 1, %s2249_s17  }
  0x40   : > { %s3145_s10 = smov (%p39_p3, %s37_s10), 0  ;;  %s3147_s4 = smov (!%p39_p3, %s41_s4), %s2265_s21 }
  0x41   : > { %3114 = sst [smem:[#allocation20_spill]] %s3145_s10  ;;  %s46_s9 = ssub.s32 %s2261_s20, %s3145_s10 }
  0x42   : > { %p43_p4 = scmp.ge.s32.totalorder %s3147_s4, 4  ;;  %s1564_s6 = sshll.u32 %s177_s24, 8 }
  0x43   : > { %s1565_s28 = sshll.u32 %s2261_s20, 6  ;;  %s1758_s7 = smul.u32 640, %s2265_s21 }
  0x44   : > { %s3149_s4 = smov (%p43_p4, %s3147_s4), 0  ;;  %s181_s11 = scalar_lea.vmem [#allocation3], %s1564_s6 }
  0x45   : > { %s191_s26 = sshll.u32 %s181_s11, 4  ;;  %s45_s12 = ssub.s32 %s2265_s21, %s3149_s4  ;;  %s2456_s26 = int_to_ptr.vmem [resolvable:$true] %s191_s26 }
  0x46   : > { %s47_s2 = sor.u32 %s46_s9, %s45_s12  ;;  %p78_p5 = scmp.eq.s32.totalorder %s45_s12, 0 }
  0x47   : > { %p50_p11 = scmp.eq.s32.totalorder %s47_s2, 0  ;;  %s188_s3 = sadd.s32 %s1758_s7, %s1565_s28 }
  0x48   : > { %s3115_s30 = sadd.s32 1, %s2237_s14  ;;  %s1566_s19 = sshll.u32 %s188_s3, 6 }
  0x49   : > { %s2461_s10 = scalar_select %p78_p5, %s2237_s14, %s3115_s30  }
  0x4a   : > { %s2464_s18 = scalar_select %p50_p11, %s2249_s17, %s52_s15  }
  0x4b   : > { %p3116_p12 = scmp.ne.s32.totalorder %s3102_s25, 0  ;;  %p3117_p13 = scmp.lt.s32.totalorder %s2269_s22, 40 }
  0x4c   : > { %s2477_s9 = scalar_lea.hbm %s3078_s0, %s1566_s19  ;;  %s2479_s2 = scalar_lea.sflag [#allocation4], %s177_s24 }
  0x4d   : > { %p2470_p7 = pnand %p3117_p13, %p3116_p12  ;;  %s2079_s3 = scalar_lea.hbm %s2477_s9, 4096 }
  0x4e   : > { %p2080_p8 = scmp.ne.s32.totalorder %s2477_s9, %s2079_s3  ;;  %s2084_s15 = scalar_lea.hbm %s3078_s0, 163840 }
  0x4f   : > { %p2081_p2 = pneg %p2470_p7  ;;  %p2085_p1 = scmp.lt.u32.totalorder %s2477_s9, %s3078_s0 }
  0x50   : > { %p2086_p6 = scmp.lt.u32.totalorder %s2084_s15, %s2079_s3  ;;  %p2088_p3 = scmp.lt.u32.totalorder %s2079_s3, %s2477_s9 }
  0x51   : > { %p2082_p10 = pnand %p2081_p2, %p2080_p8 }
  0x52   : > { %p2087_p0 = por %p2086_p6, %p2085_p1 }
  0x53   : > { %p2083_p9 = pneg %p2082_p10 }
  0x54   : > { %p2089_p4 = por %p2088_p3, %p2087_p0 }
  0x56   : > { %p2090_p5 = pnand %p2089_p4, %p2083_p9 }
  0x58   : > { %2093 = shalt.err (!%p2090_p5)
}
  0x59   : > { %s2094_s24 = scalar_lea.vmem %s2456_s26, 4096  ;;  %s2272_s7 = smov [#allocation3]  }
  0x5a   : > { %p2095_p11 = scmp.ne.s32.totalorder %s2456_s26, %s2094_s24  ;;  %s2099_s12 = sshll.u32 %s2272_s7, 4  ;;  %s2100_s12 = int_to_ptr.vmem [resolvable:$false] %s2099_s12 }
  0x5b   : > { %s2101_s6 = scalar_lea.vmem %s2100_s12, 8192  ;;  %p2102_p8 = scmp.lt.s32.totalorder %s2456_s26, %s2100_s12 }
  0x5c   : > { %p2097_p12 = pnand %p2095_p11, %p2081_p2  ;;  %p2103_p10 = scmp.lt.s32.totalorder %s2101_s6, %s2094_s24 }
  0x5e   : > { %p2098_p13 = pneg %p2097_p12  ;;  %p2104_p1 = por %p2103_p10, %p2102_p8 }
  0x60   : > { %p2105_p6 = pnand %p2104_p1, %p2098_p13 }
  0x62   : > { %2108 = shalt.err (!%p2105_p6)
}
  0x63   : > { %s2273_s11 = smov 64   ;;  %s2274_s3 = smov 4  }
  0x64   : > { %1777 = dma.hbm_to_vmem [thread:$0]  (!%p2470_p7), %s2477_s9, 4096, %s2456_s26, %s2479_s2, %s2273_s11, %s2273_s11, %s2274_s3  }
  0x65   : > { %s201_s25 = sand.u32 1, %s2269_s22   ;;  %s203_s30 = sand.u32 1, %s2237_s14  }
  0x66   : > { %s1567_s15 = sshll.u32 %s203_s30, 6  ;;  %s1621_s19 = sshll.u32 %s2265_s21, 10 }
  0x67   : > { %s2516_s7 = scalar_lea.hbm %s3079_s1, %s1621_s19  ;;  %s205_s12 = scalar_lea.vmem [#allocation6], %s1567_s15 }
  0x68   : > { %s214_s6 = sshll.u32 %s205_s12, 4  ;;  %s2520_s20 = scalar_lea.sflag [#allocation7], %s201_s25  ;;  %s2518_s6 = int_to_ptr.vmem [resolvable:$true] %s214_s6 }
  0x69   : > { %s2109_s26 = scalar_lea.hbm %s2516_s7, 1024  ;;  %p3119_p2 = scmp.ne.s32.totalorder %s3111_s8, 0 }
  0x6a   : > { %p2110_p7 = scmp.ne.s32.totalorder %s2516_s7, %s2109_s26  ;;  %s2114_s30 = scalar_lea.hbm %s3079_s1, 4096 }
  0x6b   : > { %p2111_p9 = pneg %p3119_p2  ;;  %p2115_p4 = scmp.lt.u32.totalorder %s2516_s7, %s3079_s1 }
  0x6c   : > { %p2116_p5 = scmp.lt.u32.totalorder %s2114_s30, %s2109_s26  ;;  %p2118_p12 = scmp.lt.u32.totalorder %s2109_s26, %s2516_s7 }
  0x6d   : > { %p2112_p0 = pnand %p2111_p9, %p2110_p7 }
  0x6e   : > { %p2117_p11 = por %p2116_p5, %p2115_p4 }
  0x6f   : > { %p2113_p3 = pneg %p2112_p0 }
  0x70   : > { %p2119_p13 = por %p2118_p12, %p2117_p11 }
  0x72   : > { %p2120_p8 = pnand %p2119_p13, %p2113_p3 }
  0x74   : > { %2123 = shalt.err (!%p2120_p8)
}
  0x75   : > { %s2124_s25 = scalar_lea.vmem %s2518_s6, 1024  ;;  %s2275_s15 = smov [#allocation6]  }
  0x76   : > { %p2125_p10 = scmp.ne.s32.totalorder %s2518_s6, %s2124_s25  ;;  %s2129_s24 = sshll.u32 %s2275_s15, 4  ;;  %s2130_s24 = int_to_ptr.vmem [resolvable:$false] %s2129_s24 }
  0x77   : > { %s2131_s12 = scalar_lea.vmem %s2130_s24, 2048  ;;  %p2132_p7 = scmp.lt.s32.totalorder %s2518_s6, %s2130_s24 }
  0x78   : > { %p2127_p1 = pnand %p2125_p10, %p2111_p9  ;;  %p2133_p0 = scmp.lt.s32.totalorder %s2131_s12, %s2124_s25 }
  0x7a   : > { %p2128_p6 = pneg %p2127_p1  ;;  %p2134_p4 = por %p2133_p0, %p2132_p7 }
  0x7c   : > { %p2135_p5 = pnand %p2134_p4, %p2128_p6 }
  0x7e   : > { %2138 = shalt.err (!%p2135_p5)
}
  0x7f   : > { %1780 = dma.hbm_to_vmem [thread:$0]  (!%p3119_p2), %s2516_s7, 1024, %s2518_s6, %s2520_s20, %s2273_s11, %s2273_s11, %s2274_s3  }
  0x80   : > { %p3120_p9 = scmp.ne.s32.totalorder %s3110_s5, 0 }
  0x81   : > { %s2554_s26 = sand.u32 (!%p3120_p9), 1, %s2245_s16   ;;  %p3121_p3 = scmp.ne.s32.totalorder (!%p3120_p9), %s3103_s27, 0 }
  0x82   : > { %226 = sbr.rel (%p3120_p9) target bundleno = 495 (0x1ef), region = 32  ;;  %s1571_s9 = sshll.u32 (!%p3120_p9), %s2554_s26, 8 }
  0x83   : > { %s229_s2 = scalar_lea.sflag (!%p3120_p9), [#allocation4], %s2554_s26  ;;  %s2558_s30 = scalar_lea.vmem (!%p3120_p9), [#allocation3], %s1571_s9 }
  0x89   : > { %2212 = dma.done.wait (%p3121_p3), %s229_s2, 4096  }
  0x8a   : > { %2214 = vsyncadd (%p3121_p3), %s229_s2, 4294963200  ;;  %s237_s5 = sand.u32 1, %s2354_s23   ;;  %s239_s8 = sand.u32 1, %s2233_s13  }
  0x8b   : > { %s1572_s11 = sshll.u32 %s239_s8, 6  ;;  %s238_s3 = scalar_lea.sflag [#allocation7], %s237_s5 }
  0x8c   : > { %s2566_s7 = scalar_lea.vmem [#allocation6], %s1572_s11  ;;  %p3122_p2 = scmp.ne.s32.totalorder %s3105_s29, 0 }
  0x8e   : > { %2216 = dma.done.wait (%p3122_p2), %s238_s3, 1024  }
  0x8f   : > { %2218 = vsyncadd (%p3122_p2), %s238_s3, 4294966272  ;;  %p3123_p11 = scmp.eq.s32.totalorder %s2354_s23, 0 }
  0x91   : > { %2220 = dma.done.wait (%p3123_p11), [#allocation7], 16   ;;  %p3124_p12 = pmov %p3123_p11 }
  0x92   : > { %vm281_vm0 = vcmask 23552   ;;  %v2276_v0 = vmov 0.0   ;;  %v1883_v1 = vld [vmem:[%s2566_s7] sm:$0xff]   ;;  %v1884_v2 = vld [vmem:[%s2566_s7 + $0x8] sm:$0xff]   ;;  %v1885_v3 = vld [vmem:[%s2566_s7 + $0x10] sm:$0xff]   ;;  %s1574_s23 = sshll.u32 %s2554_s26, 9 }
  0x93   : > { %2222 = vsyncadd (%p3124_p12), [#allocation7], 4294967280  ;;  %284 = vst.msk [vmem:[#allocation2 + $0x10] sm:$0xff] %vm281_vm0, %v2276_v0  ;;  %1662 = vmatprep.subr.bf16.mxu0 %v1883_v1  ;;  %1742 = vmatprep.subr.bf16.mxu1 %v1883_v1  ;;  %v1886_v4 = vld [vmem:[%s2566_s7 + $0x18] sm:$0xff]   ;;  %v1891_v5 = vld [vmem:[%s2558_s30] sm:$0xff]   ;;  %s2787_s27 = scalar_lea.vmem [#allocation9], %s1574_s23 }
  0x94   : > { %282 = vst.msk [vmem:[#allocation2] sm:$0xff] %vm281_vm0, %v2276_v0  ;;  %283 = vst.msk [vmem:[#allocation2 + $0x8] sm:$0xff] %vm281_vm0, %v2276_v0  ;;  %1663 = vmatpush3.bf16.msra.mxu0 %v1883_v1  ;;  %1750 = vmatpush3.bf16.msra.mxu1 %v1883_v1  ;;  %v1892_v6 = vld [vmem:[%s2558_s30 + $0x80] sm:$0xff]   ;;  %v1888_v8 = vld [vmem:[%s2566_s7 + $0x28] sm:$0xff]   ;;  %s3125_s29 = sld [smem:[#allocation16_spill]]  ;;  %s3126_s6 = sld [smem:[#allocation15_spill]] }
  0x95   : > { %285 = vst.msk [vmem:[#allocation2 + $0x18] sm:$0xff] %vm281_vm0, %v2276_v0  ;;  %286 = vst.msk [vmem:[#allocation2 + $0x20] sm:$0xff] %vm281_vm0, %v2276_v0  ;;  %1664 = vmatprep.subr.bf16.mxu0 %v1884_v2  ;;  %1743 = vmatprep.subr.bf16.mxu1 %v1884_v2  ;;  %v1887_v7 = vld [vmem:[%s2566_s7 + $0x20] sm:$0xff]   ;;  %v1889_v9 = vld [vmem:[%s2566_s7 + $0x30] sm:$0xff]   ;;  %s1430_s15 = sshll.u32 %s2787_s27, 4  ;;  %s3127_s24 = sld [smem:[#allocation18_spill]]  ;;  %s3009_s15 = int_to_ptr.vmem [resolvable:$true] %s1430_s15 }
  0x96   : > { %287 = vst.msk [vmem:[#allocation2 + $0x28] sm:$0xff] %vm281_vm0, %v2276_v0  ;;  %288 = vst.msk [vmem:[#allocation2 + $0x30] sm:$0xff] %vm281_vm0, %v2276_v0  ;;  %1678 = vmatprep.mubr.bf16.mxu0 %v1891_v5  ;;  %1710 = vmatprep.mubr.bf16.mxu1 %v1892_v6  ;;  %v1890_v10 = vld [vmem:[%s2566_s7 + $0x38] sm:$0xff]   ;;  %v1893_v11 = vld [vmem:[%s2558_s30 + $0x8] sm:$0xff]   ;;  %s3128_s2 = sld [smem:[#allocation22_spill]]  ;;  %s1415_s5 = scalar_lea.sflag [#allocation5], %s2554_s26 }
  0x97   : > { %289 = vst.msk [vmem:[#allocation2 + $0x38] sm:$0xff] %vm281_vm0, %v2276_v0  ;;  %290 = vst.msk [vmem:[#allocation2 + $0x40] sm:$0xff] %vm281_vm0, %v2276_v0  ;;  %v1894_v12 = vld [vmem:[%s2558_s30 + $0x88] sm:$0xff]   ;;  %v1895_v13 = vld [vmem:[%s2558_s30 + $0x10] sm:$0xff]   ;;  %s2139_s8 = scalar_lea.vmem %s3009_s15, 8192  ;;  %s2277_s11 = smov [#allocation9]  }
  0x98   : > { %291 = vst.msk [vmem:[#allocation2 + $0x48] sm:$0xff] %vm281_vm0, %v2276_v0  ;;  %292 = vst.msk [vmem:[#allocation2 + $0x50] sm:$0xff] %vm281_vm0, %v2276_v0  ;;  %1665 = vmatpush3.bf16.msra.mxu0 %v1884_v2  ;;  %1751 = vmatpush3.bf16.msra.mxu1 %v1884_v2  ;;  %v1896_v14 = vld [vmem:[%s2558_s30 + $0x90] sm:$0xff]   ;;  %v1897_v15 = vld [vmem:[%s2558_s30 + $0x18] sm:$0xff]   ;;  %p2140_p13 = scmp.ne.s32.totalorder %s3009_s15, %s2139_s8  ;;  %s2143_s3 = sshll.u32 %s2277_s11, 4  ;;  %s2144_s3 = int_to_ptr.vmem [resolvable:$false] %s2143_s3 }
  0x99   : > { %293 = vst.msk [vmem:[#allocation2 + $0x58] sm:$0xff] %vm281_vm0, %v2276_v0  ;;  %294 = vst.msk [vmem:[#allocation2 + $0x60] sm:$0xff] %vm281_vm0, %v2276_v0  ;;  %1666 = vmatprep.subr.bf16.mxu0 %v1885_v3  ;;  %1744 = vmatprep.subr.bf16.mxu1 %v1885_v3  ;;  %v1898_v16 = vld [vmem:[%s2558_s30 + $0x98] sm:$0xff]   ;;  %v1899_v17 = vld [vmem:[%s2558_s30 + $0x20] sm:$0xff]   ;;  %s2145_s7 = scalar_lea.vmem %s2144_s3, 16384  ;;  %p2146_p6 = scmp.lt.s32.totalorder %s3009_s15, %s2144_s3 }
  0x9a   : > { %295 = vst.msk [vmem:[#allocation2 + $0x68] sm:$0xff] %vm281_vm0, %v2276_v0  ;;  %296 = vst.msk [vmem:[#allocation2 + $0x70] sm:$0xff] %vm281_vm0, %v2276_v0  ;;  %v1900_v18 = vld [vmem:[%s2558_s30 + $0xa0] sm:$0xff]   ;;  %v1901_v19 = vld [vmem:[%s2558_s30 + $0x28] sm:$0xff]   ;;  %s1759_s20 = smul.u32 640, %s3125_s29  ;;  %s1617_s19 = sshll.u32 %s3126_s6, 6 }
  0x9b   : > { %297 = vst.msk [vmem:[#allocation2 + $0x78] sm:$0xff] %vm281_vm0, %v2276_v0  ;;  %298 = vst.msk [vmem:[#allocation2 + $0x80] sm:$0xff] %vm281_vm0, %v2276_v0  ;;  %v1902_v20 = vld [vmem:[%s2558_s30 + $0xa8] sm:$0xff]   ;;  %v1903_v21 = vld [vmem:[%s2558_s30 + $0x30] sm:$0xff]   ;;  %p3129_p8 = scmp.ne.s32.totalorder %s3127_s24, 0  ;;  %p2147_p7 = scmp.lt.s32.totalorder %s2145_s7, %s2139_s8 }
  0x9c   : > { %299 = vst.msk [vmem:[#allocation2 + $0x88] sm:$0xff] %vm281_vm0, %v2276_v0  ;;  %300 = vst.msk [vmem:[#allocation2 + $0x90] sm:$0xff] %vm281_vm0, %v2276_v0  ;;  %1667 = vmatpush3.bf16.msra.mxu0 %v1885_v3  ;;  %1752 = vmatpush3.bf16.msra.mxu1 %v1885_v3  ;;  %v1904_v22 = vld [vmem:[%s2558_s30 + $0xb0] sm:$0xff]   ;;  %v1905_v23 = vld [vmem:[%s2558_s30 + $0x38] sm:$0xff]   ;;  %s1427_s28 = sadd.s32 %s1759_s20, %s1617_s19 }
  0x9d   : > { %301 = vst.msk [vmem:[#allocation2 + $0x98] sm:$0xff] %vm281_vm0, %v2276_v0  ;;  %302 = vst.msk [vmem:[#allocation2 + $0xa0] sm:$0xff] %vm281_vm0, %v2276_v0  ;;  %1668 = vmatprep.subr.bf16.mxu0 %v1886_v4  ;;  %1745 = vmatprep.subr.bf16.mxu1 %v1886_v4  ;;  %v1906_v24 = vld [vmem:[%s2558_s30 + $0xb8] sm:$0xff]   ;;  %v1907_v25 = vld [vmem:[%s2558_s30 + $0x40] sm:$0xff]   ;;  %s1618_s25 = sshll.u32 %s1427_s28, 7  ;;  %p2141_p10 = pnand %p2140_p13, %p3129_p8 }
  0x9e   : > { %303 = vst.msk [vmem:[#allocation2 + $0xa8] sm:$0xff] %vm281_vm0, %v2276_v0  ;;  %304 = vst.msk [vmem:[#allocation2 + $0xb0] sm:$0xff] %vm281_vm0, %v2276_v0  ;;  %v1908_v26 = vld [vmem:[%s2558_s30 + $0xc0] sm:$0xff]   ;;  %v1909_v27 = vld [vmem:[%s2558_s30 + $0x48] sm:$0xff]   ;;  %p2148_p0 = por %p2147_p7, %p2146_p6 }
  0x9f   : > { %305 = vst.msk [vmem:[#allocation2 + $0xb8] sm:$0xff] %vm281_vm0, %v2276_v0  ;;  %306 = vst.msk [vmem:[#allocation2 + $0xc0] sm:$0xff] %vm281_vm0, %v2276_v0  ;;  %v1910_v28 = vld [vmem:[%s2558_s30 + $0xc8] sm:$0xff]   ;;  %v1911_v29 = vld [vmem:[%s2558_s30 + $0x50] sm:$0xff]   ;;  %p2142_p1 = pneg %p2141_p10 }
  0xa0   : > { %307 = vst.msk [vmem:[#allocation2 + $0xc8] sm:$0xff] %vm281_vm0, %v2276_v0  ;;  %308 = vst.msk [vmem:[#allocation2 + $0xd0] sm:$0xff] %vm281_vm0, %v2276_v0  ;;  %1669 = vmatpush3.bf16.msra.mxu0 %v1886_v4  ;;  %1753 = vmatpush3.bf16.msra.mxu1 %v1886_v4  ;;  %v1912_v30 = vld [vmem:[%s2558_s30 + $0xd0] sm:$0xff]   ;;  %v1913_v31 = vld [vmem:[%s2558_s30 + $0x58] sm:$0xff]  }
  0xa1   : > { %309 = vst.msk [vmem:[#allocation2 + $0xd8] sm:$0xff] %vm281_vm0, %v2276_v0  ;;  %310 = vst.msk [vmem:[#allocation2 + $0xe0] sm:$0xff] %vm281_vm0, %v2276_v0  ;;  %1670 = vmatprep.subr.bf16.mxu0 %v1887_v7  ;;  %1746 = vmatprep.subr.bf16.mxu1 %v1887_v7  ;;  %v1914_v32 = vld [vmem:[%s2558_s30 + $0xd8] sm:$0xff]   ;;  %v1915_v33 = vld [vmem:[%s2558_s30 + $0x60] sm:$0xff]   ;;  %p2149_p4 = pnand %p2148_p0, %p2142_p1 }
  0xa2   : > { %311 = vst.msk [vmem:[#allocation2 + $0xe8] sm:$0xff] %vm281_vm0, %v2276_v0  ;;  %312 = vst.msk [vmem:[#allocation2 + $0xf0] sm:$0xff] %vm281_vm0, %v2276_v0  ;;  %v1916_v34 = vld [vmem:[%s2558_s30 + $0xe0] sm:$0xff]   ;;  %v1917_v35 = vld [vmem:[%s2558_s30 + $0x68] sm:$0xff]  }
  0xa3   : > { %313 = vst.msk [vmem:[#allocation2 + $0xf8] sm:$0xff] %vm281_vm0, %v2276_v0  ;;  %314 = vst.msk [vmem:[#allocation2 + $0x100] sm:$0xff] %vm281_vm0, %v2276_v0  ;;  %v1918_v36 = vld [vmem:[%s2558_s30 + $0xe8] sm:$0xff]   ;;  %v1919_v37 = vld [vmem:[%s2558_s30 + $0x70] sm:$0xff]  }
  0xa4   : > { %315 = vst.msk [vmem:[#allocation2 + $0x108] sm:$0xff] %vm281_vm0, %v2276_v0  ;;  %316 = vst.msk [vmem:[#allocation2 + $0x110] sm:$0xff] %vm281_vm0, %v2276_v0  ;;  %1671 = vmatpush3.bf16.msra.mxu0 %v1887_v7  ;;  %1754 = vmatpush3.bf16.msra.mxu1 %v1887_v7  ;;  %v1920_v38 = vld [vmem:[%s2558_s30 + $0xf0] sm:$0xff]   ;;  %v1921_v39 = vld [vmem:[%s2558_s30 + $0x78] sm:$0xff]  }
  0xa5   : > { %317 = vst.msk [vmem:[#allocation2 + $0x118] sm:$0xff] %vm281_vm0, %v2276_v0  ;;  %318 = vst.msk [vmem:[#allocation2 + $0x120] sm:$0xff] %vm281_vm0, %v2276_v0  ;;  %1672 = vmatprep.subr.bf16.mxu0 %v1888_v8  ;;  %1747 = vmatprep.subr.bf16.mxu1 %v1888_v8  ;;  %v1922_v40 = vld [vmem:[%s2558_s30 + $0xf8] sm:$0xff]   ;;  %v348_v41 = vld [vmem:[#allocation2 + $0x10] sm:$0xff]  ;;  %s3007_s30 = scalar_lea.hbm %s3128_s2, %s1618_s25 }
  0xa6   : > { %319 = vst.msk [vmem:[#allocation2 + $0x128] sm:$0xff] %vm281_vm0, %v2276_v0  ;;  %320 = vst.msk [vmem:[#allocation2 + $0x130] sm:$0xff] %vm281_vm0, %v2276_v0  ;;  %v346_v43 = vld [vmem:[#allocation2] sm:$0xff]  ;;  %v349_v47 = vld [vmem:[#allocation2 + $0x18] sm:$0xff] }
  0xa7   : > { %321 = vst.msk [vmem:[#allocation2 + $0x138] sm:$0xff] %vm281_vm0, %v2276_v0  ;;  %322 = vst.msk [vmem:[#allocation2 + $0x140] sm:$0xff] %vm281_vm0, %v2276_v0  ;;  %v347_v53 = vld [vmem:[#allocation2 + $0x8] sm:$0xff]  ;;  %v352_v1 = vld [vmem:[#allocation2 + $0x30] sm:$0xff] }
  0xa8   : > { %323 = vst.msk [vmem:[#allocation2 + $0x148] sm:$0xff] %vm281_vm0, %v2276_v0  ;;  %324 = vst.msk [vmem:[#allocation2 + $0x150] sm:$0xff] %vm281_vm0, %v2276_v0  ;;  %1673 = vmatpush3.bf16.msra.mxu0 %v1888_v8  ;;  %1755 = vmatpush3.bf16.msra.mxu1 %v1888_v8  ;;  %v350_v3 = vld [vmem:[#allocation2 + $0x20] sm:$0xff]  ;;  %v353_v8 = vld [vmem:[#allocation2 + $0x38] sm:$0xff] }
  0xa9   : > { %325 = vst.msk [vmem:[#allocation2 + $0x158] sm:$0xff] %vm281_vm0, %v2276_v0  ;;  %326 = vst.msk [vmem:[#allocation2 + $0x160] sm:$0xff] %vm281_vm0, %v2276_v0  ;;  %1674 = vmatprep.subr.bf16.mxu0 %v1889_v9  ;;  %1748 = vmatprep.subr.bf16.mxu1 %v1889_v9  ;;  %v2752_v5 = vld [vmem:[#allocation8] ss:$0 sm:$0xff] }
  0xaa   : > { %327 = vst.msk [vmem:[#allocation2 + $0x168] sm:$0xff] %vm281_vm0, %v2276_v0  ;;  %328 = vst.msk [vmem:[#allocation2 + $0x170] sm:$0xff] %vm281_vm0, %v2276_v0  ;;  %v378_v44 = vld [vmem:[#allocation2 + $0x100] sm:$0xff] }
  0xab   : > { %329 = vst.msk [vmem:[#allocation2 + $0x178] sm:$0xff] %vm281_vm0, %v2276_v0  ;;  %330 = vst.msk [vmem:[#allocation2 + $0x180] sm:$0xff] %vm281_vm0, %v2276_v0  ;;  %v380_v42 = vld [vmem:[#allocation2 + $0x110] sm:$0xff]  ;;  %v379_v54 = vld [vmem:[#allocation2 + $0x108] sm:$0xff] }
  0xac   : > { %331 = vst.msk [vmem:[#allocation2 + $0x188] sm:$0xff] %vm281_vm0, %v2276_v0  ;;  %332 = vst.msk [vmem:[#allocation2 + $0x190] sm:$0xff] %vm281_vm0, %v2276_v0  ;;  %1675 = vmatpush3.bf16.msra.mxu0 %v1889_v9  ;;  %1756 = vmatpush3.bf16.msra.mxu1 %v1889_v9  ;;  %v381_v48 = vld [vmem:[#allocation2 + $0x118] sm:$0xff]  ;;  %v382_v4 = vld [vmem:[#allocation2 + $0x120] sm:$0xff] }
  0xad   : > { %333 = vst.msk [vmem:[#allocation2 + $0x198] sm:$0xff] %vm281_vm0, %v2276_v0  ;;  %334 = vst.msk [vmem:[#allocation2 + $0x1a0] sm:$0xff] %vm281_vm0, %v2276_v0  ;;  %1676 = vmatprep.subr.bf16.mxu0 %v1890_v10  ;;  %1749 = vmatprep.subr.bf16.mxu1 %v1890_v10  ;;  %v384_v2 = vld [vmem:[#allocation2 + $0x130] sm:$0xff] }
  0xae   : > { %335 = vst.msk [vmem:[#allocation2 + $0x1a8] sm:$0xff] %vm281_vm0, %v2276_v0  ;;  %336 = vst.msk [vmem:[#allocation2 + $0x1b0] sm:$0xff] %vm281_vm0, %v2276_v0  ;;  %v385_v9 = vld [vmem:[#allocation2 + $0x138] sm:$0xff] }
  0xaf   : > { %337 = vst.msk [vmem:[#allocation2 + $0x1b8] sm:$0xff] %vm281_vm0, %v2276_v0  ;;  %338 = vst.msk [vmem:[#allocation2 + $0x1c0] sm:$0xff] %vm281_vm0, %v2276_v0 }
  0xb0   : > { %339 = vst.msk [vmem:[#allocation2 + $0x1c8] sm:$0xff] %vm281_vm0, %v2276_v0  ;;  %340 = vst.msk [vmem:[#allocation2 + $0x1d0] sm:$0xff] %vm281_vm0, %v2276_v0  ;;  %1677 = vmatpush3.bf16.msra.mxu0 %v1890_v10  ;;  %1757 = vmatpush3.bf16.msra.mxu1 %v1890_v10 }
  0xb1   : > { %341 = vst.msk [vmem:[#allocation2 + $0x1d8] sm:$0xff] %vm281_vm0, %v2276_v0  ;;  %342 = vst.msk [vmem:[#allocation2 + $0x1e0] sm:$0xff] %vm281_vm0, %v2276_v0 }
  0xb2   : > { %343 = vst.msk [vmem:[#allocation2 + $0x1e8] sm:$0xff] %vm281_vm0, %v2276_v0  ;;  %344 = vst.msk [vmem:[#allocation2 + $0x1f0] sm:$0xff] %vm281_vm0, %v2276_v0 }
  0xb3   : > { %345 = vst.msk [vmem:[#allocation2 + $0x1f8] sm:$0xff] %vm281_vm0, %v2276_v0  ;;  %1679 = vmatmul.mubr.bf16.vlgmr.msra.gmra.mrb[0].mxu0 %v1893_v11  ;;  %1711 = vmatmul.mubr.bf16.vlgmr.msra.gmra.mrb[0].mxu1 %v1894_v12 }
  0xb4   : > { %1682 = vmatprep.mubr.bf16.mxu0 %v1895_v13  ;;  %1714 = vmatprep.mubr.bf16.mxu1 %v1896_v14  ;;  %v351_v14 = vld [vmem:[#allocation2 + $0x28] sm:$0xff] }
  0xbb   : > { %1683 = vmatmul.mubr.bf16.gmra.mrb[4].mxu0 %v1897_v15  ;;  %1715 = vmatmul.mubr.bf16.gmra.mrb[4].mxu1 %v1898_v16  ;;  %v383_v15 = vld [vmem:[#allocation2 + $0x128] sm:$0xff] }
  0xbc   : > { %1686 = vmatprep.mubr.bf16.mxu0 %v1899_v17  ;;  %1718 = vmatprep.mubr.bf16.mxu1 %v1900_v18 }
  0xc3   : > { %1687 = vmatmul.mubr.bf16.gmra.mrb[8].mxu0 %v1901_v19  ;;  %1719 = vmatmul.mubr.bf16.gmra.mrb[8].mxu1 %v1902_v20 }
  0xc4   : > { %1690 = vmatprep.mubr.bf16.mxu0 %v1903_v21  ;;  %1722 = vmatprep.mubr.bf16.mxu1 %v1904_v22 }
  0xcb   : > { %1691 = vmatmul.mubr.bf16.gmra.mrb[12].mxu0 %v1905_v23  ;;  %1723 = vmatmul.mubr.bf16.gmra.mrb[12].mxu1 %v1906_v24 }
  0xcc   : > { %1694 = vmatprep.mubr.bf16.mxu0 %v1907_v25  ;;  %1726 = vmatprep.mubr.bf16.mxu1 %v1908_v26 }
  0xd3   : > { %1695 = vmatmul.mubr.bf16.gmra.mrb[16].mxu0 %v1909_v27  ;;  %1727 = vmatmul.mubr.bf16.gmra.mrb[16].mxu1 %v1910_v28 }
  0xd4   : > { %1698 = vmatprep.mubr.bf16.mxu0 %v1911_v29  ;;  %1730 = vmatprep.mubr.bf16.mxu1 %v1912_v30 }
  0xdb   : > { %1699 = vmatmul.mubr.bf16.gmra.mrb[20].mxu0 %v1913_v31  ;;  %1731 = vmatmul.mubr.bf16.gmra.mrb[20].mxu1 %v1914_v32 }
  0xdc   : > { %1702 = vmatprep.mubr.bf16.mxu0 %v1915_v33  ;;  %1734 = vmatprep.mubr.bf16.mxu1 %v1916_v34 }
  0xe3   : > { %1703 = vmatmul.mubr.bf16.gmra.mrb[24].mxu0 %v1917_v35  ;;  %1735 = vmatmul.mubr.bf16.gmra.mrb[24].mxu1 %v1918_v36 }
  0xe4   : > { %1706 = vmatprep.mubr.bf16.mxu0 %v1919_v37  ;;  %1738 = vmatprep.mubr.bf16.mxu1 %v1920_v38 }
  0xeb   : > { %1707 = vmatmul.mubr.bf16.gmra.mrb[28].mxu0 %v1921_v39  ;;  %1739 = vmatmul.mubr.bf16.gmra.mrb[28].mxu1 %v1922_v40  ;;  %v356_v40 = vld [vmem:[#allocation2 + $0x50] sm:$0xff] }
 0x186   : > { %v1680_v45 = vpop.f32.mrb[0].mxu0  ;;  %v1712_v46 = vpop.f32.mrb[0].mxu1 }
 0x187   : > { %v1021_v49 = vadd.f32 %v1680_v45, %v348_v41  ;;  %v1053_v50 = vadd.f32 %v1712_v46, %v380_v42  ;;  %v764_v51 = vpop.f32.mrb[1].mxu0  ;;  %v892_v52 = vpop.f32.mrb[1].mxu1  ;;  %v388_v41 = vld [vmem:[#allocation2 + $0x150] sm:$0xff] }
 0x188   : > { %v1019_v55 = vadd.f32 %v764_v51, %v346_v43  ;;  %v1051_v56 = vadd.f32 %v892_v52, %v378_v44  ;;  %v1681_v57 = vpop.f32.mrb[2].mxu0  ;;  %v1713_v58 = vpop.f32.mrb[2].mxu1  ;;  %v354_v43 = vld [vmem:[#allocation2 + $0x40] sm:$0xff] }
 0x189   : > { %1086 = vst.msk [vmem:[#allocation2 + $0x10] sm:$0xff] %vm281_vm0, %v1021_v49  ;;  %1118 = vst.msk [vmem:[#allocation2 + $0x110] sm:$0xff] %vm281_vm0, %v1053_v50  ;;  %v1022_v59 = vadd.f32 %v1681_v57, %v349_v47  ;;  %v1054_v60 = vadd.f32 %v1713_v58, %v381_v48  ;;  %v767_v61 = vpop.f32.mrb[3].mxu0  ;;  %v895_v62 = vpop.f32.mrb[3].mxu1  ;;  %v386_v44 = vld [vmem:[#allocation2 + $0x140] sm:$0xff]  ;;  %v357_v48 = vld [vmem:[#allocation2 + $0x58] sm:$0xff] }
 0x18a   : > { %1084 = vst.msk [vmem:[#allocation2] sm:$0xff] %vm281_vm0, %v1019_v55  ;;  %1116 = vst.msk [vmem:[#allocation2 + $0x100] sm:$0xff] %vm281_vm0, %v1051_v56  ;;  %v1020_v63 = vadd.f32 %v767_v61, %v347_v53  ;;  %v1052_v0 = vadd.f32 %v895_v62, %v379_v54  ;;  %v389_v53 = vld [vmem:[#allocation2 + $0x158] sm:$0xff] }
 0x18b   : > { %1087 = vst.msk [vmem:[#allocation2 + $0x18] sm:$0xff] %vm281_vm0, %v1022_v59  ;;  %1119 = vst.msk [vmem:[#allocation2 + $0x118] sm:$0xff] %vm281_vm0, %v1054_v60  ;;  %v355_v60 = vld [vmem:[#allocation2 + $0x48] sm:$0xff] }
 0x18c   : > { %1085 = vst.msk [vmem:[#allocation2 + $0x8] sm:$0xff] %vm281_vm0, %v1020_v63  ;;  %1117 = vst.msk [vmem:[#allocation2 + $0x108] sm:$0xff] %vm281_vm0, %v1052_v0 }
 0x18e   : > { %v1684_v6 = vpop.f32.mrb[4].mxu0  ;;  %v1716_v7 = vpop.f32.mrb[4].mxu1 }
 0x18f   : > { %v1025_v10 = vadd.f32 %v1684_v6, %v352_v1  ;;  %v1057_v11 = vadd.f32 %v1716_v7, %v384_v2  ;;  %v780_v12 = vpop.f32.mrb[5].mxu0  ;;  %v908_v13 = vpop.f32.mrb[5].mxu1 }
 0x190   : > { %v1153_v16 = vld [vmem:[#allocation2 + $0x10] sm:$0xff]  ;;  %v1023_v18 = vadd.f32 %v780_v12, %v350_v3  ;;  %v1055_v19 = vadd.f32 %v908_v13, %v382_v4  ;;  %v1685_v20 = vpop.f32.mrb[6].mxu0  ;;  %v1717_v21 = vpop.f32.mrb[6].mxu1  ;;  %v387_v3 = vld [vmem:[#allocation2 + $0x148] sm:$0xff] }
 0x191   : > { %v1185_v17 = vld [vmem:[#allocation2 + $0x110] sm:$0xff]  ;;  %v1224_v22 = vadd.f32 %v2752_v5, %v1153_v16  ;;  %v1151_v24 = vld [vmem:[#allocation2] sm:$0xff]  ;;  %1090 = vst.msk [vmem:[#allocation2 + $0x30] sm:$0xff] %vm281_vm0, %v1025_v10  ;;  %1122 = vst.msk [vmem:[#allocation2 + $0x130] sm:$0xff] %vm281_vm0, %v1057_v11  ;;  %v1026_v26 = vadd.f32 %v1685_v20, %v353_v8  ;;  %v1058_v27 = vadd.f32 %v1717_v21, %v385_v9  ;;  %v783_v28 = vpop.f32.mrb[7].mxu0  ;;  %v911_v29 = vpop.f32.mrb[7].mxu1 }
 0x192   : > { %v1256_v23 = vadd.f32 %v2752_v5, %v1185_v17  ;;  %v1183_v25 = vld [vmem:[#allocation2 + $0x100] sm:$0xff]  ;;  %v1222_v30 = vadd.f32 %v2752_v5, %v1151_v24  ;;  %v1154_v32 = vld [vmem:[#allocation2 + $0x18] sm:$0xff]  ;;  %1088 = vst.msk [vmem:[#allocation2 + $0x20] sm:$0xff] %vm281_vm0, %v1023_v18  ;;  %1120 = vst.msk [vmem:[#allocation2 + $0x120] sm:$0xff] %vm281_vm0, %v1055_v19  ;;  %v1024_v34 = vadd.f32 %v783_v28, %v351_v14 }
 0x193   : > { %v1254_v31 = vadd.f32 %v2752_v5, %v1183_v25  ;;  %v1186_v33 = vld [vmem:[#allocation2 + $0x118] sm:$0xff]  ;;  %v1056_v35 = vadd.f32 %v911_v29, %v383_v15  ;;  %1923 = vtanh.f32 %v1224_v22  ;;  %v1225_v36 = vadd.f32 %v2752_v5, %v1154_v32  ;;  %v1152_v37 = vld [vmem:[#allocation2 + $0x8] sm:$0xff]  ;;  %1091 = vst.msk [vmem:[#allocation2 + $0x38] sm:$0xff] %vm281_vm0, %v1026_v26  ;;  %1123 = vst.msk [vmem:[#allocation2 + $0x138] sm:$0xff] %vm281_vm0, %v1058_v27 }
 0x194   : > { %v1184_v38 = vld [vmem:[#allocation2 + $0x108] sm:$0xff]  ;;  %1925 = vtanh.f32 %v1256_v23  ;;  %v1257_v39 = vadd.f32 %v2752_v5, %v1186_v33  ;;  %1089 = vst.msk [vmem:[#allocation2 + $0x28] sm:$0xff] %vm281_vm0, %v1024_v34  ;;  %v1223_v42 = vadd.f32 %v2752_v5, %v1152_v37  ;;  %v360_v17 = vld [vmem:[#allocation2 + $0x70] sm:$0xff]  ;;  %v358_v21 = vld [vmem:[#allocation2 + $0x60] sm:$0xff] }
 0x195   : > { %1121 = vst.msk [vmem:[#allocation2 + $0x128] sm:$0xff] %vm281_vm0, %v1056_v35  ;;  %1927 = vtanh.f32 %v1222_v30  ;;  %v1255_v45 = vadd.f32 %v2752_v5, %v1184_v38  ;;  %v392_v18 = vld [vmem:[#allocation2 + $0x170] sm:$0xff]  ;;  %v390_v22 = vld [vmem:[#allocation2 + $0x160] sm:$0xff]  ;;  %v361_v27 = vld [vmem:[#allocation2 + $0x78] sm:$0xff] }
 0x196   : > { %1929 = vtanh.f32 %v1254_v31  ;;  %v1688_v46 = vpop.f32.mrb[8].mxu0  ;;  %v1720_v47 = vpop.f32.mrb[8].mxu1  ;;  %v393_v33 = vld [vmem:[#allocation2 + $0x178] sm:$0xff]  ;;  %v359_v34 = vld [vmem:[#allocation2 + $0x68] sm:$0xff] }
 0x197   : > { %1931 = vtanh.f32 %v1225_v36  ;;  %v1029_v49 = vadd.f32 %v1688_v46, %v356_v40  ;;  %v1061_v50 = vadd.f32 %v1720_v47, %v388_v41  ;;  %v796_v51 = vpop.f32.mrb[9].mxu0  ;;  %v924_v52 = vpop.f32.mrb[9].mxu1 }
 0x198   : > { %1933 = vtanh.f32 %v1257_v39  ;;  %v1157_v54 = vld [vmem:[#allocation2 + $0x30] sm:$0xff]  ;;  %v1027_v56 = vadd.f32 %v796_v51, %v354_v43  ;;  %v1059_v57 = vadd.f32 %v924_v52, %v386_v44  ;;  %v1689_v58 = vpop.f32.mrb[10].mxu0  ;;  %v1721_v59 = vpop.f32.mrb[10].mxu1 }
 0x199   : > { %v1189_v55 = vld [vmem:[#allocation2 + $0x130] sm:$0xff]  ;;  %1935 = vtanh.f32 %v1223_v42  ;;  %v1228_v61 = vadd.f32 %v2752_v5, %v1157_v54  ;;  %v1155_v63 = vld [vmem:[#allocation2 + $0x20] sm:$0xff]  ;;  %1094 = vst.msk [vmem:[#allocation2 + $0x50] sm:$0xff] %vm281_vm0, %v1029_v49  ;;  %1126 = vst.msk [vmem:[#allocation2 + $0x150] sm:$0xff] %vm281_vm0, %v1061_v50  ;;  %v1030_v1 = vadd.f32 %v1689_v58, %v357_v48  ;;  %v799_v2 = vpop.f32.mrb[11].mxu0  ;;  %v927_v4 = vpop.f32.mrb[11].mxu1  ;;  %v1062_v10 = vadd.f32 %v1721_v59, %v389_v53 }
 0x19a   : > { %v1260_v62 = vadd.f32 %v2752_v5, %v1189_v55  ;;  %v1187_v0 = vld [vmem:[#allocation2 + $0x120] sm:$0xff]  ;;  %1937 = vtanh.f32 %v1255_v45  ;;  %v1226_v6 = vadd.f32 %v2752_v5, %v1155_v63  ;;  %v1158_v8 = vld [vmem:[#allocation2 + $0x38] sm:$0xff]  ;;  %1092 = vst.msk [vmem:[#allocation2 + $0x40] sm:$0xff] %vm281_vm0, %v1027_v56  ;;  %1124 = vst.msk [vmem:[#allocation2 + $0x140] sm:$0xff] %vm281_vm0, %v1059_v57  ;;  %v1028_v14 = vadd.f32 %v799_v2, %v355_v60 }
 0x19b   : > { %v1258_v7 = vadd.f32 %v2752_v5, %v1187_v0  ;;  %v1190_v9 = vld [vmem:[#allocation2 + $0x138] sm:$0xff]  ;;  %1939 = vtanh.f32 %v1228_v61  ;;  %v1229_v11 = vadd.f32 %v2752_v5, %v1158_v8  ;;  %v1156_v12 = vld [vmem:[#allocation2 + $0x28] sm:$0xff]  ;;  %1095 = vst.msk [vmem:[#allocation2 + $0x58] sm:$0xff] %vm281_vm0, %v1030_v1  ;;  %1127 = vst.msk [vmem:[#allocation2 + $0x158] sm:$0xff] %vm281_vm0, %v1062_v10  ;;  %v1060_v16 = vadd.f32 %v927_v4, %v387_v3 }
 0x19c   : > { %v1188_v13 = vld [vmem:[#allocation2 + $0x128] sm:$0xff]  ;;  %1941 = vtanh.f32 %v1260_v62  ;;  %v1261_v15 = vadd.f32 %v2752_v5, %v1190_v9  ;;  %v1227_v20 = vadd.f32 %v2752_v5, %v1156_v12  ;;  %1093 = vst.msk [vmem:[#allocation2 + $0x48] sm:$0xff] %vm281_vm0, %v1028_v14  ;;  %v364_v0 = vld [vmem:[#allocation2 + $0x90] sm:$0xff]  ;;  %v365_v12 = vld [vmem:[#allocation2 + $0x98] sm:$0xff] }
 0x19d   : > { %v1924_v19 = vpop.eup %1923  ;;  %1943 = vtanh.f32 %v1226_v6  ;;  %v1259_v24 = vadd.f32 %v2752_v5, %v1188_v13  ;;  %1125 = vst.msk [vmem:[#allocation2 + $0x148] sm:$0xff] %vm281_vm0, %v1060_v16  ;;  %v391_v42 = vld [vmem:[#allocation2 + $0x168] sm:$0xff]  ;;  %v396_v1 = vld [vmem:[#allocation2 + $0x190] sm:$0xff]  ;;  %v362_v6 = vld [vmem:[#allocation2 + $0x80] sm:$0xff] }
 0x19e   : > { %v1926_v23 = vpop.eup %1925  ;;  %1352 = vst.msk [vmem:[%s2787_s27 + $0x10] sm:$0xff] %vm281_vm0, %v1924_v19  ;;  %1945 = vtanh.f32 %v1258_v7  ;;  %v1692_v25 = vpop.f32.mrb[12].mxu0  ;;  %v394_v7 = vld [vmem:[#allocation2 + $0x180] sm:$0xff]  ;;  %v363_v19 = vld [vmem:[#allocation2 + $0x88] sm:$0xff] }
 0x19f   : > { %v1724_v26 = vpop.f32.mrb[12].mxu1  ;;  %v1928_v28 = vpop.eup %1927  ;;  %1384 = vst.msk [vmem:[%s2787_s27 + $0x110] sm:$0xff] %vm281_vm0, %v1926_v23  ;;  %1947 = vtanh.f32 %v1229_v11  ;;  %v1033_v29 = vadd.f32 %v1692_v25, %v360_v17 }
 0x1a0   : > { %v1065_v30 = vadd.f32 %v1724_v26, %v392_v18  ;;  %v812_v31 = vpop.f32.mrb[13].mxu0  ;;  %v940_v32 = vpop.f32.mrb[13].mxu1  ;;  %1350 = vst.msk [vmem:[%s2787_s27] sm:$0xff] %vm281_vm0, %v1928_v28  ;;  %1949 = vtanh.f32 %v1261_v15  ;;  %v1161_v36 = vld [vmem:[#allocation2 + $0x50] sm:$0xff]  ;;  %v397_v18 = vld [vmem:[#allocation2 + $0x198] sm:$0xff] }
 0x1a1   : > { %v1930_v35 = vpop.eup %1929  ;;  %v1193_v37 = vld [vmem:[#allocation2 + $0x150] sm:$0xff]  ;;  %v1031_v38 = vadd.f32 %v812_v31, %v358_v21  ;;  %v1063_v39 = vadd.f32 %v940_v32, %v390_v22  ;;  %v1693_v40 = vpop.f32.mrb[14].mxu0  ;;  %1951 = vtanh.f32 %v1227_v20  ;;  %v1232_v44 = vadd.f32 %v2752_v5, %v1161_v36  ;;  %v1159_v46 = vld [vmem:[#allocation2 + $0x40] sm:$0xff]  ;;  %1098 = vst.msk [vmem:[#allocation2 + $0x70] sm:$0xff] %vm281_vm0, %v1033_v29 }
 0x1a2   : > { %v1725_v41 = vpop.f32.mrb[14].mxu1  ;;  %v1932_v43 = vpop.eup %1931  ;;  %1382 = vst.msk [vmem:[%s2787_s27 + $0x100] sm:$0xff] %vm281_vm0, %v1930_v35  ;;  %v1264_v45 = vadd.f32 %v2752_v5, %v1193_v37  ;;  %v1191_v47 = vld [vmem:[#allocation2 + $0x140] sm:$0xff]  ;;  %1130 = vst.msk [vmem:[#allocation2 + $0x170] sm:$0xff] %vm281_vm0, %v1065_v30  ;;  %v1034_v48 = vadd.f32 %v1693_v40, %v361_v27  ;;  %1953 = vtanh.f32 %v1259_v24  ;;  %v1230_v52 = vadd.f32 %v2752_v5, %v1159_v46  ;;  %v1162_v54 = vld [vmem:[#allocation2 + $0x58] sm:$0xff] }
 0x1a3   : > { %v815_v49 = vpop.f32.mrb[15].mxu0  ;;  %v943_v50 = vpop.f32.mrb[15].mxu1  ;;  %1353 = vst.msk [vmem:[%s2787_s27 + $0x18] sm:$0xff] %vm281_vm0, %v1932_v43  ;;  %v1262_v53 = vadd.f32 %v2752_v5, %v1191_v47  ;;  %1096 = vst.msk [vmem:[#allocation2 + $0x60] sm:$0xff] %vm281_vm0, %v1031_v38  ;;  %v1066_v55 = vadd.f32 %v1725_v41, %v393_v33  ;;  %1955 = vtanh.f32 %v1232_v44  ;;  %v1233_v57 = vadd.f32 %v2752_v5, %v1162_v54  ;;  %v1194_v58 = vld [vmem:[#allocation2 + $0x158] sm:$0xff]  ;;  %v1160_v63 = vld [vmem:[#allocation2 + $0x48] sm:$0xff] }
 0x1a4   : > { %v1934_v51 = vpop.eup %1933  ;;  %1128 = vst.msk [vmem:[#allocation2 + $0x160] sm:$0xff] %vm281_vm0, %v1063_v39  ;;  %1099 = vst.msk [vmem:[#allocation2 + $0x78] sm:$0xff] %vm281_vm0, %v1034_v48  ;;  %v1032_v59 = vadd.f32 %v815_v49, %v359_v34  ;;  %v1064_v60 = vadd.f32 %v943_v50, %v391_v42  ;;  %1957 = vtanh.f32 %v1264_v45  ;;  %v1265_v62 = vadd.f32 %v2752_v5, %v1194_v58  ;;  %v1192_v4 = vld [vmem:[#allocation2 + $0x148] sm:$0xff]  ;;  %v368_v46 = vld [vmem:[#allocation2 + $0xb0] sm:$0xff] }
 0x1a5   : > { %v1936_v56 = vpop.eup %1935  ;;  %1385 = vst.msk [vmem:[%s2787_s27 + $0x118] sm:$0xff] %vm281_vm0, %v1934_v51  ;;  %1131 = vst.msk [vmem:[#allocation2 + $0x178] sm:$0xff] %vm281_vm0, %v1066_v55  ;;  %1959 = vtanh.f32 %v1230_v52  ;;  %v1231_v3 = vadd.f32 %v2752_v5, %v1160_v63  ;;  %v1263_v9 = vadd.f32 %v2752_v5, %v1192_v4  ;;  %v395_v27 = vld [vmem:[#allocation2 + $0x188] sm:$0xff]  ;;  %v400_v51 = vld [vmem:[#allocation2 + $0x1b0] sm:$0xff] }
 0x1a6   : > { %v1938_v61 = vpop.eup %1937  ;;  %1351 = vst.msk [vmem:[%s2787_s27 + $0x8] sm:$0xff] %vm281_vm0, %v1936_v56  ;;  %1097 = vst.msk [vmem:[#allocation2 + $0x68] sm:$0xff] %vm281_vm0, %v1032_v59  ;;  %1961 = vtanh.f32 %v1262_v53  ;;  %v1696_v10 = vpop.f32.mrb[16].mxu0  ;;  %v366_v54 = vld [vmem:[#allocation2 + $0xa0] sm:$0xff] }
 0x1a7   : > { %v1940_v2 = vpop.eup %1939  ;;  %1383 = vst.msk [vmem:[%s2787_s27 + $0x108] sm:$0xff] %vm281_vm0, %v1938_v61  ;;  %1129 = vst.msk [vmem:[#allocation2 + $0x168] sm:$0xff] %vm281_vm0, %v1064_v60  ;;  %v1728_v11 = vpop.f32.mrb[16].mxu1  ;;  %1963 = vtanh.f32 %v1233_v57  ;;  %v1037_v14 = vadd.f32 %v1696_v10, %v364_v0  ;;  %v398_v55 = vld [vmem:[#allocation2 + $0x1a0] sm:$0xff]  ;;  %v369_v60 = vld [vmem:[#allocation2 + $0xb8] sm:$0xff] }
 0x1a8   : > { %v1942_v8 = vpop.eup %1941  ;;  %1356 = vst.msk [vmem:[%s2787_s27 + $0x30] sm:$0xff] %vm281_vm0, %v1940_v2  ;;  %v1069_v15 = vadd.f32 %v1728_v11, %v396_v1  ;;  %v828_v16 = vpop.f32.mrb[17].mxu0  ;;  %1965 = vtanh.f32 %v1265_v62  ;;  %v1165_v21 = vld [vmem:[#allocation2 + $0x70] sm:$0xff]  ;;  %v401_v2 = vld [vmem:[#allocation2 + $0x1b8] sm:$0xff] }
 0x1a9   : > { %v1944_v13 = vpop.eup %1943  ;;  %1388 = vst.msk [vmem:[%s2787_s27 + $0x130] sm:$0xff] %vm281_vm0, %v1942_v8  ;;  %v956_v17 = vpop.f32.mrb[17].mxu1  ;;  %v1197_v22 = vld [vmem:[#allocation2 + $0x170] sm:$0xff]  ;;  %v1035_v23 = vadd.f32 %v828_v16, %v362_v6  ;;  %1967 = vtanh.f32 %v1231_v3  ;;  %v1236_v29 = vadd.f32 %v2752_v5, %v1165_v21  ;;  %1102 = vst.msk [vmem:[#allocation2 + $0x90] sm:$0xff] %vm281_vm0, %v1037_v14  ;;  %v367_v3 = vld [vmem:[#allocation2 + $0xa8] sm:$0xff] }
 0x1aa   : > { %v1946_v20 = vpop.eup %1945  ;;  %1354 = vst.msk [vmem:[%s2787_s27 + $0x20] sm:$0xff] %vm281_vm0, %v1944_v13  ;;  %v1067_v24 = vadd.f32 %v956_v17, %v394_v7  ;;  %v1697_v25 = vpop.f32.mrb[18].mxu0  ;;  %v1268_v30 = vadd.f32 %v2752_v5, %v1197_v22  ;;  %v1163_v31 = vld [vmem:[#allocation2 + $0x60] sm:$0xff]  ;;  %1134 = vst.msk [vmem:[#allocation2 + $0x190] sm:$0xff] %vm281_vm0, %v1069_v15  ;;  %1969 = vtanh.f32 %v1263_v9 }
 0x1ab   : > { %v1729_v26 = vpop.f32.mrb[18].mxu1  ;;  %v1948_v28 = vpop.eup %1947  ;;  %1386 = vst.msk [vmem:[%s2787_s27 + $0x120] sm:$0xff] %vm281_vm0, %v1946_v20  ;;  %v1195_v32 = vld [vmem:[#allocation2 + $0x160] sm:$0xff]  ;;  %v1038_v33 = vadd.f32 %v1697_v25, %v365_v12  ;;  %v1234_v37 = vadd.f32 %v2752_v5, %v1163_v31  ;;  %v1166_v39 = vld [vmem:[#allocation2 + $0x78] sm:$0xff]  ;;  %1100 = vst.msk [vmem:[#allocation2 + $0x80] sm:$0xff] %vm281_vm0, %v1035_v23  ;;  %1971 = vtanh.f32 %v1236_v29 }
 0x1ac   : > { %v831_v34 = vpop.f32.mrb[19].mxu0  ;;  %v959_v35 = vpop.f32.mrb[19].mxu1  ;;  %1357 = vst.msk [vmem:[%s2787_s27 + $0x38] sm:$0xff] %vm281_vm0, %v1948_v28  ;;  %v1266_v38 = vadd.f32 %v2752_v5, %v1195_v32  ;;  %1132 = vst.msk [vmem:[#allocation2 + $0x180] sm:$0xff] %vm281_vm0, %v1067_v24  ;;  %v1070_v40 = vadd.f32 %v1729_v26, %v397_v18  ;;  %v1237_v42 = vadd.f32 %v2752_v5, %v1166_v39  ;;  %v1198_v43 = vld [vmem:[#allocation2 + $0x178] sm:$0xff]  ;;  %1973 = vtanh.f32 %v1268_v30  ;;  %v399_v12 = vld [vmem:[#allocation2 + $0x1a8] sm:$0xff] }
 0x1ad   : > { %v1950_v36 = vpop.eup %1949  ;;  %1103 = vst.msk [vmem:[#allocation2 + $0x98] sm:$0xff] %vm281_vm0, %v1038_v33  ;;  %v1036_v44 = vadd.f32 %v831_v34, %v363_v19  ;;  %v1068_v45 = vadd.f32 %v959_v35, %v395_v27  ;;  %v1269_v48 = vadd.f32 %v2752_v5, %v1198_v43  ;;  %v1164_v49 = vld [vmem:[#allocation2 + $0x68] sm:$0xff]  ;;  %1975 = vtanh.f32 %v1234_v37  ;;  %v372_v31 = vld [vmem:[#allocation2 + $0xd0] sm:$0xff]  ;;  %v370_v39 = vld [vmem:[#allocation2 + $0xc0] sm:$0xff] }
 0x1ae   : > { %v1952_v41 = vpop.eup %1951  ;;  %1389 = vst.msk [vmem:[%s2787_s27 + $0x138] sm:$0xff] %vm281_vm0, %v1950_v36  ;;  %v1196_v50 = vld [vmem:[#allocation2 + $0x168] sm:$0xff]  ;;  %1135 = vst.msk [vmem:[#allocation2 + $0x198] sm:$0xff] %vm281_vm0, %v1070_v40  ;;  %v1235_v53 = vadd.f32 %v2752_v5, %v1164_v49  ;;  %1977 = vtanh.f32 %v1266_v38  ;;  %v1700_v58 = vpop.f32.mrb[20].mxu0  ;;  %v404_v36 = vld [vmem:[#allocation2 + $0x1d0] sm:$0xff] }
 0x1af   : > { %v1954_v47 = vpop.eup %1953  ;;  %1355 = vst.msk [vmem:[%s2787_s27 + $0x28] sm:$0xff] %vm281_vm0, %v1952_v41  ;;  %1101 = vst.msk [vmem:[#allocation2 + $0x88] sm:$0xff] %vm281_vm0, %v1036_v44  ;;  %v1267_v57 = vadd.f32 %v2752_v5, %v1196_v50  ;;  %v1732_v59 = vpop.f32.mrb[20].mxu1  ;;  %1979 = vtanh.f32 %v1237_v42  ;;  %v1041_v62 = vadd.f32 %v1700_v58, %v368_v46  ;;  %v402_v40 = vld [vmem:[#allocation2 + $0x1c0] sm:$0xff] }
 0x1b0   : > { %v1956_v52 = vpop.eup %1955  ;;  %1387 = vst.msk [vmem:[%s2787_s27 + $0x128] sm:$0xff] %vm281_vm0, %v1954_v47  ;;  %1133 = vst.msk [vmem:[#allocation2 + $0x188] sm:$0xff] %vm281_vm0, %v1068_v45  ;;  %v1073_v63 = vadd.f32 %v1732_v59, %v400_v51  ;;  %v844_v0 = vpop.f32.mrb[21].mxu0  ;;  %1981 = vtanh.f32 %v1269_v48  ;;  %v1169_v6 = vld [vmem:[#allocation2 + $0x90] sm:$0xff]  ;;  %v373_v45 = vld [vmem:[#allocation2 + $0xd8] sm:$0xff] }
 0x1b1   : > { %v1958_v56 = vpop.eup %1957  ;;  %1360 = vst.msk [vmem:[%s2787_s27 + $0x50] sm:$0xff] %vm281_vm0, %v1956_v52  ;;  %v972_v1 = vpop.f32.mrb[21].mxu1  ;;  %v1201_v7 = vld [vmem:[#allocation2 + $0x190] sm:$0xff]  ;;  %v1039_v8 = vadd.f32 %v844_v0, %v366_v54  ;;  %1983 = vtanh.f32 %v1235_v53  ;;  %v1240_v14 = vadd.f32 %v2752_v5, %v1169_v6  ;;  %1106 = vst.msk [vmem:[#allocation2 + $0xb0] sm:$0xff] %vm281_vm0, %v1041_v62  ;;  %v405_v51 = vld [vmem:[#allocation2 + $0x1d8] sm:$0xff] }
 0x1b2   : > { %v1960_v61 = vpop.eup %1959  ;;  %1392 = vst.msk [vmem:[%s2787_s27 + $0x150] sm:$0xff] %vm281_vm0, %v1958_v56  ;;  %v1071_v9 = vadd.f32 %v972_v1, %v398_v55  ;;  %v1701_v10 = vpop.f32.mrb[22].mxu0  ;;  %v1272_v15 = vadd.f32 %v2752_v5, %v1201_v7  ;;  %v1167_v16 = vld [vmem:[#allocation2 + $0x80] sm:$0xff]  ;;  %1138 = vst.msk [vmem:[#allocation2 + $0x1b0] sm:$0xff] %vm281_vm0, %v1073_v63  ;;  %1985 = vtanh.f32 %v1267_v57  ;;  %v371_v52 = vld [vmem:[#allocation2 + $0xc8] sm:$0xff] }
 0x1b3   : > { %v1962_v4 = vpop.eup %1961  ;;  %1358 = vst.msk [vmem:[%s2787_s27 + $0x40] sm:$0xff] %vm281_vm0, %v1960_v61  ;;  %v1733_v11 = vpop.f32.mrb[22].mxu1  ;;  %v1199_v17 = vld [vmem:[#allocation2 + $0x180] sm:$0xff]  ;;  %v1042_v18 = vadd.f32 %v1701_v10, %v369_v60  ;;  %v1238_v22 = vadd.f32 %v2752_v5, %v1167_v16  ;;  %1104 = vst.msk [vmem:[#allocation2 + $0xa0] sm:$0xff] %vm281_vm0, %v1039_v8  ;;  %1987 = vtanh.f32 %v1240_v14  ;;  %v403_v60 = vld [vmem:[#allocation2 + $0x1c8] sm:$0xff] }
 0x1b4   : > { %v1964_v13 = vpop.eup %1963  ;;  %1390 = vst.msk [vmem:[%s2787_s27 + $0x140] sm:$0xff] %vm281_vm0, %v1962_v4  ;;  %v847_v19 = vpop.f32.mrb[23].mxu0  ;;  %v1270_v23 = vadd.f32 %v2752_v5, %v1199_v17  ;;  %v1170_v24 = vld [vmem:[#allocation2 + $0x98] sm:$0xff]  ;;  %1136 = vst.msk [vmem:[#allocation2 + $0x1a0] sm:$0xff] %vm281_vm0, %v1071_v9  ;;  %v1074_v25 = vadd.f32 %v1733_v11, %v401_v2  ;;  %1989 = vtanh.f32 %v1272_v15  ;;  %v376_v16 = vld [vmem:[#allocation2 + $0xf0] sm:$0xff] }
 0x1b5   : > { %v975_v20 = vpop.f32.mrb[23].mxu1  ;;  %v1966_v21 = vpop.eup %1965  ;;  %1361 = vst.msk [vmem:[%s2787_s27 + $0x58] sm:$0xff] %vm281_vm0, %v1964_v13  ;;  %v1241_v27 = vadd.f32 %v2752_v5, %v1170_v24  ;;  %v1202_v28 = vld [vmem:[#allocation2 + $0x198] sm:$0xff]  ;;  %1107 = vst.msk [vmem:[#allocation2 + $0xb8] sm:$0xff] %vm281_vm0, %v1042_v18  ;;  %v1040_v29 = vadd.f32 %v847_v19, %v367_v3  ;;  %1991 = vtanh.f32 %v1238_v22  ;;  %v374_v24 = vld [vmem:[#allocation2 + $0xe0] sm:$0xff] }
 0x1b6   : > { %v1968_v26 = vpop.eup %1967  ;;  %1393 = vst.msk [vmem:[%s2787_s27 + $0x158] sm:$0xff] %vm281_vm0, %v1966_v21  ;;  %v1072_v30 = vadd.f32 %v975_v20, %v399_v12  ;;  %v1273_v33 = vadd.f32 %v2752_v5, %v1202_v28  ;;  %v1168_v34 = vld [vmem:[#allocation2 + $0x88] sm:$0xff]  ;;  %1139 = vst.msk [vmem:[#allocation2 + $0x1b8] sm:$0xff] %vm281_vm0, %v1074_v25  ;;  %1993 = vtanh.f32 %v1270_v23  ;;  %v1704_v43 = vpop.f32.mrb[24].mxu0  ;;  %v408_v21 = vld [vmem:[#allocation2 + $0x1f0] sm:$0xff] }
 0x1b7   : > { %v1970_v32 = vpop.eup %1969  ;;  %1359 = vst.msk [vmem:[%s2787_s27 + $0x48] sm:$0xff] %vm281_vm0, %v1968_v26  ;;  %v1200_v35 = vld [vmem:[#allocation2 + $0x188] sm:$0xff]  ;;  %v1239_v38 = vadd.f32 %v2752_v5, %v1168_v34  ;;  %1105 = vst.msk [vmem:[#allocation2 + $0xa8] sm:$0xff] %vm281_vm0, %v1040_v29  ;;  %v1736_v44 = vpop.f32.mrb[24].mxu1  ;;  %1995 = vtanh.f32 %v1241_v27  ;;  %v1045_v47 = vadd.f32 %v1704_v43, %v372_v31  ;;  %v406_v25 = vld [vmem:[#allocation2 + $0x1e0] sm:$0xff] }
 0x1b8   : > { %v1972_v37 = vpop.eup %1971  ;;  %1391 = vst.msk [vmem:[%s2787_s27 + $0x148] sm:$0xff] %vm281_vm0, %v1970_v32  ;;  %1137 = vst.msk [vmem:[#allocation2 + $0x1a8] sm:$0xff] %vm281_vm0, %v1072_v30  ;;  %v1271_v42 = vadd.f32 %v2752_v5, %v1200_v35  ;;  %v1077_v48 = vadd.f32 %v1736_v44, %v404_v36  ;;  %v860_v49 = vpop.f32.mrb[25].mxu0  ;;  %1997 = vtanh.f32 %v1273_v33  ;;  %v1173_v54 = vld [vmem:[#allocation2 + $0xb0] sm:$0xff]  ;;  %v377_v30 = vld [vmem:[#allocation2 + $0xf8] sm:$0xff] }
 0x1b9   : > { %v1974_v41 = vpop.eup %1973  ;;  %1364 = vst.msk [vmem:[%s2787_s27 + $0x70] sm:$0xff] %vm281_vm0, %v1972_v37  ;;  %v988_v50 = vpop.f32.mrb[25].mxu1  ;;  %v1205_v55 = vld [vmem:[#allocation2 + $0x1b0] sm:$0xff]  ;;  %v1043_v56 = vadd.f32 %v860_v49, %v370_v39  ;;  %1999 = vtanh.f32 %v1239_v38  ;;  %v1244_v62 = vadd.f32 %v2752_v5, %v1173_v54  ;;  %1110 = vst.msk [vmem:[#allocation2 + $0xd0] sm:$0xff] %vm281_vm0, %v1045_v47  ;;  %v409_v36 = vld [vmem:[#allocation2 + $0x1f8] sm:$0xff] }
 0x1ba   : > { %v1976_v46 = vpop.eup %1975  ;;  %1396 = vst.msk [vmem:[%s2787_s27 + $0x170] sm:$0xff] %vm281_vm0, %v1974_v41  ;;  %v1075_v57 = vadd.f32 %v988_v50, %v402_v40  ;;  %v1705_v58 = vpop.f32.mrb[26].mxu0  ;;  %v1276_v63 = vadd.f32 %v2752_v5, %v1205_v55  ;;  %v1171_v0 = vld [vmem:[#allocation2 + $0xa0] sm:$0xff]  ;;  %1142 = vst.msk [vmem:[#allocation2 + $0x1d0] sm:$0xff] %vm281_vm0, %v1077_v48  ;;  %2001 = vtanh.f32 %v1271_v42  ;;  %v375_v37 = vld [vmem:[#allocation2 + $0xe8] sm:$0xff] }
 0x1bb   : > { %v1978_v53 = vpop.eup %1977  ;;  %1362 = vst.msk [vmem:[%s2787_s27 + $0x60] sm:$0xff] %vm281_vm0, %v1976_v46  ;;  %v1737_v59 = vpop.f32.mrb[26].mxu1  ;;  %v1203_v1 = vld [vmem:[#allocation2 + $0x1a0] sm:$0xff]  ;;  %v1046_v2 = vadd.f32 %v1705_v58, %v373_v45  ;;  %v1242_v7 = vadd.f32 %v2752_v5, %v1171_v0  ;;  %1108 = vst.msk [vmem:[#allocation2 + $0xc0] sm:$0xff] %vm281_vm0, %v1043_v56  ;;  %2003 = vtanh.f32 %v1244_v62  ;;  %v407_v45 = vld [vmem:[#allocation2 + $0x1e8] sm:$0xff] }
 0x1bc   : > { %v1980_v61 = vpop.eup %1979  ;;  %1394 = vst.msk [vmem:[%s2787_s27 + $0x160] sm:$0xff] %vm281_vm0, %v1978_v53  ;;  %v863_v3 = vpop.f32.mrb[27].mxu0  ;;  %v1274_v8 = vadd.f32 %v2752_v5, %v1203_v1  ;;  %v1174_v9 = vld [vmem:[#allocation2 + $0xb8] sm:$0xff]  ;;  %1140 = vst.msk [vmem:[#allocation2 + $0x1c0] sm:$0xff] %vm281_vm0, %v1075_v57  ;;  %v1078_v10 = vadd.f32 %v1737_v59, %v405_v51  ;;  %2005 = vtanh.f32 %v1276_v63 }
 0x1bd   : > { %v991_v4 = vpop.f32.mrb[27].mxu1  ;;  %v1982_v6 = vpop.eup %1981  ;;  %1365 = vst.msk [vmem:[%s2787_s27 + $0x78] sm:$0xff] %vm281_vm0, %v1980_v61  ;;  %v1245_v12 = vadd.f32 %v2752_v5, %v1174_v9  ;;  %v1206_v13 = vld [vmem:[#allocation2 + $0x1b8] sm:$0xff]  ;;  %1111 = vst.msk [vmem:[#allocation2 + $0xd8] sm:$0xff] %vm281_vm0, %v1046_v2  ;;  %v1044_v14 = vadd.f32 %v863_v3, %v371_v52  ;;  %2007 = vtanh.f32 %v1242_v7 }
 0x1be   : > { %v1984_v11 = vpop.eup %1983  ;;  %1397 = vst.msk [vmem:[%s2787_s27 + $0x178] sm:$0xff] %vm281_vm0, %v1982_v6  ;;  %v1076_v15 = vadd.f32 %v991_v4, %v403_v60  ;;  %v1277_v18 = vadd.f32 %v2752_v5, %v1206_v13  ;;  %v1172_v19 = vld [vmem:[#allocation2 + $0xa8] sm:$0xff]  ;;  %1143 = vst.msk [vmem:[#allocation2 + $0x1d8] sm:$0xff] %vm281_vm0, %v1078_v10  ;;  %2009 = vtanh.f32 %v1274_v8  ;;  %v1708_v28 = vpop.f32.mrb[28].mxu0 }
 0x1bf   : > { %v1986_v17 = vpop.eup %1985  ;;  %1363 = vst.msk [vmem:[%s2787_s27 + $0x68] sm:$0xff] %vm281_vm0, %v1984_v11  ;;  %v1204_v20 = vld [vmem:[#allocation2 + $0x1a8] sm:$0xff]  ;;  %v1243_v23 = vadd.f32 %v2752_v5, %v1172_v19  ;;  %1109 = vst.msk [vmem:[#allocation2 + $0xc8] sm:$0xff] %vm281_vm0, %v1044_v14  ;;  %v1740_v29 = vpop.f32.mrb[28].mxu1  ;;  %2011 = vtanh.f32 %v1245_v12  ;;  %v1049_v32 = vadd.f32 %v1708_v28, %v376_v16 }
 0x1c0   : > { %v1988_v22 = vpop.eup %1987  ;;  %1395 = vst.msk [vmem:[%s2787_s27 + $0x168] sm:$0xff] %vm281_vm0, %v1986_v17  ;;  %1141 = vst.msk [vmem:[#allocation2 + $0x1c8] sm:$0xff] %vm281_vm0, %v1076_v15  ;;  %v1275_v27 = vadd.f32 %v2752_v5, %v1204_v20  ;;  %v1081_v33 = vadd.f32 %v1740_v29, %v408_v21  ;;  %v876_v34 = vpop.f32.mrb[29].mxu0  ;;  %2013 = vtanh.f32 %v1277_v18  ;;  %v1177_v39 = vld [vmem:[#allocation2 + $0xd0] sm:$0xff] }
 0x1c1   : > { %v1990_v26 = vpop.eup %1989  ;;  %1368 = vst.msk [vmem:[%s2787_s27 + $0x90] sm:$0xff] %vm281_vm0, %v1988_v22  ;;  %v1004_v35 = vpop.f32.mrb[29].mxu1  ;;  %v1209_v40 = vld [vmem:[#allocation2 + $0x1d0] sm:$0xff]  ;;  %v1047_v41 = vadd.f32 %v876_v34, %v374_v24  ;;  %2015 = vtanh.f32 %v1243_v23  ;;  %v1248_v47 = vadd.f32 %v2752_v5, %v1177_v39  ;;  %1114 = vst.msk [vmem:[#allocation2 + $0xf0] sm:$0xff] %vm281_vm0, %v1049_v32 }
 0x1c2   : > { %v1992_v31 = vpop.eup %1991  ;;  %1400 = vst.msk [vmem:[%s2787_s27 + $0x190] sm:$0xff] %vm281_vm0, %v1990_v26  ;;  %v1079_v42 = vadd.f32 %v1004_v35, %v406_v25  ;;  %v1709_v43 = vpop.f32.mrb[30].mxu0  ;;  %v1280_v48 = vadd.f32 %v2752_v5, %v1209_v40  ;;  %v1175_v49 = vld [vmem:[#allocation2 + $0xc0] sm:$0xff]  ;;  %1146 = vst.msk [vmem:[#allocation2 + $0x1f0] sm:$0xff] %vm281_vm0, %v1081_v33  ;;  %2017 = vtanh.f32 %v1275_v27 }
 0x1c3   : > { %v1994_v38 = vpop.eup %1993  ;;  %1366 = vst.msk [vmem:[%s2787_s27 + $0x80] sm:$0xff] %vm281_vm0, %v1992_v31  ;;  %v1741_v44 = vpop.f32.mrb[30].mxu1  ;;  %v1207_v50 = vld [vmem:[#allocation2 + $0x1c0] sm:$0xff]  ;;  %v1050_v51 = vadd.f32 %v1709_v43, %v377_v30  ;;  %v1246_v55 = vadd.f32 %v2752_v5, %v1175_v49  ;;  %1112 = vst.msk [vmem:[#allocation2 + $0xe0] sm:$0xff] %vm281_vm0, %v1047_v41  ;;  %2019 = vtanh.f32 %v1248_v47 }
 0x1c4   : > { %v1996_v46 = vpop.eup %1995  ;;  %1398 = vst.msk [vmem:[%s2787_s27 + $0x180] sm:$0xff] %vm281_vm0, %v1994_v38  ;;  %v879_v52 = vpop.f32.mrb[31].mxu0  ;;  %v1278_v56 = vadd.f32 %v2752_v5, %v1207_v50  ;;  %v1178_v57 = vld [vmem:[#allocation2 + $0xd8] sm:$0xff]  ;;  %1144 = vst.msk [vmem:[#allocation2 + $0x1e0] sm:$0xff] %vm281_vm0, %v1079_v42  ;;  %v1082_v58 = vadd.f32 %v1741_v44, %v409_v36  ;;  %2021 = vtanh.f32 %v1280_v48 }
 0x1c5   : > { %v1007_v53 = vpop.f32.mrb[31].mxu1  ;;  %v1998_v54 = vpop.eup %1997  ;;  %1369 = vst.msk [vmem:[%s2787_s27 + $0x98] sm:$0xff] %vm281_vm0, %v1996_v46  ;;  %v1249_v60 = vadd.f32 %v2752_v5, %v1178_v57  ;;  %v1210_v61 = vld [vmem:[#allocation2 + $0x1d8] sm:$0xff]  ;;  %1115 = vst.msk [vmem:[#allocation2 + $0xf8] sm:$0xff] %vm281_vm0, %v1050_v51  ;;  %v1048_v62 = vadd.f32 %v879_v52, %v375_v37  ;;  %2023 = vtanh.f32 %v1246_v55 }
 0x1c6   : > { %v2000_v59 = vpop.eup %1999  ;;  %1401 = vst.msk [vmem:[%s2787_s27 + $0x198] sm:$0xff] %vm281_vm0, %v1998_v54  ;;  %v1080_v63 = vadd.f32 %v1007_v53, %v407_v45  ;;  %v1281_v1 = vadd.f32 %v2752_v5, %v1210_v61  ;;  %v1176_v2 = vld [vmem:[#allocation2 + $0xc8] sm:$0xff]  ;;  %1147 = vst.msk [vmem:[#allocation2 + $0x1f8] sm:$0xff] %vm281_vm0, %v1082_v58  ;;  %2025 = vtanh.f32 %v1278_v56 }
 0x1c7   : > { %v2002_v0 = vpop.eup %2001  ;;  %1367 = vst.msk [vmem:[%s2787_s27 + $0x88] sm:$0xff] %vm281_vm0, %v2000_v59  ;;  %v1208_v3 = vld [vmem:[#allocation2 + $0x1c8] sm:$0xff]  ;;  %v1247_v6 = vadd.f32 %v2752_v5, %v1176_v2  ;;  %1113 = vst.msk [vmem:[#allocation2 + $0xe8] sm:$0xff] %vm281_vm0, %v1048_v62  ;;  %2027 = vtanh.f32 %v1249_v60 }
 0x1c8   : > { %v2004_v4 = vpop.eup %2003  ;;  %1399 = vst.msk [vmem:[%s2787_s27 + $0x188] sm:$0xff] %vm281_vm0, %v2002_v0  ;;  %1145 = vst.msk [vmem:[#allocation2 + $0x1e8] sm:$0xff] %vm281_vm0, %v1080_v63  ;;  %v1279_v8 = vadd.f32 %v2752_v5, %v1208_v3  ;;  %2029 = vtanh.f32 %v1281_v1  ;;  %v1181_v11 = vld [vmem:[#allocation2 + $0xf0] sm:$0xff] }
 0x1c9   : > { %v2006_v7 = vpop.eup %2005  ;;  %1372 = vst.msk [vmem:[%s2787_s27 + $0xb0] sm:$0xff] %vm281_vm0, %v2004_v4  ;;  %v1213_v12 = vld [vmem:[#allocation2 + $0x1f0] sm:$0xff]  ;;  %2031 = vtanh.f32 %v1247_v6  ;;  %v1252_v14 = vadd.f32 %v2752_v5, %v1181_v11 }
 0x1ca   : > { %v2008_v9 = vpop.eup %2007  ;;  %1404 = vst.msk [vmem:[%s2787_s27 + $0x1b0] sm:$0xff] %vm281_vm0, %v2006_v7  ;;  %v1284_v15 = vadd.f32 %v2752_v5, %v1213_v12  ;;  %v1179_v16 = vld [vmem:[#allocation2 + $0xe0] sm:$0xff]  ;;  %2033 = vtanh.f32 %v1279_v8 }
 0x1cb   : > { %v2010_v10 = vpop.eup %2009  ;;  %1370 = vst.msk [vmem:[%s2787_s27 + $0xa0] sm:$0xff] %vm281_vm0, %v2008_v9  ;;  %v1211_v17 = vld [vmem:[#allocation2 + $0x1e0] sm:$0xff]  ;;  %v1250_v19 = vadd.f32 %v2752_v5, %v1179_v16  ;;  %2035 = vtanh.f32 %v1252_v14 }
 0x1cc   : > { %v2012_v13 = vpop.eup %2011  ;;  %1402 = vst.msk [vmem:[%s2787_s27 + $0x1a0] sm:$0xff] %vm281_vm0, %v2010_v10  ;;  %v1282_v20 = vadd.f32 %v2752_v5, %v1211_v17  ;;  %v1182_v21 = vld [vmem:[#allocation2 + $0xf8] sm:$0xff]  ;;  %2037 = vtanh.f32 %v1284_v15 }
 0x1cd   : > { %v2014_v18 = vpop.eup %2013  ;;  %1373 = vst.msk [vmem:[%s2787_s27 + $0xb8] sm:$0xff] %vm281_vm0, %v2012_v13  ;;  %v1253_v23 = vadd.f32 %v2752_v5, %v1182_v21  ;;  %v1214_v24 = vld [vmem:[#allocation2 + $0x1f8] sm:$0xff]  ;;  %2039 = vtanh.f32 %v1250_v19 }
 0x1ce   : > { %v2016_v22 = vpop.eup %2015  ;;  %1405 = vst.msk [vmem:[%s2787_s27 + $0x1b8] sm:$0xff] %vm281_vm0, %v2014_v18  ;;  %v1285_v26 = vadd.f32 %v2752_v5, %v1214_v24  ;;  %v1180_v27 = vld [vmem:[#allocation2 + $0xe8] sm:$0xff]  ;;  %2041 = vtanh.f32 %v1282_v20 }
 0x1cf   : > { %v2018_v25 = vpop.eup %2017  ;;  %1371 = vst.msk [vmem:[%s2787_s27 + $0xa8] sm:$0xff] %vm281_vm0, %v2016_v22  ;;  %v1212_v28 = vld [vmem:[#allocation2 + $0x1e8] sm:$0xff]  ;;  %v1251_v30 = vadd.f32 %v2752_v5, %v1180_v27  ;;  %2043 = vtanh.f32 %v1253_v23 }
 0x1d0   : > { %v2020_v29 = vpop.eup %2019  ;;  %1403 = vst.msk [vmem:[%s2787_s27 + $0x1a8] sm:$0xff] %vm281_vm0, %v2018_v25  ;;  %v1283_v32 = vadd.f32 %v2752_v5, %v1212_v28  ;;  %2045 = vtanh.f32 %v1285_v26 }
 0x1d1   : > { %v2022_v31 = vpop.eup %2021  ;;  %1376 = vst.msk [vmem:[%s2787_s27 + $0xd0] sm:$0xff] %vm281_vm0, %v2020_v29  ;;  %2047 = vtanh.f32 %v1251_v30 }
 0x1d2   : > { %v2024_v33 = vpop.eup %2023  ;;  %1408 = vst.msk [vmem:[%s2787_s27 + $0x1d0] sm:$0xff] %vm281_vm0, %v2022_v31  ;;  %2049 = vtanh.f32 %v1283_v32 }
 0x1d3   : > { %v2026_v34 = vpop.eup %2025  ;;  %1374 = vst.msk [vmem:[%s2787_s27 + $0xc0] sm:$0xff] %vm281_vm0, %v2024_v33 }
 0x1d4   : > { %v2028_v35 = vpop.eup %2027  ;;  %1406 = vst.msk [vmem:[%s2787_s27 + $0x1c0] sm:$0xff] %vm281_vm0, %v2026_v34 }
 0x1d5   : > { %v2030_v5 = vpop.eup %2029  ;;  %1377 = vst.msk [vmem:[%s2787_s27 + $0xd8] sm:$0xff] %vm281_vm0, %v2028_v35 }
 0x1d6   : > { %v2032_v36 = vpop.eup %2031  ;;  %1409 = vst.msk [vmem:[%s2787_s27 + $0x1d8] sm:$0xff] %vm281_vm0, %v2030_v5 }
 0x1d7   : > { %v2034_v37 = vpop.eup %2033  ;;  %1375 = vst.msk [vmem:[%s2787_s27 + $0xc8] sm:$0xff] %vm281_vm0, %v2032_v36 }
 0x1d8   : > { %v2036_v38 = vpop.eup %2035  ;;  %1407 = vst.msk [vmem:[%s2787_s27 + $0x1c8] sm:$0xff] %vm281_vm0, %v2034_v37 }
 0x1d9   : > { %v2038_v39 = vpop.eup %2037  ;;  %1380 = vst.msk [vmem:[%s2787_s27 + $0xf0] sm:$0xff] %vm281_vm0, %v2036_v38 }
 0x1da   : > { %v2040_v40 = vpop.eup %2039  ;;  %1412 = vst.msk [vmem:[%s2787_s27 + $0x1f0] sm:$0xff] %vm281_vm0, %v2038_v39 }
 0x1db   : > { %v2042_v41 = vpop.eup %2041  ;;  %1378 = vst.msk [vmem:[%s2787_s27 + $0xe0] sm:$0xff] %vm281_vm0, %v2040_v40 }
 0x1dc   : > { %v2044_v42 = vpop.eup %2043  ;;  %1410 = vst.msk [vmem:[%s2787_s27 + $0x1e0] sm:$0xff] %vm281_vm0, %v2042_v41 }
 0x1dd   : > { %v2046_v43 = vpop.eup %2045  ;;  %1381 = vst.msk [vmem:[%s2787_s27 + $0xf8] sm:$0xff] %vm281_vm0, %v2044_v42 }
 0x1de   : > { %v2048_v44 = vpop.eup %2047  ;;  %1413 = vst.msk [vmem:[%s2787_s27 + $0x1f8] sm:$0xff] %vm281_vm0, %v2046_v43 }
 0x1df   : > { %v2050_v45 = vpop.eup %2049  ;;  %1379 = vst.msk [vmem:[%s2787_s27 + $0xe8] sm:$0xff] %vm281_vm0, %v2048_v44 }
 0x1e0   : > { %1411 = vst.msk [vmem:[%s2787_s27 + $0x1e8] sm:$0xff] %vm281_vm0, %v2050_v45 }
 0x1e1   : > { %2152 = shalt.err (!%p2149_p4)
}
 0x1e2   : > { %s2153_s23 = scalar_lea.hbm %s3007_s30, 8192  ;;  %s2157_s6 = scalar_lea.hbm %s3128_s2, 327680 }
 0x1e3   : > { %p2154_p5 = scmp.ne.s32.totalorder %s3007_s30, %s2153_s23  ;;  %p2158_p2 = scmp.lt.u32.totalorder %s3007_s30, %s3128_s2 }
 0x1e4   : > { %p2159_p11 = scmp.lt.u32.totalorder %s2157_s6, %s2153_s23  ;;  %p2161_p13 = scmp.lt.u32.totalorder %s2153_s23, %s3007_s30 }
 0x1e5   : > { %p2155_p9 = pnand %p2154_p5, %p3129_p8 }
 0x1e6   : > { %p2160_p12 = por %p2159_p11, %p2158_p2 }
 0x1e7   : > { %p2156_p3 = pneg %p2155_p9 }
 0x1e8   : > { %p2162_p10 = por %p2161_p13, %p2160_p12 }
 0x1ea   : > { %p2163_p1 = pnand %p2162_p10, %p2156_p3 }
 0x1ec   : > { %2166 = shalt.err (!%p2163_p1)
}
 0x1ed   : > { %s2278_s28 = smov 128   ;;  %s2279_s25 = smov 8  }
 0x1ee   : > { %1768 = dma.vmem_to_hbm [thread:$0]  (%p3129_p8), %s3009_s15, 8192, %s3007_s30, %s1415_s5, %s2278_s28, %s2278_s28, %s2279_s25  }
 0x1ef PF: > { %s3130_s12 = sld [smem:[#allocation14_spill]]  ;;  %s3131_s9 = sld [smem:[#allocation19_spill]] }
 0x1f0   : > { %p1788_p6 = scmp.ge.s32.totalorder %s2269_s22, 2 }
 0x1f5   : > { %s1445_s8 = sand.u32 1, %s3130_s12   ;;  %p3132_p7 = scmp.ne.s32.totalorder %s3131_s9, 0 }
 0x1f6   : > { %s1446_s11 = scalar_lea.sflag [#allocation5], %s1445_s8 }
 0x1f7   : > { %p1782_p0 = pnand %p1788_p6, %p3132_p7 }
 0x1f9   : > { %2224 = dma.done.wait (!%p1782_p0), %s1446_s11, 8192  }
 0x1fa   : > { %2226 = vsyncadd (!%p1782_p0), %s1446_s11, 4294959104  ;;  %s22_s22 = sadd.s32 1, %s2269_s22   ;;  %s3133_s26 = sld [smem:[#allocation17_spill]] }
 0x1fb   : > { %p19_p4 = scmp.ge.s32.totalorder %s22_s22, 42   ;;  %s3134_s20 = sld [smem:[#allocation20_spill]] }
 0x1fc   : > { %s3135_s12 = smov %s2233_s13  ;;  %s3136_s13 = smov %s2237_s14 }
 0x1fd   : > { %s3137_s14 = smov %s2461_s10  ;;  %s3138_s15 = smov %s2245_s16 }
 0x1fe   : > { %s3139_s16 = smov %s2249_s17  ;;  %s3140_s17 = smov %s2464_s18 }
 0x1ff   : > { %s3142_s19 = smov %s2265_s21  ;;  %s3143_s21 = smov %s3149_s4 }
 0x200   : > { %s3141_s18 = smov %s3133_s26  ;;  %21 = sbr.rel (!%p19_p4) target bundleno = 14 (0xe), region = 102 }
 0x207   :  { %1451 = vsyncpa [#allocation4], 1 }
 0x208   :  { %1453 = vsyncpa [#allocation4 + $0x1], 1 }
 0x209   :  { %1454 = vsyncpa [#allocation7], 1 }
 0x20a   :  { %1456 = vsyncpa [#allocation7 + $0x1], 1 }
 0x20b   :  { %1457 = vsyncpa [#allocation5], 1 }
 0x20c   :  { %1459 = vsyncpa [#allocation5 + $0x1], 1 }

</bundles_post_ra>
